<compile_context>
chip_gen: v7x
topology: tpu7x:2x2x1
jax: 0.10.0
libtpu: 0.0.40
codegen_flags: <defaults>
</compile_context>

<pallas_src>
import functools

import jax
import jax.numpy as jnp
from jax.experimental import pallas as pl
from jax.experimental.pallas import tpu as pltpu

LANE = 128                       # output-channel dims are zero-padded to this (lane-dense)
BN_EPS = 1e-5
TILE_VMEM_BUDGET = 16 * 2**20    # activation-tile budget for the row-tiled kernels
GCONV_VMEM_BUDGET = 28 * 2**20   # window + weight budget for the 3x3 grouped conv
VMEM_LIMIT = 64 * 2**20


def _round_up(x, m):
    return (x + m - 1) // m * m


def _choose_row_tile(m, row_bytes, budget=TILE_VMEM_BUDGET):
    """Largest row tile (multiple of 8) whose working set fits the budget."""
    cap = max(256, min(2048, budget // max(row_bytes, 1)))
    nt = -(-m // cap)
    return _round_up(-(-m // nt), 8)


def _choose_gconv_row_tile(oh, ow, wp, dp, dpo, stride, budget=GCONV_VMEM_BUDGET):
    """Output-row tile for the 3x3 grouped conv, VMEM-budgeted, preferring OH % TH == 0."""
    avail = max(budget - 2 * 9 * dp * dpo * 4, 2 * 2**20)   # minus double-buffered weight

    def need(th):
        win = ((th - 1) * stride + 3) * wp * dp * 4          # window scratch
        out = 3 * th * ow * dpo * 4                          # y block (x2 buf) + acc
        patch = th * ow * dp * 4                             # one extracted patch
        return win + out + patch

    th = min(oh, 64)
    while th > 1 and need(th) > avail:
        th = max(1, th // 2)
    for cand in range(th, max(th // 2, 1) - 1, -1):          # avoid tail masking if possible
        if oh % cand == 0:
            return cand
    return th


# ---------------------------------------------------------------------------
# Kernel 1: row-tiled matmul (1x1 conv) with fused affine(+ReLU) prologue and
#           per-tile partial BN sum / sum-of-squares outputs.
# ---------------------------------------------------------------------------
def _mm_affine_bn_stats_kernel(a_ref, w_ref, scale_ref, shift_ref,
                               y_ref, sum_ref, sq_ref,
                               *, prologue_relu, m_real, mask_tail):
    a = a_ref[...] * scale_ref[...] + shift_ref[...]      # previous-stage BN affine
    if prologue_relu:
        a = jnp.maximum(a, 0.0)
    y = jnp.dot(a, w_ref[...], preferred_element_type=jnp.float32)
    if mask_tail:                                          # statically compiled out if M % tm == 0
        tm = a_ref.shape[0]
        rows = pl.program_id(0) * tm + jax.lax.broadcasted_iota(jnp.int32, (tm, 1), 0)
        y = jnp.where(rows < m_real, y, 0.0)
    y_ref[...] = y
    sum_ref[...] = jnp.sum(y, axis=0)[None, None, :]       # per-tile partials (no revisits)
    sq_ref[...] = jnp.sum(y * y, axis=0)[None, None, :]


def conv1x1_bn_stats(a, w, scale, shift, *, prologue_relu):
    """a: (M, K) activations (K may be tiny / unpadded); w: (K, Np) lane-dense weight."""
    m, k = a.shape
    np_ = w.shape[1]
    tm = _choose_row_tile(m, 4 * (k + 3 * np_))
    mp = _round_up(m, tm)
    if mp != m:
        a = jnp.pad(a, ((0, mp - m), (0, 0)))
    nt = mp // tm
    kernel = functools.partial(_mm_affine_bn_stats_kernel,
                               prologue_relu=prologue_relu, m_real=m,
                               mask_tail=(mp != m))
    y, s, q = pl.pallas_call(
        kernel,
        out_shape=(jax.ShapeDtypeStruct((mp, np_), jnp.float32),
                   jax.ShapeDtypeStruct((nt, 1, np_), jnp.float32),
                   jax.ShapeDtypeStruct((nt, 1, np_), jnp.float32)),
        grid=(nt,),
        in_specs=[pl.BlockSpec((tm, k), lambda i: (i, 0)),
                  pl.BlockSpec((k, np_), lambda i: (0, 0)),
                  pl.BlockSpec((1, k), lambda i: (0, 0)),
                  pl.BlockSpec((1, k), lambda i: (0, 0))],
        out_specs=(pl.BlockSpec((tm, np_), lambda i: (i, 0)),
                   pl.BlockSpec((1, 1, np_), lambda i: (i, 0, 0)),
                   pl.BlockSpec((1, 1, np_), lambda i: (i, 0, 0))),
        compiler_params=pltpu.CompilerParams(
            dimension_semantics=("parallel",), vmem_limit_bytes=VMEM_LIMIT),
    )(a, w, scale, shift)
    return y[:m], jnp.sum(s, axis=0), jnp.sum(q, axis=0)


# ---------------------------------------------------------------------------
# Kernel 1b: fused conv1 + shortcut 1x1 conv (stride == 1): one MXU pass over x
#            producing both outputs and both BN stat pairs (x read from HBM once).
# ---------------------------------------------------------------------------
def _mm_dual_bn_stats_kernel(a_ref, w_ref, y1_ref, y2_ref,
                             s1_ref, q1_ref, s2_ref, q2_ref,
                             *, n1, m_real, mask_tail):
    y = jnp.dot(a_ref[...], w_ref[...], preferred_element_type=jnp.float32)
    if mask_tail:
        tm = a_ref.shape[0]
        rows = pl.program_id(0) * tm + jax.lax.broadcasted_iota(jnp.int32, (tm, 1), 0)
        y = jnp.where(rows < m_real, y, 0.0)
    ya, yb = y[:, :n1], y[:, n1:]                      # lane-multiple column split
    y1_ref[...] = ya
    y2_ref[...] = yb
    s1_ref[...] = jnp.sum(ya, axis=0)[None, None, :]
    q1_ref[...] = jnp.sum(ya * ya, axis=0)[None, None, :]
    s2_ref[...] = jnp.sum(yb, axis=0)[None, None, :]
    q2_ref[...] = jnp.sum(yb * yb, axis=0)[None, None, :]


def conv1x1_dual_bn_stats(a, w, *, n1):
    m, k = a.shape
    n_tot = w.shape[1]
    n2 = n_tot - n1
    tm = _choose_row_tile(m, 4 * (k + 3 * n_tot))
    mp = _round_up(m, tm)
    if mp != m:
        a = jnp.pad(a, ((0, mp - m), (0, 0)))
    nt = mp // tm
    kernel = functools.partial(_mm_dual_bn_stats_kernel, n1=n1, m_real=m,
                               mask_tail=(mp != m))
    y1, y2, s1, q1, s2, q2 = pl.pallas_call(
        kernel,
        out_shape=(jax.ShapeDtypeStruct((mp, n1), jnp.float32),
                   jax.ShapeDtypeStruct((mp, n2), jnp.float32),
                   jax.ShapeDtypeStruct((nt, 1, n1), jnp.float32),
                   jax.ShapeDtypeStruct((nt, 1, n1), jnp.float32),
                   jax.ShapeDtypeStruct((nt, 1, n2), jnp.float32),
                   jax.ShapeDtypeStruct((nt, 1, n2), jnp.float32)),
        grid=(nt,),
        in_specs=[pl.BlockSpec((tm, k), lambda i: (i, 0)),
                  pl.BlockSpec((k, n_tot), lambda i: (0, 0))],
        out_specs=(pl.BlockSpec((tm, n1), lambda i: (i, 0)),
                   pl.BlockSpec((tm, n2), lambda i: (i, 0)),
                   pl.BlockSpec((1, 1, n1), lambda i: (i, 0, 0)),
                   pl.BlockSpec((1, 1, n1), lambda i: (i, 0, 0)),
                   pl.BlockSpec((1, 1, n2), lambda i: (i, 0, 0)),
                   pl.BlockSpec((1, 1, n2), lambda i: (i, 0, 0))),
        compiler_params=pltpu.CompilerParams(
            dimension_semantics=("parallel",), vmem_limit_bytes=VMEM_LIMIT),
    )(a, w)
    return (y1[:m], y2[:m], jnp.sum(s1, axis=0), jnp.sum(q1, axis=0),
            jnp.sum(s2, axis=0), jnp.sum(q2, axis=0))


# ---------------------------------------------------------------------------
# Kernel 2: 3x3 grouped conv (block-diagonal dense weight), stride s.
#   Row-tiled: each grid step computes TH output rows of one image, fetching the
#   (TH*s + 2)-row input window once via manual DMA, with the previous BN affine+ReLU
#   fused on the window, plus per-image partial BN sum / sum-of-squares.
# ---------------------------------------------------------------------------
def _gconv3x3_kernel(x_hbm, w_ref, scale_ref, shift_ref,
                     y_ref, sum_ref, sq_ref,
                     xwin_ref, dma_sem,
                     *, stride, th, ow, oh_real, h_real, w_real,
                     zero_mask, mask_tail):
    ni = pl.program_id(0)
    ti = pl.program_id(1)
    win_h, wp, dp = xwin_ref.shape
    dpo = w_ref.shape[-1]

    # Fetch this tile's input window once (vs. 3x per-output-row windows before).
    row0 = ti * (th * stride)
    cp = pltpu.make_async_copy(x_hbm.at[ni, pl.ds(row0, win_h)], xwin_ref, dma_sem.at[0])
    cp.start()
    cp.wait()
    # TODO(synk): double-buffer this window DMA across grid steps to hide it behind the
    # nine accumulated dots (matters once N*OH/TH is large).

    # Fused BN1 affine + ReLU, applied once to the whole window.
    xw = xwin_ref[...]
    xw = jnp.maximum(xw * scale_ref[...].reshape(1, 1, dp)
                     + shift_ref[...].reshape(1, 1, dp), 0.0)
    if zero_mask:
        # 'zero' padding: affine(0) != 0, so re-zero the 1-wide padded border in-kernel.
        gr = row0 + jax.lax.broadcasted_iota(jnp.int32, (win_h, wp, 1), 0)
        gc = jax.lax.broadcasted_iota(jnp.int32, (win_h, wp, 1), 1)
        interior = (gr > 0) & (gr < h_real + 1) & (gc > 0) & (gc < w_real + 1)
        xw = jnp.where(interior, xw, 0.0)
    xwin_ref[...] = xw

    acc = jnp.zeros((th * ow, dpo), jnp.float32)
    for kh in range(3):
        for kw in range(3):
            if stride == 1:
                patch = xwin_ref[pl.ds(kh, th), pl.ds(kw, ow), :]
            else:
                patch = xwin_ref[pl.ds(kh, th, stride), pl.ds(kw, ow, stride), :]
            acc += jnp.dot(patch.reshape(th * ow, dp), w_ref[kh, kw],
                           preferred_element_type=jnp.float32)

    acc3 = acc.reshape(th, ow, dpo)
    if mask_tail:                                          # zero output rows beyond OH
        loc = jax.lax.broadcasted_iota(jnp.int32, (th, 1, 1), 0)
        acc3 = jnp.where(ti * th + loc < oh_real, acc3, 0.0)
    y_ref[...] = acc3[None]

    flat = acc3.reshape(th * ow, dpo) if mask_tail else acc
    col_sum = jnp.sum(flat, axis=0)[None, None, :]
    col_sq = jnp.sum(flat * flat, axis=0)[None, None, :]

    @pl.when(ti == 0)
    def _init():
        sum_ref[...] = jnp.zeros_like(sum_ref)
        sq_ref[...] = jnp.zeros_like(sq_ref)

    sum_ref[...] += col_sum                                # per-image partials (N axis parallel)
    sq_ref[...] += col_sq


def grouped_conv3x3_bn_stats(x_pad, w_dense, scale, shift, *, stride,
                             h_real, w_real, zero_mask):
    """x_pad: (N, H+2, W+2, Dp) spatially padded raw input; w_dense: (3, 3, Dp, Dpo)."""
    n, hp, wp, dp = x_pad.shape
    dpo = w_dense.shape[-1]
    oh = (h_real - 1) // stride + 1
    ow = (w_real - 1) // stride + 1

    th = _choose_gconv_row_tile(oh, ow, wp, dp, dpo, stride)
    n_t = -(-oh // th)
    oh_pad = n_t * th
    win_h = (th - 1) * stride + 3
    hp_need = (oh_pad - 1) * stride + 3
    if hp_need > hp:                                       # zero rows only feed masked outputs
        x_pad = jnp.pad(x_pad, ((0, 0), (0, hp_need - hp), (0, 0), (0, 0)))

    kernel = functools.partial(_gconv3x3_kernel, stride=stride, th=th, ow=ow,
                               oh_real=oh, h_real=h_real, w_real=w_real,
                               zero_mask=zero_mask, mask_tail=(oh_pad != oh))
    y, s, q = pl.pallas_call(
        kernel,
        out_shape=(jax.ShapeDtypeStruct((n, oh_pad, ow, dpo), jnp.float32),
                   jax.ShapeDtypeStruct((n, 1, dpo), jnp.float32),
                   jax.ShapeDtypeStruct((n, 1, dpo), jnp.float32)),
        grid=(n, n_t),
        in_specs=[pl.BlockSpec(memory_space=pl.ANY),                       # raw HBM ref
                  pl.BlockSpec((3, 3, dp, dpo), lambda ni, ti: (0, 0, 0, 0)),  # resident weight
                  pl.BlockSpec((1, dp), lambda ni, ti: (0, 0)),
                  pl.BlockSpec((1, dp), lambda ni, ti: (0, 0))],
        out_specs=(pl.BlockSpec((1, th, ow, dpo), lambda ni, ti: (ni, ti, 0, 0)),
                   pl.BlockSpec((1, 1, dpo), lambda ni, ti: (ni, 0, 0)),
                   pl.BlockSpec((1, 1, dpo), lambda ni, ti: (ni, 0, 0))),
        scratch_shapes=[pltpu.VMEM((win_h, wp, dp), jnp.float32),
                        pltpu.SemaphoreType.DMA((1,))],
        compiler_params=pltpu.CompilerParams(
            dimension_semantics=("parallel", "arbitrary"),
            vmem_limit_bytes=VMEM_LIMIT),
    )(x_pad, w_dense, scale, shift)
    if oh_pad != oh:
        y = y[:, :oh]
    return y, jnp.sum(s, axis=0), jnp.sum(q, axis=0)


# ---------------------------------------------------------------------------
# Kernel 3: final fused BN(main) + BN(shortcut) + add + ReLU (elementwise).
# ---------------------------------------------------------------------------
def _bn_add_relu_kernel(a_ref, b_ref, sa_ref, ha_ref, sb_ref, hb_ref, o_ref):
    a = a_ref[...] * sa_ref[...] + ha_ref[...]
    b = b_ref[...] * sb_ref[...] + hb_ref[...]
    o_ref[...] = jnp.maximum(a + b, 0.0)


def bn_add_relu(a, b, sa, ha, sb, hb):
    m, cp = a.shape
    tm = _choose_row_tile(m, 4 * 6 * cp)
    mp = _round_up(m, tm)
    if mp != m:
        a = jnp.pad(a, ((0, mp - m), (0, 0)))
        b = jnp.pad(b, ((0, mp - m), (0, 0)))
    out = pl.pallas_call(
        _bn_add_relu_kernel,
        out_shape=jax.ShapeDtypeStruct((mp, cp), jnp.float32),
        grid=(mp // tm,),
        in_specs=[pl.BlockSpec((tm, cp), lambda i: (i, 0)),
                  pl.BlockSpec((tm, cp), lambda i: (i, 0)),
                  pl.BlockSpec((1, cp), lambda i: (0, 0)),
                  pl.BlockSpec((1, cp), lambda i: (0, 0)),
                  pl.BlockSpec((1, cp), lambda i: (0, 0)),
                  pl.BlockSpec((1, cp), lambda i: (0, 0))],
        out_specs=pl.BlockSpec((tm, cp), lambda i: (i, 0)),
        compiler_params=pltpu.CompilerParams(
            dimension_semantics=("parallel",), vmem_limit_bytes=VMEM_LIMIT),
    )(a, b, sa, ha, sb, hb)
    return out[:m]


# ------------------------------- JAX glue -----------------------------------
def _bn_scale_shift(s, q, count, gamma, beta, eps=BN_EPS):
    # Single-pass E[x^2]-E[x]^2 in f32 (partial per-tile sums reduced hierarchically).
    mean = s / count
    var = jnp.maximum(q / count - mean * mean, 0.0)   # biased (training-mode) variance
    scale = gamma * jax.lax.rsqrt(var + eps)
    return scale, beta - mean * scale


def _pad_gamma(g, cp):
    return jnp.pad(g, (0, cp - g.shape[0]), constant_values=1.0).reshape(1, cp)


def _pad_beta(b, cp):
    return jnp.pad(b, (0, cp - b.shape[0])).reshape(1, cp)


def resnext_block_forward(x, params, *, stride, cardinality, width, padding_type):
    """x: (N, Cin, H, W) float32 NCHW -> (N, Cout, OH, OW)."""
    n, cin, h, w_sp = x.shape
    d = cardinality * width
    cout = params["w3"].shape[0]
    d_p, cout_p = _round_up(d, LANE), _round_up(cout, LANE)
    has_shortcut = (cin != cout) or (stride != 1)

    # single NCHW -> NHWC transform; Cin (contraction dim) is NOT lane-padded
    x_nhwc = jnp.transpose(x, (0, 2, 3, 1))               # (n, h, w, cin)
    m1 = n * h * w_sp
    x_rows = x_nhwc.reshape(m1, cin)

    # lane-padded weights (only output dims padded; zero pads keep padded channels 0)
    w1 = jnp.pad(params["w1"][:, :, 0, 0].T, ((0, 0), (0, d_p - d)))               # (cin, Dp)
    w3 = jnp.pad(params["w3"][:, :, 0, 0].T, ((0, d_p - d), (0, cout_p - cout)))   # (Dp, Coutp)
    w2 = jnp.zeros((3, 3, d_p, d_p), jnp.float32)          # block-diagonal dense grouped weight
    for g in range(cardinality):
        blk = jnp.transpose(params["w2"][g * width:(g + 1) * width], (2, 3, 1, 0))
        w2 = w2.at[:, :, g * width:(g + 1) * width, g * width:(g + 1) * width].set(blk)

    # ---- conv1 (1x1, Cin->D) + BN1 stats; shortcut conv fused in when stride == 1 ----
    if has_shortcut and stride == 1:
        ws = jnp.pad(params["ws"][:, :, 0, 0].T, ((0, 0), (0, cout_p - cout)))
        w_comb = jnp.concatenate([w1, ws], axis=1)          # (cin, Dp + Coutp)
        y1, ysc, s1, q1, ss, qs = conv1x1_dual_bn_stats(x_rows, w_comb, n1=d_p)
    else:
        ones_c = jnp.ones((1, cin), jnp.float32)
        zeros_c = jnp.zeros((1, cin), jnp.float32)
        y1, s1, q1 = conv1x1_bn_stats(x_rows, w1, ones_c, zeros_c, prologue_relu=False)
        ysc = ss = qs = None
    sc1, sh1 = _bn_scale_shift(s1, q1, m1,
                               _pad_gamma(params["bn1_gamma"], d_p),
                               _pad_beta(params["bn1_beta"], d_p))

    # ---- pad(1) + conv2 (3x3 grouped, stride) + BN2 stats (BN1 affine+ReLU fused) ----
    y1 = y1.reshape(n, h, w_sp, d_p)
    if padding_type == "zero":
        y1p = jnp.pad(y1, ((0, 0), (1, 1), (1, 1), (0, 0)))
        zero_mask = True                                    # border re-zeroed in-kernel
    else:
        mode = "reflect" if padding_type == "reflect" else "edge"
        y1p = jnp.pad(y1, ((0, 0), (1, 1), (1, 1), (0, 0)), mode=mode)
        zero_mask = False                                   # pad commutes with affine+ReLU
    y2, s2, q2 = grouped_conv3x3_bn_stats(y1p, w2, sc1, sh1, stride=stride,
                                          h_real=h, w_real=w_sp, zero_mask=zero_mask)
    _, oh, ow, _ = y2.shape
    m2 = n * oh * ow
    sc2, sh2 = _bn_scale_shift(s2, q2, m2,
                               _pad_gamma(params["bn2_gamma"], d_p),
                               _pad_beta(params["bn2_beta"], d_p))

    # ---- conv3 (1x1, D->Cout) with BN2 affine+ReLU fused on its input, + BN3 stats ----
    y3, s3, q3 = conv1x1_bn_stats(y2.reshape(m2, d_p), w3, sc2, sh2, prologue_relu=True)
    sc3, sh3 = _bn_scale_shift(s3, q3, m2,
                               _pad_gamma(params["bn3_gamma"], cout_p),
                               _pad_beta(params["bn3_beta"], cout_p))

    # ---- shortcut ----
    if has_shortcut:
        if stride != 1:                                     # not fusable with conv1 (strided x)
            ws = jnp.pad(params["ws"][:, :, 0, 0].T, ((0, 0), (0, cout_p - cout)))
            xs = x_nhwc[:, ::stride, ::stride, :].reshape(m2, cin)
            ones_c = jnp.ones((1, cin), jnp.float32)
            zeros_c = jnp.zeros((1, cin), jnp.float32)
            ysc, ss, qs = conv1x1_bn_stats(xs, ws, ones_c, zeros_c, prologue_relu=False)
        scs, shs = _bn_scale_shift(ss, qs, m2,
                                   _pad_gamma(params["bns_gamma"], cout_p),
                                   _pad_beta(params["bns_beta"], cout_p))
    else:
        ysc = jnp.pad(x_rows, ((0, 0), (0, cout_p - cin)))  # identity (Cin==Cout, s==1)
        scs = jnp.ones((1, cout_p), jnp.float32)
        shs = jnp.zeros((1, cout_p), jnp.float32)

    # ---- BN3(main) + BN_s(shortcut) + add + ReLU, one fused elementwise kernel ----
    out = bn_add_relu(y3, ysc, sc3, sh3, scs, shs)
    out = out.reshape(n, oh, ow, cout_p)[..., :cout]
    return jnp.transpose(out, (0, 3, 1, 2))                 # single NHWC -> NCHW at the end


# ---------------------- pure-JAX reference (for checking) -------------------
def reference_forward(x, params, *, stride, cardinality, width, padding_type, eps=BN_EPS):
    dn = ("NCHW", "OIHW", "NCHW")

    def bn(t, gamma, beta):
        mean = jnp.mean(t, axis=(0, 2, 3), keepdims=True)
        var = jnp.mean((t - mean) ** 2, axis=(0, 2, 3), keepdims=True)
        return ((t - mean) * jax.lax.rsqrt(var + eps)
                * gamma[None, :, None, None] + beta[None, :, None, None])

    y = jax.lax.conv_general_dilated(x, params["w1"], (1, 1), "VALID",
                                     dimension_numbers=dn)
    y = jax.nn.relu(bn(y, params["bn1_gamma"], params["bn1_beta"]))
    if padding_type == "zero":
        y = jax.lax.conv_general_dilated(y, params["w2"], (stride, stride),
                                         ((1, 1), (1, 1)), dimension_numbers=dn,
                                         feature_group_count=cardinality)
    else:
        mode = "reflect" if padding_type == "reflect" else "edge"
        y = jnp.pad(y, ((0, 0), (0, 0), (1, 1), (1, 1)), mode=mode)
        y = jax.lax.conv_general_dilated(y, params["w2"], (stride, stride), "VALID",
                                         dimension_numbers=dn,
                                         feature_group_count=cardinality)
    y = jax.nn.relu(bn(y, params["bn2_gamma"], params["bn2_beta"]))
    y = jax.lax.conv_general_dilated(y, params["w3"], (1, 1), "VALID",
                                     dimension_numbers=dn)
    y = bn(y, params["bn3_gamma"], params["bn3_beta"])
    cin, cout = x.shape[1], params["w3"].shape[0]
    if cin != cout or stride != 1:
        s = jax.lax.conv_general_dilated(x, params["ws"], (stride, stride), "VALID",
                                         dimension_numbers=dn)
        s = bn(s, params["bns_gamma"], params["bns_beta"])
    else:
        s = x
    return jax.nn.relu(y + s)


# --------------------------------- main --------------------------------------
if __name__ == "__main__":
    in_channels, out_channels = 8, 16
    cardinality, width, stride = 4, 4, 1
    padding_type = "reflect"
    n, h, w = 2, 16, 16
    d = cardinality * width

    key = jax.random.PRNGKey(0)
    ks = jax.random.split(key, 13)
    rnd = lambda k, shp, s=0.1: s * jax.random.normal(k, shp, jnp.float32)
    x = jax.random.normal(ks[0], (n, in_channels, h, w), jnp.float32)
    params = {
        "w1": rnd(ks[1], (d, in_channels, 1, 1)),
        "w2": rnd(ks[2], (d, width, 3, 3)),               # grouped: (D, D/groups, 3, 3)
        "w3": rnd(ks[3], (out_channels, d, 1, 1)),
        "ws": rnd(ks[4], (out_channels, in_channels, 1, 1)),
        "bn1_gamma": 1.0 + rnd(ks[5], (d,)), "bn1_beta": rnd(ks[6], (d,)),
        "bn2_gamma": 1.0 + rnd(ks[7], (d,)), "bn2_beta": rnd(ks[8], (d,)),
        "bn3_gamma": 1.0 + rnd(ks[9], (out_channels,)), "bn3_beta": rnd(ks[10], (out_channels,)),
        "bns_gamma": 1.0 + rnd(ks[11], (out_channels,)), "bns_beta": rnd(ks[12], (out_channels,)),
    }

    fwd = jax.jit(functools.partial(resnext_block_forward, stride=stride,
                                    cardinality=cardinality, width=width,
                                    padding_type=padding_type))
    out = jax.block_until_ready(fwd(x, params))

    ref = jax.block_until_ready(reference_forward(
        x, params, stride=stride, cardinality=cardinality, width=width,
        padding_type=padding_type))
    assert out.shape == ref.shape, (out.shape, ref.shape)
    err = float(jnp.max(jnp.abs(out - ref)))
    assert err < 2e-3, err

    print("KERNEL_OK")
</pallas_src>

<mosaic_0001>
module attributes {stable_mosaic.version = 11 : i64} {
  func.func @_mm_dual_bn_stats_kernel(%arg0: i32, %arg1: memref<512x8xf32, #tpu.memory_space<vmem>>, %arg2: memref<8x256xf32, #tpu.memory_space<vmem>>, %arg3: memref<512x128xf32, #tpu.memory_space<vmem>>, %arg4: memref<512x128xf32, #tpu.memory_space<vmem>>, %arg5: memref<1x1x128xf32, #tpu.memory_space<vmem>>, %arg6: memref<1x1x128xf32, #tpu.memory_space<vmem>>, %arg7: memref<1x1x128xf32, #tpu.memory_space<vmem>>, %arg8: memref<1x1x128xf32, #tpu.memory_space<vmem>>) attributes {dimension_semantics = [#tpu.dimension_semantics<parallel>], iteration_bounds = array<i64: 1>, scalar_prefetch = 0 : i64, scratch_operands = 0 : i64, tpu.core_type = #tpu.core_type<tc>, window_params = [{transform_indices = @transform_0, window_bounds = array<i64: 512, 8>}, {pipeline_mode = #tpu.pipeline_mode<synchronous>, transform_indices = @transform_1, window_bounds = array<i64: 8, 256>}, {transform_indices = @transform_2, window_bounds = array<i64: 512, 128>}, {transform_indices = @transform_3, window_bounds = array<i64: 512, 128>}, {transform_indices = @transform_4, window_bounds = array<i64: 1, 1, 128>}, {transform_indices = @transform_5, window_bounds = array<i64: 1, 1, 128>}, {transform_indices = @transform_6, window_bounds = array<i64: 1, 1, 128>}, {transform_indices = @transform_7, window_bounds = array<i64: 1, 1, 128>}]} {
    %c0 = arith.constant 0 : index
    %c0_0 = arith.constant 0 : index
    %0 = vector.load %arg1[%c0, %c0_0] : memref<512x8xf32, #tpu.memory_space<vmem>>, vector<512x8xf32>
    %c0_1 = arith.constant 0 : index
    %c0_2 = arith.constant 0 : index
    %1 = vector.load %arg2[%c0_1, %c0_2] : memref<8x256xf32, #tpu.memory_space<vmem>>, vector<8x256xf32>
    %cst = arith.constant dense<0.000000e+00> : vector<512x256xf32>
    %2 = tpu.matmul %0, %1, %cst {dimension_numbers = #tpu.dot_dimension_numbers<[1], [0], [0], [1], [0, 0, 1, 1], [], []>} : vector<512x8xf32>, vector<8x256xf32>, vector<512x256xf32> -> vector<512x256xf32>
    %3 = vector.extract_strided_slice %2 {offsets = [0, 0], sizes = [512, 128], strides = [1, 1]} : vector<512x256xf32> to vector<512x128xf32>
    %4 = vector.extract_strided_slice %2 {offsets = [0, 128], sizes = [512, 128], strides = [1, 1]} : vector<512x256xf32> to vector<512x128xf32>
    %c0_3 = arith.constant 0 : index
    %c0_4 = arith.constant 0 : index
    %5 = vector.load %arg3[%c0_3, %c0_4] : memref<512x128xf32, #tpu.memory_space<vmem>>, vector<512x128xf32>
    tpu.vector_store %arg3[%c0_3, %c0_4], %3 {strides = array<i32>} : memref<512x128xf32, #tpu.memory_space<vmem>>, vector<512x128xf32>,
    %c0_5 = arith.constant 0 : index
    %c0_6 = arith.constant 0 : index
    %6 = vector.load %arg4[%c0_5, %c0_6] : memref<512x128xf32, #tpu.memory_space<vmem>>, vector<512x128xf32>
    tpu.vector_store %arg4[%c0_5, %c0_6], %4 {strides = array<i32>} : memref<512x128xf32, #tpu.memory_space<vmem>>, vector<512x128xf32>,
    %cst_7 = arith.constant dense<0.000000e+00> : vector<128xf32>
    %7 = vector.multi_reduction <add>, %3, %cst_7 [0] : vector<512x128xf32> to vector<128xf32>
    %8 = vector.shape_cast %7 : vector<128xf32> to vector<1x1x128xf32>
    %c0_8 = arith.constant 0 : index
    %c0_9 = arith.constant 0 : index
    %c0_10 = arith.constant 0 : index
    %9 = vector.load %arg5[%c0_8, %c0_9, %c0_10] : memref<1x1x128xf32, #tpu.memory_space<vmem>>, vector<1x1x128xf32>
    tpu.vector_store %arg5[%c0_8, %c0_9, %c0_10], %8 {strides = array<i32>} : memref<1x1x128xf32, #tpu.memory_space<vmem>>, vector<1x1x128xf32>,
    %10 = arith.mulf %3, %3 : vector<512x128xf32>
    %cst_11 = arith.constant dense<0.000000e+00> : vector<128xf32>
    %11 = vector.multi_reduction <add>, %10, %cst_11 [0] : vector<512x128xf32> to vector<128xf32>
    %12 = vector.shape_cast %11 : vector<128xf32> to vector<1x1x128xf32>
    %c0_12 = arith.constant 0 : index
    %c0_13 = arith.constant 0 : index
    %c0_14 = arith.constant 0 : index
    %13 = vector.load %arg6[%c0_12, %c0_13, %c0_14] : memref<1x1x128xf32, #tpu.memory_space<vmem>>, vector<1x1x128xf32>
    tpu.vector_store %arg6[%c0_12, %c0_13, %c0_14], %12 {strides = array<i32>} : memref<1x1x128xf32, #tpu.memory_space<vmem>>, vector<1x1x128xf32>,
    %cst_15 = arith.constant dense<0.000000e+00> : vector<128xf32>
    %14 = vector.multi_reduction <add>, %4, %cst_15 [0] : vector<512x128xf32> to vector<128xf32>
    %15 = vector.shape_cast %14 : vector<128xf32> to vector<1x1x128xf32>
    %c0_16 = arith.constant 0 : index
    %c0_17 = arith.constant 0 : index
    %c0_18 = arith.constant 0 : index
    %16 = vector.load %arg7[%c0_16, %c0_17, %c0_18] : memref<1x1x128xf32, #tpu.memory_space<vmem>>, vector<1x1x128xf32>
    tpu.vector_store %arg7[%c0_16, %c0_17, %c0_18], %15 {strides = array<i32>} : memref<1x1x128xf32, #tpu.memory_space<vmem>>, vector<1x1x128xf32>,
    %17 = arith.mulf %4, %4 : vector<512x128xf32>
    %cst_19 = arith.constant dense<0.000000e+00> : vector<128xf32>
    %18 = vector.multi_reduction <add>, %17, %cst_19 [0] : vector<512x128xf32> to vector<128xf32>
    %19 = vector.shape_cast %18 : vector<128xf32> to vector<1x1x128xf32>
    %c0_20 = arith.constant 0 : index
    %c0_21 = arith.constant 0 : index
    %c0_22 = arith.constant 0 : index
    %20 = vector.load %arg8[%c0_20, %c0_21, %c0_22] : memref<1x1x128xf32, #tpu.memory_space<vmem>>, vector<1x1x128xf32>
    tpu.vector_store %arg8[%c0_20, %c0_21, %c0_22], %19 {strides = array<i32>} : memref<1x1x128xf32, #tpu.memory_space<vmem>>, vector<1x1x128xf32>,
    return
  }
  func.func @transform_0(%arg0: i32) -> (i32, i32) {
    %c0_i32 = arith.constant 0 : i32
    %c0_i32_0 = arith.constant 0 : i32
    return %arg0, %c0_i32 : i32, i32
  }
  func.func @transform_1(%arg0: i32) -> (i32, i32) {
    %c0_i32 = arith.constant 0 : i32
    %c0_i32_0 = arith.constant 0 : i32
    %c0_i32_1 = arith.constant 0 : i32
    return %c0_i32, %c0_i32_0 : i32, i32
  }
  func.func @transform_2(%arg0: i32) -> (i32, i32) {
    %c0_i32 = arith.constant 0 : i32
    %c0_i32_0 = arith.constant 0 : i32
    return %arg0, %c0_i32 : i32, i32
  }
  func.func @transform_3(%arg0: i32) -> (i32, i32) {
    %c0_i32 = arith.constant 0 : i32
    %c0_i32_0 = arith.constant 0 : i32
    return %arg0, %c0_i32 : i32, i32
  }
  func.func @transform_4(%arg0: i32) -> (i32, i32, i32) {
    %c0_i32 = arith.constant 0 : i32
    %c0_i32_0 = arith.constant 0 : i32
    %c0_i32_1 = arith.constant 0 : i32
    return %arg0, %c0_i32, %c0_i32_0 : i32, i32, i32
  }
  func.func @transform_5(%arg0: i32) -> (i32, i32, i32) {
    %c0_i32 = arith.constant 0 : i32
    %c0_i32_0 = arith.constant 0 : i32
    %c0_i32_1 = arith.constant 0 : i32
    return %arg0, %c0_i32, %c0_i32_0 : i32, i32, i32
  }
  func.func @transform_6(%arg0: i32) -> (i32, i32, i32) {
    %c0_i32 = arith.constant 0 : i32
    %c0_i32_0 = arith.constant 0 : i32
    %c0_i32_1 = arith.constant 0 : i32
    return %arg0, %c0_i32, %c0_i32_0 : i32, i32, i32
  }
  func.func @transform_7(%arg0: i32) -> (i32, i32, i32) {
    %c0_i32 = arith.constant 0 : i32
    %c0_i32_0 = arith.constant 0 : i32
    %c0_i32_1 = arith.constant 0 : i32
    return %arg0, %c0_i32, %c0_i32_0 : i32, i32, i32
  }
}

module attributes {stable_mosaic.version = 11 : i64} {
  func.func @_mm_affine_bn_stats_kernel(%arg0: i32, %arg1: memref<512x128xf32, #tpu.memory_space<vmem>>, %arg2: memref<128x128xf32, #tpu.memory_space<vmem>>, %arg3: memref<1x128xf32, #tpu.memory_space<vmem>>, %arg4: memref<1x128xf32, #tpu.memory_space<vmem>>, %arg5: memref<512x128xf32, #tpu.memory_space<vmem>>, %arg6: memref<1x1x128xf32, #tpu.memory_space<vmem>>, %arg7: memref<1x1x128xf32, #tpu.memory_space<vmem>>) attributes {dimension_semantics = [#tpu.dimension_semantics<parallel>], iteration_bounds = array<i64: 1>, scalar_prefetch = 0 : i64, scratch_operands = 0 : i64, tpu.core_type = #tpu.core_type<tc>, window_params = [{transform_indices = @transform_0, window_bounds = array<i64: 512, 128>}, {pipeline_mode = #tpu.pipeline_mode<synchronous>, transform_indices = @transform_1, window_bounds = array<i64: 128, 128>}, {pipeline_mode = #tpu.pipeline_mode<synchronous>, transform_indices = @transform_2, window_bounds = array<i64: 1, 128>}, {pipeline_mode = #tpu.pipeline_mode<synchronous>, transform_indices = @transform_3, window_bounds = array<i64: 1, 128>}, {transform_indices = @transform_4, window_bounds = array<i64: 512, 128>}, {transform_indices = @transform_5, window_bounds = array<i64: 1, 1, 128>}, {transform_indices = @transform_6, window_bounds = array<i64: 1, 1, 128>}]} {
    %c0 = arith.constant 0 : index
    %c0_0 = arith.constant 0 : index
    %0 = vector.load %arg1[%c0, %c0_0] : memref<512x128xf32, #tpu.memory_space<vmem>>, vector<512x128xf32>
    %c0_1 = arith.constant 0 : index
    %c0_2 = arith.constant 0 : index
    %1 = vector.load %arg3[%c0_1, %c0_2] : memref<1x128xf32, #tpu.memory_space<vmem>>, vector<1x128xf32>
    %2 = vector.broadcast %1 : vector<1x128xf32> to vector<512x128xf32>
    %3 = arith.mulf %0, %2 : vector<512x128xf32>
    %c0_3 = arith.constant 0 : index
    %c0_4 = arith.constant 0 : index
    %4 = vector.load %arg4[%c0_3, %c0_4] : memref<1x128xf32, #tpu.memory_space<vmem>>, vector<1x128xf32>
    %5 = vector.broadcast %4 : vector<1x128xf32> to vector<512x128xf32>
    %6 = arith.addf %3, %5 : vector<512x128xf32>
    %cst = arith.constant 0.000000e+00 : f32
    %7 = vector.broadcast %cst : f32 to vector<512x128xf32>
    %8 = arith.maximumf %6, %7 : vector<512x128xf32>
    %c0_5 = arith.constant 0 : index
    %c0_6 = arith.constant 0 : index
    %9 = vector.load %arg2[%c0_5, %c0_6] : memref<128x128xf32, #tpu.memory_space<vmem>>, vector<128x128xf32>
    %cst_7 = arith.constant dense<0.000000e+00> : vector<512x128xf32>
    %10 = tpu.matmul %8, %9, %cst_7 {dimension_numbers = #tpu.dot_dimension_numbers<[1], [0], [0], [1], [0, 0, 1, 1], [], []>} : vector<512x128xf32>, vector<128x128xf32>, vector<512x128xf32> -> vector<512x128xf32>
    %c0_8 = arith.constant 0 : index
    %c0_9 = arith.constant 0 : index
    %11 = vector.load %arg5[%c0_8, %c0_9] : memref<512x128xf32, #tpu.memory_space<vmem>>, vector<512x128xf32>
    tpu.vector_store %arg5[%c0_8, %c0_9], %10 {strides = array<i32>} : memref<512x128xf32, #tpu.memory_space<vmem>>, vector<512x128xf32>,
    %cst_10 = arith.constant dense<0.000000e+00> : vector<128xf32>
    %12 = vector.multi_reduction <add>, %10, %cst_10 [0] : vector<512x128xf32> to vector<128xf32>
    %13 = vector.shape_cast %12 : vector<128xf32> to vector<1x1x128xf32>
    %c0_11 = arith.constant 0 : index
    %c0_12 = arith.constant 0 : index
    %c0_13 = arith.constant 0 : index
    %14 = vector.load %arg6[%c0_11, %c0_12, %c0_13] : memref<1x1x128xf32, #tpu.memory_space<vmem>>, vector<1x1x128xf32>
    tpu.vector_store %arg6[%c0_11, %c0_12, %c0_13], %13 {strides = array<i32>} : memref<1x1x128xf32, #tpu.memory_space<vmem>>, vector<1x1x128xf32>,
    %15 = arith.mulf %10, %10 : vector<512x128xf32>
    %cst_14 = arith.constant dense<0.000000e+00> : vector<128xf32>
    %16 = vector.multi_reduction <add>, %15, %cst_14 [0] : vector<512x128xf32> to vector<128xf32>
    %17 = vector.shape_cast %16 : vector<128xf32> to vector<1x1x128xf32>
    %c0_15 = arith.constant 0 : index
    %c0_16 = arith.constant 0 : index
    %c0_17 = arith.constant 0 : index
    %18 = vector.load %arg7[%c0_15, %c0_16, %c0_17] : memref<1x1x128xf32, #tpu.memory_space<vmem>>, vector<1x1x128xf32>
    tpu.vector_store %arg7[%c0_15, %c0_16, %c0_17], %17 {strides = array<i32>} : memref<1x1x128xf32, #tpu.memory_space<vmem>>, vector<1x1x128xf32>,
    return
  }
  func.func @transform_0(%arg0: i32) -> (i32, i32) {
    %c0_i32 = arith.constant 0 : i32
    %c0_i32_0 = arith.constant 0 : i32
    return %arg0, %c0_i32 : i32, i32
  }
  func.func @transform_1(%arg0: i32) -> (i32, i32) {
    %c0_i32 = arith.constant 0 : i32
    %c0_i32_0 = arith.constant 0 : i32
    %c0_i32_1 = arith.constant 0 : i32
    return %c0_i32, %c0_i32_0 : i32, i32
  }
  func.func @transform_2(%arg0: i32) -> (i32, i32) {
    %c0_i32 = arith.constant 0 : i32
    %c0_i32_0 = arith.constant 0 : i32
    %c0_i32_1 = arith.constant 0 : i32
    return %c0_i32, %c0_i32_0 : i32, i32
  }
  func.func @transform_3(%arg0: i32) -> (i32, i32) {
    %c0_i32 = arith.constant 0 : i32
    %c0_i32_0 = arith.constant 0 : i32
    %c0_i32_1 = arith.constant 0 : i32
    return %c0_i32, %c0_i32_0 : i32, i32
  }
  func.func @transform_4(%arg0: i32) -> (i32, i32) {
    %c0_i32 = arith.constant 0 : i32
    %c0_i32_0 = arith.constant 0 : i32
    return %arg0, %c0_i32 : i32, i32
  }
  func.func @transform_5(%arg0: i32) -> (i32, i32, i32) {
    %c0_i32 = arith.constant 0 : i32
    %c0_i32_0 = arith.constant 0 : i32
    %c0_i32_1 = arith.constant 0 : i32
    return %arg0, %c0_i32, %c0_i32_0 : i32, i32, i32
  }
  func.func @transform_6(%arg0: i32) -> (i32, i32, i32) {
    %c0_i32 = arith.constant 0 : i32
    %c0_i32_0 = arith.constant 0 : i32
    %c0_i32_1 = arith.constant 0 : i32
    return %arg0, %c0_i32, %c0_i32_0 : i32, i32, i32
  }
}

module attributes {stable_mosaic.version = 11 : i64} {
  func.func @_gconv3x3_kernel(%arg0: i32, %arg1: i32, %arg2: memref<2x18x18x128xf32, #tpu.memory_space<any>>, %arg3: memref<3x3x128x128xf32, #tpu.memory_space<vmem>>, %arg4: memref<1x128xf32, #tpu.memory_space<vmem>>, %arg5: memref<1x128xf32, #tpu.memory_space<vmem>>, %arg6: memref<1x16x16x128xf32, #tpu.memory_space<vmem>>, %arg7: memref<1x1x128xf32, #tpu.memory_space<vmem>>, %arg8: memref<1x1x128xf32, #tpu.memory_space<vmem>>, %arg9: memref<18x18x128xf32, #tpu.memory_space<vmem>>, %arg10: memref<1x!tpu.dma_semaphore, #tpu.memory_space<semaphore_mem>>) attributes {dimension_semantics = [#tpu.dimension_semantics<parallel>, #tpu.dimension_semantics<arbitrary>], iteration_bounds = array<i64: 2, 1>, scalar_prefetch = 0 : i64, scratch_operands = 2 : i64, tpu.core_type = #tpu.core_type<tc>, window_params = [{}, {pipeline_mode = #tpu.pipeline_mode<synchronous>, transform_indices = @transform_1, window_bounds = array<i64: 3, 3, 128, 128>}, {pipeline_mode = #tpu.pipeline_mode<synchronous>, transform_indices = @transform_2, window_bounds = array<i64: 1, 128>}, {pipeline_mode = #tpu.pipeline_mode<synchronous>, transform_indices = @transform_3, window_bounds = array<i64: 1, 128>}, {transform_indices = @transform_4, window_bounds = array<i64: 1, 16, 16, 128>}, {transform_indices = @transform_5, window_bounds = array<i64: 1, 1, 128>}, {transform_indices = @transform_6, window_bounds = array<i64: 1, 1, 128>}]} {
    %c16_i32 = arith.constant 16 : i32
    %0 = arith.muli %arg1, %c16_i32 : i32
    %c0_i32 = arith.constant 0 : i32
    %c0_i32_0 = arith.constant 0 : i32
    %c0_i32_1 = arith.constant 0 : i32
    %1 = tpu.memref_slice %arg2[%arg0, %0, %c0_i32_0, %c0_i32_1] : memref<2x18x18x128xf32, #tpu.memory_space<any>> -> memref<1x18x18x128xf32, #tpu.memory_space<any>>
    %2 = tpu.memref_squeeze %1 : memref<1x18x18x128xf32, #tpu.memory_space<any>> -> memref<18x18x128xf32, #tpu.memory_space<any>>
    %3 = tpu.memref_slice %arg10[%c0_i32] : memref<1x!tpu.dma_semaphore, #tpu.memory_space<semaphore_mem>> -> memref<1x!tpu.dma_semaphore, #tpu.memory_space<semaphore_mem>>
    %4 = tpu.memref_squeeze %3 : memref<1x!tpu.dma_semaphore, #tpu.memory_space<semaphore_mem>> -> memref<!tpu.dma_semaphore, #tpu.memory_space<semaphore_mem>>
    tpu.enqueue_dma source(%2 : memref<18x18x128xf32, #tpu.memory_space<any>>) target(%arg9 : memref<18x18x128xf32, #tpu.memory_space<vmem>>) target_semaphore(%4 : memref<!tpu.dma_semaphore, #tpu.memory_space<semaphore_mem>>)
    %c0_i32_2 = arith.constant 0 : i32
    %c0_i32_3 = arith.constant 0 : i32
    %c0_i32_4 = arith.constant 0 : i32
    %5 = tpu.memref_slice %arg2[%arg0, %0, %c0_i32_3, %c0_i32_4] : memref<2x18x18x128xf32, #tpu.memory_space<any>> -> memref<1x18x18x128xf32, #tpu.memory_space<any>>
    %6 = tpu.memref_squeeze %5 : memref<1x18x18x128xf32, #tpu.memory_space<any>> -> memref<18x18x128xf32, #tpu.memory_space<any>>
    %7 = tpu.memref_slice %arg10[%c0_i32_2] : memref<1x!tpu.dma_semaphore, #tpu.memory_space<semaphore_mem>> -> memref<1x!tpu.dma_semaphore, #tpu.memory_space<semaphore_mem>>
    %8 = tpu.memref_squeeze %7 : memref<1x!tpu.dma_semaphore, #tpu.memory_space<semaphore_mem>> -> memref<!tpu.dma_semaphore, #tpu.memory_space<semaphore_mem>>
    tpu.wait_dma2 semaphore(%8 : memref<!tpu.dma_semaphore, #tpu.memory_space<semaphore_mem>>) src(%6 : memref<18x18x128xf32, #tpu.memory_space<any>>) dst(%arg9 : memref<18x18x128xf32, #tpu.memory_space<vmem>>)
    %c0 = arith.constant 0 : index
    %c0_5 = arith.constant 0 : index
    %c0_6 = arith.constant 0 : index
    %9 = vector.load %arg9[%c0, %c0_5, %c0_6] : memref<18x18x128xf32, #tpu.memory_space<vmem>>, vector<18x18x128xf32>
    %c0_7 = arith.constant 0 : index
    %c0_8 = arith.constant 0 : index
    %10 = vector.load %arg4[%c0_7, %c0_8] : memref<1x128xf32, #tpu.memory_space<vmem>>, vector<1x128xf32>
    %11 = vector.shape_cast %10 : vector<1x128xf32> to vector<1x1x128xf32>
    %12 = vector.broadcast %11 : vector<1x1x128xf32> to vector<18x18x128xf32>
    %13 = arith.mulf %9, %12 : vector<18x18x128xf32>
    %c0_9 = arith.constant 0 : index
    %c0_10 = arith.constant 0 : index
    %14 = vector.load %arg5[%c0_9, %c0_10] : memref<1x128xf32, #tpu.memory_space<vmem>>, vector<1x128xf32>
    %15 = vector.shape_cast %14 : vector<1x128xf32> to vector<1x1x128xf32>
    %16 = vector.broadcast %15 : vector<1x1x128xf32> to vector<18x18x128xf32>
    %17 = arith.addf %13, %16 : vector<18x18x128xf32>
    %cst = arith.constant 0.000000e+00 : f32
    %18 = vector.broadcast %cst : f32 to vector<18x18x128xf32>
    %19 = arith.maximumf %17, %18 : vector<18x18x128xf32>
    %c0_11 = arith.constant 0 : index
    %c0_12 = arith.constant 0 : index
    %c0_13 = arith.constant 0 : index
    %20 = vector.load %arg9[%c0_11, %c0_12, %c0_13] : memref<18x18x128xf32, #tpu.memory_space<vmem>>, vector<18x18x128xf32>
    tpu.vector_store %arg9[%c0_11, %c0_12, %c0_13], %19 {strides = array<i32>} : memref<18x18x128xf32, #tpu.memory_space<vmem>>, vector<18x18x128xf32>,
    %cst_14 = arith.constant 0.000000e+00 : f32
    %21 = vector.broadcast %cst_14 : f32 to vector<256x128xf32>
    %c0_15 = arith.constant 0 : index
    %c0_16 = arith.constant 0 : index
    %c0_17 = arith.constant 0 : index
    %22 = vector.load %arg9[%c0_15, %c0_16, %c0_17] : memref<18x18x128xf32, #tpu.memory_space<vmem>>, vector<16x16x128xf32>
    %23 = vector.shape_cast %22 : vector<16x16x128xf32> to vector<256x128xf32>
    %c0_18 = arith.constant 0 : index
    %c0_19 = arith.constant 0 : index
    %c0_20 = arith.constant 0 : index
    %c0_21 = arith.constant 0 : index
    %24 = vector.load %arg3[%c0_18, %c0_19, %c0_20, %c0_21] : memref<3x3x128x128xf32, #tpu.memory_space<vmem>>, vector<1x1x128x128xf32>
    %25 = vector.shape_cast %24 : vector<1x1x128x128xf32> to vector<128x128xf32>
    %cst_22 = arith.constant dense<0.000000e+00> : vector<256x128xf32>
    %26 = tpu.matmul %23, %25, %cst_22 {dimension_numbers = #tpu.dot_dimension_numbers<[1], [0], [0], [1], [0, 0, 1, 1], [], []>} : vector<256x128xf32>, vector<128x128xf32>, vector<256x128xf32> -> vector<256x128xf32>
    %27 = arith.addf %21, %26 : vector<256x128xf32>
    %c0_23 = arith.constant 0 : index
    %c1 = arith.constant 1 : index
    %c0_24 = arith.constant 0 : index
    %28 = vector.load %arg9[%c0_23, %c1, %c0_24] : memref<18x18x128xf32, #tpu.memory_space<vmem>>, vector<16x16x128xf32>
    %29 = vector.shape_cast %28 : vector<16x16x128xf32> to vector<256x128xf32>
    %c0_25 = arith.constant 0 : index
    %c1_26 = arith.constant 1 : index
    %c0_27 = arith.constant 0 : index
    %c0_28 = arith.constant 0 : index
    %30 = vector.load %arg3[%c0_25, %c1_26, %c0_27, %c0_28] : memref<3x3x128x128xf32, #tpu.memory_space<vmem>>, vector<1x1x128x128xf32>
    %31 = vector.shape_cast %30 : vector<1x1x128x128xf32> to vector<128x128xf32>
    %cst_29 = arith.constant dense<0.000000e+00> : vector<256x128xf32>
    %32 = tpu.matmul %29, %31, %cst_29 {dimension_numbers = #tpu.dot_dimension_numbers<[1], [0], [0], [1], [0, 0, 1, 1], [], []>} : vector<256x128xf32>, vector<128x128xf32>, vector<256x128xf32> -> vector<256x128xf32>
    %33 = arith.addf %27, %32 : vector<256x128xf32>
    %c0_30 = arith.constant 0 : index
    %c2 = arith.constant 2 : index
    %c0_31 = arith.constant 0 : index
    %34 = vector.load %arg9[%c0_30, %c2, %c0_31] : memref<18x18x128xf32, #tpu.memory_space<vmem>>, vector<16x16x128xf32>
    %35 = vector.shape_cast %34 : vector<16x16x128xf32> to vector<256x128xf32>
    %c0_32 = arith.constant 0 : index
    %c2_33 = arith.constant 2 : index
    %c0_34 = arith.constant 0 : index
    %c0_35 = arith.constant 0 : index
    %36 = vector.load %arg3[%c0_32, %c2_33, %c0_34, %c0_35] : memref<3x3x128x128xf32, #tpu.memory_space<vmem>>, vector<1x1x128x128xf32>
    %37 = vector.shape_cast %36 : vector<1x1x128x128xf32> to vector<128x128xf32>
    %cst_36 = arith.constant dense<0.000000e+00> : vector<256x128xf32>
    %38 = tpu.matmul %35, %37, %cst_36 {dimension_numbers = #tpu.dot_dimension_numbers<[1], [0], [0], [1], [0, 0, 1, 1], [], []>} : vector<256x128xf32>, vector<128x128xf32>, vector<256x128xf32> -> vector<256x128xf32>
    %39 = arith.addf %33, %38 : vector<256x128xf32>
    %c1_37 = arith.constant 1 : index
    %c0_38 = arith.constant 0 : index
    %c0_39 = arith.constant 0 : index
    %40 = vector.load %arg9[%c1_37, %c0_38, %c0_39] : memref<18x18x128xf32, #tpu.memory_space<vmem>>, vector<16x16x128xf32>
    %41 = vector.shape_cast %40 : vector<16x16x128xf32> to vector<256x128xf32>
    %c1_40 = arith.constant 1 : index
    %c0_41 = arith.constant 0 : index
    %c0_42 = arith.constant 0 : index
    %c0_43 = arith.constant 0 : index
    %42 = vector.load %arg3[%c1_40, %c0_41, %c0_42, %c0_43] : memref<3x3x128x128xf32, #tpu.memory_space<vmem>>, vector<1x1x128x128xf32>
    %43 = vector.shape_cast %42 : vector<1x1x128x128xf32> to vector<128x128xf32>
    %cst_44 = arith.constant dense<0.000000e+00> : vector<256x128xf32>
    %44 = tpu.matmul %41, %43, %cst_44 {dimension_numbers = #tpu.dot_dimension_numbers<[1], [0], [0], [1], [0, 0, 1, 1], [], []>} : vector<256x128xf32>, vector<128x128xf32>, vector<256x128xf32> -> vector<256x128xf32>
    %45 = arith.addf %39, %44 : vector<256x128xf32>
    %c1_45 = arith.constant 1 : index
    %c1_46 = arith.constant 1 : index
    %c0_47 = arith.constant 0 : index
    %46 = vector.load %arg9[%c1_45, %c1_46, %c0_47] : memref<18x18x128xf32, #tpu.memory_space<vmem>>, vector<16x16x128xf32>
    %47 = vector.shape_cast %46 : vector<16x16x128xf32> to vector<256x128xf32>
    %c1_48 = arith.constant 1 : index
    %c1_49 = arith.constant 1 : index
    %c0_50 = arith.constant 0 : index
    %c0_51 = arith.constant 0 : index
    %48 = vector.load %arg3[%c1_48, %c1_49, %c0_50, %c0_51] : memref<3x3x128x128xf32, #tpu.memory_space<vmem>>, vector<1x1x128x128xf32>
    %49 = vector.shape_cast %48 : vector<1x1x128x128xf32> to vector<128x128xf32>
    %cst_52 = arith.constant dense<0.000000e+00> : vector<256x128xf32>
    %50 = tpu.matmul %47, %49, %cst_52 {dimension_numbers = #tpu.dot_dimension_numbers<[1], [0], [0], [1], [0, 0, 1, 1], [], []>} : vector<256x128xf32>, vector<128x128xf32>, vector<256x128xf32> -> vector<256x128xf32>
    %51 = arith.addf %45, %50 : vector<256x128xf32>
    %c1_53 = arith.constant 1 : index
    %c2_54 = arith.constant 2 : index
    %c0_55 = arith.constant 0 : index
    %52 = vector.load %arg9[%c1_53, %c2_54, %c0_55] : memref<18x18x128xf32, #tpu.memory_space<vmem>>, vector<16x16x128xf32>
    %53 = vector.shape_cast %52 : vector<16x16x128xf32> to vector<256x128xf32>
    %c1_56 = arith.constant 1 : index
    %c2_57 = arith.constant 2 : index
    %c0_58 = arith.constant 0 : index
    %c0_59 = arith.constant 0 : index
    %54 = vector.load %arg3[%c1_56, %c2_57, %c0_58, %c0_59] : memref<3x3x128x128xf32, #tpu.memory_space<vmem>>, vector<1x1x128x128xf32>
    %55 = vector.shape_cast %54 : vector<1x1x128x128xf32> to vector<128x128xf32>
    %cst_60 = arith.constant dense<0.000000e+00> : vector<256x128xf32>
    %56 = tpu.matmul %53, %55, %cst_60 {dimension_numbers = #tpu.dot_dimension_numbers<[1], [0], [0], [1], [0, 0, 1, 1], [], []>} : vector<256x128xf32>, vector<128x128xf32>, vector<256x128xf32> -> vector<256x128xf32>
    %57 = arith.addf %51, %56 : vector<256x128xf32>
    %c2_61 = arith.constant 2 : index
    %c0_62 = arith.constant 0 : index
    %c0_63 = arith.constant 0 : index
    %58 = vector.load %arg9[%c2_61, %c0_62, %c0_63] : memref<18x18x128xf32, #tpu.memory_space<vmem>>, vector<16x16x128xf32>
    %59 = vector.shape_cast %58 : vector<16x16x128xf32> to vector<256x128xf32>
    %c2_64 = arith.constant 2 : index
    %c0_65 = arith.constant 0 : index
    %c0_66 = arith.constant 0 : index
    %c0_67 = arith.constant 0 : index
    %60 = vector.load %arg3[%c2_64, %c0_65, %c0_66, %c0_67] : memref<3x3x128x128xf32, #tpu.memory_space<vmem>>, vector<1x1x128x128xf32>
    %61 = vector.shape_cast %60 : vector<1x1x128x128xf32> to vector<128x128xf32>
    %cst_68 = arith.constant dense<0.000000e+00> : vector<256x128xf32>
    %62 = tpu.matmul %59, %61, %cst_68 {dimension_numbers = #tpu.dot_dimension_numbers<[1], [0], [0], [1], [0, 0, 1, 1], [], []>} : vector<256x128xf32>, vector<128x128xf32>, vector<256x128xf32> -> vector<256x128xf32>
    %63 = arith.addf %57, %62 : vector<256x128xf32>
    %c2_69 = arith.constant 2 : index
    %c1_70 = arith.constant 1 : index
    %c0_71 = arith.constant 0 : index
    %64 = vector.load %arg9[%c2_69, %c1_70, %c0_71] : memref<18x18x128xf32, #tpu.memory_space<vmem>>, vector<16x16x128xf32>
    %65 = vector.shape_cast %64 : vector<16x16x128xf32> to vector<256x128xf32>
    %c2_72 = arith.constant 2 : index
    %c1_73 = arith.constant 1 : index
    %c0_74 = arith.constant 0 : index
    %c0_75 = arith.constant 0 : index
    %66 = vector.load %arg3[%c2_72, %c1_73, %c0_74, %c0_75] : memref<3x3x128x128xf32, #tpu.memory_space<vmem>>, vector<1x1x128x128xf32>
    %67 = vector.shape_cast %66 : vector<1x1x128x128xf32> to vector<128x128xf32>
    %cst_76 = arith.constant dense<0.000000e+00> : vector<256x128xf32>
    %68 = tpu.matmul %65, %67, %cst_76 {dimension_numbers = #tpu.dot_dimension_numbers<[1], [0], [0], [1], [0, 0, 1, 1], [], []>} : vector<256x128xf32>, vector<128x128xf32>, vector<256x128xf32> -> vector<256x128xf32>
    %69 = arith.addf %63, %68 : vector<256x128xf32>
    %c2_77 = arith.constant 2 : index
    %c2_78 = arith.constant 2 : index
    %c0_79 = arith.constant 0 : index
    %70 = vector.load %arg9[%c2_77, %c2_78, %c0_79] : memref<18x18x128xf32, #tpu.memory_space<vmem>>, vector<16x16x128xf32>
    %71 = vector.shape_cast %70 : vector<16x16x128xf32> to vector<256x128xf32>
    %c2_80 = arith.constant 2 : index
    %c2_81 = arith.constant 2 : index
    %c0_82 = arith.constant 0 : index
    %c0_83 = arith.constant 0 : index
    %72 = vector.load %arg3[%c2_80, %c2_81, %c0_82, %c0_83] : memref<3x3x128x128xf32, #tpu.memory_space<vmem>>, vector<1x1x128x128xf32>
    %73 = vector.shape_cast %72 : vector<1x1x128x128xf32> to vector<128x128xf32>
    %cst_84 = arith.constant dense<0.000000e+00> : vector<256x128xf32>
    %74 = tpu.matmul %71, %73, %cst_84 {dimension_numbers = #tpu.dot_dimension_numbers<[1], [0], [0], [1], [0, 0, 1, 1], [], []>} : vector<256x128xf32>, vector<128x128xf32>, vector<256x128xf32> -> vector<256x128xf32>
    %75 = arith.addf %69, %74 : vector<256x128xf32>
    %76 = vector.shape_cast %75 : vector<256x128xf32> to vector<16x16x128xf32>
    %77 = vector.shape_cast %76 : vector<16x16x128xf32> to vector<1x16x16x128xf32>
    %c0_85 = arith.constant 0 : index
    %c0_86 = arith.constant 0 : index
    %c0_87 = arith.constant 0 : index
    %c0_88 = arith.constant 0 : index
    %78 = vector.load %arg6[%c0_85, %c0_86, %c0_87, %c0_88] : memref<1x16x16x128xf32, #tpu.memory_space<vmem>>, vector<1x16x16x128xf32>
    tpu.vector_store %arg6[%c0_85, %c0_86, %c0_87, %c0_88], %77 {strides = array<i32>} : memref<1x16x16x128xf32, #tpu.memory_space<vmem>>, vector<1x16x16x128xf32>,
    %cst_89 = arith.constant dense<0.000000e+00> : vector<128xf32>
    %79 = vector.multi_reduction <add>, %75, %cst_89 [0] : vector<256x128xf32> to vector<128xf32>
    %80 = vector.shape_cast %79 : vector<128xf32> to vector<1x1x128xf32>
    %81 = arith.mulf %75, %75 : vector<256x128xf32>
    %cst_90 = arith.constant dense<0.000000e+00> : vector<128xf32>
    %82 = vector.multi_reduction <add>, %81, %cst_90 [0] : vector<256x128xf32> to vector<128xf32>
    %83 = vector.shape_cast %82 : vector<128xf32> to vector<1x1x128xf32>
    %c0_i32_91 = arith.constant 0 : i32
    %84 = arith.cmpi eq, %arg1, %c0_i32_91 : i32
    %85 = arith.extui %84 : i1 to i32
    %c0_i32_92 = arith.constant 0 : i32
    %86 = arith.cmpi ne, %85, %c0_i32_92 : i32
    scf.if %86 {
      %cst_105 = arith.constant 0.000000e+00 : f32
      %93 = vector.broadcast %cst_105 : f32 to vector<1x1x128xf32>
      %c0_106 = arith.constant 0 : index
      %c0_107 = arith.constant 0 : index
      %c0_108 = arith.constant 0 : index
      %94 = vector.load %arg7[%c0_106, %c0_107, %c0_108] : memref<1x1x128xf32, #tpu.memory_space<vmem>>, vector<1x1x128xf32>
      tpu.vector_store %arg7[%c0_106, %c0_107, %c0_108], %93 {strides = array<i32>} : memref<1x1x128xf32, #tpu.memory_space<vmem>>, vector<1x1x128xf32>,
      %cst_109 = arith.constant 0.000000e+00 : f32
      %95 = vector.broadcast %cst_109 : f32 to vector<1x1x128xf32>
      %c0_110 = arith.constant 0 : index
      %c0_111 = arith.constant 0 : index
      %c0_112 = arith.constant 0 : index
      %96 = vector.load %arg8[%c0_110, %c0_111, %c0_112] : memref<1x1x128xf32, #tpu.memory_space<vmem>>, vector<1x1x128xf32>
      tpu.vector_store %arg8[%c0_110, %c0_111, %c0_112], %95 {strides = array<i32>} : memref<1x1x128xf32, #tpu.memory_space<vmem>>, vector<1x1x128xf32>,
    } else {
    }
    %c0_93 = arith.constant 0 : index
    %c0_94 = arith.constant 0 : index
    %c0_95 = arith.constant 0 : index
    %87 = vector.load %arg7[%c0_93, %c0_94, %c0_95] : memref<1x1x128xf32, #tpu.memory_space<vmem>>, vector<1x1x128xf32>
    %88 = arith.addf %87, %80 : vector<1x1x128xf32>
    %c0_96 = arith.constant 0 : index
    %c0_97 = arith.constant 0 : index
    %c0_98 = arith.constant 0 : index
    %89 = vector.load %arg7[%c0_96, %c0_97, %c0_98] : memref<1x1x128xf32, #tpu.memory_space<vmem>>, vector<1x1x128xf32>
    tpu.vector_store %arg7[%c0_96, %c0_97, %c0_98], %88 {strides = array<i32>} : memref<1x1x128xf32, #tpu.memory_space<vmem>>, vector<1x1x128xf32>,
    %c0_99 = arith.constant 0 : index
    %c0_100 = arith.constant 0 : index
    %c0_101 = arith.constant 0 : index
    %90 = vector.load %arg8[%c0_99, %c0_100, %c0_101] : memref<1x1x128xf32, #tpu.memory_space<vmem>>, vector<1x1x128xf32>
    %91 = arith.addf %90, %83 : vector<1x1x128xf32>
    %c0_102 = arith.constant 0 : index
    %c0_103 = arith.constant 0 : index
    %c0_104 = arith.constant 0 : index
    %92 = vector.load %arg8[%c0_102, %c0_103, %c0_104] : memref<1x1x128xf32, #tpu.memory_space<vmem>>, vector<1x1x128xf32>
    tpu.vector_store %arg8[%c0_102, %c0_103, %c0_104], %91 {strides = array<i32>} : memref<1x1x128xf32, #tpu.memory_space<vmem>>, vector<1x1x128xf32>,
    return
  }
  func.func @transform_1(%arg0: i32, %arg1: i32) -> (i32, i32, i32, i32) {
    %c0_i32 = arith.constant 0 : i32
    %c0_i32_0 = arith.constant 0 : i32
    %c0_i32_1 = arith.constant 0 : i32
    %c0_i32_2 = arith.constant 0 : i32
    %c0_i32_3 = arith.constant 0 : i32
    return %c0_i32, %c0_i32_0, %c0_i32_1, %c0_i32_2 : i32, i32, i32, i32
  }
  func.func @transform_2(%arg0: i32, %arg1: i32) -> (i32, i32) {
    %c0_i32 = arith.constant 0 : i32
    %c0_i32_0 = arith.constant 0 : i32
    %c0_i32_1 = arith.constant 0 : i32
    return %c0_i32, %c0_i32_0 : i32, i32
  }
  func.func @transform_3(%arg0: i32, %arg1: i32) -> (i32, i32) {
    %c0_i32 = arith.constant 0 : i32
    %c0_i32_0 = arith.constant 0 : i32
    %c0_i32_1 = arith.constant 0 : i32
    return %c0_i32, %c0_i32_0 : i32, i32
  }
  func.func @transform_4(%arg0: i32, %arg1: i32) -> (i32, i32, i32, i32) {
    %c0_i32 = arith.constant 0 : i32
    %c0_i32_0 = arith.constant 0 : i32
    %c0_i32_1 = arith.constant 0 : i32
    return %arg0, %arg1, %c0_i32, %c0_i32_0 : i32, i32, i32, i32
  }
  func.func @transform_5(%arg0: i32, %arg1: i32) -> (i32, i32, i32) {
    %c0_i32 = arith.constant 0 : i32
    %c0_i32_0 = arith.constant 0 : i32
    %c0_i32_1 = arith.constant 0 : i32
    return %arg0, %c0_i32, %c0_i32_0 : i32, i32, i32
  }
  func.func @transform_6(%arg0: i32, %arg1: i32) -> (i32, i32, i32) {
    %c0_i32 = arith.constant 0 : i32
    %c0_i32_0 = arith.constant 0 : i32
    %c0_i32_1 = arith.constant 0 : i32
    return %arg0, %c0_i32, %c0_i32_0 : i32, i32, i32
  }
}

module attributes {stable_mosaic.version = 11 : i64} {
  func.func @_bn_add_relu_kernel(%arg0: i32, %arg1: memref<512x128xf32, #tpu.memory_space<vmem>>, %arg2: memref<512x128xf32, #tpu.memory_space<vmem>>, %arg3: memref<1x128xf32, #tpu.memory_space<vmem>>, %arg4: memref<1x128xf32, #tpu.memory_space<vmem>>, %arg5: memref<1x128xf32, #tpu.memory_space<vmem>>, %arg6: memref<1x128xf32, #tpu.memory_space<vmem>>, %arg7: memref<512x128xf32, #tpu.memory_space<vmem>>) attributes {dimension_semantics = [#tpu.dimension_semantics<parallel>], iteration_bounds = array<i64: 1>, scalar_prefetch = 0 : i64, scratch_operands = 0 : i64, tpu.core_type = #tpu.core_type<tc>, window_params = [{transform_indices = @transform_0, window_bounds = array<i64: 512, 128>}, {transform_indices = @transform_1, window_bounds = array<i64: 512, 128>}, {pipeline_mode = #tpu.pipeline_mode<synchronous>, transform_indices = @transform_2, window_bounds = array<i64: 1, 128>}, {pipeline_mode = #tpu.pipeline_mode<synchronous>, transform_indices = @transform_3, window_bounds = array<i64: 1, 128>}, {pipeline_mode = #tpu.pipeline_mode<synchronous>, transform_indices = @transform_4, window_bounds = array<i64: 1, 128>}, {pipeline_mode = #tpu.pipeline_mode<synchronous>, transform_indices = @transform_5, window_bounds = array<i64: 1, 128>}, {transform_indices = @transform_6, window_bounds = array<i64: 512, 128>}]} {
    %c0 = arith.constant 0 : index
    %c0_0 = arith.constant 0 : index
    %0 = vector.load %arg1[%c0, %c0_0] : memref<512x128xf32, #tpu.memory_space<vmem>>, vector<512x128xf32>
    %c0_1 = arith.constant 0 : index
    %c0_2 = arith.constant 0 : index
    %1 = vector.load %arg3[%c0_1, %c0_2] : memref<1x128xf32, #tpu.memory_space<vmem>>, vector<1x128xf32>
    %2 = vector.broadcast %1 : vector<1x128xf32> to vector<512x128xf32>
    %3 = arith.mulf %0, %2 : vector<512x128xf32>
    %c0_3 = arith.constant 0 : index
    %c0_4 = arith.constant 0 : index
    %4 = vector.load %arg4[%c0_3, %c0_4] : memref<1x128xf32, #tpu.memory_space<vmem>>, vector<1x128xf32>
    %5 = vector.broadcast %4 : vector<1x128xf32> to vector<512x128xf32>
    %6 = arith.addf %3, %5 : vector<512x128xf32>
    %c0_5 = arith.constant 0 : index
    %c0_6 = arith.constant 0 : index
    %7 = vector.load %arg2[%c0_5, %c0_6] : memref<512x128xf32, #tpu.memory_space<vmem>>, vector<512x128xf32>
    %c0_7 = arith.constant 0 : index
    %c0_8 = arith.constant 0 : index
    %8 = vector.load %arg5[%c0_7, %c0_8] : memref<1x128xf32, #tpu.memory_space<vmem>>, vector<1x128xf32>
    %9 = vector.broadcast %8 : vector<1x128xf32> to vector<512x128xf32>
    %10 = arith.mulf %7, %9 : vector<512x128xf32>
    %c0_9 = arith.constant 0 : index
    %c0_10 = arith.constant 0 : index
    %11 = vector.load %arg6[%c0_9, %c0_10] : memref<1x128xf32, #tpu.memory_space<vmem>>, vector<1x128xf32>
    %12 = vector.broadcast %11 : vector<1x128xf32> to vector<512x128xf32>
    %13 = arith.addf %10, %12 : vector<512x128xf32>
    %14 = arith.addf %6, %13 : vector<512x128xf32>
    %cst = arith.constant 0.000000e+00 : f32
    %15 = vector.broadcast %cst : f32 to vector<512x128xf32>
    %16 = arith.maximumf %14, %15 : vector<512x128xf32>
    %c0_11 = arith.constant 0 : index
    %c0_12 = arith.constant 0 : index
    %17 = vector.load %arg7[%c0_11, %c0_12] : memref<512x128xf32, #tpu.memory_space<vmem>>, vector<512x128xf32>
    tpu.vector_store %arg7[%c0_11, %c0_12], %16 {strides = array<i32>} : memref<512x128xf32, #tpu.memory_space<vmem>>, vector<512x128xf32>,
    return
  }
  func.func @transform_0(%arg0: i32) -> (i32, i32) {
    %c0_i32 = arith.constant 0 : i32
    %c0_i32_0 = arith.constant 0 : i32
    return %arg0, %c0_i32 : i32, i32
  }
  func.func @transform_1(%arg0: i32) -> (i32, i32) {
    %c0_i32 = arith.constant 0 : i32
    %c0_i32_0 = arith.constant 0 : i32
    return %arg0, %c0_i32 : i32, i32
  }
  func.func @transform_2(%arg0: i32) -> (i32, i32) {
    %c0_i32 = arith.constant 0 : i32
    %c0_i32_0 = arith.constant 0 : i32
    %c0_i32_1 = arith.constant 0 : i32
    return %c0_i32, %c0_i32_0 : i32, i32
  }
  func.func @transform_3(%arg0: i32) -> (i32, i32) {
    %c0_i32 = arith.constant 0 : i32
    %c0_i32_0 = arith.constant 0 : i32
    %c0_i32_1 = arith.constant 0 : i32
    return %c0_i32, %c0_i32_0 : i32, i32
  }
  func.func @transform_4(%arg0: i32) -> (i32, i32) {
    %c0_i32 = arith.constant 0 : i32
    %c0_i32_0 = arith.constant 0 : i32
    %c0_i32_1 = arith.constant 0 : i32
    return %c0_i32, %c0_i32_0 : i32, i32
  }
  func.func @transform_5(%arg0: i32) -> (i32, i32) {
    %c0_i32 = arith.constant 0 : i32
    %c0_i32_0 = arith.constant 0 : i32
    %c0_i32_1 = arith.constant 0 : i32
    return %c0_i32, %c0_i32_0 : i32, i32
  }
  func.func @transform_6(%arg0: i32) -> (i32, i32) {
    %c0_i32 = arith.constant 0 : i32
    %c0_i32_0 = arith.constant 0 : i32
    return %arg0, %c0_i32 : i32, i32
  }
}

</mosaic_0001>

<bundles_post_ra>
// kernel: resnext_block_forward.4
= control target key start
LH: loop header
LB: loop body
LE: loop exit
PB: predicated region body
PF: predicated region fallthrough
CT: control target
= control target key end

     0   :  { %13 = vsyncpa [#allocation3], 0  ;;  %s2350_s0 = inlined_call_operand.hbm [shape: f32[512,8], index: 0, kind: input, shape index: {}]   ;;  %s2351_s1 = inlined_call_operand.hbm [shape: f32[8,256], index: 1, kind: input, shape index: {}]   ;;  %s2352_s2 = inlined_call_operand.hbm [shape: f32[512,128], index: 2, kind: output, shape index: {0}]   ;;  %s2353_s3 = inlined_call_operand.hbm [shape: f32[512,128], index: 3, kind: output, shape index: {1}]   ;;  %s2354_s4 = inlined_call_operand.hbm [shape: f32[1,1,128], index: 4, kind: output, shape index: {2}]   ;;  %s2355_s5 = inlined_call_operand.hbm [shape: f32[1,1,128], index: 5, kind: output, shape index: {3}]   ;;  %s2356_s6 = inlined_call_operand.hbm [shape: f32[1,1,128], index: 6, kind: output, shape index: {4}]   ;;  %s2357_s7 = inlined_call_operand.hbm [shape: f32[1,1,128], index: 7, kind: output, shape index: {5}]  }
   0x1   :  { %14 = vsyncpa [#allocation6], 0 }
   0x2   :  { %15 = vsyncpa [#allocation4], 0 }
   0x3   :  { %16 = vsyncpa [#allocation9], 0 }
   0x4   :  { %17 = vsyncpa [#allocation12], 0 }
   0x5   :  { %18 = vsyncpa [#allocation15], 0  ;;  %s1644_s24 = smov [#allocation2]   ;;  %s1456_s28 = scalar_lea.hbm %s2350_s0, 8192 }
   0x6   :  { %s24_s25 = sshll.u32 %s1644_s24, 4  ;;  %p1457_p0 = scmp.ne.s32.totalorder %s2350_s0, %s1456_s28  ;;  %s25_s25 = int_to_ptr.vmem [resolvable:$true] %s24_s25 }
   0x7   :  { %p1460_p1 = scmp.lt.u32.totalorder %s1456_s28, %s2350_s0 }
   0x9   :  { %p1462_p2 = pnand %p1460_p1, %p1457_p0 }
   0xb   :  { %1465 = shalt.err (!%p1462_p2)
}
   0xc   :  { %s1466_s10 = scalar_lea.vmem %s25_s25, 8192  ;;  %p1471_p4 = scmp.lt.s32.totalorder %s25_s25, %s25_s25 }
   0xd   :  { %p1467_p3 = scmp.ne.s32.totalorder %s25_s25, %s1466_s10  ;;  %p1472_p5 = scmp.lt.s32.totalorder %s1466_s10, %s1466_s10 }
   0xf   :  { %p1473_p6 = por %p1472_p5, %p1471_p4 }
  0x11   :  { %p1474_p7 = pnand %p1473_p6, %p1467_p3 }
  0x13   :  { %1477 = shalt.err (!%p1474_p7)
}
  0x14   :  { %s1645_s11 = smov 128   ;;  %s1646_s12 = smov 8  }
  0x15   :  { %30 = dma.hbm_to_vmem [thread:$0]  %s2350_s0, 8192, %s25_s25, [#allocation3], %s1645_s11, %s1645_s11, %s1646_s12  }
  0x16   :  { %s1647_s15 = smov [#allocation5]   ;;  %s1478_s19 = scalar_lea.hbm %s2351_s1, 256 }
  0x17   :  { %s37_s16 = sshll.u32 %s1647_s15, 4  ;;  %p1479_p8 = scmp.ne.s32.totalorder %s2351_s1, %s1478_s19  ;;  %s38_s16 = int_to_ptr.vmem [resolvable:$true] %s37_s16 }
  0x18   :  { %p1482_p9 = scmp.lt.u32.totalorder %s1478_s19, %s2351_s1 }
  0x1a   :  { %p1484_p10 = pnand %p1482_p9, %p1479_p8 }
  0x1c   :  { %1487 = shalt.err (!%p1484_p10)
}
  0x1d   :  { %s1488_s24 = scalar_lea.vmem %s38_s16, 256  ;;  %p1493_p12 = scmp.lt.s32.totalorder %s38_s16, %s38_s16 }
  0x1e   :  { %p1489_p11 = scmp.ne.s32.totalorder %s38_s16, %s1488_s24  ;;  %p1494_p13 = scmp.lt.s32.totalorder %s1488_s24, %s1488_s24 }
  0x20   :  { %p1495_p0 = por %p1494_p13, %p1493_p12 }
  0x22   :  { %p1496_p1 = pnand %p1495_p0, %p1489_p11 }
  0x24   :  { %1499 = shalt.err (!%p1496_p1)
}
  0x25   :  { %40 = dma.hbm_to_vmem [thread:$0]  %s2351_s1, 256, %s38_s16, [#allocation6]  }
  0x26   :  { %1632 = dma.done.wait [#allocation3], 8192  }
  0x27   :  { %1633 = vsyncadd [#allocation3], 4294959104 }
  0x28   :  { %1634 = dma.done.wait [#allocation6], 256  }
  0x29   :  { %1635 = vsyncadd [#allocation6], 4294967040  ;;  %v1648_v0 = vmov 0.0   ;;  %v112_v1 = vld [vmem:[#allocation5 + $0x8] sm:$0xff]  ;;  %v111_v2 = vld [vmem:[#allocation5] sm:$0xff]  ;;  %vm113_vm0 = vcmask 64512  }
  0x2a   :  { %370 = vmatprep.mubr.f32.mxu0 %v1648_v0  ;;  %562 = vmatprep.mubr.f32.mxu1 %v1648_v0  ;;  %v47_v3 = vld [vmem:[#allocation2] sm:$0xff]  ;;  %v48_v4 = vld [vmem:[#allocation2 + $0x8] sm:$0xff]  ;;  %v49_v6 = vld [vmem:[#allocation2 + $0x10] sm:$0xff]  ;;  %s1649_s1 = smov [#allocation7]   ;;  %s1650_s27 = smov [#allocation8]  }
  0x2b   :  { %306 = vmatprep.subr.mxu0 %v112_v1  ;;  %1443 = vmatprep.subr.mxu1 %v112_v1  ;;  %v79_v5 = vld [vmem:[#allocation2 + $0x100] sm:$0xff]  ;;  %v80_v7 = vld [vmem:[#allocation2 + $0x108] sm:$0xff]  ;;  %v50_v8 = vld [vmem:[#allocation2 + $0x18] sm:$0xff]  ;;  %s1296_s26 = sshll.u32 %s1649_s1, 4  ;;  %s1308_s28 = sshll.u32 %s1650_s27, 4  ;;  %s2039_s26 = int_to_ptr.vmem [resolvable:$true] %s1296_s26  ;;  %s2046_s28 = int_to_ptr.vmem [resolvable:$true] %s1308_s28 }
  0x2c   :  { %307 = vmatpush1.msra.mxu0 %v111_v2  ;;  %1444 = vmatpush1.msra.mxu1 %v111_v2  ;;  %v81_v9 = vld [vmem:[#allocation2 + $0x110] sm:$0xff]  ;;  %v51_v10 = vld [vmem:[#allocation2 + $0x20] sm:$0xff]  ;;  %v82_v11 = vld [vmem:[#allocation2 + $0x118] sm:$0xff]  ;;  %s1500_s29 = scalar_lea.vmem %s2039_s26, 8192  ;;  %p1505_p3 = scmp.lt.s32.totalorder %s2039_s26, %s2039_s26 }
  0x2d   :  { %1379 = vmatmul.mubr.msk.f32.vlgmr.msra.gmra.mrb[0].mxu0 %vm113_vm0, %v47_v3  ;;  %1411 = vmatmul.mubr.msk.f32.vlgmr.msra.gmra.mrb[0].mxu1 %vm113_vm0, %v79_v5  ;;  %v52_v12 = vld [vmem:[#allocation2 + $0x28] sm:$0xff]  ;;  %v83_v13 = vld [vmem:[#allocation2 + $0x120] sm:$0xff]  ;;  %v53_v14 = vld [vmem:[#allocation2 + $0x30] sm:$0xff]  ;;  %p1501_p2 = scmp.ne.s32.totalorder %s2039_s26, %s1500_s29  ;;  %p1506_p4 = scmp.lt.s32.totalorder %s1500_s29, %s1500_s29 }
  0x2e   :  { %376 = vmatprep.mubr.f32.mxu0 %v1648_v0  ;;  %568 = vmatprep.mubr.f32.mxu1 %v1648_v0  ;;  %v84_v15 = vld [vmem:[#allocation2 + $0x128] sm:$0xff]  ;;  %v54_v16 = vld [vmem:[#allocation2 + $0x38] sm:$0xff]  ;;  %v85_v17 = vld [vmem:[#allocation2 + $0x130] sm:$0xff] }
  0x2f   :  { %v55_v18 = vld [vmem:[#allocation2 + $0x40] sm:$0xff]  ;;  %v86_v19 = vld [vmem:[#allocation2 + $0x138] sm:$0xff]  ;;  %v56_v20 = vld [vmem:[#allocation2 + $0x48] sm:$0xff]  ;;  %p1507_p5 = por %p1506_p4, %p1505_p3 }
  0x30   :  { %v87_v21 = vld [vmem:[#allocation2 + $0x140] sm:$0xff]  ;;  %v57_v22 = vld [vmem:[#allocation2 + $0x50] sm:$0xff]  ;;  %v88_v23 = vld [vmem:[#allocation2 + $0x148] sm:$0xff] }
  0x31   :  { %1380 = vmatmul.mubr.msk.f32.gmra.mrb[2].mxu0 %vm113_vm0, %v48_v4  ;;  %1412 = vmatmul.mubr.msk.f32.gmra.mrb[2].mxu1 %vm113_vm0, %v80_v7  ;;  %v58_v24 = vld [vmem:[#allocation2 + $0x58] sm:$0xff]  ;;  %v89_v25 = vld [vmem:[#allocation2 + $0x150] sm:$0xff]  ;;  %v59_v26 = vld [vmem:[#allocation2 + $0x60] sm:$0xff]  ;;  %p1508_p6 = pnand %p1507_p5, %p1501_p2 }
  0x32   :  { %382 = vmatprep.mubr.f32.mxu0 %v1648_v0  ;;  %574 = vmatprep.mubr.f32.mxu1 %v1648_v0  ;;  %v90_v27 = vld [vmem:[#allocation2 + $0x158] sm:$0xff]  ;;  %v60_v28 = vld [vmem:[#allocation2 + $0x68] sm:$0xff]  ;;  %v91_v29 = vld [vmem:[#allocation2 + $0x160] sm:$0xff] }
  0x33   :  { %v61_v30 = vld [vmem:[#allocation2 + $0x70] sm:$0xff]  ;;  %v92_v31 = vld [vmem:[#allocation2 + $0x168] sm:$0xff]  ;;  %v62_v32 = vld [vmem:[#allocation2 + $0x78] sm:$0xff] }
  0x34   :  { %v93_v33 = vld [vmem:[#allocation2 + $0x170] sm:$0xff]  ;;  %v63_v34 = vld [vmem:[#allocation2 + $0x80] sm:$0xff]  ;;  %v94_v35 = vld [vmem:[#allocation2 + $0x178] sm:$0xff] }
  0x35   :  { %1381 = vmatmul.mubr.msk.f32.gmra.mrb[4].mxu0 %vm113_vm0, %v49_v6  ;;  %1413 = vmatmul.mubr.msk.f32.gmra.mrb[4].mxu1 %vm113_vm0, %v81_v9  ;;  %v64_v36 = vld [vmem:[#allocation2 + $0x88] sm:$0xff]  ;;  %v95_v37 = vld [vmem:[#allocation2 + $0x180] sm:$0xff]  ;;  %v65_v38 = vld [vmem:[#allocation2 + $0x90] sm:$0xff] }
  0x36   :  { %388 = vmatprep.mubr.f32.mxu0 %v1648_v0  ;;  %580 = vmatprep.mubr.f32.mxu1 %v1648_v0  ;;  %v96_v39 = vld [vmem:[#allocation2 + $0x188] sm:$0xff]  ;;  %v66_v40 = vld [vmem:[#allocation2 + $0x98] sm:$0xff]  ;;  %v97_v41 = vld [vmem:[#allocation2 + $0x190] sm:$0xff] }
  0x37   :  { %v67_v42 = vld [vmem:[#allocation2 + $0xa0] sm:$0xff]  ;;  %v98_v43 = vld [vmem:[#allocation2 + $0x198] sm:$0xff]  ;;  %v68_v44 = vld [vmem:[#allocation2 + $0xa8] sm:$0xff] }
  0x38   :  { %v99_v45 = vld [vmem:[#allocation2 + $0x1a0] sm:$0xff]  ;;  %v69_v46 = vld [vmem:[#allocation2 + $0xb0] sm:$0xff]  ;;  %v100_v47 = vld [vmem:[#allocation2 + $0x1a8] sm:$0xff] }
  0x39   :  { %1382 = vmatmul.mubr.msk.f32.gmra.mrb[6].mxu0 %vm113_vm0, %v50_v8  ;;  %1414 = vmatmul.mubr.msk.f32.gmra.mrb[6].mxu1 %vm113_vm0, %v82_v11  ;;  %v70_v48 = vld [vmem:[#allocation2 + $0xb8] sm:$0xff]  ;;  %v101_v49 = vld [vmem:[#allocation2 + $0x1b0] sm:$0xff]  ;;  %v71_v50 = vld [vmem:[#allocation2 + $0xc0] sm:$0xff] }
  0x3a   :  { %394 = vmatprep.mubr.f32.mxu0 %v1648_v0  ;;  %586 = vmatprep.mubr.f32.mxu1 %v1648_v0  ;;  %v102_v51 = vld [vmem:[#allocation2 + $0x1b8] sm:$0xff]  ;;  %v72_v52 = vld [vmem:[#allocation2 + $0xc8] sm:$0xff]  ;;  %v103_v53 = vld [vmem:[#allocation2 + $0x1c0] sm:$0xff] }
  0x3b   :  { %v73_v54 = vld [vmem:[#allocation2 + $0xd0] sm:$0xff]  ;;  %v104_v55 = vld [vmem:[#allocation2 + $0x1c8] sm:$0xff]  ;;  %v74_v56 = vld [vmem:[#allocation2 + $0xd8] sm:$0xff] }
  0x3c   :  { %v105_v57 = vld [vmem:[#allocation2 + $0x1d0] sm:$0xff]  ;;  %v75_v58 = vld [vmem:[#allocation2 + $0xe0] sm:$0xff]  ;;  %v106_v59 = vld [vmem:[#allocation2 + $0x1d8] sm:$0xff] }
  0x3d   :  { %1383 = vmatmul.mubr.msk.f32.gmra.mrb[8].mxu0 %vm113_vm0, %v51_v10  ;;  %1415 = vmatmul.mubr.msk.f32.gmra.mrb[8].mxu1 %vm113_vm0, %v83_v13  ;;  %v76_v60 = vld [vmem:[#allocation2 + $0xe8] sm:$0xff]  ;;  %v107_v61 = vld [vmem:[#allocation2 + $0x1e0] sm:$0xff]  ;;  %v77_v62 = vld [vmem:[#allocation2 + $0xf0] sm:$0xff] }
  0x3e   :  { %400 = vmatprep.mubr.f32.mxu0 %v1648_v0  ;;  %592 = vmatprep.mubr.f32.mxu1 %v1648_v0  ;;  %v108_v63 = vld [vmem:[#allocation2 + $0x1e8] sm:$0xff]  ;;  %v78_v1 = vld [vmem:[#allocation2 + $0xf8] sm:$0xff]  ;;  %v109_v2 = vld [vmem:[#allocation2 + $0x1f0] sm:$0xff] }
  0x3f   :  { %v110_v3 = vld [vmem:[#allocation2 + $0x1f8] sm:$0xff] }
  0x41   :  { %1384 = vmatmul.mubr.msk.f32.gmra.mrb[10].mxu0 %vm113_vm0, %v52_v12  ;;  %1416 = vmatmul.mubr.msk.f32.gmra.mrb[10].mxu1 %vm113_vm0, %v84_v15 }
  0x42   :  { %406 = vmatprep.mubr.f32.mxu0 %v1648_v0  ;;  %598 = vmatprep.mubr.f32.mxu1 %v1648_v0 }
  0x45   :  { %1385 = vmatmul.mubr.msk.f32.gmra.mrb[12].mxu0 %vm113_vm0, %v53_v14  ;;  %1417 = vmatmul.mubr.msk.f32.gmra.mrb[12].mxu1 %vm113_vm0, %v85_v17 }
  0x46   :  { %412 = vmatprep.mubr.f32.mxu0 %v1648_v0  ;;  %604 = vmatprep.mubr.f32.mxu1 %v1648_v0 }
  0x49   :  { %1386 = vmatmul.mubr.msk.f32.gmra.mrb[14].mxu0 %vm113_vm0, %v54_v16  ;;  %1418 = vmatmul.mubr.msk.f32.gmra.mrb[14].mxu1 %vm113_vm0, %v86_v19 }
  0x4a   :  { %418 = vmatprep.mubr.f32.mxu0 %v1648_v0  ;;  %610 = vmatprep.mubr.f32.mxu1 %v1648_v0 }
  0x4d   :  { %1387 = vmatmul.mubr.msk.f32.gmra.mrb[16].mxu0 %vm113_vm0, %v55_v18  ;;  %1419 = vmatmul.mubr.msk.f32.gmra.mrb[16].mxu1 %vm113_vm0, %v87_v21 }
  0x4e   :  { %424 = vmatprep.mubr.f32.mxu0 %v1648_v0  ;;  %616 = vmatprep.mubr.f32.mxu1 %v1648_v0 }
  0x51   :  { %1388 = vmatmul.mubr.msk.f32.gmra.mrb[18].mxu0 %vm113_vm0, %v56_v20  ;;  %1420 = vmatmul.mubr.msk.f32.gmra.mrb[18].mxu1 %vm113_vm0, %v88_v23 }
  0x52   :  { %430 = vmatprep.mubr.f32.mxu0 %v1648_v0  ;;  %622 = vmatprep.mubr.f32.mxu1 %v1648_v0 }
  0x55   :  { %1389 = vmatmul.mubr.msk.f32.gmra.mrb[20].mxu0 %vm113_vm0, %v57_v22  ;;  %1421 = vmatmul.mubr.msk.f32.gmra.mrb[20].mxu1 %vm113_vm0, %v89_v25 }
  0x56   :  { %436 = vmatprep.mubr.f32.mxu0 %v1648_v0  ;;  %628 = vmatprep.mubr.f32.mxu1 %v1648_v0 }
  0x59   :  { %1390 = vmatmul.mubr.msk.f32.gmra.mrb[22].mxu0 %vm113_vm0, %v58_v24  ;;  %1422 = vmatmul.mubr.msk.f32.gmra.mrb[22].mxu1 %vm113_vm0, %v90_v27 }
  0x5a   :  { %442 = vmatprep.mubr.f32.mxu0 %v1648_v0  ;;  %634 = vmatprep.mubr.f32.mxu1 %v1648_v0 }
  0x5d   :  { %1391 = vmatmul.mubr.msk.f32.gmra.mrb[24].mxu0 %vm113_vm0, %v59_v26  ;;  %1423 = vmatmul.mubr.msk.f32.gmra.mrb[24].mxu1 %vm113_vm0, %v91_v29 }
  0x5e   :  { %448 = vmatprep.mubr.f32.mxu0 %v1648_v0  ;;  %640 = vmatprep.mubr.f32.mxu1 %v1648_v0 }
  0x61   :  { %1392 = vmatmul.mubr.msk.f32.gmra.mrb[26].mxu0 %vm113_vm0, %v60_v28  ;;  %1424 = vmatmul.mubr.msk.f32.gmra.mrb[26].mxu1 %vm113_vm0, %v92_v31 }
  0x62   :  { %454 = vmatprep.mubr.f32.mxu0 %v1648_v0  ;;  %646 = vmatprep.mubr.f32.mxu1 %v1648_v0 }
  0x65   :  { %1393 = vmatmul.mubr.msk.f32.gmra.mrb[28].mxu0 %vm113_vm0, %v61_v30  ;;  %1425 = vmatmul.mubr.msk.f32.gmra.mrb[28].mxu1 %vm113_vm0, %v93_v33 }
  0x66   :  { %460 = vmatprep.mubr.f32.mxu0 %v1648_v0  ;;  %652 = vmatprep.mubr.f32.mxu1 %v1648_v0 }
  0x69   :  { %1394 = vmatmul.mubr.msk.f32.gmra.mrb[30].mxu0 %vm113_vm0, %v62_v32  ;;  %1426 = vmatmul.mubr.msk.f32.gmra.mrb[30].mxu1 %vm113_vm0, %v94_v35 }
  0x6a   :  { %466 = vmatprep.mubr.f32.mxu0 %v1648_v0  ;;  %658 = vmatprep.mubr.f32.mxu1 %v1648_v0 }
  0x6d   :  { %1395 = vmatmul.mubr.msk.f32.gmra.mrb[32].mxu0 %vm113_vm0, %v63_v34  ;;  %1427 = vmatmul.mubr.msk.f32.gmra.mrb[32].mxu1 %vm113_vm0, %v95_v37 }
  0x6e   :  { %472 = vmatprep.mubr.f32.mxu0 %v1648_v0  ;;  %664 = vmatprep.mubr.f32.mxu1 %v1648_v0 }
  0x71   :  { %1396 = vmatmul.mubr.msk.f32.gmra.mrb[34].mxu0 %vm113_vm0, %v64_v36  ;;  %1428 = vmatmul.mubr.msk.f32.gmra.mrb[34].mxu1 %vm113_vm0, %v96_v39 }
  0x72   :  { %478 = vmatprep.mubr.f32.mxu0 %v1648_v0  ;;  %670 = vmatprep.mubr.f32.mxu1 %v1648_v0 }
  0x75   :  { %1397 = vmatmul.mubr.msk.f32.gmra.mrb[36].mxu0 %vm113_vm0, %v65_v38  ;;  %1429 = vmatmul.mubr.msk.f32.gmra.mrb[36].mxu1 %vm113_vm0, %v97_v41 }
  0x76   :  { %484 = vmatprep.mubr.f32.mxu0 %v1648_v0  ;;  %676 = vmatprep.mubr.f32.mxu1 %v1648_v0 }
  0x79   :  { %1398 = vmatmul.mubr.msk.f32.gmra.mrb[38].mxu0 %vm113_vm0, %v66_v40  ;;  %1430 = vmatmul.mubr.msk.f32.gmra.mrb[38].mxu1 %vm113_vm0, %v98_v43 }
  0x7a   :  { %490 = vmatprep.mubr.f32.mxu0 %v1648_v0  ;;  %682 = vmatprep.mubr.f32.mxu1 %v1648_v0 }
  0x7d   :  { %1399 = vmatmul.mubr.msk.f32.gmra.mrb[40].mxu0 %vm113_vm0, %v67_v42  ;;  %1431 = vmatmul.mubr.msk.f32.gmra.mrb[40].mxu1 %vm113_vm0, %v99_v45 }
  0x7e   :  { %496 = vmatprep.mubr.f32.mxu0 %v1648_v0  ;;  %688 = vmatprep.mubr.f32.mxu1 %v1648_v0 }
  0x81   :  { %1400 = vmatmul.mubr.msk.f32.gmra.mrb[42].mxu0 %vm113_vm0, %v68_v44  ;;  %1432 = vmatmul.mubr.msk.f32.gmra.mrb[42].mxu1 %vm113_vm0, %v100_v47 }
  0x82   :  { %502 = vmatprep.mubr.f32.mxu0 %v1648_v0  ;;  %694 = vmatprep.mubr.f32.mxu1 %v1648_v0 }
  0x85   :  { %1401 = vmatmul.mubr.msk.f32.gmra.mrb[44].mxu0 %vm113_vm0, %v69_v46  ;;  %1433 = vmatmul.mubr.msk.f32.gmra.mrb[44].mxu1 %vm113_vm0, %v101_v49 }
  0x86   :  { %508 = vmatprep.mubr.f32.mxu0 %v1648_v0  ;;  %700 = vmatprep.mubr.f32.mxu1 %v1648_v0 }
  0x89   :  { %1402 = vmatmul.mubr.msk.f32.gmra.mrb[46].mxu0 %vm113_vm0, %v70_v48  ;;  %1434 = vmatmul.mubr.msk.f32.gmra.mrb[46].mxu1 %vm113_vm0, %v102_v51 }
  0x8a   :  { %514 = vmatprep.mubr.f32.mxu0 %v1648_v0  ;;  %706 = vmatprep.mubr.f32.mxu1 %v1648_v0 }
  0x8d   :  { %1403 = vmatmul.mubr.msk.f32.gmra.mrb[48].mxu0 %vm113_vm0, %v71_v50  ;;  %1435 = vmatmul.mubr.msk.f32.gmra.mrb[48].mxu1 %vm113_vm0, %v103_v53 }
  0x8e   :  { %520 = vmatprep.mubr.f32.mxu0 %v1648_v0  ;;  %712 = vmatprep.mubr.f32.mxu1 %v1648_v0 }
  0x91   :  { %1404 = vmatmul.mubr.msk.f32.gmra.mrb[50].mxu0 %vm113_vm0, %v72_v52  ;;  %1436 = vmatmul.mubr.msk.f32.gmra.mrb[50].mxu1 %vm113_vm0, %v104_v55 }
  0x92   :  { %526 = vmatprep.mubr.f32.mxu0 %v1648_v0  ;;  %718 = vmatprep.mubr.f32.mxu1 %v1648_v0 }
  0x95   :  { %1405 = vmatmul.mubr.msk.f32.gmra.mrb[52].mxu0 %vm113_vm0, %v73_v54  ;;  %1437 = vmatmul.mubr.msk.f32.gmra.mrb[52].mxu1 %vm113_vm0, %v105_v57 }
  0x96   :  { %532 = vmatprep.mubr.f32.mxu0 %v1648_v0  ;;  %724 = vmatprep.mubr.f32.mxu1 %v1648_v0 }
  0x99   :  { %1406 = vmatmul.mubr.msk.f32.gmra.mrb[54].mxu0 %vm113_vm0, %v74_v56  ;;  %1438 = vmatmul.mubr.msk.f32.gmra.mrb[54].mxu1 %vm113_vm0, %v106_v59 }
  0x9a   :  { %538 = vmatprep.mubr.f32.mxu0 %v1648_v0  ;;  %730 = vmatprep.mubr.f32.mxu1 %v1648_v0 }
  0x9d   :  { %1407 = vmatmul.mubr.msk.f32.gmra.mrb[56].mxu0 %vm113_vm0, %v75_v58  ;;  %1439 = vmatmul.mubr.msk.f32.gmra.mrb[56].mxu1 %vm113_vm0, %v107_v61 }
  0x9e   :  { %544 = vmatprep.mubr.f32.mxu0 %v1648_v0  ;;  %736 = vmatprep.mubr.f32.mxu1 %v1648_v0 }
  0xa1   :  { %1408 = vmatmul.mubr.msk.f32.gmra.mrb[58].mxu0 %vm113_vm0, %v76_v60  ;;  %1440 = vmatmul.mubr.msk.f32.gmra.mrb[58].mxu1 %vm113_vm0, %v108_v63 }
  0xa2   :  { %550 = vmatprep.mubr.f32.mxu0 %v1648_v0  ;;  %742 = vmatprep.mubr.f32.mxu1 %v1648_v0 }
  0xa5   :  { %1409 = vmatmul.mubr.msk.f32.gmra.mrb[60].mxu0 %vm113_vm0, %v77_v62  ;;  %1441 = vmatmul.mubr.msk.f32.gmra.mrb[60].mxu1 %vm113_vm0, %v109_v2 }
  0xa6   :  { %556 = vmatprep.mubr.f32.mxu0 %v1648_v0  ;;  %748 = vmatprep.mubr.f32.mxu1 %v1648_v0 }
  0xa9   :  { %1410 = vmatmul.mubr.msk.f32.gmra.mrb[62].mxu0 %vm113_vm0, %v78_v1  ;;  %1442 = vmatmul.mubr.msk.f32.gmra.mrb[62].mxu1 %vm113_vm0, %v110_v3 }
 0x100   :  { %v372_v4 = vpop.f32.mrb[0].mxu0  ;;  %v1850_v7 = vpop.f32.mrb[0].mxu1 }
 0x101   :  { %755 = vst [vmem:[#allocation7] sm:$0xff] %v372_v4  ;;  %v374_v5 = vpop.f32.mrb[1].mxu0  ;;  %v953_v8 = vmul.f32 %v372_v4, %v372_v4  ;;  %787 = vst [vmem:[#allocation7 + $0x100] sm:$0xff] %v1850_v7  ;;  %v1853_v12 = vpop.f32.mrb[1].mxu1 }
 0x102   :  { %819 = vst [vmem:[#allocation8] sm:$0xff] %v374_v5  ;;  %v1157_v0 = vmul.f32 %v374_v5, %v374_v5  ;;  %851 = vst [vmem:[#allocation8 + $0x100] sm:$0xff] %v1853_v12 }
 0x104   :  { %v378_v6 = vpop.f32.mrb[2].mxu0  ;;  %v1856_v18 = vpop.f32.mrb[2].mxu1 }
 0x105   :  { %756 = vst [vmem:[#allocation7 + $0x8] sm:$0xff] %v378_v6  ;;  %v883_v9 = vadd.f32 %v378_v6, %v372_v4  ;;  %v954_v10 = vmul.f32 %v378_v6, %v378_v6  ;;  %v380_v11 = vpop.f32.mrb[3].mxu0  ;;  %788 = vst [vmem:[#allocation7 + $0x108] sm:$0xff] %v1856_v18  ;;  %v1859_v22 = vpop.f32.mrb[3].mxu1 }
 0x106   :  { %820 = vst [vmem:[#allocation8 + $0x8] sm:$0xff] %v380_v11  ;;  %v1087_v13 = vadd.f32 %v380_v11, %v374_v5  ;;  %v1158_v14 = vmul.f32 %v380_v11, %v380_v11  ;;  %852 = vst [vmem:[#allocation8 + $0x108] sm:$0xff] %v1859_v22 }
 0x107   :  { %v1017_v15 = vadd.f32 %v954_v10, %v953_v8 }
 0x108   :  { %v1221_v16 = vadd.f32 %v1158_v14, %v1157_v0  ;;  %v384_v17 = vpop.f32.mrb[4].mxu0  ;;  %v1862_v28 = vpop.f32.mrb[4].mxu1 }
 0x109   :  { %757 = vst [vmem:[#allocation7 + $0x10] sm:$0xff] %v384_v17  ;;  %v884_v19 = vadd.f32 %v883_v9, %v384_v17  ;;  %v955_v20 = vmul.f32 %v384_v17, %v384_v17  ;;  %v386_v21 = vpop.f32.mrb[5].mxu0  ;;  %789 = vst [vmem:[#allocation7 + $0x110] sm:$0xff] %v1862_v28  ;;  %v1865_v32 = vpop.f32.mrb[5].mxu1 }
 0x10a   :  { %821 = vst [vmem:[#allocation8 + $0x10] sm:$0xff] %v386_v21  ;;  %v1088_v23 = vadd.f32 %v1087_v13, %v386_v21  ;;  %v1159_v24 = vmul.f32 %v386_v21, %v386_v21  ;;  %853 = vst [vmem:[#allocation8 + $0x110] sm:$0xff] %v1865_v32 }
 0x10b   :  { %v1018_v25 = vadd.f32 %v1017_v15, %v955_v20 }
 0x10c   :  { %v1222_v26 = vadd.f32 %v1221_v16, %v1159_v24  ;;  %v390_v27 = vpop.f32.mrb[6].mxu0  ;;  %v1868_v38 = vpop.f32.mrb[6].mxu1 }
 0x10d   :  { %758 = vst [vmem:[#allocation7 + $0x18] sm:$0xff] %v390_v27  ;;  %v885_v29 = vadd.f32 %v884_v19, %v390_v27  ;;  %v956_v30 = vmul.f32 %v390_v27, %v390_v27  ;;  %v392_v31 = vpop.f32.mrb[7].mxu0  ;;  %790 = vst [vmem:[#allocation7 + $0x118] sm:$0xff] %v1868_v38  ;;  %v1871_v42 = vpop.f32.mrb[7].mxu1 }
 0x10e   :  { %822 = vst [vmem:[#allocation8 + $0x18] sm:$0xff] %v392_v31  ;;  %v1089_v33 = vadd.f32 %v1088_v23, %v392_v31  ;;  %v1160_v34 = vmul.f32 %v392_v31, %v392_v31  ;;  %854 = vst [vmem:[#allocation8 + $0x118] sm:$0xff] %v1871_v42 }
 0x10f   :  { %v1019_v35 = vadd.f32 %v1018_v25, %v956_v30 }
 0x110   :  { %v1223_v36 = vadd.f32 %v1222_v26, %v1160_v34  ;;  %v396_v37 = vpop.f32.mrb[8].mxu0  ;;  %v1874_v48 = vpop.f32.mrb[8].mxu1 }
 0x111   :  { %759 = vst [vmem:[#allocation7 + $0x20] sm:$0xff] %v396_v37  ;;  %v886_v39 = vadd.f32 %v885_v29, %v396_v37  ;;  %v957_v40 = vmul.f32 %v396_v37, %v396_v37  ;;  %v398_v41 = vpop.f32.mrb[9].mxu0  ;;  %791 = vst [vmem:[#allocation7 + $0x120] sm:$0xff] %v1874_v48  ;;  %v1877_v52 = vpop.f32.mrb[9].mxu1 }
 0x112   :  { %823 = vst [vmem:[#allocation8 + $0x20] sm:$0xff] %v398_v41  ;;  %v1090_v43 = vadd.f32 %v1089_v33, %v398_v41  ;;  %v1161_v44 = vmul.f32 %v398_v41, %v398_v41  ;;  %855 = vst [vmem:[#allocation8 + $0x120] sm:$0xff] %v1877_v52 }
 0x113   :  { %v1020_v45 = vadd.f32 %v1019_v35, %v957_v40 }
 0x114   :  { %v1224_v46 = vadd.f32 %v1223_v36, %v1161_v44  ;;  %v402_v47 = vpop.f32.mrb[10].mxu0  ;;  %v1880_v58 = vpop.f32.mrb[10].mxu1 }
 0x115   :  { %760 = vst [vmem:[#allocation7 + $0x28] sm:$0xff] %v402_v47  ;;  %v887_v49 = vadd.f32 %v886_v39, %v402_v47  ;;  %v958_v50 = vmul.f32 %v402_v47, %v402_v47  ;;  %v404_v51 = vpop.f32.mrb[11].mxu0  ;;  %792 = vst [vmem:[#allocation7 + $0x128] sm:$0xff] %v1880_v58  ;;  %v1883_v62 = vpop.f32.mrb[11].mxu1 }
 0x116   :  { %824 = vst [vmem:[#allocation8 + $0x28] sm:$0xff] %v404_v51  ;;  %v1091_v53 = vadd.f32 %v1090_v43, %v404_v51  ;;  %v1162_v54 = vmul.f32 %v404_v51, %v404_v51  ;;  %856 = vst [vmem:[#allocation8 + $0x128] sm:$0xff] %v1883_v62 }
 0x117   :  { %v1021_v55 = vadd.f32 %v1020_v45, %v958_v50 }
 0x118   :  { %v1225_v56 = vadd.f32 %v1224_v46, %v1162_v54  ;;  %v408_v57 = vpop.f32.mrb[12].mxu0  ;;  %v1886_v5 = vpop.f32.mrb[12].mxu1 }
 0x119   :  { %761 = vst [vmem:[#allocation7 + $0x30] sm:$0xff] %v408_v57  ;;  %v888_v59 = vadd.f32 %v887_v49, %v408_v57  ;;  %v959_v60 = vmul.f32 %v408_v57, %v408_v57  ;;  %v410_v61 = vpop.f32.mrb[13].mxu0  ;;  %793 = vst [vmem:[#allocation7 + $0x130] sm:$0xff] %v1886_v5  ;;  %v1889_v10 = vpop.f32.mrb[13].mxu1 }
 0x11a   :  { %825 = vst [vmem:[#allocation8 + $0x30] sm:$0xff] %v410_v61  ;;  %v1092_v63 = vadd.f32 %v1091_v53, %v410_v61  ;;  %v1163_v1 = vmul.f32 %v410_v61, %v410_v61  ;;  %857 = vst [vmem:[#allocation8 + $0x130] sm:$0xff] %v1889_v10 }
 0x11b   :  { %v1022_v2 = vadd.f32 %v1021_v55, %v959_v60 }
 0x11c   :  { %v1226_v3 = vadd.f32 %v1225_v56, %v1163_v1  ;;  %v414_v4 = vpop.f32.mrb[14].mxu0  ;;  %v1892_v16 = vpop.f32.mrb[14].mxu1 }
 0x11d   :  { %762 = vst [vmem:[#allocation7 + $0x38] sm:$0xff] %v414_v4  ;;  %v889_v6 = vadd.f32 %v888_v59, %v414_v4  ;;  %v960_v8 = vmul.f32 %v414_v4, %v414_v4  ;;  %v416_v9 = vpop.f32.mrb[15].mxu0  ;;  %794 = vst [vmem:[#allocation7 + $0x138] sm:$0xff] %v1892_v16  ;;  %v1895_v21 = vpop.f32.mrb[15].mxu1 }
 0x11e   :  { %826 = vst [vmem:[#allocation8 + $0x38] sm:$0xff] %v416_v9  ;;  %v1093_v11 = vadd.f32 %v1092_v63, %v416_v9  ;;  %v1164_v0 = vmul.f32 %v416_v9, %v416_v9  ;;  %858 = vst [vmem:[#allocation8 + $0x138] sm:$0xff] %v1895_v21 }
 0x11f   :  { %v1023_v13 = vadd.f32 %v1022_v2, %v960_v8 }
 0x120   :  { %v1227_v14 = vadd.f32 %v1226_v3, %v1164_v0  ;;  %v420_v15 = vpop.f32.mrb[16].mxu0  ;;  %v1898_v29 = vpop.f32.mrb[16].mxu1 }
 0x121   :  { %763 = vst [vmem:[#allocation7 + $0x40] sm:$0xff] %v420_v15  ;;  %v890_v17 = vadd.f32 %v889_v6, %v420_v15  ;;  %v961_v19 = vmul.f32 %v420_v15, %v420_v15  ;;  %v422_v20 = vpop.f32.mrb[17].mxu0  ;;  %795 = vst [vmem:[#allocation7 + $0x140] sm:$0xff] %v1898_v29  ;;  %v1901_v34 = vpop.f32.mrb[17].mxu1 }
 0x122   :  { %827 = vst [vmem:[#allocation8 + $0x40] sm:$0xff] %v422_v20  ;;  %v1094_v23 = vadd.f32 %v1093_v11, %v422_v20  ;;  %v1165_v24 = vmul.f32 %v422_v20, %v422_v20  ;;  %859 = vst [vmem:[#allocation8 + $0x140] sm:$0xff] %v1901_v34 }
 0x123   :  { %v1024_v25 = vadd.f32 %v1023_v13, %v961_v19 }
 0x124   :  { %v1228_v26 = vadd.f32 %v1227_v14, %v1165_v24  ;;  %v426_v27 = vpop.f32.mrb[18].mxu0  ;;  %v1904_v41 = vpop.f32.mrb[18].mxu1 }
 0x125   :  { %764 = vst [vmem:[#allocation7 + $0x48] sm:$0xff] %v426_v27  ;;  %v891_v30 = vadd.f32 %v890_v17, %v426_v27  ;;  %v962_v31 = vmul.f32 %v426_v27, %v426_v27  ;;  %v428_v33 = vpop.f32.mrb[19].mxu0  ;;  %796 = vst [vmem:[#allocation7 + $0x148] sm:$0xff] %v1904_v41  ;;  %v1907_v46 = vpop.f32.mrb[19].mxu1 }
 0x126   :  { %828 = vst [vmem:[#allocation8 + $0x48] sm:$0xff] %v428_v33  ;;  %v1095_v35 = vadd.f32 %v1094_v23, %v428_v33  ;;  %v1166_v36 = vmul.f32 %v428_v33, %v428_v33  ;;  %860 = vst [vmem:[#allocation8 + $0x148] sm:$0xff] %v1907_v46 }
 0x127   :  { %v1025_v37 = vadd.f32 %v1024_v25, %v962_v31 }
 0x128   :  { %v1229_v39 = vadd.f32 %v1228_v26, %v1166_v36  ;;  %v432_v40 = vpop.f32.mrb[20].mxu0  ;;  %v1910_v54 = vpop.f32.mrb[20].mxu1 }
 0x129   :  { %765 = vst [vmem:[#allocation7 + $0x50] sm:$0xff] %v432_v40  ;;  %v892_v43 = vadd.f32 %v891_v30, %v432_v40  ;;  %v963_v44 = vmul.f32 %v432_v40, %v432_v40  ;;  %v434_v45 = vpop.f32.mrb[21].mxu0  ;;  %797 = vst [vmem:[#allocation7 + $0x150] sm:$0xff] %v1910_v54  ;;  %v1913_v59 = vpop.f32.mrb[21].mxu1 }
 0x12a   :  { %829 = vst [vmem:[#allocation8 + $0x50] sm:$0xff] %v434_v45  ;;  %v1096_v47 = vadd.f32 %v1095_v35, %v434_v45  ;;  %v1167_v49 = vmul.f32 %v434_v45, %v434_v45  ;;  %861 = vst [vmem:[#allocation8 + $0x150] sm:$0xff] %v1913_v59 }
 0x12b   :  { %v1026_v50 = vadd.f32 %v1025_v37, %v963_v44 }
 0x12c   :  { %v1230_v51 = vadd.f32 %v1229_v39, %v1167_v49  ;;  %v438_v53 = vpop.f32.mrb[22].mxu0  ;;  %v1916_v3 = vpop.f32.mrb[22].mxu1 }
 0x12d   :  { %766 = vst [vmem:[#allocation7 + $0x58] sm:$0xff] %v438_v53  ;;  %v893_v55 = vadd.f32 %v892_v43, %v438_v53  ;;  %v964_v56 = vmul.f32 %v438_v53, %v438_v53  ;;  %v440_v57 = vpop.f32.mrb[23].mxu0  ;;  %798 = vst [vmem:[#allocation7 + $0x158] sm:$0xff] %v1916_v3  ;;  %v1919_v9 = vpop.f32.mrb[23].mxu1 }
 0x12e   :  { %830 = vst [vmem:[#allocation8 + $0x58] sm:$0xff] %v440_v57  ;;  %v1097_v60 = vadd.f32 %v1096_v47, %v440_v57  ;;  %v1168_v61 = vmul.f32 %v440_v57, %v440_v57  ;;  %862 = vst [vmem:[#allocation8 + $0x158] sm:$0xff] %v1919_v9 }
 0x12f   :  { %v1027_v63 = vadd.f32 %v1026_v50, %v964_v56 }
 0x130   :  { %v1231_v1 = vadd.f32 %v1230_v51, %v1168_v61  ;;  %v444_v2 = vpop.f32.mrb[24].mxu0  ;;  %v1922_v17 = vpop.f32.mrb[24].mxu1 }
 0x131   :  { %767 = vst [vmem:[#allocation7 + $0x60] sm:$0xff] %v444_v2  ;;  %v894_v4 = vadd.f32 %v893_v55, %v444_v2  ;;  %v965_v6 = vmul.f32 %v444_v2, %v444_v2  ;;  %v446_v8 = vpop.f32.mrb[25].mxu0  ;;  %799 = vst [vmem:[#allocation7 + $0x160] sm:$0xff] %v1922_v17  ;;  %v1925_v24 = vpop.f32.mrb[25].mxu1 }
 0x132   :  { %831 = vst [vmem:[#allocation8 + $0x60] sm:$0xff] %v446_v8  ;;  %v1098_v11 = vadd.f32 %v1097_v60, %v446_v8  ;;  %v1169_v0 = vmul.f32 %v446_v8, %v446_v8  ;;  %863 = vst [vmem:[#allocation8 + $0x160] sm:$0xff] %v1925_v24 }
 0x133   :  { %v1028_v13 = vadd.f32 %v1027_v63, %v965_v6 }
 0x134   :  { %v1232_v14 = vadd.f32 %v1231_v1, %v1169_v0  ;;  %v450_v15 = vpop.f32.mrb[26].mxu0  ;;  %v1928_v33 = vpop.f32.mrb[26].mxu1 }
 0x135   :  { %768 = vst [vmem:[#allocation7 + $0x68] sm:$0xff] %v450_v15  ;;  %v895_v19 = vadd.f32 %v894_v4, %v450_v15  ;;  %v966_v20 = vmul.f32 %v450_v15, %v450_v15  ;;  %v452_v23 = vpop.f32.mrb[27].mxu0  ;;  %800 = vst [vmem:[#allocation7 + $0x168] sm:$0xff] %v1928_v33  ;;  %v1931_v39 = vpop.f32.mrb[27].mxu1 }
 0x136   :  { %832 = vst [vmem:[#allocation8 + $0x68] sm:$0xff] %v452_v23  ;;  %v1099_v25 = vadd.f32 %v1098_v11, %v452_v23  ;;  %v1170_v26 = vmul.f32 %v452_v23, %v452_v23  ;;  %864 = vst [vmem:[#allocation8 + $0x168] sm:$0xff] %v1931_v39 }
 0x137   :  { %v1029_v27 = vadd.f32 %v1028_v13, %v966_v20 }
 0x138   :  { %v1233_v30 = vadd.f32 %v1232_v14, %v1170_v26  ;;  %v456_v31 = vpop.f32.mrb[28].mxu0  ;;  %v1934_v49 = vpop.f32.mrb[28].mxu1 }
 0x139   :  { %769 = vst [vmem:[#allocation7 + $0x70] sm:$0xff] %v456_v31  ;;  %v896_v35 = vadd.f32 %v895_v19, %v456_v31  ;;  %v967_v36 = vmul.f32 %v456_v31, %v456_v31  ;;  %v458_v37 = vpop.f32.mrb[29].mxu0  ;;  %801 = vst [vmem:[#allocation7 + $0x170] sm:$0xff] %v1934_v49  ;;  %v1937_v55 = vpop.f32.mrb[29].mxu1 }
 0x13a   :  { %833 = vst [vmem:[#allocation8 + $0x70] sm:$0xff] %v458_v37  ;;  %v1100_v40 = vadd.f32 %v1099_v25, %v458_v37  ;;  %v1171_v43 = vmul.f32 %v458_v37, %v458_v37  ;;  %865 = vst [vmem:[#allocation8 + $0x170] sm:$0xff] %v1937_v55 }
 0x13b   :  { %v1030_v44 = vadd.f32 %v1029_v27, %v967_v36 }
 0x13c   :  { %v1234_v45 = vadd.f32 %v1233_v30, %v1171_v43  ;;  %v462_v47 = vpop.f32.mrb[30].mxu0  ;;  %v1940_v1 = vpop.f32.mrb[30].mxu1 }
 0x13d   :  { %770 = vst [vmem:[#allocation7 + $0x78] sm:$0xff] %v462_v47  ;;  %v897_v50 = vadd.f32 %v896_v35, %v462_v47  ;;  %v968_v51 = vmul.f32 %v462_v47, %v462_v47  ;;  %v464_v53 = vpop.f32.mrb[31].mxu0  ;;  %802 = vst [vmem:[#allocation7 + $0x178] sm:$0xff] %v1940_v1  ;;  %v1943_v8 = vpop.f32.mrb[31].mxu1 }
 0x13e   :  { %834 = vst [vmem:[#allocation8 + $0x78] sm:$0xff] %v464_v53  ;;  %v1101_v56 = vadd.f32 %v1100_v40, %v464_v53  ;;  %v1172_v57 = vmul.f32 %v464_v53, %v464_v53  ;;  %866 = vst [vmem:[#allocation8 + $0x178] sm:$0xff] %v1943_v8 }
 0x13f   :  { %v1031_v60 = vadd.f32 %v1030_v44, %v968_v51 }
 0x140   :  { %v1235_v61 = vadd.f32 %v1234_v45, %v1172_v57  ;;  %v468_v63 = vpop.f32.mrb[32].mxu0  ;;  %v1946_v19 = vpop.f32.mrb[32].mxu1 }
 0x141   :  { %771 = vst [vmem:[#allocation7 + $0x80] sm:$0xff] %v468_v63  ;;  %v898_v2 = vadd.f32 %v897_v50, %v468_v63  ;;  %v969_v4 = vmul.f32 %v468_v63, %v468_v63  ;;  %v470_v6 = vpop.f32.mrb[33].mxu0  ;;  %803 = vst [vmem:[#allocation7 + $0x180] sm:$0xff] %v1946_v19  ;;  %v1949_v26 = vpop.f32.mrb[33].mxu1 }
 0x142   :  { %835 = vst [vmem:[#allocation8 + $0x80] sm:$0xff] %v470_v6  ;;  %v1102_v11 = vadd.f32 %v1101_v56, %v470_v6  ;;  %v1173_v0 = vmul.f32 %v470_v6, %v470_v6  ;;  %867 = vst [vmem:[#allocation8 + $0x180] sm:$0xff] %v1949_v26 }
 0x143   :  { %v1032_v13 = vadd.f32 %v1031_v60, %v969_v4 }
 0x144   :  { %v1236_v14 = vadd.f32 %v1235_v61, %v1173_v0  ;;  %v474_v15 = vpop.f32.mrb[34].mxu0  ;;  %v1952_v37 = vpop.f32.mrb[34].mxu1 }
 0x145   :  { %772 = vst [vmem:[#allocation7 + $0x88] sm:$0xff] %v474_v15  ;;  %v899_v20 = vadd.f32 %v898_v2, %v474_v15  ;;  %v970_v23 = vmul.f32 %v474_v15, %v474_v15  ;;  %v476_v25 = vpop.f32.mrb[35].mxu0  ;;  %804 = vst [vmem:[#allocation7 + $0x188] sm:$0xff] %v1952_v37  ;;  %v1955_v45 = vpop.f32.mrb[35].mxu1 }
 0x146   :  { %836 = vst [vmem:[#allocation8 + $0x88] sm:$0xff] %v476_v25  ;;  %v1103_v27 = vadd.f32 %v1102_v11, %v476_v25  ;;  %v1174_v30 = vmul.f32 %v476_v25, %v476_v25  ;;  %868 = vst [vmem:[#allocation8 + $0x188] sm:$0xff] %v1955_v45 }
 0x147   :  { %v1033_v31 = vadd.f32 %v1032_v13, %v970_v23 }
 0x148   :  { %v1237_v35 = vadd.f32 %v1236_v14, %v1174_v30  ;;  %v480_v36 = vpop.f32.mrb[36].mxu0  ;;  %v1958_v57 = vpop.f32.mrb[36].mxu1 }
 0x149   :  { %773 = vst [vmem:[#allocation7 + $0x90] sm:$0xff] %v480_v36  ;;  %v900_v40 = vadd.f32 %v899_v20, %v480_v36  ;;  %v971_v43 = vmul.f32 %v480_v36, %v480_v36  ;;  %v482_v44 = vpop.f32.mrb[37].mxu0  ;;  %805 = vst [vmem:[#allocation7 + $0x190] sm:$0xff] %v1958_v57  ;;  %v1961_v2 = vpop.f32.mrb[37].mxu1 }
 0x14a   :  { %837 = vst [vmem:[#allocation8 + $0x90] sm:$0xff] %v482_v44  ;;  %v1104_v47 = vadd.f32 %v1103_v27, %v482_v44  ;;  %v1175_v50 = vmul.f32 %v482_v44, %v482_v44  ;;  %869 = vst [vmem:[#allocation8 + $0x190] sm:$0xff] %v1961_v2 }
 0x14b   :  { %v1034_v51 = vadd.f32 %v1033_v31, %v971_v43 }
 0x14c   :  { %v1238_v53 = vadd.f32 %v1237_v35, %v1175_v50  ;;  %v486_v56 = vpop.f32.mrb[38].mxu0  ;;  %v1964_v14 = vpop.f32.mrb[38].mxu1 }
 0x14d   :  { %774 = vst [vmem:[#allocation7 + $0x98] sm:$0xff] %v486_v56  ;;  %v901_v60 = vadd.f32 %v900_v40, %v486_v56  ;;  %v972_v61 = vmul.f32 %v486_v56, %v486_v56  ;;  %v488_v63 = vpop.f32.mrb[39].mxu0  ;;  %806 = vst [vmem:[#allocation7 + $0x198] sm:$0xff] %v1964_v14  ;;  %v1967_v25 = vpop.f32.mrb[39].mxu1 }
 0x14e   :  { %838 = vst [vmem:[#allocation8 + $0x98] sm:$0xff] %v488_v63  ;;  %v1105_v4 = vadd.f32 %v1104_v47, %v488_v63  ;;  %v1176_v6 = vmul.f32 %v488_v63, %v488_v63  ;;  %870 = vst [vmem:[#allocation8 + $0x198] sm:$0xff] %v1967_v25 }
 0x14f   :  { %v1035_v11 = vadd.f32 %v1034_v51, %v972_v61 }
 0x150   :  { %v1239_v0 = vadd.f32 %v1238_v53, %v1176_v6  ;;  %v492_v13 = vpop.f32.mrb[40].mxu0  ;;  %v1970_v40 = vpop.f32.mrb[40].mxu1 }
 0x151   :  { %775 = vst [vmem:[#allocation7 + $0xa0] sm:$0xff] %v492_v13  ;;  %v902_v15 = vadd.f32 %v901_v60, %v492_v13  ;;  %v973_v20 = vmul.f32 %v492_v13, %v492_v13  ;;  %v494_v23 = vpop.f32.mrb[41].mxu0  ;;  %807 = vst [vmem:[#allocation7 + $0x1a0] sm:$0xff] %v1970_v40  ;;  %v1973_v50 = vpop.f32.mrb[41].mxu1 }
 0x152   :  { %839 = vst [vmem:[#allocation8 + $0xa0] sm:$0xff] %v494_v23  ;;  %v1106_v27 = vadd.f32 %v1105_v4, %v494_v23  ;;  %v1177_v30 = vmul.f32 %v494_v23, %v494_v23  ;;  %871 = vst [vmem:[#allocation8 + $0x1a0] sm:$0xff] %v1973_v50 }
 0x153   :  { %v1036_v31 = vadd.f32 %v1035_v11, %v973_v20 }
 0x154   :  { %v1240_v35 = vadd.f32 %v1239_v0, %v1177_v30  ;;  %v498_v36 = vpop.f32.mrb[42].mxu0  ;;  %v1976_v63 = vpop.f32.mrb[42].mxu1 }
 0x155   :  { %776 = vst [vmem:[#allocation7 + $0xa8] sm:$0xff] %v498_v36  ;;  %v903_v43 = vadd.f32 %v902_v15, %v498_v36  ;;  %v974_v44 = vmul.f32 %v498_v36, %v498_v36  ;;  %v500_v47 = vpop.f32.mrb[43].mxu0  ;;  %808 = vst [vmem:[#allocation7 + $0x1a8] sm:$0xff] %v1976_v63  ;;  %v1979_v0 = vpop.f32.mrb[43].mxu1 }
 0x156   :  { %840 = vst [vmem:[#allocation8 + $0xa8] sm:$0xff] %v500_v47  ;;  %v1107_v51 = vadd.f32 %v1106_v27, %v500_v47  ;;  %v1178_v53 = vmul.f32 %v500_v47, %v500_v47  ;;  %872 = vst [vmem:[#allocation8 + $0x1a8] sm:$0xff] %v1979_v0 }
 0x157   :  { %v1037_v56 = vadd.f32 %v1036_v31, %v974_v44 }
 0x158   :  { %v1241_v60 = vadd.f32 %v1240_v35, %v1178_v53  ;;  %v504_v61 = vpop.f32.mrb[44].mxu0  ;;  %v1982_v30 = vpop.f32.mrb[44].mxu1 }
 0x159   :  { %777 = vst [vmem:[#allocation7 + $0xb0] sm:$0xff] %v504_v61  ;;  %v904_v4 = vadd.f32 %v903_v43, %v504_v61  ;;  %v975_v6 = vmul.f32 %v504_v61, %v504_v61  ;;  %v506_v11 = vpop.f32.mrb[45].mxu0  ;;  %809 = vst [vmem:[#allocation7 + $0x1b0] sm:$0xff] %v1982_v30  ;;  %v1985_v43 = vpop.f32.mrb[45].mxu1 }
 0x15a   :  { %841 = vst [vmem:[#allocation8 + $0xb0] sm:$0xff] %v506_v11  ;;  %v1108_v13 = vadd.f32 %v1107_v51, %v506_v11  ;;  %v1179_v15 = vmul.f32 %v506_v11, %v506_v11  ;;  %2384 = vst [vmem:[#allocation22_spill] sm:$0xff] %v1985_v43 }
 0x15b   :  { %v1038_v20 = vadd.f32 %v1037_v56, %v975_v6  ;;  %873 = vst [vmem:[#allocation8 + $0x1b0] sm:$0xff] %v1985_v43 }
 0x15c   :  { %v1242_v23 = vadd.f32 %v1241_v60, %v1179_v15  ;;  %v510_v27 = vpop.f32.mrb[46].mxu0  ;;  %v1988_v60 = vpop.f32.mrb[46].mxu1 }
 0x15d   :  { %778 = vst [vmem:[#allocation7 + $0xb8] sm:$0xff] %v510_v27  ;;  %v905_v31 = vadd.f32 %v904_v4, %v510_v27  ;;  %v976_v35 = vmul.f32 %v510_v27, %v510_v27  ;;  %v512_v36 = vpop.f32.mrb[47].mxu0  ;;  %2385 = vst [vmem:[#allocation23_spill] sm:$0xff] %v1988_v60  ;;  %v1991_v11 = vpop.f32.mrb[47].mxu1 }
 0x15e   :  { %842 = vst [vmem:[#allocation8 + $0xb8] sm:$0xff] %v512_v36  ;;  %v1109_v44 = vadd.f32 %v1108_v13, %v512_v36  ;;  %v1180_v47 = vmul.f32 %v512_v36, %v512_v36  ;;  %810 = vst [vmem:[#allocation7 + $0x1b8] sm:$0xff] %v1988_v60 }
 0x15f   :  { %v1039_v51 = vadd.f32 %v1038_v20, %v976_v35  ;;  %2386 = vst [vmem:[#allocation24_spill] sm:$0xff] %v1991_v11  ;;  %874 = vst [vmem:[#allocation8 + $0x1b8] sm:$0xff] %v1991_v11 }
 0x160   :  { %v1243_v53 = vadd.f32 %v1242_v23, %v1180_v47  ;;  %v516_v56 = vpop.f32.mrb[48].mxu0  ;;  %v1994_v23 = vpop.f32.mrb[48].mxu1 }
 0x161   :  { %779 = vst [vmem:[#allocation7 + $0xc0] sm:$0xff] %v516_v56  ;;  %v906_v61 = vadd.f32 %v905_v31, %v516_v56  ;;  %v977_v6 = vmul.f32 %v516_v56, %v516_v56  ;;  %v518_v4 = vpop.f32.mrb[49].mxu0  ;;  %2387 = vst [vmem:[#allocation25_spill] sm:$0xff] %v1994_v23  ;;  %v1997_v56 = vpop.f32.mrb[49].mxu1 }
 0x162   :  { %843 = vst [vmem:[#allocation8 + $0xc0] sm:$0xff] %v518_v4  ;;  %v1110_v15 = vadd.f32 %v1109_v44, %v518_v4  ;;  %v1181_v27 = vmul.f32 %v518_v4, %v518_v4  ;;  %811 = vst [vmem:[#allocation7 + $0x1c0] sm:$0xff] %v1994_v23 }
 0x163   :  { %v1040_v13 = vadd.f32 %v1039_v51, %v977_v6  ;;  %2388 = vst [vmem:[#allocation26_spill] sm:$0xff] %v1997_v56  ;;  %875 = vst [vmem:[#allocation8 + $0x1c0] sm:$0xff] %v1997_v56 }
 0x164   :  { %v1244_v36 = vadd.f32 %v1243_v53, %v1181_v27  ;;  %v522_v20 = vpop.f32.mrb[50].mxu0  ;;  %v2000_v53 = vpop.f32.mrb[50].mxu1 }
 0x165   :  { %780 = vst [vmem:[#allocation7 + $0xc8] sm:$0xff] %v522_v20  ;;  %v907_v35 = vadd.f32 %v906_v61, %v522_v20  ;;  %v978_v47 = vmul.f32 %v522_v20, %v522_v20  ;;  %v524_v31 = vpop.f32.mrb[51].mxu0  ;;  %2389 = vst [vmem:[#allocation27_spill] sm:$0xff] %v2000_v53  ;;  %v2003_v20 = vpop.f32.mrb[51].mxu1 }
 0x166   :  { %844 = vst [vmem:[#allocation8 + $0xc8] sm:$0xff] %v524_v31  ;;  %v1111_v60 = vadd.f32 %v1110_v15, %v524_v31  ;;  %v1182_v43 = vmul.f32 %v524_v31, %v524_v31  ;;  %812 = vst [vmem:[#allocation7 + $0x1c8] sm:$0xff] %v2000_v53 }
 0x167   :  { %v1041_v44 = vadd.f32 %v1040_v13, %v978_v47  ;;  %2390 = vst [vmem:[#allocation28_spill] sm:$0xff] %v2003_v20  ;;  %876 = vst [vmem:[#allocation8 + $0x1c8] sm:$0xff] %v2003_v20 }
 0x168   :  { %v1245_v4 = vadd.f32 %v1244_v36, %v1182_v43  ;;  %v528_v51 = vpop.f32.mrb[52].mxu0  ;;  %v2006_v43 = vpop.f32.mrb[52].mxu1 }
 0x169   :  { %781 = vst [vmem:[#allocation7 + $0xd0] sm:$0xff] %v528_v51  ;;  %v908_v6 = vadd.f32 %v907_v35, %v528_v51  ;;  %v979_v27 = vmul.f32 %v528_v51, %v528_v51  ;;  %v530_v61 = vpop.f32.mrb[53].mxu0  ;;  %2391 = vst [vmem:[#allocation29_spill] sm:$0xff] %v2006_v43  ;;  %v2009_v51 = vpop.f32.mrb[53].mxu1 }
 0x16a   :  { %845 = vst [vmem:[#allocation8 + $0xd0] sm:$0xff] %v530_v61  ;;  %v1112_v23 = vadd.f32 %v1111_v60, %v530_v61  ;;  %v1183_v11 = vmul.f32 %v530_v61, %v530_v61  ;;  %813 = vst [vmem:[#allocation7 + $0x1d0] sm:$0xff] %v2006_v43 }
 0x16b   :  { %v1042_v15 = vadd.f32 %v1041_v44, %v979_v27  ;;  %2392 = vst [vmem:[#allocation30_spill] sm:$0xff] %v2009_v51  ;;  %877 = vst [vmem:[#allocation8 + $0x1d0] sm:$0xff] %v2009_v51 }
 0x16c   :  { %v1246_v31 = vadd.f32 %v1245_v4, %v1183_v11  ;;  %v534_v13 = vpop.f32.mrb[54].mxu0  ;;  %v2012_v11 = vpop.f32.mrb[54].mxu1 }
 0x16d   :  { %782 = vst [vmem:[#allocation7 + $0xd8] sm:$0xff] %v534_v13  ;;  %v909_v36 = vadd.f32 %v908_v6, %v534_v13  ;;  %v980_v47 = vmul.f32 %v534_v13, %v534_v13  ;;  %v536_v35 = vpop.f32.mrb[55].mxu0  ;;  %2393 = vst [vmem:[#allocation31_spill] sm:$0xff] %v2012_v11  ;;  %v2015_v13 = vpop.f32.mrb[55].mxu1 }
 0x16e   :  { %846 = vst [vmem:[#allocation8 + $0xd8] sm:$0xff] %v536_v35  ;;  %v1113_v53 = vadd.f32 %v1112_v23, %v536_v35  ;;  %v1184_v56 = vmul.f32 %v536_v35, %v536_v35  ;;  %814 = vst [vmem:[#allocation7 + $0x1d8] sm:$0xff] %v2012_v11 }
 0x16f   :  { %v1043_v60 = vadd.f32 %v1042_v15, %v980_v47  ;;  %2394 = vst [vmem:[#allocation32_spill] sm:$0xff] %v2015_v13  ;;  %878 = vst [vmem:[#allocation8 + $0x1d8] sm:$0xff] %v2015_v13 }
 0x170   :  { %v1247_v61 = vadd.f32 %v1246_v31, %v1184_v56  ;;  %v540_v44 = vpop.f32.mrb[56].mxu0  ;;  %v2018_v56 = vpop.f32.mrb[56].mxu1 }
 0x171   :  { %783 = vst [vmem:[#allocation7 + $0xe0] sm:$0xff] %v540_v44  ;;  %v910_v4 = vadd.f32 %v909_v36, %v540_v44  ;;  %v981_v27 = vmul.f32 %v540_v44, %v540_v44  ;;  %v542_v6 = vpop.f32.mrb[57].mxu0  ;;  %2395 = vst [vmem:[#allocation33_spill] sm:$0xff] %v2018_v56  ;;  %v2021_v44 = vpop.f32.mrb[57].mxu1 }
 0x172   :  { %847 = vst [vmem:[#allocation8 + $0xe0] sm:$0xff] %v542_v6  ;;  %v1114_v43 = vadd.f32 %v1113_v53, %v542_v6  ;;  %v1185_v20 = vmul.f32 %v542_v6, %v542_v6  ;;  %815 = vst [vmem:[#allocation7 + $0x1e0] sm:$0xff] %v2018_v56 }
 0x173   :  { %v1044_v23 = vadd.f32 %v1043_v60, %v981_v27  ;;  %879 = vst [vmem:[#allocation8 + $0x1e0] sm:$0xff] %v2021_v44 }
 0x174   :  { %v1248_v35 = vadd.f32 %v1247_v61, %v1185_v20  ;;  %v546_v15 = vpop.f32.mrb[58].mxu0  ;;  %v2024_v20 = vpop.f32.mrb[58].mxu1 }
 0x175   :  { %784 = vst [vmem:[#allocation7 + $0xe8] sm:$0xff] %v546_v15  ;;  %v911_v31 = vadd.f32 %v910_v4, %v546_v15  ;;  %v982_v47 = vmul.f32 %v546_v15, %v546_v15  ;;  %v548_v36 = vpop.f32.mrb[59].mxu0  ;;  %816 = vst [vmem:[#allocation7 + $0x1e8] sm:$0xff] %v2024_v20  ;;  %v2027_v15 = vpop.f32.mrb[59].mxu1 }
 0x176   :  { %848 = vst [vmem:[#allocation8 + $0xe8] sm:$0xff] %v548_v36  ;;  %v1115_v11 = vadd.f32 %v1114_v43, %v548_v36  ;;  %v1186_v51 = vmul.f32 %v548_v36, %v548_v36  ;;  %880 = vst [vmem:[#allocation8 + $0x1e8] sm:$0xff] %v2027_v15 }
 0x177   :  { %v1045_v53 = vadd.f32 %v1044_v23, %v982_v47 }
 0x178   :  { %v1249_v6 = vadd.f32 %v1248_v35, %v1186_v51  ;;  %v552_v60 = vpop.f32.mrb[60].mxu0  ;;  %v2030_v51 = vpop.f32.mrb[60].mxu1 }
 0x179   :  { %785 = vst [vmem:[#allocation7 + $0xf0] sm:$0xff] %v552_v60  ;;  %v912_v61 = vadd.f32 %v911_v31, %v552_v60  ;;  %v983_v27 = vmul.f32 %v552_v60, %v552_v60  ;;  %v554_v4 = vpop.f32.mrb[61].mxu0  ;;  %817 = vst [vmem:[#allocation7 + $0x1f0] sm:$0xff] %v2030_v51  ;;  %v2033_v60 = vpop.f32.mrb[61].mxu1 }
 0x17a   :  { %849 = vst [vmem:[#allocation8 + $0xf0] sm:$0xff] %v554_v4  ;;  %v1116_v56 = vadd.f32 %v1115_v11, %v554_v4  ;;  %v1187_v13 = vmul.f32 %v554_v4, %v554_v4  ;;  %881 = vst [vmem:[#allocation8 + $0x1f0] sm:$0xff] %v2033_v60 }
 0x17b   :  { %v1046_v43 = vadd.f32 %v1045_v53, %v983_v27 }
 0x17c   :  { %v1250_v36 = vadd.f32 %v1249_v6, %v1187_v13  ;;  %v558_v23 = vpop.f32.mrb[62].mxu0  ;;  %v985_v13 = vmul.f32 %v1850_v7, %v1850_v7 }
 0x17d   :  { %786 = vst [vmem:[#allocation7 + $0xf8] sm:$0xff] %v558_v23  ;;  %v913_v35 = vadd.f32 %v912_v61, %v558_v23  ;;  %v984_v31 = vmul.f32 %v558_v23, %v558_v23  ;;  %v560_v47 = vpop.f32.mrb[63].mxu0  ;;  %v1189_v61 = vmul.f32 %v1853_v12, %v1853_v12  ;;  %v2044_v23 = vpop.f32.mrb[62].mxu1 }
 0x17e   :  { %850 = vst [vmem:[#allocation8 + $0xf8] sm:$0xff] %v560_v47  ;;  %v1117_v11 = vadd.f32 %v1116_v56, %v560_v47  ;;  %v1188_v4 = vmul.f32 %v560_v47, %v560_v47  ;;  %v986_v47 = vmul.f32 %v1856_v18, %v1856_v18  ;;  %818 = vst [vmem:[#allocation7 + $0x1f8] sm:$0xff] %v2044_v23 }
 0x17f   :  { %v914_v53 = vadd.f32 %v913_v35, %v1850_v7  ;;  %v1047_v6 = vadd.f32 %v1046_v43, %v984_v31  ;;  %v2052_v35 = vpop.f32.mrb[63].mxu1  ;;  %v1190_v31 = vmul.f32 %v1859_v22, %v1859_v22 }
 0x180   :  { %v1118_v27 = vadd.f32 %v1117_v11, %v1853_v12  ;;  %v1251_v56 = vadd.f32 %v1250_v36, %v1188_v4  ;;  %2396 = vst [vmem:[#allocation34_spill] sm:$0xff] %v2052_v35  ;;  %882 = vst [vmem:[#allocation8 + $0x1f8] sm:$0xff] %v2052_v35 }
 0x181   :  { %v915_v7 = vadd.f32 %v914_v53, %v1856_v18  ;;  %v1048_v43 = vadd.f32 %v1047_v6, %v985_v13 }
 0x182   :  { %v1119_v12 = vadd.f32 %v1118_v27, %v1859_v22  ;;  %v1252_v36 = vadd.f32 %v1251_v56, %v1189_v61 }
 0x183   :  { %1511 = shalt.err (!%p1508_p6)
}
 0x184   :  { %s1512_s9 = scalar_lea.hbm %s2352_s2, 8192 }
 0x185   :  { %p1513_p7 = scmp.ne.s32.totalorder %s2352_s2, %s1512_s9  ;;  %p1516_p8 = scmp.lt.u32.totalorder %s1512_s9, %s2352_s2 }
 0x187   :  { %p1518_p9 = pnand %p1516_p8, %p1513_p7 }
 0x189   :  { %1521 = shalt.err (!%p1518_p9)
}
 0x18a   :  { %1302 = dma.vmem_to_hbm [thread:$0]  %s2039_s26, 8192, %s2352_s2, [#allocation4], %s1645_s11, %s1645_s11, %s1646_s12   ;;  %v987_v18 = vmul.f32 %v1862_v28, %v1862_v28  ;;  %v916_v22 = vadd.f32 %v915_v7, %v1862_v28  ;;  %v1049_v11 = vadd.f32 %v1048_v43, %v986_v47 }
 0x18b   :  { %s1522_s18 = scalar_lea.vmem %s2046_s28, 8192  ;;  %p1527_p11 = scmp.lt.s32.totalorder %s2046_s28, %s2046_s28 }
 0x18c   :  { %p1523_p10 = scmp.ne.s32.totalorder %s2046_s28, %s1522_s18  ;;  %p1528_p12 = scmp.lt.s32.totalorder %s1522_s18, %s1522_s18 }
 0x18e   :  { %p1529_p13 = por %p1528_p12, %p1527_p11 }
 0x190   :  { %p1530_p0 = pnand %p1529_p13, %p1523_p10 }
 0x192   :  { %1533 = shalt.err (!%p1530_p0)
}
 0x193   :  { %s1534_s21 = scalar_lea.hbm %s2353_s3, 8192 }
 0x194   :  { %p1535_p1 = scmp.ne.s32.totalorder %s2353_s3, %s1534_s21  ;;  %p1538_p2 = scmp.lt.u32.totalorder %s1534_s21, %s2353_s3 }
 0x196   :  { %p1540_p3 = pnand %p1538_p2, %p1535_p1 }
 0x198   :  { %1543 = shalt.err (!%p1540_p3)
}
 0x199   :  { %1314 = dma.vmem_to_hbm [thread:$0]  %s2046_s28, 8192, %s2353_s3, [#allocation9], %s1645_s11, %s1645_s11, %s1646_s12   ;;  %v1191_v28 = vmul.f32 %v1865_v32, %v1865_v32  ;;  %v1120_v4 = vadd.f32 %v1119_v12, %v1865_v32  ;;  %v1253_v13 = vadd.f32 %v1252_v36, %v1190_v31  ;;  %v988_v53 = vmul.f32 %v1868_v38, %v1868_v38 }
 0x19a   :  { %v917_v6 = vadd.f32 %v916_v22, %v1868_v38  ;;  %v1050_v61 = vadd.f32 %v1049_v11, %v987_v18  ;;  %v1192_v27 = vmul.f32 %v1871_v42, %v1871_v42  ;;  %v989_v7 = vmul.f32 %v1874_v48, %v1874_v48  ;;  %s1651_s3 = smov [#allocation10]   ;;  %s1652_s12 = smov [#allocation11]  }
 0x19b   :  { %v1121_v56 = vadd.f32 %v1120_v4, %v1871_v42  ;;  %v1254_v47 = vadd.f32 %v1253_v13, %v1191_v28  ;;  %v1193_v32 = vmul.f32 %v1877_v52, %v1877_v52  ;;  %v990_v38 = vmul.f32 %v1880_v58, %v1880_v58  ;;  %s1321_s11 = sshll.u32 %s1651_s3, 4  ;;  %s1331_s1 = sshll.u32 %s1652_s12, 4  ;;  %s1322_s11 = int_to_ptr.vmem [resolvable:$true] %s1321_s11  ;;  %s2278_s1 = int_to_ptr.vmem [resolvable:$true] %s1331_s1 }
 0x19c   :  { %v918_v43 = vadd.f32 %v917_v6, %v1874_v48  ;;  %v1051_v35 = vadd.f32 %v1050_v61, %v988_v53  ;;  %v1194_v42 = vmul.f32 %v1883_v62, %v1883_v62  ;;  %v991_v48 = vmul.f32 %v1886_v5, %v1886_v5  ;;  %s1653_s26 = smov [#allocation13]   ;;  %s1654_s28 = smov [#allocation14]  }
 0x19d   :  { %v1122_v31 = vadd.f32 %v1121_v56, %v1877_v52  ;;  %v1255_v12 = vadd.f32 %v1254_v47, %v1192_v27  ;;  %v1195_v52 = vmul.f32 %v1889_v10, %v1889_v10  ;;  %s1341_s27 = sshll.u32 %s1653_s26, 4  ;;  %s1351_s29 = sshll.u32 %s1654_s28, 4  ;;  %s2280_s27 = int_to_ptr.vmem [resolvable:$true] %s1341_s27  ;;  %s2294_s29 = int_to_ptr.vmem [resolvable:$true] %s1351_s29 }
 0x19e   :  { %v919_v36 = vadd.f32 %v918_v43, %v1880_v58  ;;  %v1052_v18 = vadd.f32 %v1051_v35, %v989_v7  ;;  %v992_v58 = vmul.f32 %v1892_v16, %v1892_v16  ;;  %s1544_s30 = scalar_lea.vmem %s1322_s11, 16  ;;  %s1548_s8 = scalar_lea.vmem %s1322_s11, 32 }
 0x19f   :  { %v1123_v22 = vadd.f32 %v1122_v31, %v1883_v62  ;;  %v1256_v11 = vadd.f32 %v1255_v12, %v1193_v32  ;;  %v1196_v62 = vmul.f32 %v1895_v21, %v1895_v21  ;;  %p1545_p4 = scmp.ne.s32.totalorder %s1322_s11, %s1544_s30  ;;  %p1549_p5 = scmp.lt.s32.totalorder %s1322_s11, %s1322_s11 }
 0x1a0   :  { %v920_v28 = vadd.f32 %v919_v36, %v1886_v5  ;;  %v1053_v4 = vadd.f32 %v1052_v18, %v990_v38  ;;  %v993_v5 = vmul.f32 %v1898_v29, %v1898_v29  ;;  %p1550_p6 = scmp.lt.s32.totalorder %s1548_s8, %s1544_s30 }
 0x1a1   :  { %v1124_v13 = vadd.f32 %v1123_v22, %v1889_v10  ;;  %v1257_v53 = vadd.f32 %v1256_v11, %v1194_v42  ;;  %v1197_v10 = vmul.f32 %v1901_v34, %v1901_v34 }
 0x1a2   :  { %v921_v35 = vadd.f32 %v920_v28, %v1892_v16  ;;  %v1054_v6 = vadd.f32 %v1053_v4, %v991_v48  ;;  %v994_v16 = vmul.f32 %v1904_v41, %v1904_v41  ;;  %p1551_p7 = por %p1550_p6, %p1549_p5 }
 0x1a3   :  { %v1125_v61 = vadd.f32 %v1124_v13, %v1895_v21  ;;  %v1258_v27 = vadd.f32 %v1257_v53, %v1195_v52  ;;  %v1198_v21 = vmul.f32 %v1907_v46, %v1907_v46 }
 0x1a4   :  { %v1055_v56 = vadd.f32 %v1054_v6, %v992_v58  ;;  %v922_v47 = vadd.f32 %v921_v35, %v1898_v29  ;;  %v995_v29 = vmul.f32 %v1910_v54, %v1910_v54  ;;  %p1552_p8 = pnand %p1551_p7, %p1545_p4 }
 0x1a5   :  { %v1259_v7 = vadd.f32 %v1258_v27, %v1196_v62  ;;  %v1126_v43 = vadd.f32 %v1125_v61, %v1901_v34  ;;  %v1199_v34 = vmul.f32 %v1913_v59, %v1913_v59 }
 0x1a6   :  { %v923_v32 = vadd.f32 %v922_v47, %v1904_v41  ;;  %v1056_v31 = vadd.f32 %v1055_v56, %v993_v5  ;;  %v996_v41 = vmul.f32 %v1916_v3, %v1916_v3 }
 0x1a7   :  { %v1127_v12 = vadd.f32 %v1126_v43, %v1907_v46  ;;  %v1260_v38 = vadd.f32 %v1259_v7, %v1197_v10  ;;  %v1200_v46 = vmul.f32 %v1919_v9, %v1919_v9 }
 0x1a8   :  { %v924_v36 = vadd.f32 %v923_v32, %v1910_v54  ;;  %v1057_v18 = vadd.f32 %v1056_v31, %v994_v16  ;;  %v997_v54 = vmul.f32 %v1922_v17, %v1922_v17  ;;  %v1001_v32 = vmul.f32 %v1946_v19, %v1946_v19 }
 0x1a9   :  { %v1128_v42 = vadd.f32 %v1127_v12, %v1913_v59  ;;  %v1261_v22 = vadd.f32 %v1260_v38, %v1198_v21  ;;  %v1201_v59 = vmul.f32 %v1925_v24, %v1925_v24  ;;  %v1205_v21 = vmul.f32 %v1949_v26, %v1949_v26 }
 0x1aa   :  { %v925_v11 = vadd.f32 %v924_v36, %v1916_v3  ;;  %v1058_v48 = vadd.f32 %v1057_v18, %v995_v29  ;;  %v998_v3 = vmul.f32 %v1928_v33, %v1928_v33  ;;  %v1002_v29 = vmul.f32 %v1952_v37, %v1952_v37 }
 0x1ab   :  { %v1129_v28 = vadd.f32 %v1128_v42, %v1919_v9  ;;  %v1262_v4 = vadd.f32 %v1261_v22, %v1199_v34  ;;  %v1202_v9 = vmul.f32 %v1931_v39, %v1931_v39  ;;  %v1206_v18 = vmul.f32 %v1955_v45, %v1955_v45 }
 0x1ac   :  { %v926_v52 = vadd.f32 %v925_v11, %v1922_v17  ;;  %v1059_v13 = vadd.f32 %v1058_v48, %v996_v41  ;;  %v999_v17 = vmul.f32 %v1934_v49, %v1934_v49  ;;  %v1003_v42 = vmul.f32 %v1958_v57, %v1958_v57 }
 0x1ad   :  { %v1130_v53 = vadd.f32 %v1129_v28, %v1925_v24  ;;  %v1263_v58 = vadd.f32 %v1262_v4, %v1200_v46  ;;  %v1203_v24 = vmul.f32 %v1937_v55, %v1937_v55  ;;  %v1207_v41 = vmul.f32 %v1961_v2, %v1961_v2 }
 0x1ae   :  { %v927_v35 = vadd.f32 %v926_v52, %v1928_v33  ;;  %v1060_v6 = vadd.f32 %v1059_v13, %v997_v54  ;;  %v1000_v33 = vmul.f32 %v1940_v1, %v1940_v1  ;;  %v1004_v48 = vmul.f32 %v1964_v14, %v1964_v14 }
 0x1af   :  { %v1131_v62 = vadd.f32 %v1130_v53, %v1931_v39  ;;  %v1264_v61 = vadd.f32 %v1263_v58, %v1201_v59  ;;  %v1204_v39 = vmul.f32 %v1943_v8, %v1943_v8  ;;  %v1208_v28 = vmul.f32 %v1967_v25, %v1967_v25 }
 0x1b0   :  { %v928_v27 = vadd.f32 %v927_v35, %v1934_v49  ;;  %v1061_v5 = vadd.f32 %v1060_v6, %v998_v3  ;;  %v1005_v54 = vmul.f32 %v1970_v40, %v1970_v40  ;;  %v1209_v13 = vmul.f32 %v1973_v50, %v1973_v50 }
 0x1b1   :  { %v1132_v56 = vadd.f32 %v1131_v62, %v1937_v55  ;;  %v1265_v47 = vadd.f32 %v1264_v61, %v1202_v9  ;;  %v1006_v53 = vmul.f32 %v1976_v63, %v1976_v63  ;;  %v1210_v3 = vmul.f32 %v1979_v0, %v1979_v0 }
 0x1b2   :  { %v929_v10 = vadd.f32 %v928_v27, %v1940_v1  ;;  %v1062_v7 = vadd.f32 %v1061_v5, %v999_v17  ;;  %v1007_v6 = vmul.f32 %v1982_v30, %v1982_v30 }
 0x1b3   :  { %v1133_v43 = vadd.f32 %v1132_v56, %v1943_v8  ;;  %v1266_v16 = vadd.f32 %v1265_v47, %v1203_v24 }
 0x1b4   :  { %v930_v49 = vadd.f32 %v929_v10, %v1946_v19  ;;  %v1063_v31 = vadd.f32 %v1062_v7, %v1000_v33 }
 0x1b5   :  { %v1134_v55 = vadd.f32 %v1133_v43, %v1949_v26  ;;  %v1267_v12 = vadd.f32 %v1266_v16, %v1204_v39  ;;  %v2401_v43 = vld [vmem:[#allocation26_spill] sm:$0xff] }
 0x1b6   :  { %v1064_v1 = vadd.f32 %v1063_v31, %v1001_v32  ;;  %v931_v38 = vadd.f32 %v930_v49, %v1952_v37  ;;  %v1213_v49 = vmul.f32 %v2401_v43, %v2401_v43  ;;  %v2402_v31 = vld [vmem:[#allocation27_spill] sm:$0xff] }
 0x1b7   :  { %v1268_v8 = vadd.f32 %v1267_v12, %v1205_v21  ;;  %v1135_v36 = vadd.f32 %v1134_v55, %v1955_v45  ;;  %v1010_v21 = vmul.f32 %v2402_v31, %v2402_v31 }
 0x1b8   :  { %v1065_v19 = vadd.f32 %v1064_v1, %v1002_v29  ;;  %v932_v34 = vadd.f32 %v931_v38, %v1958_v57  ;;  %v2403_v1 = vld [vmem:[#allocation28_spill] sm:$0xff] }
 0x1b9   :  { %v1269_v26 = vadd.f32 %v1268_v8, %v1206_v18  ;;  %v1136_v22 = vadd.f32 %v1135_v36, %v1961_v2  ;;  %v1214_v29 = vmul.f32 %v2403_v1, %v2403_v1  ;;  %v2404_v36 = vld [vmem:[#allocation29_spill] sm:$0xff] }
 0x1ba   :  { %v1066_v11 = vadd.f32 %v1065_v19, %v1003_v42  ;;  %v933_v37 = vadd.f32 %v932_v34, %v1964_v14  ;;  %v1011_v19 = vmul.f32 %v2404_v36, %v2404_v36  ;;  %v2405_v42 = vld [vmem:[#allocation30_spill] sm:$0xff] }
 0x1bb   :  { %v1270_v46 = vadd.f32 %v1269_v26, %v1207_v41  ;;  %v1137_v45 = vadd.f32 %v1136_v22, %v1967_v25  ;;  %v1215_v22 = vmul.f32 %v2405_v42, %v2405_v42 }
 0x1bc   :  { %v1067_v4 = vadd.f32 %v1066_v11, %v1004_v48  ;;  %v934_v57 = vadd.f32 %v933_v37, %v1970_v40  ;;  %v2406_v11 = vld [vmem:[#allocation31_spill] sm:$0xff] }
 0x1bd   :  { %v1271_v52 = vadd.f32 %v1270_v46, %v1208_v28  ;;  %v1138_v2 = vadd.f32 %v1137_v45, %v1973_v50  ;;  %v2397_v50 = vld [vmem:[#allocation22_spill] sm:$0xff]  ;;  %v1012_v48 = vmul.f32 %v2406_v11, %v2406_v11  ;;  %v2407_v45 = vld [vmem:[#allocation32_spill] sm:$0xff] }
 0x1be   :  { %v1068_v59 = vadd.f32 %v1067_v4, %v1005_v54  ;;  %v935_v14 = vadd.f32 %v934_v57, %v1976_v63  ;;  %v1211_v61 = vmul.f32 %v2397_v50, %v2397_v50  ;;  %v2398_v63 = vld [vmem:[#allocation23_spill] sm:$0xff]  ;;  %v1216_v4 = vmul.f32 %v2407_v45, %v2407_v45  ;;  %v2408_v54 = vld [vmem:[#allocation33_spill] sm:$0xff] }
 0x1bf   :  { %v1272_v58 = vadd.f32 %v1271_v52, %v1209_v13  ;;  %v1139_v25 = vadd.f32 %v1138_v2, %v1979_v0  ;;  %v1008_v5 = vmul.f32 %v2398_v63, %v2398_v63  ;;  %v2399_v0 = vld [vmem:[#allocation24_spill] sm:$0xff]  ;;  %v1013_v2 = vmul.f32 %v2408_v54, %v2408_v54 }
 0x1c0   :  { %v1069_v35 = vadd.f32 %v1068_v59, %v1006_v53  ;;  %v936_v40 = vadd.f32 %v935_v14, %v1982_v30  ;;  %v1212_v47 = vmul.f32 %v2399_v0, %v2399_v0  ;;  %v2400_v30 = vld [vmem:[#allocation25_spill] sm:$0xff]  ;;  %v1217_v14 = vmul.f32 %v2021_v44, %v2021_v44 }
 0x1c1   :  { %v1273_v9 = vadd.f32 %v1272_v58, %v1210_v3  ;;  %v1140_v62 = vadd.f32 %v1139_v25, %v2397_v50  ;;  %v1009_v7 = vmul.f32 %v2400_v30, %v2400_v30  ;;  %v1014_v25 = vmul.f32 %v2024_v20, %v2024_v20 }
 0x1c2   :  { %v1070_v17 = vadd.f32 %v1069_v35, %v1007_v6  ;;  %v937_v27 = vadd.f32 %v936_v40, %v2398_v63  ;;  %v1218_v40 = vmul.f32 %v2027_v15, %v2027_v15  ;;  %v1015_v50 = vmul.f32 %v2030_v51, %v2030_v51 }
 0x1c3   :  { %v1274_v24 = vadd.f32 %v1273_v9, %v1211_v61  ;;  %v1141_v56 = vadd.f32 %v1140_v62, %v2399_v0 }
 0x1c4   :  { %v1071_v33 = vadd.f32 %v1070_v17, %v1008_v5  ;;  %v938_v10 = vadd.f32 %v937_v27, %v2400_v30  ;;  %v2409_v17 = vld [vmem:[#allocation34_spill] sm:$0xff] }
 0x1c5   :  { %v1275_v39 = vadd.f32 %v1274_v24, %v1212_v47  ;;  %v1142_v16 = vadd.f32 %v1141_v56, %v2401_v43  ;;  %v1220_v63 = vmul.f32 %v2409_v17, %v2409_v17 }
 0x1c6   :  { %v1072_v32 = vadd.f32 %v1071_v33, %v1009_v7  ;;  %v939_v55 = vadd.f32 %v938_v10, %v2402_v31 }
 0x1c7   :  { %v1276_v12 = vadd.f32 %v1275_v39, %v1213_v49  ;;  %v1143_v38 = vadd.f32 %v1142_v16, %v2403_v1 }
 0x1c8   :  { %v1073_v8 = vadd.f32 %v1072_v32, %v1010_v21  ;;  %v940_v18 = vadd.f32 %v939_v55, %v2404_v36 }
 0x1c9   :  { %v1277_v34 = vadd.f32 %v1276_v12, %v1214_v29  ;;  %v1144_v26 = vadd.f32 %v1143_v38, %v2405_v42 }
 0x1ca   :  { %v1074_v41 = vadd.f32 %v1073_v8, %v1011_v19  ;;  %v941_v37 = vadd.f32 %v940_v18, %v2406_v11 }
 0x1cb   :  { %v1278_v46 = vadd.f32 %v1277_v34, %v1215_v22  ;;  %v1145_v28 = vadd.f32 %v1144_v26, %v2407_v45 }
 0x1cc   :  { %v1075_v57 = vadd.f32 %v1074_v41, %v1012_v48  ;;  %v942_v52 = vadd.f32 %v941_v37, %v2408_v54 }
 0x1cd   :  { %v1279_v13 = vadd.f32 %v1278_v46, %v1216_v4  ;;  %v1146_v59 = vadd.f32 %v1145_v28, %v2021_v44  ;;  %v1016_v44 = vmul.f32 %v2044_v23, %v2044_v23 }
 0x1ce   :  { %v1076_v53 = vadd.f32 %v1075_v57, %v1013_v2  ;;  %v943_v58 = vadd.f32 %v942_v52, %v2024_v20  ;;  %v1219_v20 = vmul.f32 %v2033_v60, %v2033_v60 }
 0x1cf   :  { %v1280_v3 = vadd.f32 %v1279_v13, %v1217_v14  ;;  %v1147_v35 = vadd.f32 %v1146_v59, %v2027_v15 }
 0x1d0   :  { %v1077_v6 = vadd.f32 %v1076_v53, %v1014_v25  ;;  %v944_v9 = vadd.f32 %v943_v58, %v2030_v51 }
 0x1d1   :  { %v1281_v62 = vadd.f32 %v1280_v3, %v1218_v40  ;;  %v1148_v61 = vadd.f32 %v1147_v35, %v2033_v60 }
 0x1d2   :  { %v1078_v27 = vadd.f32 %v1077_v6, %v1015_v50  ;;  %v945_v15 = vadd.f32 %v944_v9, %v2044_v23 }
 0x1d3   :  { %v1282_v5 = vadd.f32 %v1281_v62, %v1219_v20  ;;  %v1149_v24 = vadd.f32 %v1148_v61, %v2409_v17 }
 0x1d4   :  { %v946_v0 = vrot.slane %v945_v15, 4  ;;  %v1079_v51 = vadd.f32 %v1078_v27, %v1016_v44 }
 0x1d5   :  { %v1150_v56 = vrot.slane %v1149_v24, 4  ;;  %v1283_v47 = vadd.f32 %v1282_v5, %v1220_v63 }
 0x1d6   :  { %v947_v33 = vadd.f32 %v946_v0, %v945_v15  ;;  %v1080_v30 = vrot.slane %v1079_v51, 4 }
 0x1d7   :  { %v1151_v10 = vadd.f32 %v1150_v56, %v1149_v24  ;;  %v1284_v7 = vrot.slane %v1283_v47, 4 }
 0x1d8   :  { %v948_v39 = vrot.slane %v947_v33, 2  ;;  %v1081_v43 = vadd.f32 %v1080_v30, %v1079_v51 }
 0x1d9   :  { %v1152_v60 = vrot.slane %v1151_v10, 2  ;;  %v1285_v16 = vadd.f32 %v1284_v7, %v1283_v47 }
 0x1da   :  { %v1082_v49 = vrot.slane %v1081_v43, 2  ;;  %v949_v32 = vadd.f32 %v948_v39, %v947_v33 }
 0x1db   :  { %v1153_v31 = vadd.f32 %v1152_v60, %v1151_v10  ;;  %v1286_v23 = vrot.slane %v1285_v16, 2 }
 0x1dc   :  { %v1083_v55 = vadd.f32 %v1082_v49, %v1081_v43  ;;  %v950_v21 = vrot.slane %v949_v32, 1 }
 0x1dd   :  { %v1154_v12 = vrot.slane %v1153_v31, 1  ;;  %v1287_v1 = vadd.f32 %v1286_v23, %v1285_v16 }
 0x1de   :  { %v1084_v38 = vrot.slane %v1083_v55, 1  ;;  %v951_v29 = vadd.f32 %v950_v21, %v949_v32 }
 0x1df   :  { %v1155_v8 = vadd.f32 %v1154_v12, %v1153_v31  ;;  %v1288_v36 = vrot.slane %v1287_v1, 1 }
 0x1e0   :  { %v1085_v18 = vadd.f32 %v1084_v38, %v1083_v55  ;;  %952 = vst [vmem:[#allocation10] sm:$0x1] %v951_v29 }
 0x1e1   :  { %1555 = shalt.err (!%p1552_p8)
}
 0x1e2   :  { %s1556_s13 = scalar_lea.hbm %s2354_s4, 16 }
 0x1e3   :  { %p1557_p9 = scmp.ne.s32.totalorder %s2354_s4, %s1556_s13  ;;  %p1560_p10 = scmp.lt.u32.totalorder %s1556_s13, %s2354_s4 }
 0x1e5   :  { %p1562_p11 = pnand %p1560_p10, %p1557_p9 }
 0x1e7   :  { %1565 = shalt.err (!%p1562_p11)
}
 0x1e8   :  { %1324 = dma.vmem_to_hbm [thread:$0]  %s1322_s11, 16, %s2354_s4, [#allocation9]   ;;  %1156 = vst [vmem:[#allocation13] sm:$0x1] %v1155_v8  ;;  %v1289_v19 = vadd.f32 %v1288_v36, %v1287_v1  ;;  %1086 = vst [vmem:[#allocation11] sm:$0x1] %v1085_v18 }
 0x1e9   :  { %s1566_s20 = scalar_lea.vmem %s2278_s1, 16  ;;  %s1570_s21 = scalar_lea.vmem %s2278_s1, 32 }
 0x1ea   :  { %p1567_p12 = scmp.ne.s32.totalorder %s2278_s1, %s1566_s20  ;;  %p1571_p13 = scmp.lt.s32.totalorder %s2278_s1, %s2278_s1 }
 0x1eb   :  { %p1572_p0 = scmp.lt.s32.totalorder %s1570_s21, %s1566_s20 }
 0x1ed   :  { %p1573_p1 = por %p1572_p0, %p1571_p13 }
 0x1ef   :  { %p1574_p2 = pnand %p1573_p1, %p1567_p12 }
 0x1f1   :  { %1577 = shalt.err (!%p1574_p2)
}
 0x1f2   :  { %s1578_s23 = scalar_lea.hbm %s2355_s5, 16 }
 0x1f3   :  { %p1579_p3 = scmp.ne.s32.totalorder %s2355_s5, %s1578_s23  ;;  %p1582_p4 = scmp.lt.u32.totalorder %s1578_s23, %s2355_s5 }
 0x1f5   :  { %p1584_p5 = pnand %p1582_p4, %p1579_p3 }
 0x1f7   :  { %1587 = shalt.err (!%p1584_p5)
}
 0x1f8   :  { %1334 = dma.vmem_to_hbm [thread:$0]  %s2278_s1, 16, %s2355_s5, [#allocation12]   ;;  %1290 = vst [vmem:[#allocation14] sm:$0x1] %v1289_v19 }
 0x1f9   :  { %s1588_s12 = scalar_lea.vmem %s2280_s27, 16  ;;  %s1592_s26 = scalar_lea.vmem %s2280_s27, 32 }
 0x1fa   :  { %p1589_p6 = scmp.ne.s32.totalorder %s2280_s27, %s1588_s12  ;;  %p1593_p7 = scmp.lt.s32.totalorder %s2280_s27, %s2280_s27 }
 0x1fb   :  { %p1594_p8 = scmp.lt.s32.totalorder %s1592_s26, %s1588_s12 }
 0x1fd   :  { %p1595_p9 = por %p1594_p8, %p1593_p7 }
 0x1ff   :  { %p1596_p10 = pnand %p1595_p9, %p1589_p6 }
 0x201   :  { %1599 = shalt.err (!%p1596_p10)
}
 0x202   :  { %s1600_s8 = scalar_lea.hbm %s2356_s6, 16 }
 0x203   :  { %p1601_p11 = scmp.ne.s32.totalorder %s2356_s6, %s1600_s8  ;;  %p1604_p12 = scmp.lt.u32.totalorder %s1600_s8, %s2356_s6 }
 0x205   :  { %p1606_p13 = pnand %p1604_p12, %p1601_p11 }
 0x207   :  { %1609 = shalt.err (!%p1606_p13)
}
 0x208   :  { %1344 = dma.vmem_to_hbm [thread:$0]  %s2280_s27, 16, %s2356_s6, [#allocation12]  }
 0x209   :  { %s1610_s15 = scalar_lea.vmem %s2294_s29, 16  ;;  %s1614_s16 = scalar_lea.vmem %s2294_s29, 32 }
 0x20a   :  { %p1611_p0 = scmp.ne.s32.totalorder %s2294_s29, %s1610_s15  ;;  %p1615_p1 = scmp.lt.s32.totalorder %s2294_s29, %s2294_s29 }
 0x20b   :  { %p1616_p2 = scmp.lt.s32.totalorder %s1614_s16, %s1610_s15 }
 0x20d   :  { %p1617_p3 = por %p1616_p2, %p1615_p1 }
 0x20f   :  { %p1618_p4 = pnand %p1617_p3, %p1611_p0 }
 0x211   :  { %1621 = shalt.err (!%p1618_p4)
}
 0x212   :  { %s1622_s19 = scalar_lea.hbm %s2357_s7, 16 }
 0x213   :  { %p1623_p5 = scmp.ne.s32.totalorder %s2357_s7, %s1622_s19  ;;  %p1626_p6 = scmp.lt.u32.totalorder %s1622_s19, %s2357_s7 }
 0x215   :  { %p1628_p7 = pnand %p1626_p6, %p1623_p5 }
 0x217   :  { %1631 = shalt.err (!%p1628_p7)
}
 0x218   :  { %1354 = dma.vmem_to_hbm [thread:$0]  %s2294_s29, 16, %s2357_s7, [#allocation15]  }
 0x219   :  { %1636 = dma.done.wait [#allocation4], 8192  }
 0x21a   :  { %1637 = vsyncadd [#allocation4], 4294959104 }
 0x21b   :  { %1638 = dma.done.wait [#allocation9], 8208  }
 0x21c   :  { %1639 = vsyncadd [#allocation9], 4294959088 }
 0x21d   :  { %1640 = dma.done.wait [#allocation12], 32  }
 0x21e   :  { %1641 = vsyncadd [#allocation12], 4294967264 }
 0x21f   :  { %1642 = dma.done.wait [#allocation15], 16  }
 0x220   :  { %1643 = vsyncadd [#allocation15], 4294967280 }
 0x221   :  { %1373 = vsyncpa [#allocation3], 1 }
 0x222   :  { %1374 = vsyncpa [#allocation6], 1 }
 0x223   :  { %1375 = vsyncpa [#allocation4], 1 }
 0x224   :  { %1376 = vsyncpa [#allocation9], 1 }
 0x225   :  { %1377 = vsyncpa [#allocation12], 1 }
 0x226   :  { %1378 = vsyncpa [#allocation15], 1 }

// kernel: resnext_block_forward.6
= control target key start
LH: loop header
LB: loop body
LE: loop exit
PB: predicated region body
PF: predicated region fallthrough
CT: control target
= control target key end

     0   :  { %12 = vsyncpa [#allocation3], 0  ;;  %s2079_s0 = inlined_call_operand.hbm [shape: f32[512,128], index: 0, kind: input, shape index: {}]   ;;  %s2080_s1 = inlined_call_operand.hbm [shape: f32[128,128], index: 1, kind: input, shape index: {}]   ;;  %s2081_s2 = inlined_call_operand.hbm [shape: f32[1,128], index: 2, kind: input, shape index: {}]   ;;  %s2082_s3 = inlined_call_operand.hbm [shape: f32[1,128], index: 3, kind: input, shape index: {}]   ;;  %s2083_s4 = inlined_call_operand.hbm [shape: f32[512,128], index: 4, kind: output, shape index: {0}]   ;;  %s2084_s5 = inlined_call_operand.hbm [shape: f32[1,1,128], index: 5, kind: output, shape index: {1}]   ;;  %s2085_s6 = inlined_call_operand.hbm [shape: f32[1,1,128], index: 6, kind: output, shape index: {2}]  }
   0x1   :  { %13 = vsyncpa [#allocation6], 0 }
   0x2   :  { %14 = vsyncpa [#allocation9], 0 }
   0x3   :  { %15 = vsyncpa [#allocation4], 0 }
   0x4   :  { %16 = vsyncpa [#allocation12], 0  ;;  %s1489_s21 = smov [#allocation5]   ;;  %s1490_s23 = smov [#allocation2]  }
   0x5   :  { %s34_s22 = sshll.u32 %s1489_s21, 4  ;;  %s22_s24 = sshll.u32 %s1490_s23, 4  ;;  %s35_s22 = int_to_ptr.vmem [resolvable:$true] %s34_s22  ;;  %s1533_s24 = int_to_ptr.vmem [resolvable:$true] %s22_s24 }
   0x6   :  { %s1325_s27 = scalar_lea.hbm %s2080_s1, 2048 }
   0x7   :  { %p1326_p0 = scmp.ne.s32.totalorder %s2080_s1, %s1325_s27  ;;  %p1329_p1 = scmp.lt.u32.totalorder %s1325_s27, %s2080_s1 }
   0x9   :  { %p1331_p2 = pnand %p1329_p1, %p1326_p0 }
   0xb   :  { %1334 = shalt.err (!%p1331_p2)
}
   0xc   :  { %s1335_s8 = scalar_lea.vmem %s35_s22, 2048  ;;  %p1340_p4 = scmp.lt.s32.totalorder %s35_s22, %s35_s22 }
   0xd   :  { %p1336_p3 = scmp.ne.s32.totalorder %s35_s22, %s1335_s8  ;;  %p1341_p5 = scmp.lt.s32.totalorder %s1335_s8, %s1335_s8 }
   0xf   :  { %p1342_p6 = por %p1341_p5, %p1340_p4 }
  0x11   :  { %p1343_p7 = pnand %p1342_p6, %p1336_p3 }
  0x13   :  { %1346 = shalt.err (!%p1343_p7)
}
  0x14   :  { %s1491_s9 = smov 128   ;;  %s1492_s10 = smov 8  }
  0x15   :  { %40 = dma.hbm_to_vmem [thread:$0]  %s2080_s1, 2048, %s35_s22, [#allocation6], %s1491_s9, %s1491_s9, %s1492_s10  }
  0x16   :  { %s1347_s15 = scalar_lea.hbm %s2079_s0, 8192 }
  0x17   :  { %p1348_p8 = scmp.ne.s32.totalorder %s2079_s0, %s1347_s15  ;;  %p1351_p9 = scmp.lt.u32.totalorder %s1347_s15, %s2079_s0 }
  0x19   :  { %p1353_p10 = pnand %p1351_p9, %p1348_p8 }
  0x1b   :  { %1356 = shalt.err (!%p1353_p10)
}
  0x1c   :  { %s1357_s20 = scalar_lea.vmem %s1533_s24, 8192  ;;  %p1362_p12 = scmp.lt.s32.totalorder %s1533_s24, %s1533_s24 }
  0x1d   :  { %p1358_p11 = scmp.ne.s32.totalorder %s1533_s24, %s1357_s20  ;;  %p1363_p13 = scmp.lt.s32.totalorder %s1357_s20, %s1357_s20 }
  0x1f   :  { %p1364_p0 = por %p1363_p13, %p1362_p12 }
  0x21   :  { %p1365_p1 = pnand %p1364_p0, %p1358_p11 }
  0x23   :  { %1368 = shalt.err (!%p1365_p1)
}
  0x24   :  { %28 = dma.hbm_to_vmem [thread:$0]  %s2079_s0, 8192, %s1533_s24, [#allocation3], %s1491_s9, %s1491_s9, %s1492_s10  }
  0x25   :  { %s1493_s22 = smov [#allocation7]   ;;  %s1494_s25 = smov [#allocation8]  }
  0x26   :  { %s47_s23 = sshll.u32 %s1493_s22, 4  ;;  %s57_s26 = sshll.u32 %s1494_s25, 4  ;;  %s48_s23 = int_to_ptr.vmem [resolvable:$true] %s47_s23  ;;  %s58_s26 = int_to_ptr.vmem [resolvable:$true] %s57_s26 }
  0x27   :  { %s1369_s29 = scalar_lea.hbm %s2081_s2, 16 }
  0x28   :  { %p1370_p2 = scmp.ne.s32.totalorder %s2081_s2, %s1369_s29  ;;  %p1373_p3 = scmp.lt.u32.totalorder %s1369_s29, %s2081_s2 }
  0x2a   :  { %p1375_p4 = pnand %p1373_p3, %p1370_p2 }
  0x2c   :  { %1378 = shalt.err (!%p1375_p4)
}
  0x2d   :  { %s1379_s0 = scalar_lea.vmem %s48_s23, 16  ;;  %s1383_s24 = scalar_lea.vmem %s48_s23, 32 }
  0x2e   :  { %p1380_p5 = scmp.ne.s32.totalorder %s48_s23, %s1379_s0  ;;  %p1384_p6 = scmp.lt.s32.totalorder %s48_s23, %s48_s23 }
  0x2f   :  { %p1385_p7 = scmp.lt.s32.totalorder %s1383_s24, %s1379_s0 }
  0x31   :  { %p1386_p8 = por %p1385_p7, %p1384_p6 }
  0x33   :  { %p1387_p9 = pnand %p1386_p8, %p1380_p5 }
  0x35   :  { %1390 = shalt.err (!%p1387_p9)
}
  0x36   :  { %50 = dma.hbm_to_vmem [thread:$0]  %s2081_s2, 16, %s48_s23, [#allocation6]  }
  0x37   :  { %s1391_s16 = scalar_lea.hbm %s2082_s3, 16 }
  0x38   :  { %p1392_p10 = scmp.ne.s32.totalorder %s2082_s3, %s1391_s16  ;;  %p1395_p11 = scmp.lt.u32.totalorder %s1391_s16, %s2082_s3 }
  0x3a   :  { %p1397_p12 = pnand %p1395_p11, %p1392_p10 }
  0x3c   :  { %1400 = shalt.err (!%p1397_p12)
}
  0x3d   :  { %s1401_s1 = scalar_lea.vmem %s58_s26, 16  ;;  %s1405_s21 = scalar_lea.vmem %s58_s26, 32 }
  0x3e   :  { %p1402_p13 = scmp.ne.s32.totalorder %s58_s26, %s1401_s1  ;;  %p1406_p0 = scmp.lt.s32.totalorder %s58_s26, %s58_s26 }
  0x3f   :  { %p1407_p1 = scmp.lt.s32.totalorder %s1405_s21, %s1401_s1 }
  0x41   :  { %p1408_p2 = por %p1407_p1, %p1406_p0 }
  0x43   :  { %p1409_p3 = pnand %p1408_p2, %p1402_p13 }
  0x45   :  { %1412 = shalt.err (!%p1409_p3)
}
  0x46   :  { %60 = dma.hbm_to_vmem [thread:$0]  %s2082_s3, 16, %s58_s26, [#allocation9]  }
  0x47   :  { %1479 = dma.done.wait [#allocation3], 8192  }
  0x48   :  { %1480 = vsyncadd [#allocation3], 4294959104 }
  0x49   :  { %1481 = dma.done.wait [#allocation6], 2064  }
  0x4a   :  { %1482 = vsyncadd [#allocation6], 4294965232 }
  0x4b   :  { %1483 = dma.done.wait [#allocation9], 16  }
  0x4c   :  { %1484 = vsyncadd [#allocation9], 4294967280  ;;  %v343_v0 = vld [vmem:[#allocation5] sm:$0xff]  ;;  %v344_v1 = vld [vmem:[#allocation5 + $0x8] sm:$0xff]  ;;  %s1495_s3 = smov [#allocation10]  }
  0x4d   :  { %v345_v2 = vld [vmem:[#allocation5 + $0x10] sm:$0xff]  ;;  %v1268_v3 = vpack.c.bf16 %v344_v1, %v343_v0  ;;  %v346_v4 = vld [vmem:[#allocation5 + $0x18] sm:$0xff]  ;;  %v347_v6 = vld [vmem:[#allocation5 + $0x20] sm:$0xff]  ;;  %s1017_s23 = sshll.u32 %s1495_s3, 4  ;;  %s1018_s23 = int_to_ptr.vmem [resolvable:$true] %s1017_s23 }
  0x4e   :  { %v1272_v5 = vpack.c.bf16 %v346_v4, %v345_v2  ;;  %v348_v7 = vld [vmem:[#allocation5 + $0x28] sm:$0xff]  ;;  %v73_v9 = vld [vmem:[#allocation2] sm:$0xff]  ;;  %v349_v11 = vld [vmem:[#allocation5 + $0x30] sm:$0xff]  ;;  %s1413_s25 = scalar_lea.vmem %s1018_s23, 8192  ;;  %p1418_p5 = scmp.lt.s32.totalorder %s1018_s23, %s1018_s23 }
  0x4f   :  { %1269 = vmatprep.subr.bf16.mxu0 %v1268_v3  ;;  %1300 = vmatprep.subr.bf16.mxu1 %v1268_v3  ;;  %v1276_v8 = vpack.c.bf16 %v348_v7, %v347_v6  ;;  %v1594_v10 = vld [vmem:[#allocation7] ss:$0 sm:$0xff]  ;;  %v350_v12 = vld [vmem:[#allocation5 + $0x38] sm:$0xff]  ;;  %v1597_v14 = vld [vmem:[#allocation8] ss:$0 sm:$0xff]  ;;  %p1414_p4 = scmp.ne.s32.totalorder %s1018_s23, %s1413_s25  ;;  %p1419_p6 = scmp.lt.s32.totalorder %s1413_s25, %s1413_s25 }
  0x50   :  { %1271 = vmatpush3.bf16.msra.mxu0 %v1268_v3  ;;  %1308 = vmatpush3.bf16.msra.mxu1 %v1268_v3  ;;  %v144_v13 = vmul.f32 %v1594_v10, %v73_v9  ;;  %v1280_v16 = vpack.c.bf16 %v350_v12, %v349_v11  ;;  %v351_v17 = vld [vmem:[#allocation5 + $0x40] sm:$0xff]  ;;  %v352_v18 = vld [vmem:[#allocation5 + $0x48] sm:$0xff]  ;;  %v353_v21 = vld [vmem:[#allocation5 + $0x50] sm:$0xff] }
  0x51   :  { %1273 = vmatprep.subr.bf16.mxu0 %v1272_v5  ;;  %1301 = vmatprep.subr.bf16.mxu1 %v1272_v5  ;;  %v1284_v20 = vpack.c.bf16 %v352_v18, %v351_v17  ;;  %v354_v22 = vld [vmem:[#allocation5 + $0x58] sm:$0xff]  ;;  %v355_v24 = vld [vmem:[#allocation5 + $0x60] sm:$0xff]  ;;  %v356_v25 = vld [vmem:[#allocation5 + $0x68] sm:$0xff]  ;;  %p1420_p7 = por %p1419_p6, %p1418_p5 }
  0x52   :  { %v215_v15 = vadd.f32 %v1597_v14, %v144_v13  ;;  %v1288_v23 = vpack.c.bf16 %v354_v22, %v353_v21  ;;  %v74_v26 = vld [vmem:[#allocation2 + $0x8] sm:$0xff]  ;;  %v75_v27 = vld [vmem:[#allocation2 + $0x10] sm:$0xff]  ;;  %v96_v29 = vld [vmem:[#allocation2 + $0xb8] sm:$0xff]  ;;  %v1292_v34 = vpack.c.bf16 %v356_v25, %v355_v24 }
  0x53   :  { %v95_v28 = vld [vmem:[#allocation2 + $0xb0] sm:$0xff]  ;;  %v358_v31 = vld [vmem:[#allocation5 + $0x78] sm:$0xff]  ;;  %v145_v32 = vmul.f32 %v1594_v10, %v74_v26  ;;  %v146_v35 = vmul.f32 %v1594_v10, %v75_v27  ;;  %v77_v36 = vld [vmem:[#allocation2 + $0x20] sm:$0xff]  ;;  %v167_v39 = vmul.f32 %v1594_v10, %v96_v29  ;;  %p1421_p8 = pnand %p1420_p7, %p1414_p4 }
  0x54   :  { %1275 = vmatpush3.bf16.msra.mxu0 %v1272_v5  ;;  %v279_v19 = vmax.f32 %v215_v15, 0.0  ;;  %1309 = vmatpush3.bf16.msra.mxu1 %v1272_v5  ;;  %v357_v30 = vld [vmem:[#allocation5 + $0x70] sm:$0xff]  ;;  %v76_v33 = vld [vmem:[#allocation2 + $0x18] sm:$0xff]  ;;  %v78_v37 = vld [vmem:[#allocation2 + $0x28] sm:$0xff]  ;;  %v166_v38 = vmul.f32 %v1594_v10, %v95_v28  ;;  %v148_v52 = vmul.f32 %v1594_v10, %v77_v36 }
  0x55   :  { %1277 = vmatprep.subr.bf16.mxu0 %v1276_v8  ;;  %1302 = vmatprep.subr.bf16.mxu1 %v1276_v8  ;;  %v97_v40 = vld [vmem:[#allocation2 + $0xc0] sm:$0xff]  ;;  %v79_v41 = vld [vmem:[#allocation2 + $0x30] sm:$0xff]  ;;  %v98_v42 = vld [vmem:[#allocation2 + $0xc8] sm:$0xff]  ;;  %v1604_v44 = vpack.c.bf16 %v358_v31, %v357_v30  ;;  %v147_v45 = vmul.f32 %v1594_v10, %v76_v33  ;;  %v1611_v47 = vadd.f32 %v1597_v14, %v167_v39 }
  0x56   :  { %1172 = vmatprep.mubr.f32.mxu0 %v279_v19  ;;  %v99_v43 = vld [vmem:[#allocation2 + $0xd0] sm:$0xff]  ;;  %v1608_v46 = vadd.f32 %v1597_v14, %v166_v38  ;;  %v100_v48 = vld [vmem:[#allocation2 + $0xd8] sm:$0xff]  ;;  %v101_v49 = vld [vmem:[#allocation2 + $0xe0] sm:$0xff]  ;;  %v1614_v51 = vadd.f32 %v1597_v14, %v145_v32  ;;  %v149_v53 = vmul.f32 %v1594_v10, %v78_v37  ;;  %v168_v54 = vmul.f32 %v1594_v10, %v97_v40 }
  0x57   :  { %v102_v50 = vld [vmem:[#allocation2 + $0xe8] sm:$0xff]  ;;  %v103_v55 = vld [vmem:[#allocation2 + $0xf0] sm:$0xff]  ;;  %v104_v56 = vld [vmem:[#allocation2 + $0xf8] sm:$0xff]  ;;  %v1620_v57 = vadd.f32 %v1597_v14, %v146_v35  ;;  %v150_v58 = vmul.f32 %v1594_v10, %v79_v41  ;;  %v169_v59 = vmul.f32 %v1594_v10, %v98_v42  ;;  %v170_v60 = vmul.f32 %v1594_v10, %v99_v43 }
  0x58   :  { %1279 = vmatpush3.bf16.msra.mxu0 %v1276_v8  ;;  %1310 = vmatpush3.bf16.msra.mxu1 %v1276_v8  ;;  %v80_v61 = vld [vmem:[#allocation2 + $0x38] sm:$0xff]  ;;  %v1626_v62 = vadd.f32 %v1597_v14, %v168_v54  ;;  %v171_v63 = vmul.f32 %v1594_v10, %v100_v48  ;;  %v172_v0 = vmul.f32 %v1594_v10, %v101_v49  ;;  %v105_v6 = vld [vmem:[#allocation2 + $0x100] sm:$0xff]  ;;  %v106_v12 = vld [vmem:[#allocation2 + $0x108] sm:$0xff] }
  0x59   :  { %1281 = vmatprep.subr.bf16.mxu0 %v1280_v16  ;;  %1303 = vmatprep.subr.bf16.mxu1 %v1280_v16  ;;  %v173_v1 = vmul.f32 %v1594_v10, %v102_v50  ;;  %v1632_v2 = vadd.f32 %v1597_v14, %v169_v59  ;;  %v1635_v3 = vadd.f32 %v1597_v14, %v170_v60  ;;  %v107_v13 = vld [vmem:[#allocation2 + $0x110] sm:$0xff]  ;;  %v108_v18 = vld [vmem:[#allocation2 + $0x118] sm:$0xff]  ;;  %v109_v19 = vld [vmem:[#allocation2 + $0x120] sm:$0xff]  ;;  %v281_v26 = vmax.f32 %v1620_v57, 0.0 }
  0x5a   :  { %v174_v4 = vmul.f32 %v1594_v10, %v103_v55  ;;  %v175_v5 = vmul.f32 %v1594_v10, %v104_v56  ;;  %v1640_v7 = vadd.f32 %v1597_v14, %v147_v45  ;;  %v1643_v8 = vadd.f32 %v1597_v14, %v171_v63  ;;  %v110_v25 = vld [vmem:[#allocation2 + $0x128] sm:$0xff]  ;;  %v111_v30 = vld [vmem:[#allocation2 + $0x130] sm:$0xff]  ;;  %v112_v41 = vld [vmem:[#allocation2 + $0x138] sm:$0xff] }
  0x5b   :  { %v1646_v9 = vadd.f32 %v1597_v14, %v172_v0  ;;  %v1649_v11 = vadd.f32 %v1597_v14, %v173_v1  ;;  %v151_v15 = vmul.f32 %v1594_v10, %v80_v61  ;;  %v1661_v21 = vadd.f32 %v1597_v14, %v148_v52  ;;  %v82_v32 = vld [vmem:[#allocation2 + $0x48] sm:$0xff]  ;;  %v83_v33 = vld [vmem:[#allocation2 + $0x50] sm:$0xff]  ;;  %v84_v42 = vld [vmem:[#allocation2 + $0x58] sm:$0xff] }
  0x5c   :  { %1283 = vmatpush3.bf16.msra.mxu0 %v1280_v16  ;;  %1311 = vmatpush3.bf16.msra.mxu1 %v1280_v16  ;;  %v1654_v16 = vadd.f32 %v1597_v14, %v174_v4  ;;  %v1657_v17 = vadd.f32 %v1597_v14, %v175_v5  ;;  %v1664_v22 = vadd.f32 %v1597_v14, %v149_v53  ;;  %v282_v31 = vmax.f32 %v1640_v7, 0.0  ;;  %v85_v52 = vld [vmem:[#allocation2 + $0x60] sm:$0xff]  ;;  %v87_v59 = vld [vmem:[#allocation2 + $0x70] sm:$0xff]  ;;  %v88_v0 = vld [vmem:[#allocation2 + $0x78] sm:$0xff] }
  0x5d   :  { %1285 = vmatprep.subr.bf16.mxu0 %v1284_v20  ;;  %1304 = vmatprep.subr.bf16.mxu1 %v1284_v20  ;;  %v176_v24 = vmul.f32 %v1594_v10, %v105_v6  ;;  %v1669_v27 = vadd.f32 %v1597_v14, %v150_v58  ;;  %v177_v28 = vmul.f32 %v1594_v10, %v106_v12  ;;  %v113_v55 = vld [vmem:[#allocation2 + $0x140] sm:$0xff]  ;;  %v283_v56 = vmax.f32 %v1661_v21, 0.0  ;;  %v86_v58 = vld [vmem:[#allocation2 + $0x68] sm:$0xff] }
  0x5e   :  { %v178_v29 = vmul.f32 %v1594_v10, %v107_v13  ;;  %v179_v35 = vmul.f32 %v1594_v10, %v108_v18  ;;  %v180_v36 = vmul.f32 %v1594_v10, %v109_v19  ;;  %v181_v40 = vmul.f32 %v1594_v10, %v110_v25  ;;  %v114_v13 = vld [vmem:[#allocation2 + $0x148] sm:$0xff] }
  0x5f   :  { %v248_v38 = vadd.f32 %v1597_v14, %v177_v28  ;;  %v182_v49 = vmul.f32 %v1594_v10, %v111_v30  ;;  %v153_v50 = vmul.f32 %v1594_v10, %v82_v32  ;;  %v1692_v57 = vadd.f32 %v1597_v14, %v151_v15  ;;  %v115_v15 = vld [vmem:[#allocation2 + $0x150] sm:$0xff]  ;;  %v117_v32 = vld [vmem:[#allocation2 + $0x160] sm:$0xff] }
  0x60   :  { %1287 = vmatpush3.bf16.msra.mxu0 %v1284_v20  ;;  %1312 = vmatpush3.bf16.msra.mxu1 %v1284_v20  ;;  %v280_v20 = vmax.f32 %v1614_v51, 0.0  ;;  %v249_v39 = vadd.f32 %v1597_v14, %v178_v29  ;;  %v250_v45 = vadd.f32 %v1597_v14, %v179_v35  ;;  %v251_v48 = vadd.f32 %v1597_v14, %v180_v36 }
  0x61   :  { %1289 = vmatprep.subr.bf16.mxu0 %v1288_v23  ;;  %1305 = vmatprep.subr.bf16.mxu1 %v1288_v23  ;;  %v154_v51 = vmul.f32 %v1594_v10, %v83_v33  ;;  %v312_v53 = vmax.f32 %v248_v38, 0.0  ;;  %v183_v60 = vmul.f32 %v1594_v10, %v112_v41  ;;  %v155_v63 = vmul.f32 %v1594_v10, %v84_v42  ;;  %v126_v33 = vld [vmem:[#allocation2 + $0x1a8] sm:$0xff]  ;;  %v128_v38 = vld [vmem:[#allocation2 + $0x1b8] sm:$0xff] }
  0x62   :  { %v313_v54 = vmax.f32 %v249_v39, 0.0  ;;  %v314_v1 = vmax.f32 %v250_v45, 0.0  ;;  %v252_v4 = vadd.f32 %v1597_v14, %v181_v40  ;;  %v156_v5 = vmul.f32 %v1594_v10, %v85_v52 }
  0x63   :  { %v315_v6 = vmax.f32 %v251_v48, 0.0  ;;  %v253_v7 = vadd.f32 %v1597_v14, %v182_v49  ;;  %v184_v12 = vmul.f32 %v1594_v10, %v113_v55  ;;  %v1704_v18 = vadd.f32 %v1597_v14, %v153_v50  ;;  %v118_v50 = vld [vmem:[#allocation2 + $0x168] sm:$0xff] }
  0x64   :  { %1291 = vmatpush3.bf16.msra.mxu0 %v1288_v23  ;;  %1313 = vmatpush3.bf16.msra.mxu1 %v1288_v23  ;;  %v81_v23 = vld [vmem:[#allocation2 + $0x40] sm:$0xff]  ;;  %v1707_v19 = vadd.f32 %v1597_v14, %v154_v51  ;;  %v158_v21 = vmul.f32 %v1594_v10, %v87_v59  ;;  %v254_v25 = vadd.f32 %v1597_v14, %v183_v60  ;;  %v316_v28 = vmax.f32 %v252_v4, 0.0 }
  0x65   :  { %1293 = vmatprep.subr.bf16.mxu0 %v1292_v34  ;;  %1306 = vmatprep.subr.bf16.mxu1 %v1292_v34  ;;  %v152_v37 = vmul.f32 %v1594_v10, %v81_v23  ;;  %v286_v23 = vmax.f32 %v1692_v57, 0.0  ;;  %v185_v29 = vmul.f32 %v1594_v10, %v114_v13  ;;  %v186_v30 = vmul.f32 %v1594_v10, %v115_v15 }
  0x66   :  { %v317_v35 = vmax.f32 %v253_v7, 0.0  ;;  %v255_v36 = vadd.f32 %v1597_v14, %v184_v12  ;;  %v288_v39 = vmax.f32 %v1704_v18, 0.0  ;;  %v289_v40 = vmax.f32 %v1707_v19, 0.0  ;;  %v133_v7 = vld [vmem:[#allocation2 + $0x1e0] sm:$0xff]  ;;  %v134_v12 = vld [vmem:[#allocation2 + $0x1e8] sm:$0xff] }
  0x67   :  { %v1696_v61 = vadd.f32 %v1597_v14, %v152_v37  ;;  %v127_v37 = vld [vmem:[#allocation2 + $0x1b0] sm:$0xff]  ;;  %v1733_v42 = vadd.f32 %v1597_v14, %v158_v21  ;;  %v318_v45 = vmax.f32 %v254_v25, 0.0  ;;  %v188_v49 = vmul.f32 %v1594_v10, %v117_v32  ;;  %v136_v21 = vld [vmem:[#allocation2 + $0x1f8] sm:$0xff] }
  0x68   :  { %1295 = vmatpush3.bf16.msra.mxu0 %v1292_v34  ;;  %1314 = vmatpush3.bf16.msra.mxu1 %v1292_v34  ;;  %v247_v34 = vadd.f32 %v1597_v14, %v176_v24  ;;  %v1714_v24 = vmul.f32 %v1594_v10, %v88_v0  ;;  %v197_v51 = vmul.f32 %v1594_v10, %v126_v33  ;;  %v319_v59 = vmax.f32 %v255_v36, 0.0  ;;  %v120_v25 = vld [vmem:[#allocation2 + $0x178] sm:$0xff]  ;;  %v121_v33 = vld [vmem:[#allocation2 + $0x180] sm:$0xff] }
  0x69   :  { %1297 = vmatprep.subr.bf16.mxu0 %v1604_v44  ;;  %1307 = vmatprep.subr.bf16.mxu1 %v1604_v44  ;;  %v256_v52 = vadd.f32 %v1597_v14, %v185_v29  ;;  %v198_v55 = vmul.f32 %v1594_v10, %v127_v37  ;;  %v259_v15 = vadd.f32 %v1597_v14, %v188_v49  ;;  %v90_v37 = vld [vmem:[#allocation2 + $0x88] sm:$0xff] }
  0x6a   :  { %v311_v43 = vmax.f32 %v247_v34, 0.0  ;;  %v1724_v34 = vadd.f32 %v1597_v14, %v156_v5  ;;  %v1745_v60 = vadd.f32 %v1597_v14, %v197_v51  ;;  %v205_v32 = vmul.f32 %v1594_v10, %v134_v12  ;;  %v93_v12 = vld [vmem:[#allocation2 + $0xa0] sm:$0xff] }
  0x6b   :  { %v1750_v4 = vadd.f32 %v1597_v14, %v198_v55  ;;  %v207_v36 = vmul.f32 %v1594_v10, %v136_v21  ;;  %v122_v55 = vld [vmem:[#allocation2 + $0x188] sm:$0xff] }
  0x6c   :  { %1299 = vmatpush3.bf16.msra.mxu0 %v1604_v44  ;;  %1315 = vmatpush3.bf16.msra.mxu1 %v1604_v44  ;;  %v284_v44 = vmax.f32 %v1664_v22, 0.0  ;;  %v285_v22 = vmax.f32 %v1669_v27, 0.0  ;;  %v1721_v27 = vadd.f32 %v1597_v14, %v155_v63  ;;  %v131_v63 = vld [vmem:[#allocation2 + $0x1d0] sm:$0xff] }
  0x6d   :  { %1220 = vmatprep.mubr.f32.mxu1 %v311_v43  ;;  %v89_v43 = vld [vmem:[#allocation2 + $0x80] sm:$0xff]  ;;  %v202_v29 = vmul.f32 %v1594_v10, %v131_v63  ;;  %v293_v63 = vmax.f32 %v1733_v42, 0.0 }
  0x6e   :  { %v290_v57 = vmax.f32 %v1721_v27, 0.0  ;;  %v160_v0 = vmul.f32 %v1594_v10, %v89_v43 }
  0x6f   :  { %1173 = vmatmul.mubr.f32.vlgmr.msra.gmra.mrb[0].mxu0 %v280_v20  ;;  %1221 = vmatmul.mubr.f32.vlgmr.msra.gmra.mrb[0].mxu1 %v312_v53  ;;  %v157_v20 = vmul.f32 %v1594_v10, %v86_v58  ;;  %v257_v53 = vadd.f32 %v1597_v14, %v186_v30  ;;  %v291_v58 = vmax.f32 %v1724_v34, 0.0  ;;  %v1771_v34 = vadd.f32 %v1597_v14, %v202_v29 }
  0x70   :  { %1175 = vmatprep.mubr.f32.mxu0 %v281_v26  ;;  %1223 = vmatprep.mubr.f32.mxu1 %v313_v54  ;;  %v287_v26 = vmax.f32 %v1696_v61, 0.0  ;;  %v119_v54 = vld [vmem:[#allocation2 + $0x170] sm:$0xff]  ;;  %v130_v61 = vld [vmem:[#allocation2 + $0x1c8] sm:$0xff] }
  0x71   :  { %v1730_v41 = vadd.f32 %v1597_v14, %v157_v20  ;;  %v190_v18 = vmul.f32 %v1594_v10, %v119_v54  ;;  %v135_v20 = vld [vmem:[#allocation2 + $0x1f0] sm:$0xff]  ;;  %v192_v54 = vmul.f32 %v1594_v10, %v121_v33 }
  0x73   :  { %1176 = vmatmul.mubr.f32.gmra.mrb[2].mxu0 %v282_v31  ;;  %1224 = vmatmul.mubr.f32.gmra.mrb[2].mxu1 %v314_v1  ;;  %v116_v31 = vld [vmem:[#allocation2 + $0x158] sm:$0xff]  ;;  %v189_v1 = vmul.f32 %v1594_v10, %v118_v50 }
  0x74   :  { %1178 = vmatprep.mubr.f32.mxu0 %v283_v56  ;;  %1226 = vmatprep.mubr.f32.mxu1 %v315_v6  ;;  %v187_v48 = vmul.f32 %v1594_v10, %v116_v31  ;;  %v199_v56 = vmul.f32 %v1594_v10, %v128_v38  ;;  %v132_v6 = vld [vmem:[#allocation2 + $0x1d8] sm:$0xff]  ;;  %v204_v31 = vmul.f32 %v1594_v10, %v133_v7 }
  0x75   :  { %v203_v30 = vmul.f32 %v1594_v10, %v132_v6  ;;  %v191_v38 = vmul.f32 %v1594_v10, %v120_v25  ;;  %v260_v50 = vadd.f32 %v1597_v14, %v189_v1  ;;  %v231_v1 = vadd.f32 %v1597_v14, %v160_v0  ;;  %v92_v7 = vld [vmem:[#allocation2 + $0x98] sm:$0xff]  ;;  %v94_v25 = vld [vmem:[#allocation2 + $0xa8] sm:$0xff] }
  0x76   :  { %v1753_v5 = vadd.f32 %v1597_v14, %v199_v56  ;;  %v258_v13 = vadd.f32 %v1597_v14, %v187_v48  ;;  %v91_v48 = vld [vmem:[#allocation2 + $0x90] sm:$0xff]  ;;  %v292_v56 = vmax.f32 %v1730_v41, 0.0  ;;  %v193_v41 = vmul.f32 %v1594_v10, %v122_v55 }
  0x77   :  { %1179 = vmatmul.mubr.f32.gmra.mrb[4].mxu0 %v284_v44  ;;  %1227 = vmatmul.mubr.f32.gmra.mrb[4].mxu1 %v316_v28  ;;  %v129_v44 = vld [vmem:[#allocation2 + $0x1c0] sm:$0xff]  ;;  %v201_v28 = vmul.f32 %v1594_v10, %v130_v61  ;;  %v1777_v43 = vadd.f32 %v1597_v14, %v203_v30  ;;  %v123_v61 = vld [vmem:[#allocation2 + $0x190] sm:$0xff]  ;;  %v162_v6 = vmul.f32 %v1594_v10, %v91_v48  ;;  %v295_v21 = vmax.f32 %v231_v1, 0.0 }
  0x78   :  { %1181 = vmatprep.mubr.f32.mxu0 %v285_v22  ;;  %1229 = vmatprep.mubr.f32.mxu1 %v317_v35  ;;  %v200_v19 = vmul.f32 %v1594_v10, %v129_v44  ;;  %v320_v22 = vmax.f32 %v256_v52, 0.0  ;;  %v206_v35 = vmul.f32 %v1594_v10, %v135_v20  ;;  %v322_v49 = vmax.f32 %v258_v13, 0.0  ;;  %v125_v20 = vld [vmem:[#allocation2 + $0x1a0] sm:$0xff] }
  0x79   :  { %v1768_v27 = vadd.f32 %v1597_v14, %v201_v28  ;;  %v323_v52 = vmax.f32 %v259_v15, 0.0  ;;  %v230_v44 = vadd.f32 %v1597_v14, %v1714_v24  ;;  %v324_v13 = vmax.f32 %v260_v50, 0.0 }
  0x7a   :  { %v1787_v51 = vadd.f32 %v1597_v14, %v206_v35  ;;  %v263_v15 = vadd.f32 %v1597_v14, %v192_v54  ;;  %v264_v29 = vadd.f32 %v1597_v14, %v193_v41  ;;  %v196_v33 = vmul.f32 %v1594_v10, %v125_v20 }
  0x7b   :  { %1182 = vmatmul.mubr.f32.gmra.mrb[6].mxu0 %v286_v23  ;;  %1230 = vmatmul.mubr.f32.gmra.mrb[6].mxu1 %v318_v45  ;;  %v321_v23 = vmax.f32 %v257_v53, 0.0  ;;  %v1783_v45 = vadd.f32 %v1597_v14, %v205_v32  ;;  %v261_v53 = vadd.f32 %v1597_v14, %v190_v18  ;;  %v124_v18 = vld [vmem:[#allocation2 + $0x198] sm:$0xff]  ;;  %v294_v42 = vmax.f32 %v230_v44, 0.0 }
  0x7c   :  { %1184 = vmatprep.mubr.f32.mxu0 %v287_v26  ;;  %1232 = vmatprep.mubr.f32.mxu1 %v319_v59  ;;  %v1762_v26 = vadd.f32 %v1597_v14, %v200_v19  ;;  %v161_v59 = vmul.f32 %v1594_v10, %v90_v37  ;;  %v163_v19 = vmul.f32 %v1594_v10, %v92_v7  ;;  %v333_v1 = vmax.f32 %v1750_v4, 0.0 }
  0x7d   :  { %v325_v24 = vmax.f32 %v261_v53, 0.0  ;;  %v195_v30 = vmul.f32 %v1594_v10, %v124_v18  ;;  %v165_v37 = vmul.f32 %v1594_v10, %v94_v25  ;;  %v267_v53 = vadd.f32 %v1597_v14, %v196_v33 }
  0x7e   :  { %v232_v0 = vadd.f32 %v1597_v14, %v161_v59  ;;  %v334_v7 = vmax.f32 %v1753_v5, 0.0  ;;  %v336_v4 = vmax.f32 %v1768_v27, 0.0  ;;  %v307_v5 = vmax.f32 %v1646_v9, 0.0 }
  0x7f   :  { %1185 = vmatmul.mubr.f32.gmra.mrb[8].mxu0 %v288_v39  ;;  %v1780_v39 = vadd.f32 %v1597_v14, %v204_v31  ;;  %1233 = vmatmul.mubr.f32.gmra.mrb[8].mxu1 %v320_v22  ;;  %v233_v22 = vadd.f32 %v1597_v14, %v162_v6  ;;  %v327_v31 = vmax.f32 %v263_v15, 0.0  ;;  %v266_v50 = vadd.f32 %v1597_v14, %v195_v30 }
  0x80   :  { %1187 = vmatprep.mubr.f32.mxu0 %v289_v40  ;;  %v1790_v40 = vadd.f32 %v1597_v14, %v207_v36  ;;  %1235 = vmatprep.mubr.f32.mxu1 %v321_v23  ;;  %v164_v23 = vmul.f32 %v1594_v10, %v93_v12  ;;  %v296_v35 = vmax.f32 %v232_v0, 0.0  ;;  %v234_v36 = vadd.f32 %v1597_v14, %v163_v19 }
  0x81   :  { %v236_v55 = vadd.f32 %v1597_v14, %v165_v37  ;;  %v331_v44 = vmax.f32 %v267_v53, 0.0  ;;  %v303_v6 = vmax.f32 %v1626_v62, 0.0  ;;  %v335_v12 = vmax.f32 %v1762_v26, 0.0 }
  0x82   :  { %v235_v48 = vadd.f32 %v1597_v14, %v164_v23  ;;  %v298_v54 = vmax.f32 %v234_v36, 0.0  ;;  %v306_v62 = vmax.f32 %v1643_v8, 0.0  ;;  %v338_v26 = vmax.f32 %v1777_v43, 0.0 }
  0x83   :  { %1188 = vmatmul.mubr.f32.gmra.mrb[10].mxu0 %v290_v57  ;;  %1236 = vmatmul.mubr.f32.gmra.mrb[10].mxu1 %v322_v49  ;;  %v262_v57 = vadd.f32 %v1597_v14, %v191_v38  ;;  %v297_v38 = vmax.f32 %v233_v22, 0.0  ;;  %v328_v49 = vmax.f32 %v264_v29, 0.0  ;;  %v300_v59 = vmax.f32 %v236_v55, 0.0 }
  0x84   :  { %1190 = vmatprep.mubr.f32.mxu0 %v291_v58  ;;  %1238 = vmatprep.mubr.f32.mxu1 %v323_v52  ;;  %v194_v58 = vmul.f32 %v1594_v10, %v123_v61  ;;  %v330_v10 = vmax.f32 %v266_v50, 0.0  ;;  %v301_v61 = vmax.f32 %v1608_v46, 0.0  ;;  %v304_v46 = vmax.f32 %v1632_v2, 0.0 }
  0x85   :  { %v326_v28 = vmax.f32 %v262_v57, 0.0  ;;  %v339_v2 = vmax.f32 %v1780_v39, 0.0  ;;  %v309_v27 = vmax.f32 %v1654_v16, 0.0  ;;  %v341_v8 = vmax.f32 %v1787_v51, 0.0 }
  0x86   :  { %v265_v32 = vadd.f32 %v1597_v14, %v194_v58  ;;  %v302_v14 = vmax.f32 %v1611_v47, 0.0  ;;  %v337_v47 = vmax.f32 %v1771_v34, 0.0  ;;  %v340_v34 = vmax.f32 %v1783_v45, 0.0 }
  0x87   :  { %1191 = vmatmul.mubr.f32.gmra.mrb[12].mxu0 %v292_v56  ;;  %1239 = vmatmul.mubr.f32.gmra.mrb[12].mxu1 %v324_v13  ;;  %v299_v56 = vmax.f32 %v235_v48, 0.0  ;;  %v310_v9 = vmax.f32 %v1657_v17, 0.0  ;;  %v342_v43 = vmax.f32 %v1790_v40, 0.0 }
  0x88   :  { %1193 = vmatprep.mubr.f32.mxu0 %v293_v63  ;;  %1241 = vmatprep.mubr.f32.mxu1 %v325_v24  ;;  %v329_v52 = vmax.f32 %v265_v32, 0.0  ;;  %v332_v63 = vmax.f32 %v1745_v60, 0.0  ;;  %v305_v60 = vmax.f32 %v1635_v3, 0.0  ;;  %v308_v3 = vmax.f32 %v1649_v11, 0.0 }
  0x8b   :  { %1194 = vmatmul.mubr.f32.gmra.mrb[14].mxu0 %v294_v42  ;;  %1242 = vmatmul.mubr.f32.gmra.mrb[14].mxu1 %v326_v28 }
  0x8c   :  { %1196 = vmatprep.mubr.f32.mxu0 %v295_v21  ;;  %1244 = vmatprep.mubr.f32.mxu1 %v327_v31 }
  0x8f   :  { %1197 = vmatmul.mubr.f32.gmra.mrb[16].mxu0 %v296_v35  ;;  %1245 = vmatmul.mubr.f32.gmra.mrb[16].mxu1 %v328_v49 }
  0x90   :  { %1199 = vmatprep.mubr.f32.mxu0 %v297_v38  ;;  %1247 = vmatprep.mubr.f32.mxu1 %v329_v52 }
  0x93   :  { %1200 = vmatmul.mubr.f32.gmra.mrb[18].mxu0 %v298_v54  ;;  %1248 = vmatmul.mubr.f32.gmra.mrb[18].mxu1 %v330_v10 }
  0x94   :  { %1202 = vmatprep.mubr.f32.mxu0 %v299_v56  ;;  %1250 = vmatprep.mubr.f32.mxu1 %v331_v44 }
  0x97   :  { %1203 = vmatmul.mubr.f32.gmra.mrb[20].mxu0 %v300_v59  ;;  %1251 = vmatmul.mubr.f32.gmra.mrb[20].mxu1 %v332_v63 }
  0x98   :  { %1205 = vmatprep.mubr.f32.mxu0 %v301_v61  ;;  %1253 = vmatprep.mubr.f32.mxu1 %v333_v1 }
  0x9b   :  { %1206 = vmatmul.mubr.f32.gmra.mrb[22].mxu0 %v302_v14  ;;  %1254 = vmatmul.mubr.f32.gmra.mrb[22].mxu1 %v334_v7 }
  0x9c   :  { %1208 = vmatprep.mubr.f32.mxu0 %v303_v6  ;;  %1256 = vmatprep.mubr.f32.mxu1 %v335_v12 }
  0x9f   :  { %1209 = vmatmul.mubr.f32.gmra.mrb[24].mxu0 %v304_v46  ;;  %1257 = vmatmul.mubr.f32.gmra.mrb[24].mxu1 %v336_v4 }
  0xa0   :  { %1211 = vmatprep.mubr.f32.mxu0 %v305_v60  ;;  %1259 = vmatprep.mubr.f32.mxu1 %v337_v47 }
  0xa3   :  { %1212 = vmatmul.mubr.f32.gmra.mrb[26].mxu0 %v306_v62  ;;  %1260 = vmatmul.mubr.f32.gmra.mrb[26].mxu1 %v338_v26 }
  0xa4   :  { %1214 = vmatprep.mubr.f32.mxu0 %v307_v5  ;;  %1262 = vmatprep.mubr.f32.mxu1 %v339_v2 }
  0xa7   :  { %1215 = vmatmul.mubr.f32.gmra.mrb[28].mxu0 %v308_v3  ;;  %1263 = vmatmul.mubr.f32.gmra.mrb[28].mxu1 %v340_v34 }
  0xa8   :  { %1217 = vmatprep.mubr.f32.mxu0 %v309_v27  ;;  %1265 = vmatprep.mubr.f32.mxu1 %v341_v8 }
  0xab   :  { %1218 = vmatmul.mubr.f32.gmra.mrb[30].mxu0 %v310_v9  ;;  %1266 = vmatmul.mubr.f32.gmra.mrb[30].mxu1 %v342_v43 }
 0x142   :  { %v1174_v11 = vpop.f32.mrb[0].mxu0  ;;  %v1840_v57 = vpop.f32.mrb[0].mxu1 }
 0x143   :  { %745 = vst [vmem:[#allocation10 + $0x8] sm:$0xff] %v1174_v11  ;;  %v879_v39 = vmul.f32 %v1174_v11, %v1174_v11  ;;  %v425_v16 = vpop.f32.mrb[1].mxu0  ;;  %777 = vst [vmem:[#allocation10 + $0x108] sm:$0xff] %v1840_v57  ;;  %v1843_v51 = vpop.f32.mrb[1].mxu1 }
 0x144   :  { %744 = vst [vmem:[#allocation10] sm:$0xff] %v425_v16  ;;  %v808_v13 = vadd.f32 %v1174_v11, %v425_v16  ;;  %v878_v45 = vmul.f32 %v425_v16, %v425_v16  ;;  %776 = vst [vmem:[#allocation10 + $0x100] sm:$0xff] %v1843_v51 }
 0x146   :  { %v942_v17 = vadd.f32 %v879_v39, %v878_v45  ;;  %v1177_v41 = vpop.f32.mrb[2].mxu0  ;;  %v1846_v58 = vpop.f32.mrb[2].mxu1 }
 0x147   :  { %747 = vst [vmem:[#allocation10 + $0x18] sm:$0xff] %v1177_v41  ;;  %v435_v40 = vpop.f32.mrb[3].mxu0  ;;  %779 = vst [vmem:[#allocation10 + $0x118] sm:$0xff] %v1846_v58  ;;  %v1849_v18 = vpop.f32.mrb[3].mxu1  ;;  %v881_v42 = vmul.f32 %v1177_v41, %v1177_v41 }
 0x148   :  { %746 = vst [vmem:[#allocation10 + $0x10] sm:$0xff] %v435_v40  ;;  %v809_v24 = vadd.f32 %v808_v13, %v435_v40  ;;  %v880_v15 = vmul.f32 %v435_v40, %v435_v40  ;;  %778 = vst [vmem:[#allocation10 + $0x110] sm:$0xff] %v1849_v18 }
 0x14a   :  { %v943_v0 = vadd.f32 %v942_v17, %v880_v15  ;;  %v1180_v19 = vpop.f32.mrb[4].mxu0  ;;  %v810_v20 = vadd.f32 %v1177_v41, %v809_v24  ;;  %v1852_v28 = vpop.f32.mrb[4].mxu1 }
 0x14b   :  { %749 = vst [vmem:[#allocation10 + $0x28] sm:$0xff] %v1180_v19  ;;  %v445_v21 = vpop.f32.mrb[5].mxu0  ;;  %781 = vst [vmem:[#allocation10 + $0x128] sm:$0xff] %v1852_v28  ;;  %v1855_v29 = vpop.f32.mrb[5].mxu1  ;;  %v883_v30 = vmul.f32 %v1180_v19, %v1180_v19 }
 0x14c   :  { %748 = vst [vmem:[#allocation10 + $0x20] sm:$0xff] %v445_v21  ;;  %v811_v22 = vadd.f32 %v810_v20, %v445_v21  ;;  %v882_v23 = vmul.f32 %v445_v21, %v445_v21  ;;  %v944_v25 = vadd.f32 %v943_v0, %v881_v42  ;;  %780 = vst [vmem:[#allocation10 + $0x120] sm:$0xff] %v1855_v29 }
 0x14e   :  { %v945_v31 = vadd.f32 %v944_v25, %v882_v23  ;;  %v1183_v32 = vpop.f32.mrb[6].mxu0  ;;  %v812_v33 = vadd.f32 %v1180_v19, %v811_v22  ;;  %v1858_v48 = vpop.f32.mrb[6].mxu1 }
 0x14f   :  { %751 = vst [vmem:[#allocation10 + $0x38] sm:$0xff] %v1183_v32  ;;  %v455_v35 = vpop.f32.mrb[7].mxu0  ;;  %783 = vst [vmem:[#allocation10 + $0x138] sm:$0xff] %v1858_v48  ;;  %v1861_v49 = vpop.f32.mrb[7].mxu1  ;;  %v885_v50 = vmul.f32 %v1183_v32, %v1183_v32 }
 0x150   :  { %750 = vst [vmem:[#allocation10 + $0x30] sm:$0xff] %v455_v35  ;;  %v813_v36 = vadd.f32 %v812_v33, %v455_v35  ;;  %v884_v37 = vmul.f32 %v455_v35, %v455_v35  ;;  %v946_v38 = vadd.f32 %v945_v31, %v883_v30  ;;  %782 = vst [vmem:[#allocation10 + $0x130] sm:$0xff] %v1861_v49 }
 0x152   :  { %v947_v52 = vadd.f32 %v946_v38, %v884_v37  ;;  %v1186_v53 = vpop.f32.mrb[8].mxu0  ;;  %v814_v54 = vadd.f32 %v1183_v32, %v813_v36  ;;  %v1864_v59 = vpop.f32.mrb[8].mxu1 }
 0x153   :  { %753 = vst [vmem:[#allocation10 + $0x48] sm:$0xff] %v1186_v53  ;;  %v465_v55 = vpop.f32.mrb[9].mxu0  ;;  %785 = vst [vmem:[#allocation10 + $0x148] sm:$0xff] %v1864_v59  ;;  %v1867_v61 = vpop.f32.mrb[9].mxu1  ;;  %v887_v63 = vmul.f32 %v1186_v53, %v1186_v53 }
 0x154   :  { %752 = vst [vmem:[#allocation10 + $0x40] sm:$0xff] %v465_v55  ;;  %v815_v56 = vadd.f32 %v814_v54, %v465_v55  ;;  %v886_v10 = vmul.f32 %v465_v55, %v465_v55  ;;  %v948_v44 = vadd.f32 %v947_v52, %v885_v50  ;;  %784 = vst [vmem:[#allocation10 + $0x140] sm:$0xff] %v1867_v61 }
 0x156   :  { %v949_v1 = vadd.f32 %v948_v44, %v886_v10  ;;  %v1189_v14 = vpop.f32.mrb[10].mxu0  ;;  %v816_v6 = vadd.f32 %v1186_v53, %v815_v56  ;;  %v1870_v4 = vpop.f32.mrb[10].mxu1 }
 0x157   :  { %755 = vst [vmem:[#allocation10 + $0x58] sm:$0xff] %v1189_v14  ;;  %v475_v7 = vpop.f32.mrb[11].mxu0  ;;  %787 = vst [vmem:[#allocation10 + $0x158] sm:$0xff] %v1870_v4  ;;  %v1873_v47 = vpop.f32.mrb[11].mxu1  ;;  %v889_v62 = vmul.f32 %v1189_v14, %v1189_v14 }
 0x158   :  { %754 = vst [vmem:[#allocation10 + $0x50] sm:$0xff] %v475_v7  ;;  %v817_v12 = vadd.f32 %v816_v6, %v475_v7  ;;  %v888_v46 = vmul.f32 %v475_v7, %v475_v7  ;;  %v950_v60 = vadd.f32 %v949_v1, %v887_v63  ;;  %786 = vst [vmem:[#allocation10 + $0x150] sm:$0xff] %v1873_v47 }
 0x15a   :  { %v951_v5 = vadd.f32 %v950_v60, %v888_v46  ;;  %v1192_v26 = vpop.f32.mrb[12].mxu0  ;;  %v818_v2 = vadd.f32 %v1189_v14, %v817_v12  ;;  %v1876_v9 = vpop.f32.mrb[12].mxu1 }
 0x15b   :  { %757 = vst [vmem:[#allocation10 + $0x68] sm:$0xff] %v1192_v26  ;;  %v485_v3 = vpop.f32.mrb[13].mxu0  ;;  %789 = vst [vmem:[#allocation10 + $0x168] sm:$0xff] %v1876_v9  ;;  %v1879_v43 = vpop.f32.mrb[13].mxu1  ;;  %v891_v11 = vmul.f32 %v1192_v26, %v1192_v26 }
 0x15c   :  { %756 = vst [vmem:[#allocation10 + $0x60] sm:$0xff] %v485_v3  ;;  %v819_v27 = vadd.f32 %v818_v2, %v485_v3  ;;  %v890_v34 = vmul.f32 %v485_v3, %v485_v3  ;;  %v952_v8 = vadd.f32 %v951_v5, %v889_v62  ;;  %788 = vst [vmem:[#allocation10 + $0x160] sm:$0xff] %v1879_v43 }
 0x15e   :  { %v953_v39 = vadd.f32 %v952_v8, %v890_v34  ;;  %v1195_v16 = vpop.f32.mrb[14].mxu0  ;;  %v820_v13 = vadd.f32 %v1192_v26, %v819_v27  ;;  %v1882_v24 = vpop.f32.mrb[14].mxu1 }
 0x15f   :  { %759 = vst [vmem:[#allocation10 + $0x78] sm:$0xff] %v1195_v16  ;;  %v495_v45 = vpop.f32.mrb[15].mxu0  ;;  %791 = vst [vmem:[#allocation10 + $0x178] sm:$0xff] %v1882_v24  ;;  %v1885_v15 = vpop.f32.mrb[15].mxu1  ;;  %v893_v42 = vmul.f32 %v1195_v16, %v1195_v16 }
 0x160   :  { %758 = vst [vmem:[#allocation10 + $0x70] sm:$0xff] %v495_v45  ;;  %v821_v17 = vadd.f32 %v820_v13, %v495_v45  ;;  %v892_v41 = vmul.f32 %v495_v45, %v495_v45  ;;  %v954_v40 = vadd.f32 %v953_v39, %v891_v11  ;;  %790 = vst [vmem:[#allocation10 + $0x170] sm:$0xff] %v1885_v15 }
 0x162   :  { %v955_v0 = vadd.f32 %v954_v40, %v892_v41  ;;  %v1198_v19 = vpop.f32.mrb[16].mxu0  ;;  %v822_v20 = vadd.f32 %v1195_v16, %v821_v17  ;;  %v1888_v30 = vpop.f32.mrb[16].mxu1 }
 0x163   :  { %761 = vst [vmem:[#allocation10 + $0x88] sm:$0xff] %v1198_v19  ;;  %v505_v21 = vpop.f32.mrb[17].mxu0  ;;  %793 = vst [vmem:[#allocation10 + $0x188] sm:$0xff] %v1888_v30  ;;  %v1891_v31 = vpop.f32.mrb[17].mxu1  ;;  %v895_v32 = vmul.f32 %v1198_v19, %v1198_v19 }
 0x164   :  { %760 = vst [vmem:[#allocation10 + $0x80] sm:$0xff] %v505_v21  ;;  %v823_v22 = vadd.f32 %v822_v20, %v505_v21  ;;  %v894_v23 = vmul.f32 %v505_v21, %v505_v21  ;;  %v956_v25 = vadd.f32 %v955_v0, %v893_v42  ;;  %792 = vst [vmem:[#allocation10 + $0x180] sm:$0xff] %v1891_v31 }
 0x166   :  { %v957_v33 = vadd.f32 %v956_v25, %v894_v23  ;;  %v1201_v35 = vpop.f32.mrb[18].mxu0  ;;  %v824_v36 = vadd.f32 %v1198_v19, %v823_v22  ;;  %v1894_v53 = vpop.f32.mrb[18].mxu1 }
 0x167   :  { %763 = vst [vmem:[#allocation10 + $0x98] sm:$0xff] %v1201_v35  ;;  %v515_v37 = vpop.f32.mrb[19].mxu0  ;;  %795 = vst [vmem:[#allocation10 + $0x198] sm:$0xff] %v1894_v53  ;;  %v1897_v54 = vpop.f32.mrb[19].mxu1  ;;  %v897_v55 = vmul.f32 %v1201_v35, %v1201_v35 }
 0x168   :  { %762 = vst [vmem:[#allocation10 + $0x90] sm:$0xff] %v515_v37  ;;  %v825_v38 = vadd.f32 %v824_v36, %v515_v37  ;;  %v896_v50 = vmul.f32 %v515_v37, %v515_v37  ;;  %v958_v52 = vadd.f32 %v957_v33, %v895_v32  ;;  %794 = vst [vmem:[#allocation10 + $0x190] sm:$0xff] %v1897_v54 }
 0x16a   :  { %v959_v56 = vadd.f32 %v958_v52, %v896_v50  ;;  %v1204_v10 = vpop.f32.mrb[20].mxu0  ;;  %v826_v44 = vadd.f32 %v1201_v35, %v825_v38  ;;  %v1900_v7 = vpop.f32.mrb[20].mxu1 }
 0x16b   :  { %765 = vst [vmem:[#allocation10 + $0xa8] sm:$0xff] %v1204_v10  ;;  %v525_v63 = vpop.f32.mrb[21].mxu0  ;;  %797 = vst [vmem:[#allocation10 + $0x1a8] sm:$0xff] %v1900_v7  ;;  %v1903_v12 = vpop.f32.mrb[21].mxu1  ;;  %v899_v46 = vmul.f32 %v1204_v10, %v1204_v10 }
 0x16c   :  { %764 = vst [vmem:[#allocation10 + $0xa0] sm:$0xff] %v525_v63  ;;  %v827_v1 = vadd.f32 %v826_v44, %v525_v63  ;;  %v898_v14 = vmul.f32 %v525_v63, %v525_v63  ;;  %v960_v6 = vadd.f32 %v959_v56, %v897_v55  ;;  %796 = vst [vmem:[#allocation10 + $0x1a0] sm:$0xff] %v1903_v12 }
 0x16e   :  { %v961_v60 = vadd.f32 %v960_v6, %v898_v14  ;;  %v1207_v62 = vpop.f32.mrb[22].mxu0  ;;  %v828_v5 = vadd.f32 %v1204_v10, %v827_v1  ;;  %v1906_v34 = vpop.f32.mrb[22].mxu1 }
 0x16f   :  { %767 = vst [vmem:[#allocation10 + $0xb8] sm:$0xff] %v1207_v62  ;;  %v535_v26 = vpop.f32.mrb[23].mxu0  ;;  %799 = vst [vmem:[#allocation10 + $0x1b8] sm:$0xff] %v1906_v34  ;;  %v1909_v8 = vpop.f32.mrb[23].mxu1  ;;  %v901_v11 = vmul.f32 %v1207_v62, %v1207_v62 }
 0x170   :  { %766 = vst [vmem:[#allocation10 + $0xb0] sm:$0xff] %v535_v26  ;;  %v829_v2 = vadd.f32 %v828_v5, %v535_v26  ;;  %v900_v3 = vmul.f32 %v535_v26, %v535_v26  ;;  %v962_v27 = vadd.f32 %v961_v60, %v899_v46  ;;  %798 = vst [vmem:[#allocation10 + $0x1b0] sm:$0xff] %v1909_v8 }
 0x172   :  { %v963_v39 = vadd.f32 %v962_v27, %v900_v3  ;;  %v1210_v16 = vpop.f32.mrb[24].mxu0  ;;  %v830_v13 = vadd.f32 %v1207_v62, %v829_v2  ;;  %v1912_v42 = vpop.f32.mrb[24].mxu1 }
 0x173   :  { %769 = vst [vmem:[#allocation10 + $0xc8] sm:$0xff] %v1210_v16  ;;  %v545_v45 = vpop.f32.mrb[25].mxu0  ;;  %801 = vst [vmem:[#allocation10 + $0x1c8] sm:$0xff] %v1912_v42  ;;  %v1915_v0 = vpop.f32.mrb[25].mxu1  ;;  %v903_v19 = vmul.f32 %v1210_v16, %v1210_v16 }
 0x174   :  { %768 = vst [vmem:[#allocation10 + $0xc0] sm:$0xff] %v545_v45  ;;  %v831_v17 = vadd.f32 %v830_v13, %v545_v45  ;;  %v902_v41 = vmul.f32 %v545_v45, %v545_v45  ;;  %v964_v40 = vadd.f32 %v963_v39, %v901_v11  ;;  %800 = vst [vmem:[#allocation10 + $0x1c0] sm:$0xff] %v1915_v0 }
 0x175   :  { %v910_v13 = vmul.f32 %v1843_v51, %v1843_v51 }
 0x176   :  { %v965_v20 = vadd.f32 %v964_v40, %v902_v41  ;;  %v1213_v21 = vpop.f32.mrb[26].mxu0  ;;  %v832_v22 = vadd.f32 %v1210_v16, %v831_v17  ;;  %v1918_v35 = vpop.f32.mrb[26].mxu1 }
 0x177   :  { %771 = vst [vmem:[#allocation10 + $0xd8] sm:$0xff] %v1213_v21  ;;  %v555_v23 = vpop.f32.mrb[27].mxu0  ;;  %803 = vst [vmem:[#allocation10 + $0x1d8] sm:$0xff] %v1918_v35  ;;  %v1921_v36 = vpop.f32.mrb[27].mxu1  ;;  %v905_v37 = vmul.f32 %v1213_v21, %v1213_v21 }
 0x178   :  { %770 = vst [vmem:[#allocation10 + $0xd0] sm:$0xff] %v555_v23  ;;  %v833_v25 = vadd.f32 %v832_v22, %v555_v23  ;;  %v904_v32 = vmul.f32 %v555_v23, %v555_v23  ;;  %v966_v33 = vadd.f32 %v965_v20, %v903_v19  ;;  %802 = vst [vmem:[#allocation10 + $0x1d0] sm:$0xff] %v1921_v36 }
 0x17a   :  { %v967_v38 = vadd.f32 %v966_v33, %v904_v32  ;;  %v1216_v50 = vpop.f32.mrb[28].mxu0  ;;  %v834_v52 = vadd.f32 %v1213_v21, %v833_v25  ;;  %v1924_v63 = vpop.f32.mrb[28].mxu1 }
 0x17b   :  { %773 = vst [vmem:[#allocation10 + $0xe8] sm:$0xff] %v1216_v50  ;;  %v565_v55 = vpop.f32.mrb[29].mxu0  ;;  %805 = vst [vmem:[#allocation10 + $0x1e8] sm:$0xff] %v1924_v63  ;;  %v1927_v1 = vpop.f32.mrb[29].mxu1  ;;  %v907_v14 = vmul.f32 %v1216_v50, %v1216_v50 }
 0x17c   :  { %772 = vst [vmem:[#allocation10 + $0xe0] sm:$0xff] %v565_v55  ;;  %v835_v56 = vadd.f32 %v834_v52, %v565_v55  ;;  %v906_v10 = vmul.f32 %v565_v55, %v565_v55  ;;  %v968_v44 = vadd.f32 %v967_v38, %v905_v37  ;;  %804 = vst [vmem:[#allocation10 + $0x1e0] sm:$0xff] %v1927_v1 }
 0x17e   :  { %v969_v6 = vadd.f32 %v968_v44, %v906_v10  ;;  %v1219_v46 = vpop.f32.mrb[30].mxu0  ;;  %v836_v60 = vadd.f32 %v1216_v50, %v835_v56  ;;  %v1930_v3 = vpop.f32.mrb[30].mxu1 }
 0x17f   :  { %775 = vst [vmem:[#allocation10 + $0xf8] sm:$0xff] %v1219_v46  ;;  %v575_v62 = vpop.f32.mrb[31].mxu0  ;;  %807 = vst [vmem:[#allocation10 + $0x1f8] sm:$0xff] %v1930_v3  ;;  %v1933_v27 = vpop.f32.mrb[31].mxu1  ;;  %v909_v11 = vmul.f32 %v1219_v46, %v1219_v46 }
 0x180   :  { %774 = vst [vmem:[#allocation10 + $0xf0] sm:$0xff] %v575_v62  ;;  %v837_v5 = vadd.f32 %v836_v60, %v575_v62  ;;  %v908_v26 = vmul.f32 %v575_v62, %v575_v62  ;;  %v970_v2 = vadd.f32 %v969_v6, %v907_v14  ;;  %806 = vst [vmem:[#allocation10 + $0x1f0] sm:$0xff] %v1933_v27 }
 0x182   :  { %v838_v39 = vadd.f32 %v1219_v46, %v837_v5  ;;  %v971_v16 = vadd.f32 %v970_v2, %v908_v26 }
 0x183   :  { %1424 = shalt.err (!%p1421_p8)
}
 0x184   :  { %s1425_s28 = scalar_lea.hbm %s2083_s4, 8192 }
 0x185   :  { %p1426_p9 = scmp.ne.s32.totalorder %s2083_s4, %s1425_s28  ;;  %p1429_p10 = scmp.lt.u32.totalorder %s1425_s28, %s2083_s4 }
 0x187   :  { %p1431_p11 = pnand %p1429_p10, %p1426_p9 }
 0x189   :  { %1434 = shalt.err (!%p1431_p11)
}
 0x18a   :  { %1023 = dma.vmem_to_hbm [thread:$0]  %s1018_s23, 8192, %s2083_s4, [#allocation4], %s1491_s9, %s1491_s9, %s1492_s10   ;;  %v972_v45 = vadd.f32 %v971_v16, %v909_v11  ;;  %v839_v17 = vadd.f32 %v838_v39, %v1843_v51  ;;  %v911_v41 = vmul.f32 %v1840_v57, %v1840_v57  ;;  %v912_v20 = vmul.f32 %v1849_v18, %v1849_v18 }
 0x18b   :  { %v913_v23 = vmul.f32 %v1846_v58, %v1846_v58  ;;  %v914_v51 = vmul.f32 %v1855_v29, %v1855_v29  ;;  %s1496_s4 = smov [#allocation11]   ;;  %s1497_s10 = smov [#allocation13]  }
 0x18c   :  { %v973_v40 = vadd.f32 %v972_v45, %v910_v13  ;;  %v840_v19 = vadd.f32 %v1840_v57, %v839_v17  ;;  %v915_v57 = vmul.f32 %v1852_v28, %v1852_v28  ;;  %s1030_s9 = sshll.u32 %s1496_s4, 4  ;;  %s1040_s24 = sshll.u32 %s1497_s10, 4  ;;  %s1031_s9 = int_to_ptr.vmem [resolvable:$true] %s1030_s9  ;;  %s2047_s24 = int_to_ptr.vmem [resolvable:$true] %s1040_s24 }
 0x18d   :  { %s1435_s12 = scalar_lea.vmem %s1031_s9, 16  ;;  %s1439_s13 = scalar_lea.vmem %s1031_s9, 32 }
 0x18e   :  { %v841_v21 = vadd.f32 %v840_v19, %v1849_v18  ;;  %v974_v22 = vadd.f32 %v973_v40, %v911_v41  ;;  %v916_v18 = vmul.f32 %v1861_v49, %v1861_v49  ;;  %p1436_p12 = scmp.ne.s32.totalorder %s1031_s9, %s1435_s12  ;;  %p1440_p13 = scmp.lt.s32.totalorder %s1031_s9, %s1031_s9 }
 0x18f   :  { %p1441_p0 = scmp.lt.s32.totalorder %s1439_s13, %s1435_s12 }
 0x190   :  { %v975_v25 = vadd.f32 %v974_v22, %v912_v20  ;;  %v842_v32 = vadd.f32 %v1846_v58, %v841_v21  ;;  %v917_v58 = vmul.f32 %v1858_v48, %v1858_v48 }
 0x191   :  { %p1442_p1 = por %p1441_p0, %p1440_p13 }
 0x192   :  { %v843_v33 = vadd.f32 %v842_v32, %v1855_v29  ;;  %v976_v37 = vadd.f32 %v975_v25, %v913_v23  ;;  %v918_v29 = vmul.f32 %v1867_v61, %v1867_v61 }
 0x193   :  { %p1443_p2 = pnand %p1442_p1, %p1436_p12 }
 0x194   :  { %v977_v38 = vadd.f32 %v976_v37, %v914_v51  ;;  %v844_v50 = vadd.f32 %v1852_v28, %v843_v33  ;;  %v919_v28 = vmul.f32 %v1864_v59, %v1864_v59 }
 0x196   :  { %v845_v52 = vadd.f32 %v844_v50, %v1861_v49  ;;  %v978_v55 = vadd.f32 %v977_v38, %v915_v57  ;;  %v920_v49 = vmul.f32 %v1873_v47, %v1873_v47 }
 0x198   :  { %v979_v56 = vadd.f32 %v978_v55, %v916_v18  ;;  %v846_v10 = vadd.f32 %v1858_v48, %v845_v52  ;;  %v921_v48 = vmul.f32 %v1870_v4, %v1870_v4 }
 0x19a   :  { %v847_v44 = vadd.f32 %v846_v10, %v1867_v61  ;;  %v980_v14 = vadd.f32 %v979_v56, %v917_v58  ;;  %v922_v61 = vmul.f32 %v1879_v43, %v1879_v43 }
 0x19c   :  { %v981_v6 = vadd.f32 %v980_v14, %v918_v29  ;;  %v848_v46 = vadd.f32 %v1864_v59, %v847_v44  ;;  %v923_v59 = vmul.f32 %v1876_v9, %v1876_v9 }
 0x19e   :  { %v849_v60 = vadd.f32 %v848_v46, %v1873_v47  ;;  %v982_v62 = vadd.f32 %v981_v6, %v919_v28  ;;  %v924_v47 = vmul.f32 %v1885_v15, %v1885_v15 }
 0x1a0   :  { %v983_v5 = vadd.f32 %v982_v62, %v920_v49  ;;  %v850_v26 = vadd.f32 %v1870_v4, %v849_v60  ;;  %v925_v4 = vmul.f32 %v1882_v24, %v1882_v24 }
 0x1a2   :  { %v851_v2 = vadd.f32 %v850_v26, %v1879_v43  ;;  %v984_v11 = vadd.f32 %v983_v5, %v921_v48  ;;  %v926_v43 = vmul.f32 %v1891_v31, %v1891_v31 }
 0x1a4   :  { %v985_v39 = vadd.f32 %v984_v11, %v922_v61  ;;  %v852_v16 = vadd.f32 %v1876_v9, %v851_v2  ;;  %v927_v9 = vmul.f32 %v1888_v30, %v1888_v30 }
 0x1a6   :  { %v853_v13 = vadd.f32 %v852_v16, %v1885_v15  ;;  %v986_v45 = vadd.f32 %v985_v39, %v923_v59  ;;  %v928_v15 = vmul.f32 %v1897_v54, %v1897_v54 }
 0x1a8   :  { %v987_v17 = vadd.f32 %v986_v45, %v924_v47  ;;  %v854_v41 = vadd.f32 %v1882_v24, %v853_v13  ;;  %v929_v24 = vmul.f32 %v1894_v53, %v1894_v53 }
 0x1aa   :  { %v855_v40 = vadd.f32 %v854_v41, %v1891_v31  ;;  %v988_v19 = vadd.f32 %v987_v17, %v925_v4  ;;  %v930_v31 = vmul.f32 %v1903_v12, %v1903_v12 }
 0x1ac   :  { %v989_v20 = vadd.f32 %v988_v19, %v926_v43  ;;  %v856_v21 = vadd.f32 %v1888_v30, %v855_v40  ;;  %v931_v30 = vmul.f32 %v1900_v7, %v1900_v7 }
 0x1ae   :  { %v857_v22 = vadd.f32 %v856_v21, %v1897_v54  ;;  %v990_v23 = vadd.f32 %v989_v20, %v927_v9  ;;  %v932_v54 = vmul.f32 %v1909_v8, %v1909_v8 }
 0x1b0   :  { %v991_v25 = vadd.f32 %v990_v23, %v928_v15  ;;  %v858_v32 = vadd.f32 %v1894_v53, %v857_v22  ;;  %v933_v53 = vmul.f32 %v1906_v34, %v1906_v34 }
 0x1b2   :  { %v859_v51 = vadd.f32 %v858_v32, %v1903_v12  ;;  %v992_v33 = vadd.f32 %v991_v25, %v929_v24  ;;  %v934_v12 = vmul.f32 %v1915_v0, %v1915_v0 }
 0x1b4   :  { %v993_v37 = vadd.f32 %v992_v33, %v930_v31  ;;  %v860_v57 = vadd.f32 %v1900_v7, %v859_v51  ;;  %v935_v7 = vmul.f32 %v1912_v42, %v1912_v42 }
 0x1b6   :  { %v861_v38 = vadd.f32 %v860_v57, %v1909_v8  ;;  %v994_v50 = vadd.f32 %v993_v37, %v931_v30  ;;  %v936_v8 = vmul.f32 %v1921_v36, %v1921_v36 }
 0x1b8   :  { %v995_v18 = vadd.f32 %v994_v50, %v932_v54  ;;  %v862_v52 = vadd.f32 %v1906_v34, %v861_v38  ;;  %v937_v34 = vmul.f32 %v1918_v35, %v1918_v35 }
 0x1ba   :  { %v863_v55 = vadd.f32 %v862_v52, %v1915_v0  ;;  %v996_v58 = vadd.f32 %v995_v18, %v933_v53  ;;  %v938_v0 = vmul.f32 %v1927_v1, %v1927_v1 }
 0x1bc   :  { %v997_v56 = vadd.f32 %v996_v58, %v934_v12  ;;  %v864_v10 = vadd.f32 %v1912_v42, %v863_v55  ;;  %v939_v42 = vmul.f32 %v1924_v63, %v1924_v63 }
 0x1be   :  { %v865_v29 = vadd.f32 %v864_v10, %v1921_v36  ;;  %v998_v44 = vadd.f32 %v997_v56, %v935_v7  ;;  %v940_v36 = vmul.f32 %v1933_v27, %v1933_v27 }
 0x1c0   :  { %v999_v14 = vadd.f32 %v998_v44, %v936_v8  ;;  %v866_v28 = vadd.f32 %v1918_v35, %v865_v29  ;;  %v941_v35 = vmul.f32 %v1930_v3, %v1930_v3 }
 0x1c2   :  { %v867_v6 = vadd.f32 %v866_v28, %v1927_v1  ;;  %v1000_v46 = vadd.f32 %v999_v14, %v937_v34 }
 0x1c4   :  { %v1001_v49 = vadd.f32 %v1000_v46, %v938_v0  ;;  %v868_v60 = vadd.f32 %v1924_v63, %v867_v6 }
 0x1c6   :  { %v869_v62 = vadd.f32 %v868_v60, %v1933_v27  ;;  %v1002_v48 = vadd.f32 %v1001_v49, %v939_v42 }
 0x1c8   :  { %v870_v5 = vadd.f32 %v1930_v3, %v869_v62  ;;  %v1003_v26 = vadd.f32 %v1002_v48, %v940_v36 }
 0x1ca   :  { %v871_v1 = vrot.slane %v870_v5, 4  ;;  %v1004_v61 = vadd.f32 %v1003_v26, %v941_v35 }
 0x1cc   :  { %v872_v2 = vadd.f32 %v871_v1, %v870_v5  ;;  %v1005_v11 = vrot.slane %v1004_v61, 4 }
 0x1ce   :  { %v1006_v59 = vadd.f32 %v1005_v11, %v1004_v61  ;;  %v873_v39 = vrot.slane %v872_v2, 2 }
 0x1d0   :  { %v874_v16 = vadd.f32 %v873_v39, %v872_v2  ;;  %v1007_v63 = vrot.slane %v1006_v59, 2 }
 0x1d2   :  { %v875_v47 = vrot.slane %v874_v16, 1  ;;  %v1008_v13 = vadd.f32 %v1007_v63, %v1006_v59 }
 0x1d4   :  { %v876_v27 = vadd.f32 %v875_v47, %v874_v16  ;;  %v1009_v45 = vrot.slane %v1008_v13, 1 }
 0x1d6   :  { %877 = vst [vmem:[#allocation11] sm:$0x1] %v876_v27  ;;  %v1010_v3 = vadd.f32 %v1009_v45, %v1008_v13 }
 0x1d7   :  { %1446 = shalt.err (!%p1443_p2)
}
 0x1d8   :  { %s1447_s16 = scalar_lea.hbm %s2084_s5, 16 }
 0x1d9   :  { %p1448_p3 = scmp.ne.s32.totalorder %s2084_s5, %s1447_s16  ;;  %p1451_p4 = scmp.lt.u32.totalorder %s1447_s16, %s2084_s5 }
 0x1db   :  { %p1453_p5 = pnand %p1451_p4, %p1448_p3 }
 0x1dd   :  { %1456 = shalt.err (!%p1453_p5)
}
 0x1de   :  { %1033 = dma.vmem_to_hbm [thread:$0]  %s1031_s9, 16, %s2084_s5, [#allocation12]   ;;  %1011 = vst [vmem:[#allocation13] sm:$0x1] %v1010_v3 }
 0x1df   :  { %s1457_s2 = scalar_lea.vmem %s2047_s24, 16  ;;  %s1461_s22 = scalar_lea.vmem %s2047_s24, 32 }
 0x1e0   :  { %p1458_p6 = scmp.ne.s32.totalorder %s2047_s24, %s1457_s2  ;;  %p1462_p7 = scmp.lt.s32.totalorder %s2047_s24, %s2047_s24 }
 0x1e1   :  { %p1463_p8 = scmp.lt.s32.totalorder %s1461_s22, %s1457_s2 }
 0x1e3   :  { %p1464_p9 = por %p1463_p8, %p1462_p7 }
 0x1e5   :  { %p1465_p10 = pnand %p1464_p9, %p1458_p6 }
 0x1e7   :  { %1468 = shalt.err (!%p1465_p10)
}
 0x1e8   :  { %s1469_s25 = scalar_lea.hbm %s2085_s6, 16 }
 0x1e9   :  { %p1470_p11 = scmp.ne.s32.totalorder %s2085_s6, %s1469_s25  ;;  %p1473_p12 = scmp.lt.u32.totalorder %s1469_s25, %s2085_s6 }
 0x1eb   :  { %p1475_p13 = pnand %p1473_p12, %p1470_p11 }
 0x1ed   :  { %1478 = shalt.err (!%p1475_p13)
}
 0x1ee   :  { %1043 = dma.vmem_to_hbm [thread:$0]  %s2047_s24, 16, %s2085_s6, [#allocation12]  }
 0x1ef   :  { %1485 = dma.done.wait [#allocation4], 8192  }
 0x1f0   :  { %1486 = vsyncadd [#allocation4], 4294959104 }
 0x1f1   :  { %1487 = dma.done.wait [#allocation12], 32  }
 0x1f2   :  { %1488 = vsyncadd [#allocation12], 4294967264 }
 0x1f3   :  { %1053 = vsyncpa [#allocation3], 1 }
 0x1f4   :  { %1054 = vsyncpa [#allocation6], 1 }
 0x1f5   :  { %1055 = vsyncpa [#allocation9], 1 }
 0x1f6   :  { %1056 = vsyncpa [#allocation4], 1 }
 0x1f7   :  { %1057 = vsyncpa [#allocation12], 1 }

// kernel: resnext_block_forward.7
= control target key start
LH: loop header
LB: loop body
LE: loop exit
PB: predicated region body
PF: predicated region fallthrough
CT: control target
= control target key end

     0   :  { %11 = vsyncpa [#allocation3], 0  ;;  %s1285_s0 = inlined_call_operand.hbm [shape: f32[512,128], index: 0, kind: input, shape index: {}]   ;;  %s1286_s1 = inlined_call_operand.hbm [shape: f32[512,128], index: 1, kind: input, shape index: {}]   ;;  %s1287_s2 = inlined_call_operand.hbm [shape: f32[1,128], index: 2, kind: input, shape index: {}]   ;;  %s1288_s3 = inlined_call_operand.hbm [shape: f32[1,128], index: 3, kind: input, shape index: {}]   ;;  %s1289_s4 = inlined_call_operand.hbm [shape: f32[1,128], index: 4, kind: input, shape index: {}]   ;;  %s1290_s5 = inlined_call_operand.hbm [shape: f32[1,128], index: 5, kind: input, shape index: {}]   ;;  %s1291_s6 = inlined_call_operand.hbm [shape: f32[512,128], index: 6, kind: output, shape index: {}]  }
   0x1   :  { %12 = vsyncpa [#allocation6], 0 }
   0x2   :  { %13 = vsyncpa [#allocation9], 0 }
   0x3   :  { %14 = vsyncpa [#allocation12], 0 }
   0x4   :  { %15 = vsyncpa [#allocation4], 0  ;;  %s903_s21 = smov [#allocation5]   ;;  %s904_s23 = smov [#allocation8]  }
   0x5   :  { %s33_s22 = sshll.u32 %s903_s21, 4  ;;  %s56_s24 = sshll.u32 %s904_s23, 4  ;;  %s34_s22 = int_to_ptr.vmem [resolvable:$true] %s33_s22  ;;  %s947_s24 = int_to_ptr.vmem [resolvable:$true] %s56_s24 }
   0x6   :  { %s739_s27 = scalar_lea.hbm %s1286_s1, 8192 }
   0x7   :  { %p740_p0 = scmp.ne.s32.totalorder %s1286_s1, %s739_s27  ;;  %p743_p1 = scmp.lt.u32.totalorder %s739_s27, %s1286_s1 }
   0x9   :  { %p745_p2 = pnand %p743_p1, %p740_p0 }
   0xb   :  { %748 = shalt.err (!%p745_p2)
}
   0xc   :  { %s749_s8 = scalar_lea.vmem %s34_s22, 8192  ;;  %p754_p4 = scmp.lt.s32.totalorder %s34_s22, %s34_s22 }
   0xd   :  { %p750_p3 = scmp.ne.s32.totalorder %s34_s22, %s749_s8  ;;  %p755_p5 = scmp.lt.s32.totalorder %s749_s8, %s749_s8 }
   0xf   :  { %p756_p6 = por %p755_p5, %p754_p4 }
  0x11   :  { %p757_p7 = pnand %p756_p6, %p750_p3 }
  0x13   :  { %760 = shalt.err (!%p757_p7)
}
  0x14   :  { %s905_s9 = smov 128   ;;  %s906_s10 = smov 8  }
  0x15   :  { %39 = dma.hbm_to_vmem [thread:$0]  %s1286_s1, 8192, %s34_s22, [#allocation6], %s905_s9, %s905_s9, %s906_s10  }
  0x16   :  { %s761_s15 = scalar_lea.hbm %s1288_s3, 16 }
  0x17   :  { %p762_p8 = scmp.ne.s32.totalorder %s1288_s3, %s761_s15  ;;  %p765_p9 = scmp.lt.u32.totalorder %s761_s15, %s1288_s3 }
  0x19   :  { %p767_p10 = pnand %p765_p9, %p762_p8 }
  0x1b   :  { %770 = shalt.err (!%p767_p10)
}
  0x1c   :  { %s771_s20 = scalar_lea.vmem %s947_s24, 16  ;;  %s775_s1 = scalar_lea.vmem %s947_s24, 32 }
  0x1d   :  { %p772_p11 = scmp.ne.s32.totalorder %s947_s24, %s771_s20  ;;  %p776_p12 = scmp.lt.s32.totalorder %s947_s24, %s947_s24 }
  0x1e   :  { %p777_p13 = scmp.lt.s32.totalorder %s775_s1, %s771_s20 }
  0x20   :  { %p778_p0 = por %p777_p13, %p776_p12 }
  0x22   :  { %p779_p1 = pnand %p778_p0, %p772_p11 }
  0x24   :  { %782 = shalt.err (!%p779_p1)
}
  0x25   :  { %59 = dma.hbm_to_vmem [thread:$0]  %s1288_s3, 16, %s947_s24, [#allocation9]  }
  0x26   :  { %s907_s23 = smov [#allocation2]   ;;  %s908_s26 = smov [#allocation7]  }
  0x27   :  { %s21_s25 = sshll.u32 %s907_s23, 4  ;;  %s46_s27 = sshll.u32 %s908_s26, 4  ;;  %s22_s25 = int_to_ptr.vmem [resolvable:$true] %s21_s25  ;;  %s47_s27 = int_to_ptr.vmem [resolvable:$true] %s46_s27 }
  0x28   :  { %s783_s30 = scalar_lea.hbm %s1285_s0, 8192 }
  0x29   :  { %p784_p2 = scmp.ne.s32.totalorder %s1285_s0, %s783_s30  ;;  %p787_p3 = scmp.lt.u32.totalorder %s783_s30, %s1285_s0 }
  0x2b   :  { %p789_p4 = pnand %p787_p3, %p784_p2 }
  0x2d   :  { %792 = shalt.err (!%p789_p4)
}
  0x2e   :  { %s793_s3 = scalar_lea.vmem %s22_s25, 8192  ;;  %p798_p6 = scmp.lt.s32.totalorder %s22_s25, %s22_s25 }
  0x2f   :  { %p794_p5 = scmp.ne.s32.totalorder %s22_s25, %s793_s3  ;;  %p799_p7 = scmp.lt.s32.totalorder %s793_s3, %s793_s3 }
  0x31   :  { %p800_p8 = por %p799_p7, %p798_p6 }
  0x33   :  { %p801_p9 = pnand %p800_p8, %p794_p5 }
  0x35   :  { %804 = shalt.err (!%p801_p9)
}
  0x36   :  { %27 = dma.hbm_to_vmem [thread:$0]  %s1285_s0, 8192, %s22_s25, [#allocation3], %s905_s9, %s905_s9, %s906_s10  }
  0x37   :  { %s805_s16 = scalar_lea.hbm %s1287_s2, 16 }
  0x38   :  { %p806_p10 = scmp.ne.s32.totalorder %s1287_s2, %s805_s16  ;;  %p809_p11 = scmp.lt.u32.totalorder %s805_s16, %s1287_s2 }
  0x3a   :  { %p811_p12 = pnand %p809_p11, %p806_p10 }
  0x3c   :  { %814 = shalt.err (!%p811_p12)
}
  0x3d   :  { %s815_s1 = scalar_lea.vmem %s47_s27, 16  ;;  %s819_s21 = scalar_lea.vmem %s47_s27, 32 }
  0x3e   :  { %p816_p13 = scmp.ne.s32.totalorder %s47_s27, %s815_s1  ;;  %p820_p0 = scmp.lt.s32.totalorder %s47_s27, %s47_s27 }
  0x3f   :  { %p821_p1 = scmp.lt.s32.totalorder %s819_s21, %s815_s1 }
  0x41   :  { %p822_p2 = por %p821_p1, %p820_p0 }
  0x43   :  { %p823_p3 = pnand %p822_p2, %p816_p13 }
  0x45   :  { %826 = shalt.err (!%p823_p3)
}
  0x46   :  { %49 = dma.hbm_to_vmem [thread:$0]  %s1287_s2, 16, %s47_s27, [#allocation6]  }
  0x47   :  { %s909_s23 = smov [#allocation10]   ;;  %s910_s26 = smov [#allocation11]  }
  0x48   :  { %s66_s25 = sshll.u32 %s909_s23, 4  ;;  %s76_s28 = sshll.u32 %s910_s26, 4  ;;  %s67_s25 = int_to_ptr.vmem [resolvable:$true] %s66_s25  ;;  %s77_s28 = int_to_ptr.vmem [resolvable:$true] %s76_s28 }
  0x49   :  { %s827_s7 = scalar_lea.hbm %s1289_s4, 16 }
  0x4a   :  { %p828_p4 = scmp.ne.s32.totalorder %s1289_s4, %s827_s7  ;;  %p831_p5 = scmp.lt.u32.totalorder %s827_s7, %s1289_s4 }
  0x4c   :  { %p833_p6 = pnand %p831_p5, %p828_p4 }
  0x4e   :  { %836 = shalt.err (!%p833_p6)
}
  0x4f   :  { %s837_s2 = scalar_lea.vmem %s67_s25, 16  ;;  %s841_s27 = scalar_lea.vmem %s67_s25, 32 }
  0x50   :  { %p838_p7 = scmp.ne.s32.totalorder %s67_s25, %s837_s2  ;;  %p842_p8 = scmp.lt.s32.totalorder %s67_s25, %s67_s25 }
  0x51   :  { %p843_p9 = scmp.lt.s32.totalorder %s841_s27, %s837_s2 }
  0x53   :  { %p844_p10 = por %p843_p9, %p842_p8 }
  0x55   :  { %p845_p11 = pnand %p844_p10, %p838_p7 }
  0x57   :  { %848 = shalt.err (!%p845_p11)
}
  0x58   :  { %69 = dma.hbm_to_vmem [thread:$0]  %s1289_s4, 16, %s67_s25, [#allocation9]  }
  0x59   :  { %s849_s16 = scalar_lea.hbm %s1290_s5, 16 }
  0x5a   :  { %p850_p12 = scmp.ne.s32.totalorder %s1290_s5, %s849_s16  ;;  %p853_p13 = scmp.lt.u32.totalorder %s849_s16, %s1290_s5 }
  0x5c   :  { %p855_p0 = pnand %p853_p13, %p850_p12 }
  0x5e   :  { %858 = shalt.err (!%p855_p0)
}
  0x5f   :  { %s859_s1 = scalar_lea.vmem %s77_s28, 16  ;;  %s863_s21 = scalar_lea.vmem %s77_s28, 32 }
  0x60   :  { %p860_p1 = scmp.ne.s32.totalorder %s77_s28, %s859_s1  ;;  %p864_p2 = scmp.lt.s32.totalorder %s77_s28, %s77_s28 }
  0x61   :  { %p865_p3 = scmp.lt.s32.totalorder %s863_s21, %s859_s1 }
  0x63   :  { %p866_p4 = por %p865_p3, %p864_p2 }
  0x65   :  { %p867_p5 = pnand %p866_p4, %p860_p1 }
  0x67   :  { %870 = shalt.err (!%p867_p5)
}
  0x68   :  { %79 = dma.hbm_to_vmem [thread:$0]  %s1290_s5, 16, %s77_s28, [#allocation12]  }
  0x69   :  { %893 = dma.done.wait [#allocation3], 8192  }
  0x6a   :  { %894 = vsyncadd [#allocation3], 4294959104 }
  0x6b   :  { %895 = dma.done.wait [#allocation6], 8208  }
  0x6c   :  { %896 = vsyncadd [#allocation6], 4294959088 }
  0x6d   :  { %897 = dma.done.wait [#allocation9], 32  }
  0x6e   :  { %898 = vsyncadd [#allocation9], 4294967264 }
  0x6f   :  { %899 = dma.done.wait [#allocation12], 16  }
  0x70   :  { %900 = vsyncadd [#allocation12], 4294967280  ;;  %v98_v0 = vld [vmem:[#allocation2] sm:$0xff]  ;;  %v99_v8 = vld [vmem:[#allocation2 + $0x8] sm:$0xff]  ;;  %s911_s5 = smov [#allocation13]  }
  0x71   :  { %v1033_v1 = vld [vmem:[#allocation7] ss:$0 sm:$0xff]  ;;  %v1035_v2 = vld [vmem:[#allocation8] ss:$0 sm:$0xff]  ;;  %v1038_v5 = vld [vmem:[#allocation10] ss:$0 sm:$0xff] }
  0x72   :  { %v169_v3 = vmul.f32 %v1033_v1, %v98_v0  ;;  %v304_v4 = vld [vmem:[#allocation5] sm:$0xff]  ;;  %v305_v9 = vld [vmem:[#allocation5 + $0x8] sm:$0xff]  ;;  %v100_v10 = vld [vmem:[#allocation2 + $0x10] sm:$0xff]  ;;  %v170_v12 = vmul.f32 %v1033_v1, %v99_v8  ;;  %s707_s22 = sshll.u32 %s911_s5, 4  ;;  %s708_s22 = int_to_ptr.vmem [resolvable:$true] %s707_s22 }
  0x73   :  { %v1040_v6 = vld [vmem:[#allocation11] ss:$0 sm:$0xff]  ;;  %v375_v7 = vmul.f32 %v1038_v5, %v304_v4  ;;  %v376_v13 = vmul.f32 %v1038_v5, %v305_v9  ;;  %v171_v14 = vmul.f32 %v1033_v1, %v100_v10  ;;  %v306_v15 = vld [vmem:[#allocation5 + $0x10] sm:$0xff]  ;;  %v101_v16 = vld [vmem:[#allocation2 + $0x18] sm:$0xff]  ;;  %s871_s23 = scalar_lea.vmem %s708_s22, 8192  ;;  %p876_p7 = scmp.lt.s32.totalorder %s708_s22, %s708_s22 }
  0x74   :  { %v240_v11 = vadd.f32 %v1035_v2, %v169_v3  ;;  %v307_v17 = vld [vmem:[#allocation5 + $0x18] sm:$0xff]  ;;  %v377_v19 = vmul.f32 %v1038_v5, %v306_v15  ;;  %v172_v20 = vmul.f32 %v1033_v1, %v101_v16  ;;  %v102_v22 = vld [vmem:[#allocation2 + $0x20] sm:$0xff]  ;;  %v103_v24 = vld [vmem:[#allocation2 + $0x28] sm:$0xff]  ;;  %v241_v25 = vadd.f32 %v1035_v2, %v170_v12  ;;  %p872_p6 = scmp.ne.s32.totalorder %s708_s22, %s871_s23  ;;  %p877_p8 = scmp.lt.s32.totalorder %s871_s23, %s871_s23 }
  0x75   :  { %v446_v18 = vadd.f32 %v1040_v6, %v375_v7  ;;  %v378_v21 = vmul.f32 %v1038_v5, %v307_v17  ;;  %v308_v23 = vld [vmem:[#allocation5 + $0x20] sm:$0xff]  ;;  %v447_v26 = vadd.f32 %v1040_v6, %v376_v13  ;;  %v242_v27 = vadd.f32 %v1035_v2, %v171_v14  ;;  %v309_v29 = vld [vmem:[#allocation5 + $0x28] sm:$0xff]  ;;  %v104_v34 = vld [vmem:[#allocation2 + $0x30] sm:$0xff] }
  0x76   :  { %v173_v28 = vmul.f32 %v1033_v1, %v102_v22  ;;  %v448_v31 = vadd.f32 %v1040_v6, %v377_v19  ;;  %v243_v32 = vadd.f32 %v1035_v2, %v172_v20  ;;  %v379_v37 = vmul.f32 %v1038_v5, %v308_v23  ;;  %v310_v39 = vld [vmem:[#allocation5 + $0x30] sm:$0xff]  ;;  %v105_v44 = vld [vmem:[#allocation2 + $0x38] sm:$0xff]  ;;  %v106_v50 = vld [vmem:[#allocation2 + $0x40] sm:$0xff]  ;;  %p878_p9 = por %p877_p8, %p876_p7 }
  0x77   :  { %v510_v30 = vadd.f32 %v446_v18, %v240_v11  ;;  %v449_v33 = vadd.f32 %v1040_v6, %v378_v21  ;;  %v511_v35 = vadd.f32 %v447_v26, %v241_v25  ;;  %v174_v38 = vmul.f32 %v1033_v1, %v103_v24  ;;  %v311_v45 = vld [vmem:[#allocation5 + $0x38] sm:$0xff]  ;;  %v312_v51 = vld [vmem:[#allocation5 + $0x40] sm:$0xff]  ;;  %v107_v56 = vld [vmem:[#allocation2 + $0x48] sm:$0xff] }
  0x78   :  { %v244_v36 = vadd.f32 %v1035_v2, %v173_v28  ;;  %v512_v41 = vadd.f32 %v448_v31, %v242_v27  ;;  %v380_v43 = vmul.f32 %v1038_v5, %v309_v29  ;;  %v450_v47 = vadd.f32 %v1040_v6, %v379_v37  ;;  %v313_v3 = vld [vmem:[#allocation5 + $0x48] sm:$0xff]  ;;  %v108_v4 = vld [vmem:[#allocation2 + $0x50] sm:$0xff]  ;;  %v109_v12 = vld [vmem:[#allocation2 + $0x58] sm:$0xff]  ;;  %p879_p10 = pnand %p878_p9, %p872_p6 }
  0x79   :  { %v574_v40 = vmax.f32 %v510_v30, 0.0  ;;  %v513_v42 = vadd.f32 %v449_v33, %v243_v32  ;;  %v575_v46 = vmax.f32 %v511_v35, 0.0  ;;  %v245_v48 = vadd.f32 %v1035_v2, %v174_v38  ;;  %v314_v11 = vld [vmem:[#allocation5 + $0x50] sm:$0xff]  ;;  %v315_v17 = vld [vmem:[#allocation5 + $0x58] sm:$0xff]  ;;  %v110_v22 = vld [vmem:[#allocation2 + $0x60] sm:$0xff] }
  0x7a   :  { %v175_v49 = vmul.f32 %v1033_v1, %v104_v34  ;;  %v576_v52 = vmax.f32 %v512_v41, 0.0  ;;  %v451_v54 = vadd.f32 %v1040_v6, %v380_v43  ;;  %v381_v55 = vmul.f32 %v1038_v5, %v310_v39  ;;  %v316_v27 = vld [vmem:[#allocation5 + $0x60] sm:$0xff]  ;;  %v111_v28 = vld [vmem:[#allocation2 + $0x68] sm:$0xff]  ;;  %v112_v34 = vld [vmem:[#allocation2 + $0x70] sm:$0xff] }
  0x7b   :  { %638 = vst [vmem:[#allocation13] sm:$0xff] %v574_v40  ;;  %v577_v53 = vmax.f32 %v513_v42, 0.0  ;;  %639 = vst [vmem:[#allocation13 + $0x8] sm:$0xff] %v575_v46  ;;  %v514_v57 = vadd.f32 %v450_v47, %v244_v36  ;;  %v176_v59 = vmul.f32 %v1033_v1, %v105_v44  ;;  %v382_v60 = vmul.f32 %v1038_v5, %v311_v45  ;;  %v317_v33 = vld [vmem:[#allocation5 + $0x68] sm:$0xff]  ;;  %v318_v43 = vld [vmem:[#allocation5 + $0x70] sm:$0xff] }
  0x7c   :  { %v246_v58 = vadd.f32 %v1035_v2, %v175_v49  ;;  %640 = vst [vmem:[#allocation13 + $0x10] sm:$0xff] %v576_v52  ;;  %v515_v61 = vadd.f32 %v451_v54, %v245_v48  ;;  %v452_v62 = vadd.f32 %v1040_v6, %v381_v55  ;;  %v177_v63 = vmul.f32 %v1033_v1, %v106_v50  ;;  %v113_v48 = vld [vmem:[#allocation2 + $0x78] sm:$0xff]  ;;  %v114_v54 = vld [vmem:[#allocation2 + $0x80] sm:$0xff] }
  0x7d   :  { %641 = vst [vmem:[#allocation13 + $0x18] sm:$0xff] %v577_v53  ;;  %v383_v0 = vmul.f32 %v1038_v5, %v312_v51  ;;  %v578_v7 = vmax.f32 %v514_v57, 0.0  ;;  %v247_v8 = vadd.f32 %v1035_v2, %v176_v59  ;;  %v453_v9 = vadd.f32 %v1040_v6, %v382_v60  ;;  %v319_v49 = vld [vmem:[#allocation5 + $0x78] sm:$0xff]  ;;  %v320_v55 = vld [vmem:[#allocation5 + $0x80] sm:$0xff]  ;;  %v115_v60 = vld [vmem:[#allocation2 + $0x88] sm:$0xff] }
  0x7e   :  { %v178_v10 = vmul.f32 %v1033_v1, %v107_v56  ;;  %v579_v13 = vmax.f32 %v515_v61, 0.0  ;;  %v516_v14 = vadd.f32 %v452_v62, %v246_v58  ;;  %v248_v15 = vadd.f32 %v1035_v2, %v177_v63 }
  0x7f   :  { %v454_v16 = vadd.f32 %v1040_v6, %v383_v0  ;;  %642 = vst [vmem:[#allocation13 + $0x20] sm:$0xff] %v578_v7  ;;  %v517_v18 = vadd.f32 %v453_v9, %v247_v8  ;;  %v384_v20 = vmul.f32 %v1038_v5, %v313_v3  ;;  %v179_v21 = vmul.f32 %v1033_v1, %v108_v4  ;;  %v321_v9 = vld [vmem:[#allocation5 + $0x88] sm:$0xff] }
  0x80   :  { %v249_v19 = vadd.f32 %v1035_v2, %v178_v10  ;;  %643 = vst [vmem:[#allocation13 + $0x28] sm:$0xff] %v579_v13  ;;  %v580_v23 = vmax.f32 %v516_v14, 0.0  ;;  %v385_v25 = vmul.f32 %v1038_v5, %v314_v11  ;;  %v180_v26 = vmul.f32 %v1033_v1, %v109_v12  ;;  %v116_v10 = vld [vmem:[#allocation2 + $0x90] sm:$0xff] }
  0x81   :  { %v518_v24 = vadd.f32 %v454_v16, %v248_v15  ;;  %v581_v29 = vmax.f32 %v517_v18, 0.0  ;;  %v455_v30 = vadd.f32 %v1040_v6, %v384_v20  ;;  %v250_v31 = vadd.f32 %v1035_v2, %v179_v21  ;;  %v322_v15 = vld [vmem:[#allocation5 + $0x90] sm:$0xff]  ;;  %v117_v16 = vld [vmem:[#allocation2 + $0x98] sm:$0xff] }
  0x82   :  { %v386_v32 = vmul.f32 %v1038_v5, %v315_v17  ;;  %644 = vst [vmem:[#allocation13 + $0x30] sm:$0xff] %v580_v23  ;;  %v456_v36 = vadd.f32 %v1040_v6, %v385_v25  ;;  %v251_v37 = vadd.f32 %v1035_v2, %v180_v26  ;;  %v181_v38 = vmul.f32 %v1033_v1, %v110_v22  ;;  %v323_v21 = vld [vmem:[#allocation5 + $0x98] sm:$0xff]  ;;  %v118_v26 = vld [vmem:[#allocation2 + $0xa0] sm:$0xff] }
  0x83   :  { %v582_v35 = vmax.f32 %v518_v24, 0.0  ;;  %645 = vst [vmem:[#allocation13 + $0x38] sm:$0xff] %v581_v29  ;;  %v519_v39 = vadd.f32 %v455_v30, %v249_v19  ;;  %v387_v41 = vmul.f32 %v1038_v5, %v316_v27  ;;  %v182_v42 = vmul.f32 %v1033_v1, %v111_v28 }
  0x84   :  { %v457_v40 = vadd.f32 %v1040_v6, %v386_v32  ;;  %v520_v44 = vadd.f32 %v456_v36, %v250_v31  ;;  %v252_v45 = vadd.f32 %v1035_v2, %v181_v38  ;;  %v388_v46 = vmul.f32 %v1038_v5, %v317_v33  ;;  %v324_v31 = vld [vmem:[#allocation5 + $0xa0] sm:$0xff]  ;;  %v119_v32 = vld [vmem:[#allocation2 + $0xa8] sm:$0xff]  ;;  %v120_v38 = vld [vmem:[#allocation2 + $0xb0] sm:$0xff] }
  0x85   :  { %646 = vst [vmem:[#allocation13 + $0x40] sm:$0xff] %v582_v35  ;;  %v183_v47 = vmul.f32 %v1033_v1, %v112_v34  ;;  %v583_v50 = vmax.f32 %v519_v39, 0.0  ;;  %v458_v52 = vadd.f32 %v1040_v6, %v387_v41  ;;  %v253_v53 = vadd.f32 %v1035_v2, %v182_v42 }
  0x86   :  { %v521_v51 = vadd.f32 %v457_v40, %v251_v37  ;;  %v584_v56 = vmax.f32 %v520_v44, 0.0  ;;  %v459_v57 = vadd.f32 %v1040_v6, %v388_v46  ;;  %v389_v59 = vmul.f32 %v1038_v5, %v318_v43  ;;  %v325_v37 = vld [vmem:[#allocation5 + $0xa8] sm:$0xff] }
  0x87   :  { %v254_v58 = vadd.f32 %v1035_v2, %v183_v47  ;;  %647 = vst [vmem:[#allocation13 + $0x48] sm:$0xff] %v583_v50  ;;  %v522_v62 = vadd.f32 %v458_v52, %v252_v45  ;;  %v184_v63 = vmul.f32 %v1033_v1, %v113_v48  ;;  %v390_v0 = vmul.f32 %v1038_v5, %v319_v49  ;;  %v326_v47 = vld [vmem:[#allocation5 + $0xb0] sm:$0xff]  ;;  %v121_v52 = vld [vmem:[#allocation2 + $0xb8] sm:$0xff] }
  0x88   :  { %v585_v61 = vmax.f32 %v521_v51, 0.0  ;;  %648 = vst [vmem:[#allocation13 + $0x50] sm:$0xff] %v584_v56  ;;  %v523_v3 = vadd.f32 %v459_v57, %v253_v53  ;;  %v460_v4 = vadd.f32 %v1040_v6, %v389_v59  ;;  %v185_v7 = vmul.f32 %v1033_v1, %v114_v54  ;;  %v327_v53 = vld [vmem:[#allocation5 + $0xb8] sm:$0xff]  ;;  %v328_v59 = vld [vmem:[#allocation5 + $0xc0] sm:$0xff] }
  0x89   :  { %v391_v8 = vmul.f32 %v1038_v5, %v320_v55  ;;  %v586_v11 = vmax.f32 %v522_v62, 0.0  ;;  %v255_v12 = vadd.f32 %v1035_v2, %v184_v63  ;;  %v461_v13 = vadd.f32 %v1040_v6, %v390_v0  ;;  %v123_v0 = vld [vmem:[#allocation2 + $0xc8] sm:$0xff] }
  0x8a   :  { %649 = vst [vmem:[#allocation13 + $0x58] sm:$0xff] %v585_v61  ;;  %v186_v14 = vmul.f32 %v1033_v1, %v115_v60  ;;  %v587_v17 = vmax.f32 %v523_v3, 0.0  ;;  %v524_v18 = vadd.f32 %v460_v4, %v254_v58  ;;  %v256_v19 = vadd.f32 %v1035_v2, %v185_v7  ;;  %v122_v58 = vld [vmem:[#allocation2 + $0xc0] sm:$0xff] }
  0x8b   :  { %v462_v20 = vadd.f32 %v1040_v6, %v391_v8  ;;  %650 = vst [vmem:[#allocation13 + $0x60] sm:$0xff] %v586_v11  ;;  %v525_v22 = vadd.f32 %v461_v13, %v255_v12  ;;  %v392_v24 = vmul.f32 %v1038_v5, %v321_v9  ;;  %v187_v25 = vmul.f32 %v1033_v1, %v116_v10  ;;  %v329_v13 = vld [vmem:[#allocation5 + $0xc8] sm:$0xff] }
  0x8c   :  { %v257_v23 = vadd.f32 %v1035_v2, %v186_v14  ;;  %651 = vst [vmem:[#allocation13 + $0x68] sm:$0xff] %v587_v17  ;;  %v588_v27 = vmax.f32 %v524_v18, 0.0  ;;  %v393_v29 = vmul.f32 %v1038_v5, %v322_v15  ;;  %v188_v30 = vmul.f32 %v1033_v1, %v117_v16  ;;  %v124_v14 = vld [vmem:[#allocation2 + $0xd0] sm:$0xff] }
  0x8d   :  { %v526_v28 = vadd.f32 %v462_v20, %v256_v19  ;;  %v589_v33 = vmax.f32 %v525_v22, 0.0  ;;  %v463_v34 = vadd.f32 %v1040_v6, %v392_v24  ;;  %v258_v35 = vadd.f32 %v1035_v2, %v187_v25  ;;  %v330_v19 = vld [vmem:[#allocation5 + $0xd0] sm:$0xff]  ;;  %v125_v20 = vld [vmem:[#allocation2 + $0xd8] sm:$0xff] }
  0x8e   :  { %v394_v36 = vmul.f32 %v1038_v5, %v323_v21  ;;  %652 = vst [vmem:[#allocation13 + $0x70] sm:$0xff] %v588_v27  ;;  %v464_v40 = vadd.f32 %v1040_v6, %v393_v29  ;;  %v259_v41 = vadd.f32 %v1035_v2, %v188_v30  ;;  %v189_v42 = vmul.f32 %v1033_v1, %v118_v26  ;;  %v331_v25 = vld [vmem:[#allocation5 + $0xd8] sm:$0xff]  ;;  %v126_v30 = vld [vmem:[#allocation2 + $0xe0] sm:$0xff] }
  0x8f   :  { %v590_v39 = vmax.f32 %v526_v28, 0.0  ;;  %653 = vst [vmem:[#allocation13 + $0x78] sm:$0xff] %v589_v33  ;;  %v527_v43 = vadd.f32 %v463_v34, %v257_v23  ;;  %v395_v45 = vmul.f32 %v1038_v5, %v324_v31  ;;  %v190_v46 = vmul.f32 %v1033_v1, %v119_v32 }
  0x90   :  { %v465_v44 = vadd.f32 %v1040_v6, %v394_v36  ;;  %v528_v48 = vadd.f32 %v464_v40, %v258_v35  ;;  %v260_v49 = vadd.f32 %v1035_v2, %v189_v42  ;;  %v396_v50 = vmul.f32 %v1038_v5, %v325_v37  ;;  %v332_v35 = vld [vmem:[#allocation5 + $0xe0] sm:$0xff]  ;;  %v127_v36 = vld [vmem:[#allocation2 + $0xe8] sm:$0xff]  ;;  %v128_v42 = vld [vmem:[#allocation2 + $0xf0] sm:$0xff] }
  0x91   :  { %654 = vst [vmem:[#allocation13 + $0x80] sm:$0xff] %v590_v39  ;;  %v191_v51 = vmul.f32 %v1033_v1, %v120_v38  ;;  %v591_v54 = vmax.f32 %v527_v43, 0.0  ;;  %v466_v56 = vadd.f32 %v1040_v6, %v395_v45  ;;  %v261_v57 = vadd.f32 %v1035_v2, %v190_v46 }
  0x92   :  { %v529_v55 = vadd.f32 %v465_v44, %v259_v41  ;;  %v592_v60 = vmax.f32 %v528_v48, 0.0  ;;  %v467_v61 = vadd.f32 %v1040_v6, %v396_v50  ;;  %v397_v63 = vmul.f32 %v1038_v5, %v326_v47  ;;  %v333_v41 = vld [vmem:[#allocation5 + $0xe8] sm:$0xff] }
  0x93   :  { %v262_v62 = vadd.f32 %v1035_v2, %v191_v51  ;;  %655 = vst [vmem:[#allocation13 + $0x88] sm:$0xff] %v591_v54  ;;  %v530_v4 = vadd.f32 %v466_v56, %v260_v49  ;;  %v192_v7 = vmul.f32 %v1033_v1, %v121_v52  ;;  %v398_v8 = vmul.f32 %v1038_v5, %v327_v53  ;;  %v334_v51 = vld [vmem:[#allocation5 + $0xf0] sm:$0xff]  ;;  %v129_v56 = vld [vmem:[#allocation2 + $0xf8] sm:$0xff] }
  0x94   :  { %v593_v3 = vmax.f32 %v529_v55, 0.0  ;;  %656 = vst [vmem:[#allocation13 + $0x90] sm:$0xff] %v592_v60  ;;  %v531_v9 = vadd.f32 %v467_v61, %v261_v57  ;;  %v468_v10 = vadd.f32 %v1040_v6, %v397_v63  ;;  %v193_v11 = vmul.f32 %v1033_v1, %v122_v58  ;;  %v335_v57 = vld [vmem:[#allocation5 + $0xf8] sm:$0xff]  ;;  %v336_v63 = vld [vmem:[#allocation5 + $0x100] sm:$0xff] }
  0x95   :  { %v399_v12 = vmul.f32 %v1038_v5, %v328_v59  ;;  %v594_v15 = vmax.f32 %v530_v4, 0.0  ;;  %v263_v16 = vadd.f32 %v1035_v2, %v192_v7  ;;  %v469_v17 = vadd.f32 %v1040_v6, %v398_v8  ;;  %v131_v8 = vld [vmem:[#allocation2 + $0x108] sm:$0xff] }
  0x96   :  { %657 = vst [vmem:[#allocation13 + $0x98] sm:$0xff] %v593_v3  ;;  %v194_v18 = vmul.f32 %v1033_v1, %v123_v0  ;;  %v595_v21 = vmax.f32 %v531_v9, 0.0  ;;  %v532_v22 = vadd.f32 %v468_v10, %v262_v62  ;;  %v264_v23 = vadd.f32 %v1035_v2, %v193_v11  ;;  %v130_v62 = vld [vmem:[#allocation2 + $0x100] sm:$0xff] }
  0x97   :  { %v470_v24 = vadd.f32 %v1040_v6, %v399_v12  ;;  %658 = vst [vmem:[#allocation13 + $0xa0] sm:$0xff] %v594_v15  ;;  %v533_v26 = vadd.f32 %v469_v17, %v263_v16  ;;  %v400_v28 = vmul.f32 %v1038_v5, %v329_v13  ;;  %v195_v29 = vmul.f32 %v1033_v1, %v124_v14  ;;  %v337_v17 = vld [vmem:[#allocation5 + $0x108] sm:$0xff] }
  0x98   :  { %v265_v27 = vadd.f32 %v1035_v2, %v194_v18  ;;  %659 = vst [vmem:[#allocation13 + $0xa8] sm:$0xff] %v595_v21  ;;  %v596_v31 = vmax.f32 %v532_v22, 0.0  ;;  %v401_v33 = vmul.f32 %v1038_v5, %v330_v19  ;;  %v196_v34 = vmul.f32 %v1033_v1, %v125_v20  ;;  %v132_v18 = vld [vmem:[#allocation2 + $0x110] sm:$0xff] }
  0x99   :  { %v534_v32 = vadd.f32 %v470_v24, %v264_v23  ;;  %v597_v37 = vmax.f32 %v533_v26, 0.0  ;;  %v471_v38 = vadd.f32 %v1040_v6, %v400_v28  ;;  %v266_v39 = vadd.f32 %v1035_v2, %v195_v29  ;;  %v338_v23 = vld [vmem:[#allocation5 + $0x110] sm:$0xff]  ;;  %v133_v24 = vld [vmem:[#allocation2 + $0x118] sm:$0xff] }
  0x9a   :  { %v402_v40 = vmul.f32 %v1038_v5, %v331_v25  ;;  %660 = vst [vmem:[#allocation13 + $0xb0] sm:$0xff] %v596_v31  ;;  %v472_v44 = vadd.f32 %v1040_v6, %v401_v33  ;;  %v267_v45 = vadd.f32 %v1035_v2, %v196_v34  ;;  %v197_v46 = vmul.f32 %v1033_v1, %v126_v30  ;;  %v339_v29 = vld [vmem:[#allocation5 + $0x118] sm:$0xff]  ;;  %v134_v34 = vld [vmem:[#allocation2 + $0x120] sm:$0xff] }
  0x9b   :  { %v598_v43 = vmax.f32 %v534_v32, 0.0  ;;  %661 = vst [vmem:[#allocation13 + $0xb8] sm:$0xff] %v597_v37  ;;  %v535_v47 = vadd.f32 %v471_v38, %v265_v27  ;;  %v403_v49 = vmul.f32 %v1038_v5, %v332_v35  ;;  %v198_v50 = vmul.f32 %v1033_v1, %v127_v36 }
  0x9c   :  { %v473_v48 = vadd.f32 %v1040_v6, %v402_v40  ;;  %v536_v52 = vadd.f32 %v472_v44, %v266_v39  ;;  %v268_v53 = vadd.f32 %v1035_v2, %v197_v46  ;;  %v404_v54 = vmul.f32 %v1038_v5, %v333_v41  ;;  %v340_v39 = vld [vmem:[#allocation5 + $0x120] sm:$0xff]  ;;  %v135_v40 = vld [vmem:[#allocation2 + $0x128] sm:$0xff]  ;;  %v136_v46 = vld [vmem:[#allocation2 + $0x130] sm:$0xff] }
  0x9d   :  { %662 = vst [vmem:[#allocation13 + $0xc0] sm:$0xff] %v598_v43  ;;  %v199_v55 = vmul.f32 %v1033_v1, %v128_v42  ;;  %v599_v58 = vmax.f32 %v535_v47, 0.0  ;;  %v474_v60 = vadd.f32 %v1040_v6, %v403_v49  ;;  %v269_v61 = vadd.f32 %v1035_v2, %v198_v50 }
  0x9e   :  { %v537_v59 = vadd.f32 %v473_v48, %v267_v45  ;;  %v600_v0 = vmax.f32 %v536_v52, 0.0  ;;  %v475_v3 = vadd.f32 %v1040_v6, %v404_v54  ;;  %v405_v7 = vmul.f32 %v1038_v5, %v334_v51  ;;  %v341_v45 = vld [vmem:[#allocation5 + $0x128] sm:$0xff] }
  0x9f   :  { %v270_v4 = vadd.f32 %v1035_v2, %v199_v55  ;;  %663 = vst [vmem:[#allocation13 + $0xc8] sm:$0xff] %v599_v58  ;;  %v538_v10 = vadd.f32 %v474_v60, %v268_v53  ;;  %v200_v11 = vmul.f32 %v1033_v1, %v129_v56  ;;  %v406_v12 = vmul.f32 %v1038_v5, %v335_v57  ;;  %v342_v55 = vld [vmem:[#allocation5 + $0x130] sm:$0xff]  ;;  %v137_v60 = vld [vmem:[#allocation2 + $0x138] sm:$0xff] }
  0xa0   :  { %v601_v9 = vmax.f32 %v537_v59, 0.0  ;;  %664 = vst [vmem:[#allocation13 + $0xd0] sm:$0xff] %v600_v0  ;;  %v539_v13 = vadd.f32 %v475_v3, %v269_v61  ;;  %v476_v14 = vadd.f32 %v1040_v6, %v405_v7  ;;  %v201_v15 = vmul.f32 %v1033_v1, %v130_v62  ;;  %v343_v61 = vld [vmem:[#allocation5 + $0x138] sm:$0xff]  ;;  %v344_v7 = vld [vmem:[#allocation5 + $0x140] sm:$0xff] }
  0xa1   :  { %v407_v16 = vmul.f32 %v1038_v5, %v336_v63  ;;  %v602_v19 = vmax.f32 %v538_v10, 0.0  ;;  %v271_v20 = vadd.f32 %v1035_v2, %v200_v11  ;;  %v477_v21 = vadd.f32 %v1040_v6, %v406_v12  ;;  %v139_v12 = vld [vmem:[#allocation2 + $0x148] sm:$0xff] }
  0xa2   :  { %665 = vst [vmem:[#allocation13 + $0xd8] sm:$0xff] %v601_v9  ;;  %v202_v22 = vmul.f32 %v1033_v1, %v131_v8  ;;  %v603_v25 = vmax.f32 %v539_v13, 0.0  ;;  %v540_v26 = vadd.f32 %v476_v14, %v270_v4  ;;  %v272_v27 = vadd.f32 %v1035_v2, %v201_v15  ;;  %v138_v4 = vld [vmem:[#allocation2 + $0x140] sm:$0xff] }
  0xa3   :  { %v478_v28 = vadd.f32 %v1040_v6, %v407_v16  ;;  %666 = vst [vmem:[#allocation13 + $0xe0] sm:$0xff] %v602_v19  ;;  %v541_v30 = vadd.f32 %v477_v21, %v271_v20  ;;  %v408_v32 = vmul.f32 %v1038_v5, %v337_v17  ;;  %v203_v33 = vmul.f32 %v1033_v1, %v132_v18  ;;  %v345_v21 = vld [vmem:[#allocation5 + $0x148] sm:$0xff] }
  0xa4   :  { %v273_v31 = vadd.f32 %v1035_v2, %v202_v22  ;;  %667 = vst [vmem:[#allocation13 + $0xe8] sm:$0xff] %v603_v25  ;;  %v604_v35 = vmax.f32 %v540_v26, 0.0  ;;  %v409_v37 = vmul.f32 %v1038_v5, %v338_v23  ;;  %v204_v38 = vmul.f32 %v1033_v1, %v133_v24  ;;  %v140_v22 = vld [vmem:[#allocation2 + $0x150] sm:$0xff] }
  0xa5   :  { %v542_v36 = vadd.f32 %v478_v28, %v272_v27  ;;  %v605_v41 = vmax.f32 %v541_v30, 0.0  ;;  %v479_v42 = vadd.f32 %v1040_v6, %v408_v32  ;;  %v274_v43 = vadd.f32 %v1035_v2, %v203_v33  ;;  %v346_v27 = vld [vmem:[#allocation5 + $0x150] sm:$0xff]  ;;  %v141_v28 = vld [vmem:[#allocation2 + $0x158] sm:$0xff] }
  0xa6   :  { %v410_v44 = vmul.f32 %v1038_v5, %v339_v29  ;;  %668 = vst [vmem:[#allocation13 + $0xf0] sm:$0xff] %v604_v35  ;;  %v480_v48 = vadd.f32 %v1040_v6, %v409_v37  ;;  %v275_v49 = vadd.f32 %v1035_v2, %v204_v38  ;;  %v205_v50 = vmul.f32 %v1033_v1, %v134_v34  ;;  %v347_v33 = vld [vmem:[#allocation5 + $0x158] sm:$0xff]  ;;  %v142_v38 = vld [vmem:[#allocation2 + $0x160] sm:$0xff] }
  0xa7   :  { %v606_v47 = vmax.f32 %v542_v36, 0.0  ;;  %669 = vst [vmem:[#allocation13 + $0xf8] sm:$0xff] %v605_v41  ;;  %v543_v51 = vadd.f32 %v479_v42, %v273_v31  ;;  %v411_v53 = vmul.f32 %v1038_v5, %v340_v39  ;;  %v206_v54 = vmul.f32 %v1033_v1, %v135_v40 }
  0xa8   :  { %v481_v52 = vadd.f32 %v1040_v6, %v410_v44  ;;  %v544_v56 = vadd.f32 %v480_v48, %v274_v43  ;;  %v276_v57 = vadd.f32 %v1035_v2, %v205_v50  ;;  %v412_v58 = vmul.f32 %v1038_v5, %v341_v45  ;;  %v348_v43 = vld [vmem:[#allocation5 + $0x160] sm:$0xff]  ;;  %v143_v44 = vld [vmem:[#allocation2 + $0x168] sm:$0xff]  ;;  %v144_v50 = vld [vmem:[#allocation2 + $0x170] sm:$0xff] }
  0xa9   :  { %670 = vst [vmem:[#allocation13 + $0x100] sm:$0xff] %v606_v47  ;;  %v207_v59 = vmul.f32 %v1033_v1, %v136_v46  ;;  %v607_v62 = vmax.f32 %v543_v51, 0.0  ;;  %v482_v0 = vadd.f32 %v1040_v6, %v411_v53  ;;  %v277_v3 = vadd.f32 %v1035_v2, %v206_v54 }
  0xaa   :  { %v545_v63 = vadd.f32 %v481_v52, %v275_v49  ;;  %v608_v8 = vmax.f32 %v544_v56, 0.0  ;;  %v483_v9 = vadd.f32 %v1040_v6, %v412_v58  ;;  %v413_v11 = vmul.f32 %v1038_v5, %v342_v55  ;;  %v349_v49 = vld [vmem:[#allocation5 + $0x168] sm:$0xff] }
  0xab   :  { %v278_v10 = vadd.f32 %v1035_v2, %v207_v59  ;;  %671 = vst [vmem:[#allocation13 + $0x108] sm:$0xff] %v607_v62  ;;  %v546_v14 = vadd.f32 %v482_v0, %v276_v57  ;;  %v208_v15 = vmul.f32 %v1033_v1, %v137_v60  ;;  %v414_v16 = vmul.f32 %v1038_v5, %v343_v61  ;;  %v350_v59 = vld [vmem:[#allocation5 + $0x170] sm:$0xff]  ;;  %v145_v0 = vld [vmem:[#allocation2 + $0x178] sm:$0xff] }
  0xac   :  { %v609_v13 = vmax.f32 %v545_v63, 0.0  ;;  %672 = vst [vmem:[#allocation13 + $0x110] sm:$0xff] %v608_v8  ;;  %v547_v17 = vadd.f32 %v483_v9, %v277_v3  ;;  %v484_v18 = vadd.f32 %v1040_v6, %v413_v11  ;;  %v209_v19 = vmul.f32 %v1033_v1, %v138_v4  ;;  %v351_v3 = vld [vmem:[#allocation5 + $0x178] sm:$0xff]  ;;  %v352_v11 = vld [vmem:[#allocation5 + $0x180] sm:$0xff] }
  0xad   :  { %v415_v20 = vmul.f32 %v1038_v5, %v344_v7  ;;  %v610_v23 = vmax.f32 %v546_v14, 0.0  ;;  %v279_v24 = vadd.f32 %v1035_v2, %v208_v15  ;;  %v485_v25 = vadd.f32 %v1040_v6, %v414_v16  ;;  %v147_v16 = vld [vmem:[#allocation2 + $0x188] sm:$0xff] }
  0xae   :  { %673 = vst [vmem:[#allocation13 + $0x118] sm:$0xff] %v609_v13  ;;  %v210_v26 = vmul.f32 %v1033_v1, %v139_v12  ;;  %v611_v29 = vmax.f32 %v547_v17, 0.0  ;;  %v548_v30 = vadd.f32 %v484_v18, %v278_v10  ;;  %v280_v31 = vadd.f32 %v1035_v2, %v209_v19  ;;  %v146_v10 = vld [vmem:[#allocation2 + $0x180] sm:$0xff] }
  0xaf   :  { %v486_v32 = vadd.f32 %v1040_v6, %v415_v20  ;;  %674 = vst [vmem:[#allocation13 + $0x120] sm:$0xff] %v610_v23  ;;  %v549_v34 = vadd.f32 %v485_v25, %v279_v24  ;;  %v416_v36 = vmul.f32 %v1038_v5, %v345_v21  ;;  %v211_v37 = vmul.f32 %v1033_v1, %v140_v22  ;;  %v353_v25 = vld [vmem:[#allocation5 + $0x188] sm:$0xff] }
  0xb0   :  { %v281_v35 = vadd.f32 %v1035_v2, %v210_v26  ;;  %675 = vst [vmem:[#allocation13 + $0x128] sm:$0xff] %v611_v29  ;;  %v612_v39 = vmax.f32 %v548_v30, 0.0  ;;  %v417_v41 = vmul.f32 %v1038_v5, %v346_v27  ;;  %v212_v42 = vmul.f32 %v1033_v1, %v141_v28  ;;  %v148_v26 = vld [vmem:[#allocation2 + $0x190] sm:$0xff] }
  0xb1   :  { %v550_v40 = vadd.f32 %v486_v32, %v280_v31  ;;  %v613_v45 = vmax.f32 %v549_v34, 0.0  ;;  %v487_v46 = vadd.f32 %v1040_v6, %v416_v36  ;;  %v282_v47 = vadd.f32 %v1035_v2, %v211_v37  ;;  %v354_v31 = vld [vmem:[#allocation5 + $0x190] sm:$0xff]  ;;  %v149_v32 = vld [vmem:[#allocation2 + $0x198] sm:$0xff] }
  0xb2   :  { %v418_v48 = vmul.f32 %v1038_v5, %v347_v33  ;;  %676 = vst [vmem:[#allocation13 + $0x130] sm:$0xff] %v612_v39  ;;  %v488_v52 = vadd.f32 %v1040_v6, %v417_v41  ;;  %v283_v53 = vadd.f32 %v1035_v2, %v212_v42  ;;  %v213_v54 = vmul.f32 %v1033_v1, %v142_v38  ;;  %v355_v37 = vld [vmem:[#allocation5 + $0x198] sm:$0xff]  ;;  %v150_v42 = vld [vmem:[#allocation2 + $0x1a0] sm:$0xff] }
  0xb3   :  { %v614_v51 = vmax.f32 %v550_v40, 0.0  ;;  %677 = vst [vmem:[#allocation13 + $0x138] sm:$0xff] %v613_v45  ;;  %v551_v55 = vadd.f32 %v487_v46, %v281_v35  ;;  %v419_v57 = vmul.f32 %v1038_v5, %v348_v43  ;;  %v214_v58 = vmul.f32 %v1033_v1, %v143_v44 }
  0xb4   :  { %v489_v56 = vadd.f32 %v1040_v6, %v418_v48  ;;  %v552_v60 = vadd.f32 %v488_v52, %v282_v47  ;;  %v284_v61 = vadd.f32 %v1035_v2, %v213_v54  ;;  %v420_v62 = vmul.f32 %v1038_v5, %v349_v49  ;;  %v356_v47 = vld [vmem:[#allocation5 + $0x1a0] sm:$0xff]  ;;  %v151_v48 = vld [vmem:[#allocation2 + $0x1a8] sm:$0xff]  ;;  %v152_v54 = vld [vmem:[#allocation2 + $0x1b0] sm:$0xff] }
  0xb5   :  { %678 = vst [vmem:[#allocation13 + $0x140] sm:$0xff] %v614_v51  ;;  %v215_v63 = vmul.f32 %v1033_v1, %v144_v50  ;;  %v615_v4 = vmax.f32 %v551_v55, 0.0  ;;  %v490_v8 = vadd.f32 %v1040_v6, %v419_v57  ;;  %v285_v9 = vadd.f32 %v1035_v2, %v214_v58 }
  0xb6   :  { %v553_v7 = vadd.f32 %v489_v56, %v283_v53  ;;  %v616_v12 = vmax.f32 %v552_v60, 0.0  ;;  %v491_v13 = vadd.f32 %v1040_v6, %v420_v62  ;;  %v421_v15 = vmul.f32 %v1038_v5, %v350_v59  ;;  %v357_v53 = vld [vmem:[#allocation5 + $0x1a8] sm:$0xff] }
  0xb7   :  { %v286_v14 = vadd.f32 %v1035_v2, %v215_v63  ;;  %679 = vst [vmem:[#allocation13 + $0x148] sm:$0xff] %v615_v4  ;;  %v554_v18 = vadd.f32 %v490_v8, %v284_v61  ;;  %v216_v19 = vmul.f32 %v1033_v1, %v145_v0  ;;  %v422_v20 = vmul.f32 %v1038_v5, %v351_v3  ;;  %v358_v63 = vld [vmem:[#allocation5 + $0x1b0] sm:$0xff]  ;;  %v153_v8 = vld [vmem:[#allocation2 + $0x1b8] sm:$0xff] }
  0xb8   :  { %v617_v17 = vmax.f32 %v553_v7, 0.0  ;;  %680 = vst [vmem:[#allocation13 + $0x150] sm:$0xff] %v616_v12  ;;  %v555_v21 = vadd.f32 %v491_v13, %v285_v9  ;;  %v492_v22 = vadd.f32 %v1040_v6, %v421_v15  ;;  %v217_v23 = vmul.f32 %v1033_v1, %v146_v10  ;;  %v359_v9 = vld [vmem:[#allocation5 + $0x1b8] sm:$0xff]  ;;  %v360_v15 = vld [vmem:[#allocation5 + $0x1c0] sm:$0xff] }
  0xb9   :  { %v423_v24 = vmul.f32 %v1038_v5, %v352_v11  ;;  %v618_v27 = vmax.f32 %v554_v18, 0.0  ;;  %v287_v28 = vadd.f32 %v1035_v2, %v216_v19  ;;  %v493_v29 = vadd.f32 %v1040_v6, %v422_v20  ;;  %v155_v20 = vld [vmem:[#allocation2 + $0x1c8] sm:$0xff] }
  0xba   :  { %681 = vst [vmem:[#allocation13 + $0x158] sm:$0xff] %v617_v17  ;;  %v218_v30 = vmul.f32 %v1033_v1, %v147_v16  ;;  %v619_v33 = vmax.f32 %v555_v21, 0.0  ;;  %v556_v34 = vadd.f32 %v492_v22, %v286_v14  ;;  %v288_v35 = vadd.f32 %v1035_v2, %v217_v23  ;;  %v154_v14 = vld [vmem:[#allocation2 + $0x1c0] sm:$0xff] }
  0xbb   :  { %v494_v36 = vadd.f32 %v1040_v6, %v423_v24  ;;  %682 = vst [vmem:[#allocation13 + $0x160] sm:$0xff] %v618_v27  ;;  %v557_v38 = vadd.f32 %v493_v29, %v287_v28  ;;  %v424_v40 = vmul.f32 %v1038_v5, %v353_v25  ;;  %v219_v41 = vmul.f32 %v1033_v1, %v148_v26  ;;  %v361_v29 = vld [vmem:[#allocation5 + $0x1c8] sm:$0xff] }
  0xbc   :  { %v289_v39 = vadd.f32 %v1035_v2, %v218_v30  ;;  %683 = vst [vmem:[#allocation13 + $0x168] sm:$0xff] %v619_v33  ;;  %v620_v43 = vmax.f32 %v556_v34, 0.0  ;;  %v425_v45 = vmul.f32 %v1038_v5, %v354_v31  ;;  %v220_v46 = vmul.f32 %v1033_v1, %v149_v32  ;;  %v156_v30 = vld [vmem:[#allocation2 + $0x1d0] sm:$0xff] }
  0xbd   :  { %v558_v44 = vadd.f32 %v494_v36, %v288_v35  ;;  %v621_v49 = vmax.f32 %v557_v38, 0.0  ;;  %v495_v50 = vadd.f32 %v1040_v6, %v424_v40  ;;  %v290_v51 = vadd.f32 %v1035_v2, %v219_v41  ;;  %v362_v35 = vld [vmem:[#allocation5 + $0x1d0] sm:$0xff]  ;;  %v157_v36 = vld [vmem:[#allocation2 + $0x1d8] sm:$0xff] }
  0xbe   :  { %v426_v52 = vmul.f32 %v1038_v5, %v355_v37  ;;  %684 = vst [vmem:[#allocation13 + $0x170] sm:$0xff] %v620_v43  ;;  %v496_v56 = vadd.f32 %v1040_v6, %v425_v45  ;;  %v291_v57 = vadd.f32 %v1035_v2, %v220_v46  ;;  %v221_v58 = vmul.f32 %v1033_v1, %v150_v42  ;;  %v363_v41 = vld [vmem:[#allocation5 + $0x1d8] sm:$0xff]  ;;  %v735_v42 = vld [vmem:[#allocation8] ss:$0 sm:$0xff]  ;;  %v737_v46 = vld [vmem:[#allocation7] ss:$0 sm:$0xff] }
  0xbf   :  { %v622_v55 = vmax.f32 %v558_v44, 0.0  ;;  %685 = vst [vmem:[#allocation13 + $0x178] sm:$0xff] %v621_v49  ;;  %v559_v59 = vadd.f32 %v495_v50, %v289_v39  ;;  %v427_v61 = vmul.f32 %v1038_v5, %v356_v47  ;;  %v222_v62 = vmul.f32 %v1033_v1, %v151_v48  ;;  %v736_v44 = vld [vmem:[#allocation10] ss:$0 sm:$0xff] }
  0xc0   :  { %v497_v60 = vadd.f32 %v1040_v6, %v426_v52  ;;  %v560_v0 = vadd.f32 %v496_v56, %v290_v51  ;;  %v292_v3 = vadd.f32 %v1035_v2, %v221_v58  ;;  %v428_v4 = vmul.f32 %v1038_v5, %v357_v53  ;;  %v158_v48 = vld [vmem:[#allocation2 + $0x1e0] sm:$0xff]  ;;  %v159_v53 = vld [vmem:[#allocation2 + $0x1e8] sm:$0xff]  ;;  %v160_v58 = vld [vmem:[#allocation2 + $0x1f0] sm:$0xff] }
  0xc1   :  { %686 = vst [vmem:[#allocation13 + $0x180] sm:$0xff] %v622_v55  ;;  %v223_v7 = vmul.f32 %v1033_v1, %v152_v54  ;;  %v623_v10 = vmax.f32 %v559_v59, 0.0  ;;  %v498_v12 = vadd.f32 %v1040_v6, %v427_v61  ;;  %v293_v13 = vadd.f32 %v1035_v2, %v222_v62  ;;  %v364_v52 = vld [vmem:[#allocation5 + $0x1e0] sm:$0xff] }
  0xc2   :  { %v561_v11 = vadd.f32 %v497_v60, %v291_v57  ;;  %v624_v16 = vmax.f32 %v560_v0, 0.0  ;;  %v499_v17 = vadd.f32 %v1040_v6, %v428_v4  ;;  %v429_v19 = vmul.f32 %v1038_v5, %v358_v63  ;;  %v738_v54 = vld [vmem:[#allocation11] ss:$0 sm:$0xff]  ;;  %v365_v57 = vld [vmem:[#allocation5 + $0x1e8] sm:$0xff] }
  0xc3   :  { %v294_v18 = vadd.f32 %v1035_v2, %v223_v7  ;;  %687 = vst [vmem:[#allocation13 + $0x188] sm:$0xff] %v623_v10  ;;  %v562_v22 = vadd.f32 %v498_v12, %v292_v3  ;;  %v224_v23 = vmul.f32 %v1033_v1, %v153_v8  ;;  %v430_v24 = vmul.f32 %v1038_v5, %v359_v9  ;;  %v366_v7 = vld [vmem:[#allocation5 + $0x1f0] sm:$0xff]  ;;  %v161_v12 = vld [vmem:[#allocation2 + $0x1f8] sm:$0xff] }
  0xc4   :  { %v625_v21 = vmax.f32 %v561_v11, 0.0  ;;  %688 = vst [vmem:[#allocation13 + $0x190] sm:$0xff] %v624_v16  ;;  %v563_v25 = vadd.f32 %v499_v17, %v293_v13  ;;  %v500_v26 = vadd.f32 %v1040_v6, %v429_v19  ;;  %v225_v27 = vmul.f32 %v1033_v1, %v154_v14  ;;  %v367_v13 = vld [vmem:[#allocation5 + $0x1f8] sm:$0xff] }
  0xc5   :  { %v431_v28 = vmul.f32 %v1038_v5, %v360_v15  ;;  %v626_v31 = vmax.f32 %v562_v22, 0.0  ;;  %v295_v32 = vadd.f32 %v1035_v2, %v224_v23  ;;  %v501_v33 = vadd.f32 %v1040_v6, %v430_v24 }
  0xc6   :  { %689 = vst [vmem:[#allocation13 + $0x198] sm:$0xff] %v625_v21  ;;  %v226_v34 = vmul.f32 %v1033_v1, %v155_v20  ;;  %v627_v37 = vmax.f32 %v563_v25, 0.0  ;;  %v564_v38 = vadd.f32 %v500_v26, %v294_v18  ;;  %v296_v39 = vadd.f32 %v1035_v2, %v225_v27 }
  0xc7   :  { %v502_v40 = vadd.f32 %v1040_v6, %v431_v28  ;;  %690 = vst [vmem:[#allocation13 + $0x1a0] sm:$0xff] %v626_v31  ;;  %v565_v5 = vadd.f32 %v501_v33, %v295_v32  ;;  %v432_v45 = vmul.f32 %v736_v44, %v361_v29  ;;  %v227_v47 = vmul.f32 %v737_v46, %v156_v30 }
  0xc8   :  { %v297_v43 = vadd.f32 %v735_v42, %v226_v34  ;;  %691 = vst [vmem:[#allocation13 + $0x1a8] sm:$0xff] %v627_v37  ;;  %v628_v1 = vmax.f32 %v564_v38, 0.0  ;;  %v433_v50 = vmul.f32 %v736_v44, %v362_v35  ;;  %v228_v51 = vmul.f32 %v737_v46, %v157_v36 }
  0xc9   :  { %v566_v49 = vadd.f32 %v502_v40, %v296_v39  ;;  %v629_v2 = vmax.f32 %v565_v5, 0.0  ;;  %v503_v6 = vadd.f32 %v738_v54, %v432_v45  ;;  %v298_v55 = vadd.f32 %v735_v42, %v227_v47 }
  0xca   :  { %v434_v56 = vmul.f32 %v736_v44, %v363_v41  ;;  %692 = vst [vmem:[#allocation13 + $0x1b0] sm:$0xff] %v628_v1  ;;  %v504_v60 = vadd.f32 %v738_v54, %v433_v50  ;;  %v299_v61 = vadd.f32 %v735_v42, %v228_v51  ;;  %v229_v62 = vmul.f32 %v737_v46, %v158_v48 }
  0xcb   :  { %v630_v59 = vmax.f32 %v566_v49, 0.0  ;;  %693 = vst [vmem:[#allocation13 + $0x1b8] sm:$0xff] %v629_v2  ;;  %v567_v63 = vadd.f32 %v503_v6, %v297_v43  ;;  %v435_v3 = vmul.f32 %v736_v44, %v364_v52  ;;  %v230_v4 = vmul.f32 %v737_v46, %v159_v53 }
  0xcc   :  { %v505_v0 = vadd.f32 %v738_v54, %v434_v56  ;;  %v568_v8 = vadd.f32 %v504_v60, %v298_v55  ;;  %v300_v9 = vadd.f32 %v735_v42, %v229_v62  ;;  %v436_v10 = vmul.f32 %v736_v44, %v365_v57 }
  0xcd   :  { %694 = vst [vmem:[#allocation13 + $0x1c0] sm:$0xff] %v630_v59  ;;  %v231_v11 = vmul.f32 %v737_v46, %v160_v58  ;;  %v631_v14 = vmax.f32 %v567_v63, 0.0  ;;  %v506_v16 = vadd.f32 %v738_v54, %v435_v3  ;;  %v301_v17 = vadd.f32 %v735_v42, %v230_v4 }
  0xce   :  { %v569_v15 = vadd.f32 %v505_v0, %v299_v61  ;;  %v632_v18 = vmax.f32 %v568_v8, 0.0  ;;  %v507_v19 = vadd.f32 %v738_v54, %v436_v10  ;;  %v437_v21 = vmul.f32 %v736_v44, %v366_v7 }
  0xcf   :  { %v302_v20 = vadd.f32 %v735_v42, %v231_v11  ;;  %695 = vst [vmem:[#allocation13 + $0x1c8] sm:$0xff] %v631_v14  ;;  %v570_v23 = vadd.f32 %v506_v16, %v300_v9  ;;  %v232_v24 = vmul.f32 %v737_v46, %v161_v12  ;;  %v438_v25 = vmul.f32 %v736_v44, %v367_v13 }
  0xd0   :  { %v633_v22 = vmax.f32 %v569_v15, 0.0  ;;  %696 = vst [vmem:[#allocation13 + $0x1d0] sm:$0xff] %v632_v18  ;;  %v571_v26 = vadd.f32 %v507_v19, %v301_v17  ;;  %v508_v27 = vadd.f32 %v738_v54, %v437_v21 }
  0xd1   :  { %v634_v28 = vmax.f32 %v570_v23, 0.0  ;;  %v303_v29 = vadd.f32 %v735_v42, %v232_v24  ;;  %v509_v30 = vadd.f32 %v738_v54, %v438_v25 }
  0xd2   :  { %697 = vst [vmem:[#allocation13 + $0x1d8] sm:$0xff] %v633_v22  ;;  %v635_v31 = vmax.f32 %v571_v26, 0.0  ;;  %v572_v32 = vadd.f32 %v508_v27, %v302_v20 }
  0xd3   :  { %698 = vst [vmem:[#allocation13 + $0x1e0] sm:$0xff] %v634_v28  ;;  %v573_v33 = vadd.f32 %v509_v30, %v303_v29 }
  0xd4   :  { %699 = vst [vmem:[#allocation13 + $0x1e8] sm:$0xff] %v635_v31  ;;  %v636_v34 = vmax.f32 %v572_v32, 0.0 }
  0xd5   :  { %v637_v35 = vmax.f32 %v573_v33, 0.0 }
  0xd6   :  { %700 = vst [vmem:[#allocation13 + $0x1f0] sm:$0xff] %v636_v34 }
  0xd7   :  { %701 = vst [vmem:[#allocation13 + $0x1f8] sm:$0xff] %v637_v35 }
  0xd8   :  { %882 = shalt.err (!%p879_p10)
}
  0xd9   :  { %s883_s28 = scalar_lea.hbm %s1291_s6, 8192 }
  0xda   :  { %p884_p11 = scmp.ne.s32.totalorder %s1291_s6, %s883_s28  ;;  %p887_p12 = scmp.lt.u32.totalorder %s883_s28, %s1291_s6 }
  0xdc   :  { %p889_p13 = pnand %p887_p12, %p884_p11 }
  0xde   :  { %892 = shalt.err (!%p889_p13)
}
  0xdf   :  { %713 = dma.vmem_to_hbm [thread:$0]  %s708_s22, 8192, %s1291_s6, [#allocation4], %s905_s9, %s905_s9, %s906_s10  }
  0xe0   :  { %901 = dma.done.wait [#allocation4], 8192  }
  0xe1   :  { %902 = vsyncadd [#allocation4], 4294959104 }
  0xe2   :  { %717 = vsyncpa [#allocation3], 1 }
  0xe3   :  { %718 = vsyncpa [#allocation6], 1 }
  0xe4   :  { %719 = vsyncpa [#allocation9], 1 }
  0xe5   :  { %720 = vsyncpa [#allocation12], 1 }
  0xe6   :  { %721 = vsyncpa [#allocation4], 1 }

// kernel: resnext_block_forward.5
= control target key start
LH: loop header
LB: loop body
LE: loop exit
PB: predicated region body
PF: predicated region fallthrough
CT: control target
= control target key end

     0   :  { %s6771_s0 = inlined_call_operand.hbm [shape: f32[2,18,18,128], index: 0, kind: input, shape index: {}]   ;;  %s6772_s1 = inlined_call_operand.hbm [shape: f32[3,3,128,128], index: 1, kind: input, shape index: {}]   ;;  %s6773_s2 = inlined_call_operand.hbm [shape: f32[1,128], index: 2, kind: input, shape index: {}]   ;;  %s6774_s3 = inlined_call_operand.hbm [shape: f32[1,128], index: 3, kind: input, shape index: {}]   ;;  %s6775_s4 = inlined_call_operand.hbm [shape: f32[2,16,16,128], index: 4, kind: output, shape index: {0}]   ;;  %s6776_s5 = inlined_call_operand.hbm [shape: f32[2,1,128], index: 5, kind: output, shape index: {1}]   ;;  %s6777_s6 = inlined_call_operand.hbm [shape: f32[2,1,128], index: 6, kind: output, shape index: {2}]  }
   0x1   :  { %6824 = sst [smem:[#allocation39_spill]] %s6773_s2 }
   0x2   :  { %12 = vsyncpa [#allocation5], 0 }
   0x3   :  { %13 = vsyncpa [#allocation8], 0 }
   0x4   :  { %14 = vsyncpa [#allocation6], 0 }
   0x5   :  { %16 = vsyncpa [#allocation6 + $0x1], 0 }
   0x6   :  { %17 = vsyncpa [#allocation12], 0 }
   0x7   :  { %19 = vsyncpa [#allocation12 + $0x1], 0  ;;  %s5777_s21 = smov 0   ;;  %s5779_s22 = smov 0  }
   0x8   :  { %s5781_s23 = smov 0   ;;  %s5783_s24 = smov 0  }
   0x9   :  { %s5785_s25 = smov 0   ;;  %s5787_s26 = smov 0  }
   0xa LB: > { %6825 = sst [smem:[#allocation20_spill]] %s5722_s25  ;;  %s5808_s27 = sadd.s32 4294967295, %s5726_s26   ;;  %s5726_s26 = sphi %s5787_s26, %s25_s26   ;;  %s5722_s25 = sphi %s5785_s25, %s6892_s25   ;;  %s5718_s24 = sphi %s5783_s24, %s6891_s24   ;;  %s5714_s23 = sphi %s5781_s23, %s6895_s23   ;;  %s5710_s22 = sphi %s5779_s22, %s6894_s22   ;;  %s5706_s21 = sphi %s5777_s21, %s6893_s21  }
   0xb   : > { %s6781_s28 = sadd.s32 4294967294, %s5726_s26   ;;  %s37_s29 = sadd.s32 1, %s5722_s25 }
   0xc   : > { %s109_s30 = sadd.s32 1, %s5714_s23  ;;  %p39_p0 = scmp.ge.s32.totalorder %s37_s29, 2 }
   0xd   : > { %p119_p1 = scmp.ne.s32.totalorder %s5714_s23, %s5710_s22  ;;  %p120_p2 = scmp.eq.s32.totalorder %s5808_s27, 1 }
   0xe   : > { %p125_p3 = scmp.ne.s32.totalorder %s5710_s22, %s5706_s21  ;;  %s6897_s29 = smov (%p39_p0, %s37_s29), 0 }
   0xf   : > { %6826 = sst [smem:[#allocation21_spill]] %s6897_s29  ;;  %p5820_p4 = por %p120_p2, %p119_p1 }
  0x10   : > { %p126_p5 = scmp.eq.s32.totalorder %s6781_s28, 1  ;;  %s104_s8 = ssub.s32 %s5722_s25, %s6897_s29 }
  0x11   : > { %s6827_s7 = scalar_select %p5820_p4, 1, 0 }
  0x12   : > { %p3624_p6 = scmp.ge.s32.totalorder %s5726_s26, 1  ;;  %p107_p7 = scmp.eq.s32.totalorder %s104_s8, 0 }
  0x13   : > { %p5829_p8 = por %p126_p5, %p125_p3  ;;  %p185_p9 = scmp.lt.s32.totalorder %s5726_s26, 3 }
  0x14   : > { %s5835_s10 = scalar_select %p107_p7, %s5714_s23, %s109_s30  }
  0x15   : > { %s6828_s9 = scalar_select %p5829_p8, 1, 0 }
  0x16   : > { %6829 = sst [smem:[#allocation22_spill]] %s5835_s10  ;;  %p5837_p10 = pnand %p3624_p6, %p185_p9 }
  0x17   : > { %p6778_p11 = scmp.eq.s32.totalorder %s5808_s27, 0  ;;  %s5728_s12 = smov [#allocation7]  }
  0x18   : > { %s6830_s11 = scalar_select %p5837_p10, 1, 0 }
  0x19   : > { %p5376_p12 = pneg %p5837_p10  ;;  %s211_s13 = sshll.u32 %s5728_s12, 4  ;;  %s212_s13 = int_to_ptr.vmem [resolvable:$true] %s211_s13 }
  0x1a   : > { %s5729_s15 = smov [#allocation4]   ;;  %s6832_s2 = sld [smem:[#allocation39_spill]] }
  0x1b   : > { %p5846_p13 = pnand %p6778_p11, %p5376_p12  ;;  %s197_s16 = sshll.u32 %s5729_s15, 4  ;;  %s5850_s16 = int_to_ptr.vmem [resolvable:$true] %s197_s16 }
  0x1d   : > { %p5860_p1 = pneg %p5846_p13 }
  0x20   : > { %s5470_s19 = scalar_lea.hbm %s6832_s2, 16 }
  0x21   : > { %p5471_p0 = scmp.ne.s32.totalorder %s6832_s2, %s5470_s19  ;;  %p5477_p5 = scmp.lt.u32.totalorder %s5470_s19, %s6832_s2 }
  0x23   : > { %p5473_p2 = pnand %p5860_p1, %p5471_p0 }
  0x25   : > { %p5474_p3 = pneg %p5473_p2 }
  0x27   : > { %p5479_p6 = pnand %p5477_p5, %p5474_p3 }
  0x29   : > { %5482 = shalt.err (!%p5479_p6)
}
  0x2a   : > { %s5483_s17 = scalar_lea.vmem %s212_s13, 16  ;;  %s5490_s18 = scalar_lea.vmem %s212_s13, 32 }
  0x2b   : > { %p5484_p7 = scmp.ne.s32.totalorder %s212_s13, %s5483_s17  ;;  %p5491_p11 = scmp.lt.s32.totalorder %s212_s13, %s212_s13 }
  0x2c   : > { %p5492_p8 = scmp.lt.s32.totalorder %s5490_s18, %s5483_s17 }
  0x2d   : > { %p5486_p9 = pnand %p5484_p7, %p5860_p1 }
  0x2e   : > { %p5493_p4 = por %p5492_p8, %p5491_p11 }
  0x2f   : > { %p5487_p12 = pneg %p5486_p9 }
  0x31   : > { %p5494_p10 = pnand %p5493_p4, %p5487_p12 }
  0x33   : > { %5497 = shalt.err (!%p5494_p10)
}
  0x34   : > { %5382 = dma.hbm_to_vmem [thread:$0]  (!%p5846_p13), %s6832_s2, 16, %s212_s13, [#allocation8]  }
  0x35   : > { %s5498_s15 = scalar_lea.hbm %s6772_s1, 18432 }
  0x36   : > { %p5499_p0 = scmp.ne.s32.totalorder %s6772_s1, %s5498_s15  ;;  %p5505_p4 = scmp.lt.u32.totalorder %s5498_s15, %s6772_s1 }
  0x38   : > { %p5501_p2 = pnand %p5499_p0, %p5860_p1 }
  0x3a   : > { %p5502_p8 = pneg %p5501_p2 }
  0x3c   : > { %p5507_p10 = pnand %p5505_p4, %p5502_p8 }
  0x3e   : > { %5510 = shalt.err (!%p5507_p10)
}
  0x3f   : > { %s5511_s13 = scalar_lea.vmem %s5850_s16, 18432  ;;  %p5519_p6 = scmp.lt.s32.totalorder %s5850_s16, %s5850_s16 }
  0x40   : > { %p5512_p11 = scmp.ne.s32.totalorder %s5850_s16, %s5511_s13  ;;  %p5520_p7 = scmp.lt.s32.totalorder %s5511_s13, %s5511_s13 }
  0x42   : > { %p5514_p3 = pnand %p5512_p11, %p5860_p1  ;;  %p5521_p9 = por %p5520_p7, %p5519_p6 }
  0x44   : > { %p5515_p5 = pneg %p5514_p3 }
  0x46   : > { %p5522_p12 = pnand %p5521_p9, %p5515_p5 }
  0x48   : > { %5525 = shalt.err (!%p5522_p12)
}
  0x49   : > { %s5730_s28 = smov 128   ;;  %s5731_s29 = smov 8  }
  0x4a   : > { %5379 = dma.hbm_to_vmem [thread:$0]  (!%p5846_p13), %s6772_s1, 18432, %s5850_s16, [#allocation5], %s5730_s28, %s5730_s28, %s5731_s29  }
  0x4b   : > { %s5732_s19 = smov [#allocation9]   ;;  %s5526_s18 = scalar_lea.hbm %s6774_s3, 16 }
  0x4c   : > { %s222_s12 = sshll.u32 %s5732_s19, 4  ;;  %p5527_p0 = scmp.ne.s32.totalorder %s6774_s3, %s5526_s18  ;;  %s223_s12 = int_to_ptr.vmem [resolvable:$true] %s222_s12 }
  0x4d   : > { %p5533_p4 = scmp.lt.u32.totalorder %s5526_s18, %s6774_s3 }
  0x4e   : > { %p5529_p2 = pnand %p5527_p0, %p5860_p1 }
  0x50   : > { %p5530_p8 = pneg %p5529_p2 }
  0x52   : > { %p5535_p10 = pnand %p5533_p4, %p5530_p8 }
  0x54   : > { %5538 = shalt.err (!%p5535_p10)
}
  0x55   : > { %s5539_s16 = scalar_lea.vmem %s223_s12, 16  ;;  %s5546_s28 = scalar_lea.vmem %s223_s12, 32 }
  0x56   : > { %p5540_p11 = scmp.ne.s32.totalorder %s223_s12, %s5539_s16  ;;  %p5547_p6 = scmp.lt.s32.totalorder %s223_s12, %s223_s12 }
  0x57   : > { %p5548_p7 = scmp.lt.s32.totalorder %s5546_s28, %s5539_s16 }
  0x58   : > { %p5542_p3 = pnand %p5540_p11, %p5860_p1 }
  0x59   : > { %p5549_p9 = por %p5548_p7, %p5547_p6 }
  0x5a   : > { %p5543_p5 = pneg %p5542_p3 }
  0x5c   : > { %p5550_p12 = pnand %p5549_p9, %p5543_p5 }
  0x5e   : > { %5553 = shalt.err (!%p5550_p12)
}
  0x5f   : > { %5385 = dma.hbm_to_vmem [thread:$0]  (!%p5846_p13), %s6774_s3, 16, %s223_s12, [#allocation8]  }
  0x60   : > { %p6834_p0 = scmp.ne.s32.totalorder %s6830_s11, 0 }
  0x62   : > { %235 = sbr.rel (%p6834_p0) target bundleno = 740 (0x2e4), region = 32 }
  0x69   : > { %p6835_p2 = scmp.eq.s32.totalorder %s5808_s27, 0 }
  0x6b   : > { %5687 = dma.done.wait (%p6835_p2), [#allocation5], 18432   ;;  %p6836_p1 = pmov %p6835_p2 }
  0x6d   : > { %5689 = vsyncadd (%p6836_p1), [#allocation5], 4294948864  ;;  %p6837_p8 = pmov %p6836_p1 }
  0x6e   : > { %p6838_p4 = pmov %p6836_p1 }
  0x6f   : > { %5691 = dma.done.wait (%p6837_p8), [#allocation8], 32  }
  0x70   : > { %5693 = vsyncadd (%p6838_p4), [#allocation8], 4294967264  ;;  %s5928_s25 = sand.u32 1, %s5710_s22   ;;  %s3644_s10 = smul.u32 6912, %s5718_s24 }
  0x71   : > { %s3632_s11 = sshll.u32 %s5928_s25, 8  ;;  %s5733_s30 = smov [#allocation2]  }
  0x72   : > { %s280_s20 = scalar_lea.hbm %s6771_s0, %s3644_s10  ;;  %s282_s19 = sshll.u32 %s5733_s30, 4  ;;  %s283_s19 = int_to_ptr.vmem [resolvable:$true] %s282_s19 }
  0x73   : > { %s5554_s12 = scalar_lea.hbm %s280_s20, 5184  ;;  %s5556_s18 = scalar_lea.hbm %s6771_s0, 13824 }
  0x74   : > { %p5555_p13 = scmp.ne.s32.totalorder %s280_s20, %s5554_s12  ;;  %p5557_p10 = scmp.lt.u32.totalorder %s280_s20, %s6771_s0 }
  0x75   : > { %p5558_p11 = scmp.lt.u32.totalorder %s5556_s18, %s5554_s12  ;;  %p5560_p5 = scmp.lt.u32.totalorder %s5554_s12, %s280_s20 }
  0x77   : > { %p5559_p3 = por %p5558_p11, %p5557_p10 }
  0x79   : > { %p5561_p6 = por %p5560_p5, %p5559_p3 }
  0x7b   : > { %p5562_p7 = pnand %p5561_p6, %p5555_p13 }
  0x7d   : > { %5565 = shalt.err (!%p5562_p7)  }
  0x7e   : > { %s5566_s28 = scalar_lea.vmem %s283_s19, 5184  ;;  %s5570_s2 = scalar_lea.vmem %s283_s19, 6912 }
  0x7f   : > { %p5567_p9 = scmp.ne.s32.totalorder %s283_s19, %s5566_s28  ;;  %p5571_p12 = scmp.lt.s32.totalorder %s283_s19, %s283_s19 }
  0x80   : > { %p5572_p0 = scmp.lt.s32.totalorder %s5570_s2, %s5566_s28 }
  0x82   : > { %p5573_p2 = por %p5572_p0, %p5571_p12 }
  0x84   : > { %p5574_p1 = pnand %p5573_p2, %p5567_p9 }
  0x86   : > { %5577 = shalt.err (!%p5574_p1)  }
  0x87   : > { %s5734_s29 = smov 384   ;;  %s5735_s10 = smov 18  }
  0x88   : > { %285 = dma.hbm_to_vmem [thread:$0]  %s280_s20, 5184, %s283_s19, [#allocation3], %s5734_s29, %s5734_s29, %s5735_s10 }
  0x89   : > { %s5943_s14 = scalar_lea.vmem [#allocation10], %s3632_s11  ;;  %s5946_s8 = scalar_lea.vmem [#allocation11], %s5928_s25 }
  0x8a   : > { %s5949_s30 = scalar_lea.vmem [#allocation13], %s5928_s25 }
  0x8b   : > { %5694 = dma.done.wait [#allocation3], 5184 }
  0x8c   : > { %5695 = vsyncadd [#allocation3], 4294962112  ;;  %v655_v0 = vld [vmem:[#allocation4 + $0x80] sm:$0xff]  ;;  %v656_v1 = vld [vmem:[#allocation4 + $0x88] sm:$0xff]  ;;  %s3645_s11 = sshll.u32 %s5718_s24, 12  ;;  %s3440_s20 = sshll.u32 %s5943_s14, 4  ;;  %s6651_s20 = int_to_ptr.vmem [resolvable:$true] %s3440_s20 }
  0x8d   : > { %v1767_v2 = vld [vmem:[#allocation4 + $0x200] sm:$0xff]  ;;  %v4798_v3 = vpack.c.bf16 %v656_v1, %v655_v0  ;;  %v1768_v4 = vld [vmem:[#allocation4 + $0x208] sm:$0xff]  ;;  %v657_v5 = vld [vmem:[#allocation4 + $0x90] sm:$0xff]  ;;  %s6649_s15 = scalar_lea.hbm %s6775_s4, %s3645_s11  ;;  %s3416_s17 = scalar_lea.sflag [#allocation6], %s5928_s25 }
  0x8e   : > { %v658_v6 = vld [vmem:[#allocation4 + $0x98] sm:$0xff]  ;;  %v5951_v7 = vpack.c.bf16 %v1768_v4, %v1767_v2  ;;  %v1769_v9 = vld [vmem:[#allocation4 + $0x210] sm:$0xff]  ;;  %v659_v11 = vld [vmem:[#allocation4 + $0xa0] sm:$0xff]  ;;  %s5578_s18 = scalar_lea.vmem %s6651_s20, 4096  ;;  %p6887_p4 = scmp.ne.s32.totalorder %s6827_s7, 0 }
  0x8f   : > { %v4802_v8 = vpack.c.bf16 %v658_v6, %v657_v5  ;;  %v1770_v10 = vld [vmem:[#allocation4 + $0x218] sm:$0xff]  ;;  %4799 = vmatprep.subr.bf16.mxu1 %v4798_v3  ;;  %v660_v13 = vld [vmem:[#allocation4 + $0xa8] sm:$0xff]  ;;  %v1771_v14 = vld [vmem:[#allocation4 + $0x220] sm:$0xff]  ;;  %p5579_p8 = scmp.ne.s32.totalorder %s6651_s20, %s5578_s18  ;;  %s5737_s13 = smov [#allocation10]  }
  0x90   : > { %6839 = vst [vmem:[#allocation23_spill] sm:$0xff] %v5951_v7  ;;  %v5953_v12 = vpack.c.bf16 %v1770_v10, %v1769_v9  ;;  %v1772_v15 = vld [vmem:[#allocation4 + $0x228] sm:$0xff]  ;;  %4927 = vmatprep.subr.bf16.mxu0 %v5951_v7  ;;  %4801 = vmatpush3.bf16.msra.mxu1 %v4798_v3  ;;  %v4806_v16 = vpack.c.bf16 %v660_v13, %v659_v11  ;;  %v661_v18 = vld [vmem:[#allocation4 + $0xb0] sm:$0xff]  ;;  %v662_v19 = vld [vmem:[#allocation4 + $0xb8] sm:$0xff]  ;;  %s5582_s16 = sshll.u32 %s5737_s13, 4  ;;  %s5583_s16 = int_to_ptr.vmem [resolvable:$false] %s5582_s16 }
  0x91   : > { %4929 = vmatpush3.bf16.msra.mxu0 %v5951_v7  ;;  %4803 = vmatprep.subr.bf16.mxu1 %v4802_v8  ;;  %v5958_v17 = vpack.c.bf16 %v1772_v15, %v1771_v14  ;;  %v1773_v20 = vld [vmem:[#allocation4 + $0x230] sm:$0xff]  ;;  %v1774_v21 = vld [vmem:[#allocation4 + $0x238] sm:$0xff]  ;;  %v663_v22 = vld [vmem:[#allocation4 + $0xc0] sm:$0xff]  ;;  %v4810_v23 = vpack.c.bf16 %v662_v19, %v661_v18  ;;  %p5580_p13 = pnand %p5579_p8, %p6887_p4  ;;  %s5584_s28 = scalar_lea.vmem %s5583_s16, 8192 }
  0x92   : > { %6840 = vst [vmem:[#allocation24_spill] sm:$0xff] %v5953_v12  ;;  %4931 = vmatprep.subr.bf16.mxu0 %v5953_v12  ;;  %v664_v24 = vld [vmem:[#allocation4 + $0xc8] sm:$0xff]  ;;  %v1775_v25 = vld [vmem:[#allocation4 + $0x240] sm:$0xff]  ;;  %v5962_v27 = vpack.c.bf16 %v1774_v21, %v1773_v20  ;;  %v665_v28 = vld [vmem:[#allocation4 + $0xd0] sm:$0xff]  ;;  %p5585_p11 = scmp.lt.s32.totalorder %s6651_s20, %s5583_s16  ;;  %p5586_p3 = scmp.lt.s32.totalorder %s5584_s28, %s5578_s18 }
  0x93   : > { %6841 = vst [vmem:[#allocation25_spill] sm:$0xff] %v5958_v17  ;;  %v1776_v26 = vld [vmem:[#allocation4 + $0x248] sm:$0xff]  ;;  %v666_v29 = vld [vmem:[#allocation4 + $0xd8] sm:$0xff]  ;;  %v290_v30 = vld [vmem:[#allocation2] sm:$0xff]  ;;  %v4814_v34 = vpack.c.bf16 %v664_v24, %v663_v22  ;;  %p5581_p10 = pneg %p5580_p13 }
  0x94   : > { %4805 = vmatpush3.bf16.msra.mxu1 %v4802_v8  ;;  %6842 = vst [vmem:[#allocation26_spill] sm:$0xff] %v5962_v27  ;;  %v291_v31 = vld [vmem:[#allocation2 + $0x8] sm:$0xff]  ;;  %v5964_v32 = vld [vmem:[#allocation7] ss:$0 sm:$0xff]  ;;  %v5966_v33 = vld [vmem:[#allocation9] ss:$0 sm:$0xff]  ;;  %v5975_v44 = vpack.c.bf16 %v1776_v26, %v1775_v25  ;;  %v5984_v51 = vpack.c.bf16 %v666_v29, %v665_v28  ;;  %p5587_p5 = por %p5586_p3, %p5585_p11 }
  0x95   : > { %4933 = vmatpush3.bf16.msra.mxu0 %v5953_v12  ;;  %4807 = vmatprep.subr.bf16.mxu1 %v4806_v16  ;;  %v351_v35 = vmul.f32 %v5964_v32, %v290_v30  ;;  %v352_v36 = vmul.f32 %v5964_v32, %v291_v31  ;;  %v293_v37 = vld [vmem:[#allocation2 + $0x18] sm:$0xff]  ;;  %v294_v38 = vld [vmem:[#allocation2 + $0x20] sm:$0xff]  ;;  %v292_v39 = vld [vmem:[#allocation2 + $0x10] sm:$0x3] }
  0x96   : > { %4935 = vmatprep.subr.bf16.mxu0 %v5958_v17  ;;  %v354_v40 = vmul.f32 %v5964_v32, %v293_v37  ;;  %v355_v41 = vmul.f32 %v5964_v32, %v294_v38  ;;  %v353_v42 = vmul.f32 %v5964_v32, %v292_v39  ;;  %v295_v43 = vld [vmem:[#allocation2 + $0x28] sm:$0x3]  ;;  %6843 = vst [vmem:[#allocation27_spill] sm:$0xff] %v5975_v44  ;;  %v1777_v45 = vld [vmem:[#allocation4 + $0x250] sm:$0xff]  ;;  %v296_v50 = vld [vmem:[#allocation2 + $0x30] sm:$0xff]  ;;  %p5588_p6 = pnand %p5587_p5, %p5581_p10 }
  0x97   : > { %v1778_v46 = vld [vmem:[#allocation4 + $0x258] sm:$0xff]  ;;  %v5978_v47 = vadd.f32 %v5966_v33, %v351_v35  ;;  %v5981_v48 = vadd.f32 %v5966_v33, %v352_v36  ;;  %v356_v49 = vmul.f32 %v5964_v32, %v295_v43  ;;  %v667_v52 = vld [vmem:[#allocation4 + $0xe0] sm:$0xff]  ;;  %v297_v56 = vld [vmem:[#allocation2 + $0x38] sm:$0xff]  ;;  %v357_v62 = vmul.f32 %v5964_v32, %v296_v50 }
  0x98   : > { %4809 = vmatpush3.bf16.msra.mxu1 %v4806_v16  ;;  %v5987_v53 = vadd.f32 %v5966_v33, %v354_v40  ;;  %v5990_v54 = vadd.f32 %v5966_v33, %v355_v41  ;;  %v414_v55 = vadd.f32 %v5966_v33, %v353_v42  ;;  %v298_v57 = vld [vmem:[#allocation2 + $0x40] sm:$0x3]  ;;  %v668_v58 = vld [vmem:[#allocation4 + $0xe8] sm:$0xff]  ;;  %v299_v63 = vld [vmem:[#allocation2 + $0x48] sm:$0xff]  ;;  %v358_v6 = vmul.f32 %v5964_v32, %v297_v56 }
  0x99   : > { %4937 = vmatpush3.bf16.msra.mxu0 %v5958_v17  ;;  %4811 = vmatprep.subr.bf16.mxu1 %v4810_v23  ;;  %v6795_v59 = vmax.f32 %v5978_v47, 0.0  ;;  %v6794_v60 = vmax.f32 %v5981_v48, 0.0  ;;  %v417_v61 = vadd.f32 %v5966_v33, %v356_v49  ;;  %v300_v0 = vld [vmem:[#allocation2 + $0x50] sm:$0xff]  ;;  %v1780_v2 = vld [vmem:[#allocation4 + $0x268] sm:$0xff]  ;;  %v6002_v8 = vpack.c.bf16 %v1778_v46, %v1777_v45  ;;  %v302_v14 = vld [vmem:[#allocation2 + $0x60] sm:$0xff] }
  0x9a   : > { %4939 = vmatprep.subr.bf16.mxu0 %v5962_v27  ;;  %v1779_v1 = vld [vmem:[#allocation4 + $0x260] sm:$0xff]  ;;  %v6793_v3 = vmax.f32 %v5987_v53, 0.0  ;;  %v6792_v4 = vmax.f32 %v5990_v54, 0.0  ;;  %v468_v5 = vmax.f32 %v414_v55, 0.0  ;;  %v6009_v10 = vadd.f32 %v5966_v33, %v357_v62  ;;  %v301_v13 = vld [vmem:[#allocation2 + $0x58] sm:$0x3] }
  0x9b   : > { %6844 = vst [vmem:[#allocation28_spill] sm:$0xff] %v6002_v8  ;;  %520 = vst [vmem:[#allocation2] sm:$0xff] %v6795_v59  ;;  %v471_v9 = vmax.f32 %v417_v61, 0.0  ;;  %v359_v11 = vmul.f32 %v5964_v32, %v298_v57  ;;  %v6012_v15 = vpack.c.bf16 %v668_v58, %v667_v52  ;;  %v6019_v16 = vadd.f32 %v5966_v33, %v358_v6  ;;  %v303_v20 = vld [vmem:[#allocation2 + $0x68] sm:$0xff]  ;;  %v304_v21 = vld [vmem:[#allocation2 + $0x70] sm:$0x3] }
  0x9c   : > { %4813 = vmatpush3.bf16.msra.mxu1 %v4810_v23  ;;  %521 = vst [vmem:[#allocation2 + $0x8] sm:$0xff] %v6794_v60  ;;  %523 = vst [vmem:[#allocation2 + $0x18] sm:$0xff] %v6793_v3  ;;  %v360_v18 = vmul.f32 %v5964_v32, %v299_v63  ;;  %v361_v19 = vmul.f32 %v5964_v32, %v300_v0  ;;  %v6023_v22 = vpack.c.bf16 %v1780_v2, %v1779_v1  ;;  %v669_v23 = vld [vmem:[#allocation4 + $0xf0] sm:$0xff]  ;;  %v670_v24 = vld [vmem:[#allocation4 + $0xf8] sm:$0xff] }
  0x9d   : > { %4941 = vmatpush3.bf16.msra.mxu0 %v5962_v27  ;;  %4815 = vmatprep.subr.bf16.mxu1 %v4814_v34  ;;  %524 = vst [vmem:[#allocation2 + $0x20] sm:$0xff] %v6792_v4  ;;  %522 = vst [vmem:[#allocation2 + $0x10] sm:$0x3] %v468_v5  ;;  %v6791_v25 = vmax.f32 %v6009_v10, 0.0  ;;  %v420_v26 = vadd.f32 %v5966_v33, %v359_v11  ;;  %v362_v28 = vmul.f32 %v5964_v32, %v301_v13  ;;  %v1781_v29 = vld [vmem:[#allocation4 + $0x270] sm:$0xff]  ;;  %v305_v36 = vld [vmem:[#allocation2 + $0x78] sm:$0xff] }
  0x9e   : > { %4943 = vmatprep.subr.bf16.mxu0 %v5975_v44  ;;  %6845 = vst [vmem:[#allocation29_spill] sm:$0xff] %v6023_v22  ;;  %525 = vst [vmem:[#allocation2 + $0x28] sm:$0x3] %v471_v9  ;;  %v6790_v30 = vmax.f32 %v6019_v16, 0.0  ;;  %v6032_v31 = vadd.f32 %v5966_v33, %v360_v18  ;;  %v363_v35 = vmul.f32 %v5964_v32, %v302_v14  ;;  %v1782_v37 = vld [vmem:[#allocation4 + $0x278] sm:$0xff]  ;;  %v306_v42 = vld [vmem:[#allocation2 + $0x80] sm:$0xff] }
  0x9f   : > { %526 = vst [vmem:[#allocation2 + $0x30] sm:$0xff] %v6791_v25  ;;  %v474_v38 = vmax.f32 %v420_v26, 0.0  ;;  %v423_v39 = vadd.f32 %v5966_v33, %v362_v28  ;;  %v364_v40 = vmul.f32 %v5964_v32, %v303_v20  ;;  %v365_v41 = vmul.f32 %v5964_v32, %v304_v21  ;;  %v307_v43 = vld [vmem:[#allocation2 + $0x88] sm:$0x3]  ;;  %v606_v46 = vld [vmem:[#allocation4] sm:$0xff]  ;;  %v607_v49 = vld [vmem:[#allocation4 + $0x8] sm:$0xff] }
  0xa0   : > { %4817 = vmatpush3.bf16.msra.mxu1 %v4814_v34  ;;  %v6035_v34 = vadd.f32 %v5966_v33, %v361_v19  ;;  %v6044_v45 = vpack.c.bf16 %v670_v24, %v669_v23  ;;  %v2073_v50 = vld [vmem:[#allocation4 + $0x280] sm:$0xff]  ;;  %527 = vst [vmem:[#allocation2 + $0x38] sm:$0xff] %v6790_v30  ;;  %v6789_v52 = vmax.f32 %v6032_v31, 0.0  ;;  %v6051_v56 = vadd.f32 %v5966_v33, %v363_v35  ;;  %v2074_v57 = vld [vmem:[#allocation4 + $0x288] sm:$0xff]  ;;  %v310_v11 = vld [vmem:[#allocation2 + $0xa0] sm:$0x3] }
  0xa1   : > { %4945 = vmatpush3.bf16.msra.mxu0 %v5975_v44  ;;  %4819 = vmatprep.subr.bf16.mxu1 %v5984_v51  ;;  %528 = vst [vmem:[#allocation2 + $0x40] sm:$0x3] %v474_v38  ;;  %v477_v58 = vmax.f32 %v423_v39, 0.0  ;;  %v6055_v61 = vadd.f32 %v5966_v33, %v364_v40  ;;  %v426_v62 = vadd.f32 %v5966_v33, %v365_v41  ;;  %v308_v0 = vld [vmem:[#allocation2 + $0x90] sm:$0xff]  ;;  %v309_v1 = vld [vmem:[#allocation2 + $0x98] sm:$0xff]  ;;  %v311_v13 = vld [vmem:[#allocation2 + $0xa8] sm:$0xff] }
  0xa2   : > { %4947 = vmatprep.subr.bf16.mxu0 %v6002_v8  ;;  %v6788_v55 = vmax.f32 %v6035_v34, 0.0  ;;  %v366_v63 = vmul.f32 %v5964_v32, %v305_v36  ;;  %v6061_v2 = vpack.c.bf16 %v1782_v37, %v1781_v29  ;;  %529 = vst [vmem:[#allocation2 + $0x48] sm:$0xff] %v6789_v52  ;;  %v367_v6 = vmul.f32 %v5964_v32, %v306_v42  ;;  %v2075_v23 = vld [vmem:[#allocation4 + $0x290] sm:$0xff]  ;;  %v2076_v24 = vld [vmem:[#allocation4 + $0x298] sm:$0xff]  ;;  %v312_v36 = vld [vmem:[#allocation2 + $0xb0] sm:$0xff] }
  0xa3   : > { %v622_v5 = vld [vmem:[#allocation2 + $0x1] sm:$0xff]  ;;  %v368_v9 = vmul.f32 %v5964_v32, %v307_v43  ;;  %v6073_v18 = vpack.c.bf16 %v607_v49, %v606_v46  ;;  %531 = vst [vmem:[#allocation2 + $0x58] sm:$0x3] %v477_v58  ;;  %v6786_v19 = vmax.f32 %v6055_v61, 0.0  ;;  %v480_v20 = vmax.f32 %v426_v62, 0.0  ;;  %v2077_v62 = vld [vmem:[#allocation4 + $0x2a0] sm:$0xff] }
  0xa4   : > { %4821 = vmatpush3.bf16.msra.mxu1 %v5984_v51  ;;  %6846 = vst [vmem:[#allocation30_spill] sm:$0xff] %v6061_v2  ;;  %530 = vst [vmem:[#allocation2 + $0x50] sm:$0xff] %v6788_v55  ;;  %v6787_v51 = vmax.f32 %v6051_v56, 0.0  ;;  %4110 = vmatprep.mubr.f32.mxu1 %v622_v5  ;;  %v6071_v14 = vld [vmem:[#allocation2 + $0x19] sm:$0xff]  ;;  %v6077_v21 = vadd.f32 %v5966_v33, %v366_v63  ;;  %v6083_v26 = vadd.f32 %v5966_v33, %v367_v6  ;;  %v609_v39 = vld [vmem:[#allocation4 + $0x18] sm:$0xff] }
  0xa5   : > { %4949 = vmatpush3.bf16.msra.mxu0 %v6002_v8  ;;  %4823 = vmatprep.subr.bf16.mxu1 %v6012_v15  ;;  %v429_v28 = vadd.f32 %v5966_v33, %v368_v9  ;;  %v369_v29 = vmul.f32 %v5964_v32, %v308_v0  ;;  %v370_v35 = vmul.f32 %v5964_v32, %v309_v1  ;;  %v608_v38 = vld [vmem:[#allocation4 + $0x10] sm:$0xff]  ;;  %v313_v43 = vld [vmem:[#allocation2 + $0xb8] sm:$0x3]  ;;  %v315_v5 = vld [vmem:[#allocation2 + $0xc8] sm:$0xff] }
  0xa6   : > { %4951 = vmatprep.subr.bf16.mxu0 %v6023_v22  ;;  %4430 = vmatprep.mubr.f32.mxu0 %v6071_v14  ;;  %532 = vst [vmem:[#allocation2 + $0x60] sm:$0xff] %v6787_v51  ;;  %v6089_v37 = vpack.c.bf16 %v2074_v57, %v2073_v50  ;;  %533 = vst [vmem:[#allocation2 + $0x68] sm:$0xff] %v6786_v19  ;;  %v6785_v40 = vmax.f32 %v6077_v21, 0.0  ;;  %v371_v41 = vmul.f32 %v5964_v32, %v310_v11  ;;  %v314_v57 = vld [vmem:[#allocation2 + $0xc0] sm:$0xff]  ;;  %v316_v6 = vld [vmem:[#allocation2 + $0xd0] sm:$0x3] }
  0xa7   : > { %534 = vst [vmem:[#allocation2 + $0x70] sm:$0x3] %v480_v20  ;;  %v372_v42 = vmul.f32 %v5964_v32, %v311_v13  ;;  %v483_v46 = vmax.f32 %v429_v28, 0.0  ;;  %v430_v49 = vadd.f32 %v5966_v33, %v369_v29  ;;  %v431_v50 = vadd.f32 %v5966_v33, %v370_v35  ;;  %v2078_v11 = vld [vmem:[#allocation4 + $0x2a8] sm:$0xff]  ;;  %v2079_v13 = vld [vmem:[#allocation4 + $0x2b0] sm:$0xff]  ;;  %v2080_v20 = vld [vmem:[#allocation4 + $0x2b8] sm:$0xff] }
  0xa8   : > { %4825 = vmatpush3.bf16.msra.mxu1 %v6012_v15  ;;  %v6784_v15 = vmax.f32 %v6083_v26, 0.0  ;;  %v6102_v58 = vpack.c.bf16 %v2076_v24, %v2075_v23  ;;  %535 = vst [vmem:[#allocation2 + $0x78] sm:$0xff] %v6785_v40  ;;  %v432_v63 = vadd.f32 %v5966_v33, %v371_v41  ;;  %v373_v0 = vmul.f32 %v5964_v32, %v312_v36  ;;  %v623_v29 = vld [vmem:[#allocation2 + $0x9] sm:$0xff]  ;;  %v611_v36 = vld [vmem:[#allocation4 + $0x28] sm:$0xff]  ;;  %v330_v30 = vld [vmem:[#allocation2 + $0x140] sm:$0xff] }
  0xa9   : > { %4953 = vmatpush3.bf16.msra.mxu0 %v6023_v22  ;;  %4827 = vmatprep.subr.bf16.mxu1 %v6044_v45  ;;  %v433_v1 = vadd.f32 %v5966_v33, %v372_v42  ;;  %v6109_v9 = vpack.c.bf16 %v609_v39, %v608_v38  ;;  %537 = vst [vmem:[#allocation2 + $0x88] sm:$0x3] %v483_v46  ;;  %v6113_v23 = vmax.f32 %v430_v49, 0.0  ;;  %v6115_v24 = vmax.f32 %v431_v50, 0.0  ;;  %v610_v35 = vld [vmem:[#allocation4 + $0x20] sm:$0xff]  ;;  %v1735_v46 = vld [vmem:[#allocation2 + $0x21] sm:$0xff] }
  0xaa   : > { %4955 = vmatprep.subr.bf16.mxu0 %v6061_v2  ;;  %536 = vst [vmem:[#allocation2 + $0x80] sm:$0xff] %v6784_v15  ;;  %v374_v28 = vmul.f32 %v5964_v32, %v313_v43  ;;  %v486_v38 = vmax.f32 %v432_v63, 0.0  ;;  %v434_v39 = vadd.f32 %v5966_v33, %v373_v0  ;;  %v375_v42 = vmul.f32 %v5964_v32, %v314_v57  ;;  %v317_v50 = vld [vmem:[#allocation2 + $0xd8] sm:$0xff]  ;;  %v318_v63 = vld [vmem:[#allocation2 + $0xe0] sm:$0xff]  ;;  %v320_v40 = vld [vmem:[#allocation2 + $0xf0] sm:$0xff] }
  0xab   : > { %v6120_v41 = vmax.f32 %v433_v1, 0.0  ;;  %538 = vst [vmem:[#allocation2 + $0x90] sm:$0xff] %v6113_v23  ;;  %539 = vst [vmem:[#allocation2 + $0x98] sm:$0xff] %v6115_v24  ;;  %v376_v43 = vmul.f32 %v5964_v32, %v315_v5  ;;  %v377_v49 = vmul.f32 %v5964_v32, %v316_v6  ;;  %v6131_v57 = vpack.c.bf16 %v2078_v11, %v2077_v62  ;;  %v1736_v5 = vld [vmem:[#allocation2 + $0x31] sm:$0xff]  ;;  %v331_v60 = vld [vmem:[#allocation2 + $0x148] sm:$0x3] }
  0xac   : > { %4829 = vmatpush3.bf16.msra.mxu1 %v6044_v45  ;;  %v435_v45 = vadd.f32 %v5966_v33, %v374_v28  ;;  %v6133_v0 = vpack.c.bf16 %v2080_v20, %v2079_v13  ;;  %540 = vst [vmem:[#allocation2 + $0xa0] sm:$0x3] %v486_v38  ;;  %v6135_v1 = vmax.f32 %v434_v39, 0.0  ;;  %v436_v15 = vadd.f32 %v5966_v33, %v375_v42  ;;  %v319_v28 = vld [vmem:[#allocation2 + $0xe8] sm:$0x3]  ;;  %v321_v11 = vld [vmem:[#allocation2 + $0xf8] sm:$0xff] }
  0xad   : > { %4957 = vmatpush3.bf16.msra.mxu0 %v6061_v2  ;;  %4831 = vmatprep.subr.bf16.mxu1 %v6073_v18  ;;  %541 = vst [vmem:[#allocation2 + $0xa8] sm:$0xff] %v6120_v41  ;;  %v6139_v6 = vpack.c.bf16 %v611_v36, %v610_v35  ;;  %v437_v51 = vadd.f32 %v5966_v33, %v376_v43  ;;  %v322_v36 = vld [vmem:[#allocation2 + $0x100] sm:$0x3]  ;;  %v2081_v39 = vld [vmem:[#allocation4 + $0x2c0] sm:$0xff]  ;;  %v2082_v42 = vld [vmem:[#allocation4 + $0x2c8] sm:$0xff] }
  0xae   : > { %4959 = vmatprep.subr.bf16.mxu0 %v6089_v37  ;;  %v489_v19 = vmax.f32 %v435_v45, 0.0  ;;  %v438_v62 = vadd.f32 %v5966_v33, %v377_v49  ;;  %542 = vst [vmem:[#allocation2 + $0xb0] sm:$0xff] %v6135_v1  ;;  %v6145_v13 = vmax.f32 %v436_v15, 0.0  ;;  %v378_v20 = vmul.f32 %v5964_v32, %v317_v50  ;;  %v1737_v38 = vld [vmem:[#allocation2 + $0x39] sm:$0xff]  ;;  %v1738_v49 = vld [vmem:[#allocation2 + $0x49] sm:$0xff] }
  0xaf   : > { %4111 = vmatmul.mubr.f32.vlgmr.msra.gmra.mrb[0].mxu1 %v623_v29  ;;  %v379_v29 = vmul.f32 %v5964_v32, %v318_v63  ;;  %v380_v35 = vmul.f32 %v5964_v32, %v319_v28  ;;  %v381_v15 = vmul.f32 %v5964_v32, %v320_v40  ;;  %v382_v43 = vmul.f32 %v5964_v32, %v321_v11  ;;  %v612_v50 = vld [vmem:[#allocation4 + $0x30] sm:$0xff]  ;;  %v613_v63 = vld [vmem:[#allocation4 + $0x38] sm:$0xff]  ;;  %v324_v11 = vld [vmem:[#allocation2 + $0x110] sm:$0xff] }
  0xb0   : > { %4431 = vmatmul.mubr.f32.vlgmr.msra.gmra.mrb[0].mxu0 %v1735_v46  ;;  %4833 = vmatpush3.bf16.msra.mxu1 %v6073_v18  ;;  %543 = vst [vmem:[#allocation2 + $0xb8] sm:$0x3] %v489_v19  ;;  %v6152_v18 = vmax.f32 %v437_v51, 0.0  ;;  %v492_v45 = vmax.f32 %v438_v62, 0.0  ;;  %544 = vst [vmem:[#allocation2 + $0xc0] sm:$0xff] %v6145_v13  ;;  %v383_v28 = vmul.f32 %v5964_v32, %v322_v36  ;;  %v323_v62 = vld [vmem:[#allocation2 + $0x108] sm:$0xff] }
  0xb1   : > { %4961 = vmatpush3.bf16.msra.mxu0 %v6089_v37  ;;  %4113 = vmatprep.mubr.f32.mxu1 %v6071_v14  ;;  %v439_v14 = vadd.f32 %v5966_v33, %v378_v20  ;;  %v440_v37 = vadd.f32 %v5966_v33, %v379_v29  ;;  %v441_v51 = vadd.f32 %v5966_v33, %v380_v35  ;;  %v325_v55 = vld [vmem:[#allocation2 + $0x118] sm:$0x3]  ;;  %v6305_v22 = vld [vmem:[#allocation2 + $0x7a] sm:$0xff] }
  0xb2   : > { %4433 = vmatprep.mubr.f32.mxu0 %v1736_v5  ;;  %4963 = vmatprep.subr.bf16.mxu0 %v6102_v58  ;;  %545 = vst [vmem:[#allocation2 + $0xc8] sm:$0xff] %v6152_v18  ;;  %546 = vst [vmem:[#allocation2 + $0xd0] sm:$0x3] %v492_v45  ;;  %v442_v19 = vadd.f32 %v5966_v33, %v381_v15  ;;  %v443_v40 = vadd.f32 %v5966_v33, %v382_v43  ;;  %v1739_v45 = vld [vmem:[#allocation2 + $0x51] sm:$0xff] }
  0xb3   : > { %4114 = vmatmul.mubr.f32.gmra.mrb[2].mxu1 %v1735_v46  ;;  %4835 = vmatprep.subr.bf16.mxu1 %v6109_v9  ;;  %v6166_v20 = vpack.c.bf16 %v2082_v42, %v2081_v39  ;;  %v6168_v29 = vmax.f32 %v439_v14, 0.0  ;;  %v6170_v46 = vmax.f32 %v440_v37, 0.0  ;;  %v495_v35 = vmax.f32 %v441_v51, 0.0  ;;  %v326_v39 = vld [vmem:[#allocation2 + $0x120] sm:$0xff]  ;;  %v327_v14 = vld [vmem:[#allocation2 + $0x128] sm:$0xff]  ;;  %v341_v8 = vld [vmem:[#allocation2 + $0x198] sm:$0xff] }
  0xb4   : > { %4434 = vmatmul.mubr.f32.gmra.mrb[2].mxu0 %v1737_v38  ;;  %4116 = vmatprep.mubr.f32.mxu1 %v1736_v5  ;;  %v6173_v15 = vpack.c.bf16 %v613_v63, %v612_v50  ;;  %v6175_v43 = vmax.f32 %v442_v19, 0.0  ;;  %v6177_v36 = vmax.f32 %v443_v40, 0.0  ;;  %v444_v5 = vadd.f32 %v5966_v33, %v383_v28  ;;  %v1740_v42 = vld [vmem:[#allocation2 + $0x61] sm:$0xff]  ;;  %v328_v37 = vld [vmem:[#allocation2 + $0x130] sm:$0x3]  ;;  %v6311_v44 = vld [vmem:[#allocation2 + $0x92] sm:$0xff] }
  0xb5   : > { %4965 = vmatpush3.bf16.msra.mxu0 %v6102_v58  ;;  %4436 = vmatprep.mubr.f32.mxu0 %v1738_v49  ;;  %547 = vst [vmem:[#allocation2 + $0xd8] sm:$0xff] %v6168_v29  ;;  %548 = vst [vmem:[#allocation2 + $0xe0] sm:$0xff] %v6170_v46  ;;  %v384_v58 = vmul.f32 %v5964_v32, %v323_v62  ;;  %v385_v50 = vmul.f32 %v5964_v32, %v324_v11  ;;  %v2083_v51 = vld [vmem:[#allocation4 + $0x2d0] sm:$0xff]  ;;  %v2084_v19 = vld [vmem:[#allocation4 + $0x2d8] sm:$0xff] }
  0xb6   : > { %4967 = vmatprep.subr.bf16.mxu0 %v6131_v57  ;;  %4837 = vmatpush3.bf16.msra.mxu1 %v6109_v9  ;;  %549 = vst [vmem:[#allocation2 + $0xe8] sm:$0x3] %v495_v35  ;;  %v386_v63 = vmul.f32 %v5964_v32, %v325_v55  ;;  %550 = vst [vmem:[#allocation2 + $0xf0] sm:$0xff] %v6175_v43  ;;  %v498_v9 = vmax.f32 %v444_v5, 0.0  ;;  %v387_v40 = vmul.f32 %v5964_v32, %v326_v39  ;;  %v614_v55 = vld [vmem:[#allocation4 + $0x40] sm:$0xff]  ;;  %v615_v11 = vld [vmem:[#allocation4 + $0x48] sm:$0xff] }
  0xb7   : > { %4117 = vmatmul.mubr.f32.gmra.mrb[4].mxu1 %v1737_v38  ;;  %4839 = vmatprep.subr.bf16.mxu1 %v6139_v6  ;;  %551 = vst [vmem:[#allocation2 + $0xf8] sm:$0xff] %v6177_v36  ;;  %v388_v28 = vmul.f32 %v5964_v32, %v327_v14  ;;  %v389_v62 = vmul.f32 %v5964_v32, %v328_v37  ;;  %v1741_v5 = vld [vmem:[#allocation2 + $0x69] sm:$0xff]  ;;  %v2393_v27 = vld [vmem:[#allocation4 + $0x368] sm:$0xff] }
  0xb8   : > { %4437 = vmatmul.mubr.f32.gmra.mrb[4].mxu0 %v1739_v45  ;;  %4119 = vmatprep.mubr.f32.mxu1 %v1738_v49  ;;  %v445_v38 = vadd.f32 %v5966_v33, %v384_v58  ;;  %v446_v35 = vadd.f32 %v5966_v33, %v385_v50  ;;  %v447_v52 = vadd.f32 %v5966_v33, %v386_v63  ;;  %v329_v49 = vld [vmem:[#allocation2 + $0x138] sm:$0xff]  ;;  %v616_v63 = vld [vmem:[#allocation4 + $0x50] sm:$0xff] }
  0xb9   : > { %4969 = vmatpush3.bf16.msra.mxu0 %v6131_v57  ;;  %4439 = vmatprep.mubr.f32.mxu0 %v1740_v42  ;;  %552 = vst [vmem:[#allocation2 + $0x100] sm:$0x3] %v498_v9  ;;  %v448_v39 = vadd.f32 %v5966_v33, %v387_v40  ;;  %v449_v14 = vadd.f32 %v5966_v33, %v388_v28  ;;  %v1742_v58 = vld [vmem:[#allocation2 + $0x79] sm:$0xff]  ;;  %v617_v57 = vld [vmem:[#allocation4 + $0x58] sm:$0xff] }
  0xba   : > { %v450_v37 = vadd.f32 %v5966_v33, %v389_v62  ;;  %4971 = vmatprep.subr.bf16.mxu0 %v6133_v0  ;;  %4841 = vmatpush3.bf16.msra.mxu1 %v6139_v6  ;;  %v6202_v50 = vpack.c.bf16 %v2084_v19, %v2083_v51  ;;  %v6204_v25 = vmax.f32 %v445_v38, 0.0  ;;  %v6206_v9 = vmax.f32 %v446_v35, 0.0  ;;  %v332_v51 = vld [vmem:[#allocation2 + $0x150] sm:$0xff]  ;;  %v333_v19 = vld [vmem:[#allocation2 + $0x158] sm:$0xff] }
  0xbb   : > { %v501_v40 = vmax.f32 %v447_v52, 0.0  ;;  %4120 = vmatmul.mubr.f32.gmra.mrb[6].mxu1 %v1739_v45  ;;  %4843 = vmatprep.subr.bf16.mxu1 %v6173_v15  ;;  %v4846_v28 = vpack.c.bf16 %v615_v11, %v614_v55  ;;  %v6209_v62 = vmax.f32 %v448_v39, 0.0  ;;  %v6211_v4 = vmax.f32 %v449_v14, 0.0  ;;  %v1743_v55 = vld [vmem:[#allocation2 + $0x81] sm:$0xff]  ;;  %v2085_v35 = vld [vmem:[#allocation4 + $0x2e0] sm:$0xff]  ;;  %v2086_v39 = vld [vmem:[#allocation4 + $0x2e8] sm:$0xff] }
  0xbc   : > { %v504_v3 = vmax.f32 %v450_v37, 0.0  ;;  %4440 = vmatmul.mubr.f32.gmra.mrb[6].mxu0 %v1741_v5  ;;  %4122 = vmatprep.mubr.f32.mxu1 %v1740_v42  ;;  %553 = vst [vmem:[#allocation2 + $0x108] sm:$0xff] %v6204_v25  ;;  %554 = vst [vmem:[#allocation2 + $0x110] sm:$0xff] %v6206_v9  ;;  %v390_v6 = vmul.f32 %v5964_v32, %v329_v49  ;;  %v391_v52 = vmul.f32 %v5964_v32, %v330_v30  ;;  %v334_v30 = vld [vmem:[#allocation2 + $0x160] sm:$0x3] }
  0xbd   : > { %555 = vst [vmem:[#allocation2 + $0x118] sm:$0x3] %v501_v40  ;;  %v392_v45 = vmul.f32 %v5964_v32, %v331_v60  ;;  %4973 = vmatpush3.bf16.msra.mxu0 %v6133_v0  ;;  %4442 = vmatprep.mubr.f32.mxu0 %v1742_v58  ;;  %v6219_v11 = vpack.c.bf16 %v617_v57, %v616_v63  ;;  %556 = vst [vmem:[#allocation2 + $0x120] sm:$0xff] %v6209_v62  ;;  %v1744_v60 = vld [vmem:[#allocation2 + $0x91] sm:$0xff] }
  0xbe   : > { %557 = vst [vmem:[#allocation2 + $0x128] sm:$0xff] %v6211_v4  ;;  %558 = vst [vmem:[#allocation2 + $0x130] sm:$0x3] %v504_v3  ;;  %v393_v42 = vmul.f32 %v5964_v32, %v332_v51  ;;  %v394_v38 = vmul.f32 %v5964_v32, %v333_v19  ;;  %4975 = vmatprep.subr.bf16.mxu0 %v6166_v20  ;;  %4845 = vmatpush3.bf16.msra.mxu1 %v6173_v15  ;;  %v618_v3 = vld [vmem:[#allocation4 + $0x60] sm:$0xff]  ;;  %v619_v40 = vld [vmem:[#allocation4 + $0x68] sm:$0xff] }
  0xbf   : > { %v451_v0 = vadd.f32 %v5966_v33, %v390_v6  ;;  %v452_v14 = vadd.f32 %v5966_v33, %v391_v52  ;;  %v453_v37 = vadd.f32 %v5966_v33, %v392_v45  ;;  %4123 = vmatmul.mubr.f32.gmra.mrb[8].mxu1 %v1741_v5  ;;  %4847 = vmatprep.subr.bf16.mxu1 %v4846_v28  ;;  %v335_v52 = vld [vmem:[#allocation2 + $0x168] sm:$0xff]  ;;  %v336_v19 = vld [vmem:[#allocation2 + $0x170] sm:$0xff]  ;;  %v1745_v5 = vld [vmem:[#allocation2 + $0x99] sm:$0xff] }
  0xc0   : > { %v454_v49 = vadd.f32 %v5966_v33, %v393_v42  ;;  %v455_v63 = vadd.f32 %v5966_v33, %v394_v38  ;;  %v395_v57 = vmul.f32 %v5964_v32, %v334_v30  ;;  %4443 = vmatmul.mubr.f32.gmra.mrb[8].mxu0 %v1743_v55  ;;  %4125 = vmatprep.mubr.f32.mxu1 %v1742_v58  ;;  %v337_v58 = vld [vmem:[#allocation2 + $0x178] sm:$0x3] }
  0xc1   : > { %v6233_v51 = vmax.f32 %v451_v0, 0.0  ;;  %v6235_v15 = vmax.f32 %v452_v14, 0.0  ;;  %v507_v6 = vmax.f32 %v453_v37, 0.0  ;;  %4977 = vmatpush3.bf16.msra.mxu0 %v6166_v20  ;;  %4445 = vmatprep.mubr.f32.mxu0 %v1744_v60  ;;  %v4982_v45 = vpack.c.bf16 %v2086_v39, %v2085_v35  ;;  %v1746_v0 = vld [vmem:[#allocation2 + $0xa9] sm:$0xff]  ;;  %v2087_v14 = vld [vmem:[#allocation4 + $0x2f0] sm:$0xff] }
  0xc2   : > { %v6238_v42 = vmax.f32 %v454_v49, 0.0  ;;  %v6240_v38 = vmax.f32 %v455_v63, 0.0  ;;  %v456_v30 = vadd.f32 %v5966_v33, %v395_v57  ;;  %4979 = vmatprep.subr.bf16.mxu0 %v6202_v50  ;;  %4849 = vmatpush3.bf16.msra.mxu1 %v4846_v28  ;;  %v396_v20 = vmul.f32 %v5964_v32, %v335_v52  ;;  %v2088_v37 = vld [vmem:[#allocation4 + $0x2f8] sm:$0xff]  ;;  %v620_v63 = vld [vmem:[#allocation4 + $0x70] sm:$0xff] }
  0xc3   : > { %559 = vst [vmem:[#allocation2 + $0x138] sm:$0xff] %v6233_v51  ;;  %560 = vst [vmem:[#allocation2 + $0x140] sm:$0xff] %v6235_v15  ;;  %v397_v35 = vmul.f32 %v5964_v32, %v336_v19  ;;  %v398_v39 = vmul.f32 %v5964_v32, %v337_v58  ;;  %4126 = vmatmul.mubr.f32.gmra.mrb[10].mxu1 %v1743_v55  ;;  %4851 = vmatprep.subr.bf16.mxu1 %v6219_v11  ;;  %v621_v57 = vld [vmem:[#allocation4 + $0x78] sm:$0xff]  ;;  %v1747_v19 = vld [vmem:[#allocation2 + $0xb1] sm:$0xff] }
  0xc4   : > { %561 = vst [vmem:[#allocation2 + $0x148] sm:$0x3] %v507_v6  ;;  %v4854_v49 = vpack.c.bf16 %v619_v40, %v618_v3  ;;  %562 = vst [vmem:[#allocation2 + $0x150] sm:$0xff] %v6238_v42  ;;  %v510_v28 = vmax.f32 %v456_v30, 0.0  ;;  %4446 = vmatmul.mubr.f32.gmra.mrb[10].mxu0 %v1745_v5  ;;  %4128 = vmatprep.mubr.f32.mxu1 %v1744_v60  ;;  %v457_v6 = vadd.f32 %v5966_v33, %v396_v20  ;;  %v1748_v3 = vld [vmem:[#allocation2 + $0xc1] sm:$0xff]  ;;  %v2380_v20 = vld [vmem:[#allocation4 + $0x300] sm:$0xff] }
  0xc5   : > { %563 = vst [vmem:[#allocation2 + $0x158] sm:$0xff] %v6240_v38  ;;  %v458_v52 = vadd.f32 %v5966_v33, %v397_v35  ;;  %v459_v55 = vadd.f32 %v5966_v33, %v398_v39  ;;  %4981 = vmatpush3.bf16.msra.mxu0 %v6202_v50  ;;  %4448 = vmatprep.mubr.f32.mxu0 %v1746_v0  ;;  %v2381_v35 = vld [vmem:[#allocation4 + $0x308] sm:$0xff]  ;;  %v1154_v50 = vld [vmem:[#allocation4 + $0x100] sm:$0xff] }
  0xc6   : > { %564 = vst [vmem:[#allocation2 + $0x160] sm:$0x3] %v510_v28  ;;  %4983 = vmatprep.subr.bf16.mxu0 %v4982_v45  ;;  %v4986_v40 = vpack.c.bf16 %v2088_v37, %v2087_v14  ;;  %4853 = vmatpush3.bf16.msra.mxu1 %v6219_v11  ;;  %v6257_v30 = vmax.f32 %v457_v6, 0.0  ;;  %v4858_v39 = vpack.c.bf16 %v621_v57, %v620_v63  ;;  %v1155_v14 = vld [vmem:[#allocation4 + $0x108] sm:$0xff]  ;;  %v1749_v11 = vld [vmem:[#allocation2 + $0xc9] sm:$0xff]  ;;  %v2382_v28 = vld [vmem:[#allocation4 + $0x310] sm:$0xff] }
  0xc7   : > { %v6259_v60 = vmax.f32 %v458_v52, 0.0  ;;  %v513_v58 = vmax.f32 %v459_v55, 0.0  ;;  %4129 = vmatmul.mubr.f32.gmra.mrb[12].mxu1 %v1745_v5  ;;  %4855 = vmatprep.subr.bf16.mxu1 %v4854_v49  ;;  %v6263_v37 = vld [vmem:[#allocation2 + $0x1a] sm:$0xff]  ;;  %v4990_v5 = vpack.c.bf16 %v2381_v35, %v2380_v20  ;;  %v2383_v63 = vld [vmem:[#allocation4 + $0x318] sm:$0xff]  ;;  %v6270_v6 = vld [vmem:[#allocation2 + $0x32] sm:$0xff] }
  0xc8   : > { %4449 = vmatmul.mubr.f32.gmra.mrb[12].mxu0 %v1747_v19  ;;  %4131 = vmatprep.mubr.f32.mxu1 %v1746_v0  ;;  %565 = vst [vmem:[#allocation2 + $0x168] sm:$0xff] %v6257_v30  ;;  %v6265_v0 = vpack.c.bf16 %v1155_v14, %v1154_v50  ;;  %v6268_v57 = vld [vmem:[#allocation2 + $0x22] sm:$0xff]  ;;  %v4994_v52 = vpack.c.bf16 %v2383_v63, %v2382_v28  ;;  %v2385_v20 = vld [vmem:[#allocation4 + $0x328] sm:$0xff] }
  0xc9   : > { %566 = vst [vmem:[#allocation2 + $0x170] sm:$0xff] %v6259_v60  ;;  %567 = vst [vmem:[#allocation2 + $0x178] sm:$0x3] %v513_v58  ;;  %4985 = vmatpush3.bf16.msra.mxu0 %v4982_v45  ;;  %4451 = vmatprep.mubr.f32.mxu0 %v1748_v3  ;;  %v640_v45 = vld [vmem:[#allocation2 + $0xd9] sm:$0xff]  ;;  %v339_v55 = vld [vmem:[#allocation2 + $0x188] sm:$0xff] }
  0xca   : > { %4987 = vmatprep.subr.bf16.mxu0 %v4986_v40  ;;  %4857 = vmatpush3.bf16.msra.mxu1 %v4854_v49  ;;  %v338_v49 = vld [vmem:[#allocation2 + $0x180] sm:$0xff]  ;;  %v2384_v58 = vld [vmem:[#allocation4 + $0x320] sm:$0xff] }
  0xcb   : > { %4132 = vmatmul.mubr.f32.gmra.mrb[14].mxu1 %v1747_v19  ;;  %4859 = vmatprep.subr.bf16.mxu1 %v4858_v39  ;;  %v340_v19 = vld [vmem:[#allocation2 + $0x190] sm:$0x3]  ;;  %v641_v50 = vld [vmem:[#allocation2 + $0xe1] sm:$0xff] }
  0xcc   : > { %4452 = vmatmul.mubr.f32.gmra.mrb[14].mxu0 %v1749_v11  ;;  %4134 = vmatprep.mubr.f32.mxu1 %v1748_v3  ;;  %v399_v3 = vmul.f32 %v5964_v32, %v338_v49  ;;  %v401_v35 = vmul.f32 %v5964_v32, %v340_v19  ;;  %v642_v14 = vld [vmem:[#allocation2 + $0xf1] sm:$0xff]  ;;  %v649_v17 = vld [vmem:[#allocation2 + $0x141] sm:$0xff] }
  0xcd   : > { %4989 = vmatpush3.bf16.msra.mxu0 %v4986_v40  ;;  %4510 = vmatprep.mubr.f32.mxu0 %v6263_v37  ;;  %v400_v40 = vmul.f32 %v5964_v32, %v339_v55  ;;  %v6287_v49 = vld [vmem:[#allocation2 + $0x4a] sm:$0xff]  ;;  %v4998_v55 = vpack.c.bf16 %v2385_v20, %v2384_v58  ;;  %v6299_v58 = vld [vmem:[#allocation2 + $0x62] sm:$0xff]  ;;  %v651_v7 = vld [vmem:[#allocation2 + $0x159] sm:$0xff] }
  0xce   : > { %4991 = vmatprep.subr.bf16.mxu0 %v4990_v5  ;;  %4861 = vmatpush3.bf16.msra.mxu1 %v4858_v39  ;;  %v6278_v39 = vld [vmem:[#allocation2 + $0x3a] sm:$0xff]  ;;  %v462_v63 = vadd.f32 %v5966_v33, %v401_v35  ;;  %v644_v35 = vld [vmem:[#allocation2 + $0x109] sm:$0xff] }
  0xcf   : > { %4135 = vmatmul.mubr.f32.gmra.mrb[16].mxu1 %v1749_v11  ;;  %4863 = vmatprep.subr.bf16.mxu1 %v6265_v0  ;;  %v6281_v11 = vadd.f32 %v5966_v33, %v399_v3  ;;  %v6284_v28 = vadd.f32 %v5966_v33, %v400_v40  ;;  %v643_v3 = vld [vmem:[#allocation2 + $0xf9] sm:$0xff] }
  0xd0   : > { %4511 = vmatmul.mubr.f32.vlgmr.msra.gmra.mrb[0].mxu0 %v6268_v57  ;;  %4137 = vmatprep.mubr.f32.mxu1 %v640_v45  ;;  %v2386_v45 = vld [vmem:[#allocation4 + $0x330] sm:$0xff]  ;;  %v516_v2 = vmax.f32 %v462_v63, 0.0  ;;  %v6293_v40 = vld [vmem:[#allocation2 + $0x52] sm:$0xff] }
  0xd1   : > { %4993 = vmatpush3.bf16.msra.mxu0 %v4990_v5  ;;  %4513 = vmatprep.mubr.f32.mxu0 %v6270_v6  ;;  %v2387_v5 = vld [vmem:[#allocation4 + $0x338] sm:$0xff]  ;;  %v6798_v19 = vmax.f32 %v6281_v11, 0.0  ;;  %v6801_v59 = vmax.f32 %v6284_v28, 0.0  ;;  %v645_v63 = vld [vmem:[#allocation2 + $0x111] sm:$0xff] }
  0xd2   : > { %4995 = vmatprep.subr.bf16.mxu0 %v4994_v52  ;;  %570 = vst [vmem:[#allocation2 + $0x190] sm:$0x3] %v516_v2  ;;  %v5002_v20 = vpack.c.bf16 %v2387_v5, %v2386_v45  ;;  %v2391_v45 = vld [vmem:[#allocation4 + $0x358] sm:$0xff] }
  0xd3   : > { %4138 = vmatmul.mubr.f32.gmra.mrb[18].mxu1 %v641_v50  ;;  %568 = vst [vmem:[#allocation2 + $0x180] sm:$0xff] %v6798_v19  ;;  %569 = vst [vmem:[#allocation2 + $0x188] sm:$0xff] %v6801_v59  ;;  %v2388_v50 = vld [vmem:[#allocation4 + $0x340] sm:$0xff]  ;;  %v646_v19 = vld [vmem:[#allocation2 + $0x121] sm:$0xff] }
  0xd4   : > { %4514 = vmatmul.mubr.f32.gmra.mrb[2].mxu0 %v6278_v39  ;;  %4140 = vmatprep.mubr.f32.mxu1 %v642_v14  ;;  %v2389_v14 = vld [vmem:[#allocation4 + $0x348] sm:$0xff]  ;;  %v2390_v59 = vld [vmem:[#allocation4 + $0x350] sm:$0xff]  ;;  %v647_v5 = vld [vmem:[#allocation2 + $0x129] sm:$0xff] }
  0xd5   : > { %4516 = vmatprep.mubr.f32.mxu0 %v6287_v49  ;;  %4997 = vmatpush3.bf16.msra.mxu0 %v4994_v52  ;;  %v6303_v52 = vld [vmem:[#allocation2 + $0x6a] sm:$0xff]  ;;  %v5006_v2 = vpack.c.bf16 %v2389_v14, %v2388_v50  ;;  %v402_v50 = vmul.f32 %v5964_v32, %v341_v8  ;;  %v342_v14 = vld [vmem:[#allocation2 + $0x1a0] sm:$0xff] }
  0xd6   : > { %4999 = vmatprep.subr.bf16.mxu0 %v4998_v55 }
  0xd7   : > { %4141 = vmatmul.mubr.f32.gmra.mrb[20].mxu1 %v643_v3  ;;  %v6309_v3 = vld [vmem:[#allocation2 + $0x82] sm:$0xff]  ;;  %v6317_v12 = vadd.f32 %v5966_v33, %v402_v50 }
  0xd8   : > { %4517 = vmatmul.mubr.f32.gmra.mrb[4].mxu0 %v6293_v40  ;;  %4143 = vmatprep.mubr.f32.mxu1 %v644_v35  ;;  %v648_v35 = vld [vmem:[#allocation2 + $0x139] sm:$0xff] }
  0xd9   : > { %4519 = vmatprep.mubr.f32.mxu0 %v6299_v58  ;;  %5001 = vmatpush3.bf16.msra.mxu0 %v4998_v55  ;;  %v5010_v55 = vpack.c.bf16 %v2391_v45, %v2390_v59  ;;  %v650_v59 = vld [vmem:[#allocation2 + $0x151] sm:$0xff] }
  0xda   : > { %5003 = vmatprep.subr.bf16.mxu0 %v5002_v20  ;;  %v6325_v45 = vld [vmem:[#allocation2 + $0xaa] sm:$0xff] }
  0xdb   : > { %4144 = vmatmul.mubr.f32.gmra.mrb[22].mxu1 %v645_v63  ;;  %v2392_v63 = vld [vmem:[#allocation4 + $0x360] sm:$0xff] }
  0xdc   : > { %4520 = vmatmul.mubr.f32.gmra.mrb[6].mxu0 %v6303_v52  ;;  %4146 = vmatprep.mubr.f32.mxu1 %v646_v19  ;;  %v403_v19 = vmul.f32 %v5964_v32, %v342_v14  ;;  %v5014_v32 = vpack.c.bf16 %v2393_v27, %v2392_v63  ;;  %v2395_v14 = vld [vmem:[#allocation4 + $0x378] sm:$0xff]  ;;  %v2686_v63 = vld [vmem:[#allocation4 + $0x380] sm:$0xff] }
  0xdd   : > { %4522 = vmatprep.mubr.f32.mxu0 %v6305_v22  ;;  %5005 = vmatpush3.bf16.msra.mxu0 %v5002_v20  ;;  %v6320_v20 = vld [vmem:[#allocation2 + $0x9a] sm:$0xff] }
  0xde   : > { %5007 = vmatprep.subr.bf16.mxu0 %v5006_v2  ;;  %v6323_v8 = vadd.f32 %v5966_v33, %v403_v19  ;;  %v6333_v33 = vld [vmem:[#allocation2 + $0xb2] sm:$0xff] }
  0xdf   : > { %4147 = vmatmul.mubr.f32.gmra.mrb[24].mxu1 %v647_v5  ;;  %v6814_v5 = vmax.f32 %v6317_v12, 0.0  ;;  %v2687_v19 = vld [vmem:[#allocation4 + $0x388] sm:$0xff] }
  0xe0   : > { %4523 = vmatmul.mubr.f32.gmra.mrb[8].mxu0 %v6309_v3  ;;  %4149 = vmatprep.mubr.f32.mxu1 %v648_v35  ;;  %v2394_v35 = vld [vmem:[#allocation4 + $0x370] sm:$0xff]  ;;  %v6815_v50 = vmax.f32 %v6323_v8, 0.0 }
  0xe1   : > { %4525 = vmatprep.mubr.f32.mxu0 %v6311_v44  ;;  %5009 = vmatpush3.bf16.msra.mxu0 %v5006_v2  ;;  %571 = vst [vmem:[#allocation2 + $0x198] sm:$0xff] %v6814_v5  ;;  %v652_v2 = vld [vmem:[#allocation2 + $0x169] sm:$0xff]  ;;  %v5018_v27 = vpack.c.bf16 %v2395_v14, %v2394_v35  ;;  %v6849_v14 = vmax.f32 %v5978_v47, 0.0  ;;  %v6852_v47 = vmax.f32 %v5987_v53, 0.0  ;;  %v6376_v53 = vld [vmem:[#allocation2 + $0x112] sm:$0xff] }
  0xe2   : > { %5011 = vmatprep.subr.bf16.mxu0 %v5010_v55  ;;  %572 = vst [vmem:[#allocation2 + $0x1a0] sm:$0xff] %v6815_v50  ;;  %v6343_v5 = vld [vmem:[#allocation2 + $0xca] sm:$0xff]  ;;  %v6347_v50 = vpack.c.bf16 %v2687_v19, %v2686_v63  ;;  %v6851_v63 = vmax.f32 %v5981_v48, 0.0  ;;  %v6853_v48 = vmax.f32 %v5990_v54, 0.0 }
  0xe3   : > { %4150 = vmatmul.mubr.f32.gmra.mrb[26].mxu1 %v649_v17  ;;  %v6337_v17 = vld [vmem:[#allocation2 + $0xc2] sm:$0xff]  ;;  %v1158_v19 = vld [vmem:[#allocation4 + $0x120] sm:$0xff] }
  0xe4   : > { %4526 = vmatmul.mubr.f32.gmra.mrb[10].mxu0 %v6320_v20  ;;  %4152 = vmatprep.mubr.f32.mxu1 %v650_v59  ;;  %6847 = vst [vmem:[#allocation31_spill] sm:$0xff] %v6337_v17  ;;  %v6340_v59 = vld [vmem:[#allocation2 + $0x171] sm:$0xff]  ;;  %v1157_v35 = vld [vmem:[#allocation4 + $0x118] sm:$0xff] }
  0xe5   : > { %4528 = vmatprep.mubr.f32.mxu0 %v6325_v45  ;;  %5013 = vmatpush3.bf16.msra.mxu0 %v5010_v55  ;;  %6848 = vst [vmem:[#allocation32_spill] sm:$0xff] %v6340_v59  ;;  %v6345_v55 = vld [vmem:[#allocation2 + $0xda] sm:$0xff]  ;;  %v1162_v54 = vld [vmem:[#allocation4 + $0x140] sm:$0xff] }
  0xe6   : > { %5015 = vmatprep.subr.bf16.mxu0 %v5014_v32 }
  0xe7   : > { %4153 = vmatmul.mubr.f32.gmra.mrb[28].mxu1 %v651_v7  ;;  %v1156_v7 = vld [vmem:[#allocation4 + $0x110] sm:$0xff] }
  0xe8   : > { %4529 = vmatmul.mubr.f32.gmra.mrb[12].mxu0 %v6333_v33  ;;  %4155 = vmatprep.mubr.f32.mxu1 %v652_v2  ;;  %v6354_v2 = vld [vmem:[#allocation2 + $0xe2] sm:$0xff] }
  0xe9   : > { %4531 = vmatprep.mubr.f32.mxu0 %v6337_v17  ;;  %5017 = vmatpush3.bf16.msra.mxu0 %v5014_v32  ;;  %v6356_v32 = vld [vmem:[#allocation2 + $0xf2] sm:$0xff]  ;;  %v4866_v17 = vpack.c.bf16 %v1157_v35, %v1156_v7  ;;  %v1160_v35 = vld [vmem:[#allocation4 + $0x130] sm:$0xff] }
  0xea   : > { %5019 = vmatprep.subr.bf16.mxu0 %v5018_v27  ;;  %6850 = vst [vmem:[#allocation33_spill] sm:$0xff] %v6356_v32 }
  0xeb   : > { %4156 = vmatmul.mubr.f32.gmra.mrb[30].mxu1 %v6340_v59  ;;  %v1159_v59 = vld [vmem:[#allocation4 + $0x128] sm:$0xff] }
  0xec   : > { %4532 = vmatmul.mubr.f32.gmra.mrb[14].mxu0 %v6343_v5  ;;  %4190 = vmatprep.mubr.f32.mxu1 %v6849_v14  ;;  %v6368_v14 = vld [vmem:[#allocation2 + $0x10a] sm:$0xff]  ;;  %v4870_v7 = vpack.c.bf16 %v1159_v59, %v1158_v19  ;;  %v6856_v59 = vmax.f32 %v6019_v16, 0.0  ;;  %v1163_v19 = vld [vmem:[#allocation4 + $0x148] sm:$0xff]  ;;  %v1164_v16 = vld [vmem:[#allocation4 + $0x150] sm:$0xff] }
  0xed   : > { %4534 = vmatprep.mubr.f32.mxu0 %v6345_v55  ;;  %5021 = vmatpush3.bf16.msra.mxu0 %v5018_v27  ;;  %v6366_v27 = vld [vmem:[#allocation2 + $0xfa] sm:$0xff] }
  0xee   : > { %5023 = vmatprep.subr.bf16.mxu0 %v6347_v50 }
  0xef   : > { %4191 = vmatmul.mubr.f32.vlgmr.msra.gmra.mrb[0].mxu1 %v6851_v63  ;;  %v1161_v63 = vld [vmem:[#allocation4 + $0x138] sm:$0xff] }
  0xf0   : > { %4535 = vmatmul.mubr.f32.gmra.mrb[16].mxu0 %v6354_v2  ;;  %4865 = vmatpush3.bf16.msra.mxu1 %v6265_v0  ;;  %v6854_v0 = vmax.f32 %v6009_v10, 0.0  ;;  %v6386_v10 = vld [vmem:[#allocation2 + $0x12a] sm:$0xff] }
  0xf1   : > { %4193 = vmatprep.mubr.f32.mxu1 %v6852_v47  ;;  %4537 = vmatprep.mubr.f32.mxu0 %v6356_v32  ;;  %v6378_v47 = vld [vmem:[#allocation2 + $0x122] sm:$0xff]  ;;  %v4874_v32 = vpack.c.bf16 %v1161_v63, %v1160_v35  ;;  %6858 = vst [vmem:[#allocation35_spill] sm:$0xff] %v6386_v10  ;;  %v6860_v35 = vmax.f32 %v6035_v34, 0.0 }
  0xf2   : > { %4867 = vmatprep.subr.bf16.mxu1 %v4866_v17  ;;  %6855 = vst [vmem:[#allocation34_spill] sm:$0xff] %v6378_v47  ;;  %v1165_v63 = vld [vmem:[#allocation4 + $0x158] sm:$0xff] }
  0xf3   : > { %4194 = vmatmul.mubr.f32.gmra.mrb[2].mxu1 %v6853_v48  ;;  %v6857_v48 = vmax.f32 %v6032_v31, 0.0  ;;  %v6396_v31 = vld [vmem:[#allocation2 + $0x142] sm:$0xff] }
  0xf4   : > { %4538 = vmatmul.mubr.f32.gmra.mrb[18].mxu0 %v6366_v27  ;;  %4196 = vmatprep.mubr.f32.mxu1 %v6854_v0  ;;  %v4878_v0 = vpack.c.bf16 %v1163_v19, %v1162_v54  ;;  %v4882_v54 = vpack.c.bf16 %v1165_v63, %v1164_v16  ;;  %v5462_v19 = vld [vmem:[#allocation7] ss:$0 sm:$0xff] }
  0xf5   : > { %4540 = vmatprep.mubr.f32.mxu0 %v6368_v14  ;;  %4869 = vmatpush3.bf16.msra.mxu1 %v4866_v17  ;;  %v6388_v17 = vld [vmem:[#allocation2 + $0x13a] sm:$0xff]  ;;  %v6408_v16 = vld [vmem:[#allocation2 + $0x16a] sm:$0xff] }
  0xf6   : > { %4871 = vmatprep.subr.bf16.mxu1 %v4870_v7  ;;  %6859 = vst [vmem:[#allocation36_spill] sm:$0xff] %v6388_v17 }
  0xf7   : > { %4197 = vmatmul.mubr.f32.gmra.mrb[4].mxu1 %v6856_v59  ;;  %v6861_v59 = vmax.f32 %v6051_v56, 0.0  ;;  %v6863_v56 = vmax.f32 %v6077_v21, 0.0  ;;  %v6415_v21 = vld [vmem:[#allocation2 + $0x172] sm:$0xff] }
  0xf8   : > { %4541 = vmatmul.mubr.f32.gmra.mrb[20].mxu0 %v6376_v53  ;;  %4199 = vmatprep.mubr.f32.mxu1 %v6857_v48  ;;  %v6398_v48 = vld [vmem:[#allocation2 + $0x152] sm:$0xff] }
  0xf9   : > { %4543 = vmatprep.mubr.f32.mxu0 %v6378_v47  ;;  %4873 = vmatpush3.bf16.msra.mxu1 %v4870_v7  ;;  %v343_v7 = vld [vmem:[#allocation2 + $0x1a8] sm:$0x3]  ;;  %v1166_v47 = vld [vmem:[#allocation4 + $0x160] sm:$0xff] }
  0xfa   : > { %4875 = vmatprep.subr.bf16.mxu1 %v4874_v32  ;;  %v404_v34 = vmul.f32 %v5462_v19, %v343_v7  ;;  %v6864_v7 = vmax.f32 %v6083_v26, 0.0  ;;  %v1168_v19 = vld [vmem:[#allocation4 + $0x170] sm:$0xff]  ;;  %v1462_v26 = vld [vmem:[#allocation4 + $0x188] sm:$0xff] }
  0xfb   : > { %4200 = vmatmul.mubr.f32.gmra.mrb[6].mxu1 %v6860_v35  ;;  %v6862_v35 = vmax.f32 %v6055_v61, 0.0 }
  0xfc   : > { %4544 = vmatmul.mubr.f32.gmra.mrb[22].mxu0 %v6386_v10  ;;  %4202 = vmatprep.mubr.f32.mxu1 %v6861_v59  ;;  %v1167_v10 = vld [vmem:[#allocation4 + $0x168] sm:$0xff]  ;;  %v5463_v59 = vld [vmem:[#allocation9] ss:$0 sm:$0xff] }
  0xfd   : > { %4546 = vmatprep.mubr.f32.mxu0 %v6388_v17  ;;  %4877 = vmatpush3.bf16.msra.mxu1 %v4874_v32  ;;  %v465_v17 = vadd.f32 %v5463_v59, %v404_v34  ;;  %v6406_v32 = vld [vmem:[#allocation2 + $0x15a] sm:$0xff]  ;;  %v4886_v63 = vpack.c.bf16 %v1167_v10, %v1166_v47  ;;  %v1461_v47 = vld [vmem:[#allocation4 + $0x180] sm:$0xff]  ;;  %v2689_v59 = vld [vmem:[#allocation4 + $0x398] sm:$0xff] }
  0xfe   : > { %4879 = vmatprep.subr.bf16.mxu1 %v4878_v0  ;;  %v2071_v10 = vld [vmem:[#allocation2 + $0x18a] sm:$0xff] }
  0xff   : > { %4203 = vmatmul.mubr.f32.gmra.mrb[8].mxu1 %v6862_v35  ;;  %v519_v61 = vmax.f32 %v465_v17, 0.0  ;;  %v1169_v35 = vld [vmem:[#allocation4 + $0x178] sm:$0xff]  ;;  %v6420_v17 = vld [vmem:[#allocation2 + $0x30] sm:$0xff] }
 0x100   : > { %4547 = vmatmul.mubr.f32.gmra.mrb[24].mxu0 %v6396_v31  ;;  %4205 = vmatprep.mubr.f32.mxu1 %v6863_v56  ;;  %v4890_v34 = vpack.c.bf16 %v1169_v35, %v1168_v19  ;;  %v6422_v56 = vpack.c.bf16 %v1462_v26, %v1461_v47  ;;  %v2690_v19 = vld [vmem:[#allocation4 + $0x3a0] sm:$0xff]  ;;  %v2691_v35 = vld [vmem:[#allocation4 + $0x3a8] sm:$0xff]  ;;  %v2692_v47 = vld [vmem:[#allocation4 + $0x3b0] sm:$0xff] }
 0x101   : > { %4549 = vmatprep.mubr.f32.mxu0 %v6398_v48  ;;  %4881 = vmatpush3.bf16.msra.mxu1 %v4878_v0  ;;  %573 = vst [vmem:[#allocation2 + $0x1a8] sm:$0x3] %v519_v61  ;;  %v2070_v0 = vld [vmem:[#allocation2 + $0x182] sm:$0xff]  ;;  %v6427_v61 = vld [vmem:[#allocation2 + $0x38] sm:$0xff] }
 0x102   : > { %4883 = vmatprep.subr.bf16.mxu1 %v4882_v54  ;;  %v2693_v26 = vld [vmem:[#allocation4 + $0x3b8] sm:$0xff] }
 0x103   : > { %4206 = vmatmul.mubr.f32.gmra.mrb[10].mxu1 %v6864_v7  ;;  %v6429_v7 = vld [vmem:[#allocation2 + $0x48] sm:$0xff] }
 0x104   : > { %4550 = vmatmul.mubr.f32.gmra.mrb[26].mxu0 %v6406_v32  ;;  %4208 = vmatprep.mubr.f32.mxu1 %v6113_v23  ;;  %6865 = vst [vmem:[#allocation37_spill] sm:$0xff] %v6429_v7 }
 0x105   : > { %4552 = vmatprep.mubr.f32.mxu0 %v6408_v16  ;;  %4885 = vmatpush3.bf16.msra.mxu1 %v4882_v54  ;;  %v2688_v54 = vld [vmem:[#allocation4 + $0x390] sm:$0xff] }
 0x106   : > { %4887 = vmatprep.subr.bf16.mxu1 %v4886_v63 }
 0x107   : > { %4209 = vmatmul.mubr.f32.gmra.mrb[12].mxu1 %v6115_v24 }
 0x108   : > { %4553 = vmatmul.mubr.f32.gmra.mrb[28].mxu0 %v6415_v21  ;;  %4211 = vmatprep.mubr.f32.mxu1 %v6120_v41 }
 0x109   : > { %4555 = vmatprep.mubr.f32.mxu0 %v2070_v0  ;;  %4889 = vmatpush3.bf16.msra.mxu1 %v4886_v63  ;;  %v5026_v63 = vpack.c.bf16 %v2689_v59, %v2688_v54  ;;  %v6437_v0 = vld [vmem:[#allocation2 + $0x50] sm:$0xff]  ;;  %v5034_v54 = vpack.c.bf16 %v2693_v26, %v2692_v47  ;;  %v2695_v59 = vld [vmem:[#allocation4 + $0x3c8] sm:$0xff] }
 0x10a   : > { %4891 = vmatprep.subr.bf16.mxu1 %v4890_v34  ;;  %6866 = vst [vmem:[#allocation38_spill] sm:$0xff] %v6437_v0  ;;  %v2698_v47 = vld [vmem:[#allocation4 + $0x3e0] sm:$0xff]  ;;  %v2699_v26 = vld [vmem:[#allocation4 + $0x3e8] sm:$0xff] }
 0x10b   : > { %4212 = vmatmul.mubr.f32.gmra.mrb[14].mxu1 %v6135_v1 }
 0x10c   : > { %4556 = vmatmul.mubr.f32.gmra.mrb[30].mxu0 %v2071_v10  ;;  %4214 = vmatprep.mubr.f32.mxu1 %v6145_v13  ;;  %v5464_v10 = vld [vmem:[#allocation2 + $0x60] sm:$0xff] }
 0x10d   : > { %4590 = vmatprep.mubr.f32.mxu0 %v6420_v17  ;;  %4893 = vmatpush3.bf16.msra.mxu1 %v4890_v34  ;;  %v5030_v34 = vpack.c.bf16 %v2691_v35, %v2690_v19  ;;  %v5466_v19 = vld [vmem:[#allocation2 + $0x78] sm:$0xff] }
 0x10e   : > { %4895 = vmatprep.subr.bf16.mxu1 %v6422_v56 }
 0x10f   : > { %4215 = vmatmul.mubr.f32.gmra.mrb[16].mxu1 %v6152_v18 }
 0x110   : > { %4591 = vmatmul.mubr.f32.vlgmr.msra.gmra.mrb[0].mxu0 %v6427_v61  ;;  %4217 = vmatprep.mubr.f32.mxu1 %v6168_v29 }
 0x111   : > { %5025 = vmatpush3.bf16.msra.mxu0 %v6347_v50  ;;  %4593 = vmatprep.mubr.f32.mxu0 %v6429_v7  ;;  %v2694_v50 = vld [vmem:[#allocation4 + $0x3c0] sm:$0xff]  ;;  %v5465_v7 = vld [vmem:[#allocation2 + $0x68] sm:$0xff] }
 0x112   : > { %5027 = vmatprep.subr.bf16.mxu0 %v5026_v63  ;;  %v5038_v35 = vpack.c.bf16 %v2695_v59, %v2694_v50  ;;  %v2700_v50 = vld [vmem:[#allocation4 + $0x3f0] sm:$0xff]  ;;  %v1464_v59 = vld [vmem:[#allocation4 + $0x198] sm:$0xff] }
 0x113   : > { %4218 = vmatmul.mubr.f32.gmra.mrb[18].mxu1 %v6170_v46 }
 0x114   : > { %4594 = vmatmul.mubr.f32.gmra.mrb[2].mxu0 %v6437_v0  ;;  %4220 = vmatprep.mubr.f32.mxu1 %v6175_v43  ;;  %v2696_v0 = vld [vmem:[#allocation4 + $0x3d0] sm:$0xff] }
 0x115   : > { %4596 = vmatprep.mubr.f32.mxu0 %v5464_v10  ;;  %5029 = vmatpush3.bf16.msra.mxu0 %v5026_v63  ;;  %v2697_v10 = vld [vmem:[#allocation4 + $0x3d8] sm:$0xff]  ;;  %v5467_v63 = vld [vmem:[#allocation2 + $0x80] sm:$0xff] }
 0x116   : > { %5031 = vmatprep.subr.bf16.mxu0 %v5030_v34 }
 0x117   : > { %4221 = vmatmul.mubr.f32.gmra.mrb[20].mxu1 %v6177_v36 }
 0x118   : > { %4597 = vmatmul.mubr.f32.gmra.mrb[4].mxu0 %v5465_v7  ;;  %4223 = vmatprep.mubr.f32.mxu1 %v6204_v25  ;;  %v5042_v7 = vpack.c.bf16 %v2697_v10, %v2696_v0  ;;  %v2992_v0 = vld [vmem:[#allocation4 + $0x400] sm:$0xff]  ;;  %v1468_v10 = vld [vmem:[#allocation4 + $0x1b8] sm:$0xff] }
 0x119   : > { %4599 = vmatprep.mubr.f32.mxu0 %v5466_v19  ;;  %5033 = vmatpush3.bf16.msra.mxu0 %v5030_v34  ;;  %v5046_v34 = vpack.c.bf16 %v2699_v26, %v2698_v47  ;;  %v1122_v19 = vld [vmem:[#allocation2 + $0xa] sm:$0xff]  ;;  %v2659_v26 = vld [vmem:[#allocation2 + $0x79] sm:$0xff] }
 0x11a   : > { %5035 = vmatprep.subr.bf16.mxu0 %v5034_v54  ;;  %v6873_v47 = vld [vmem:[#allocation33_spill] sm:$0xff] }
 0x11b   : > { %4224 = vmatmul.mubr.f32.gmra.mrb[22].mxu1 %v6206_v9 }
 0x11c   : > { %4600 = vmatmul.mubr.f32.gmra.mrb[6].mxu0 %v5467_v63  ;;  %4226 = vmatprep.mubr.f32.mxu1 %v6209_v62  ;;  %v2998_v63 = vld [vmem:[#allocation4 + $0x430] sm:$0xff] }
 0x11d   : > { %4602 = vmatprep.mubr.f32.mxu0 %v6113_v23  ;;  %5037 = vmatpush3.bf16.msra.mxu0 %v5034_v54  ;;  %v2701_v23 = vld [vmem:[#allocation4 + $0x3f8] sm:$0xff] }
 0x11e   : > { %5039 = vmatprep.subr.bf16.mxu0 %v5038_v35  ;;  %v1121_v54 = vld [vmem:[#allocation2 + $0x2] sm:$0xff] }
 0x11f   : > { %4227 = vmatmul.mubr.f32.gmra.mrb[24].mxu1 %v6211_v4 }
 0x120   : > { %4603 = vmatmul.mubr.f32.gmra.mrb[8].mxu0 %v6115_v24  ;;  %4229 = vmatprep.mubr.f32.mxu1 %v6233_v51  ;;  %v5050_v24 = vpack.c.bf16 %v2701_v23, %v2700_v50  ;;  %v3001_v50 = vld [vmem:[#allocation4 + $0x448] sm:$0xff] }
 0x121   : > { %4605 = vmatprep.mubr.f32.mxu0 %v6120_v41  ;;  %5041 = vmatpush3.bf16.msra.mxu0 %v5038_v35  ;;  %v2993_v41 = vld [vmem:[#allocation4 + $0x408] sm:$0xff] }
 0x122   : > { %5043 = vmatprep.subr.bf16.mxu0 %v5042_v7  ;;  %v1466_v35 = vld [vmem:[#allocation4 + $0x1a8] sm:$0xff] }
 0x123   : > { %4230 = vmatmul.mubr.f32.gmra.mrb[26].mxu1 %v6235_v15  ;;  %v2661_v23 = vld [vmem:[#allocation2 + $0x91] sm:$0xff] }
 0x124   : > { %4606 = vmatmul.mubr.f32.gmra.mrb[10].mxu0 %v6135_v1  ;;  %4232 = vmatprep.mubr.f32.mxu1 %v6238_v42  ;;  %v6459_v1 = vpack.c.bf16 %v2993_v41, %v2992_v0  ;;  %v3002_v0 = vld [vmem:[#allocation4 + $0x450] sm:$0xff]  ;;  %v3003_v41 = vld [vmem:[#allocation4 + $0x458] sm:$0xff] }
 0x125   : > { %4608 = vmatprep.mubr.f32.mxu0 %v6145_v13  ;;  %5045 = vmatpush3.bf16.msra.mxu0 %v5042_v7  ;;  %v1463_v13 = vld [vmem:[#allocation4 + $0x190] sm:$0xff]  ;;  %v2999_v7 = vld [vmem:[#allocation4 + $0x438] sm:$0xff] }
 0x126   : > { %5047 = vmatprep.subr.bf16.mxu0 %v5046_v34 }
 0x127   : > { %4233 = vmatmul.mubr.f32.gmra.mrb[28].mxu1 %v6240_v38 }
 0x128   : > { %4609 = vmatmul.mubr.f32.gmra.mrb[12].mxu0 %v6152_v18  ;;  %4235 = vmatprep.mubr.f32.mxu1 %v6257_v30  ;;  %v4898_v18 = vpack.c.bf16 %v1464_v59, %v1463_v13  ;;  %v5074_v13 = vpack.c.bf16 %v3003_v41, %v3002_v0  ;;  %v3004_v59 = vld [vmem:[#allocation4 + $0x460] sm:$0xff]  ;;  %v1448_v0 = vld [vmem:[#allocation2 + $0x108] sm:$0xff] }
 0x129   : > { %4611 = vmatprep.mubr.f32.mxu0 %v6168_v29  ;;  %5049 = vmatpush3.bf16.msra.mxu0 %v5046_v34  ;;  %v1465_v29 = vld [vmem:[#allocation4 + $0x1a0] sm:$0xff]  ;;  %v2963_v41 = vld [vmem:[#allocation2 + $0x62] sm:$0xff] }
 0x12a   : > { %5051 = vmatprep.subr.bf16.mxu0 %v5050_v24  ;;  %v3000_v34 = vld [vmem:[#allocation4 + $0x440] sm:$0xff] }
 0x12b   : > { %4236 = vmatmul.mubr.f32.gmra.mrb[30].mxu1 %v6259_v60 }
 0x12c   : > { %4612 = vmatmul.mubr.f32.gmra.mrb[14].mxu0 %v6170_v46  ;;  %4270 = vmatprep.mubr.f32.mxu1 %v1121_v54  ;;  %v4902_v46 = vpack.c.bf16 %v1466_v35, %v1465_v29  ;;  %v6874_v54 = vld [vmem:[#allocation34_spill] sm:$0xff]  ;;  %v2665_v29 = vld [vmem:[#allocation2 + $0xc1] sm:$0xff] }
 0x12d   : > { %4614 = vmatprep.mubr.f32.mxu0 %v6175_v43  ;;  %5053 = vmatpush3.bf16.msra.mxu0 %v5050_v24  ;;  %v1467_v43 = vld [vmem:[#allocation4 + $0x1b0] sm:$0xff]  ;;  %v5070_v24 = vpack.c.bf16 %v3001_v50, %v3000_v34  ;;  %v1446_v50 = vld [vmem:[#allocation2 + $0xf0] sm:$0xff] }
 0x12e   : > { %5055 = vmatprep.subr.bf16.mxu0 %v6459_v1  ;;  %v2960_v34 = vld [vmem:[#allocation2 + $0x3a] sm:$0xff] }
 0x12f   : > { %4271 = vmatmul.mubr.f32.vlgmr.msra.gmra.mrb[0].mxu1 %v1122_v19  ;;  %v3005_v19 = vld [vmem:[#allocation4 + $0x468] sm:$0xff] }
 0x130   : > { %4615 = vmatmul.mubr.f32.gmra.mrb[16].mxu0 %v6177_v36  ;;  %4897 = vmatpush3.bf16.msra.mxu1 %v6422_v56  ;;  %v4906_v36 = vpack.c.bf16 %v1468_v10, %v1467_v43  ;;  %v1470_v56 = vld [vmem:[#allocation4 + $0x1c8] sm:$0xff]  ;;  %v5078_v35 = vpack.c.bf16 %v3005_v19, %v3004_v59  ;;  %v3007_v43 = vld [vmem:[#allocation4 + $0x478] sm:$0xff] }
 0x131   : > { %4273 = vmatprep.mubr.f32.mxu1 %v6263_v37  ;;  %4617 = vmatprep.mubr.f32.mxu0 %v6204_v25  ;;  %v1469_v37 = vld [vmem:[#allocation4 + $0x1c0] sm:$0xff]  ;;  %v2966_v59 = vld [vmem:[#allocation2 + $0x82] sm:$0xff]  ;;  %v1452_v19 = vld [vmem:[#allocation2 + $0x138] sm:$0xff] }
 0x132   : > { %4899 = vmatprep.subr.bf16.mxu1 %v4898_v18  ;;  %v4910_v25 = vpack.c.bf16 %v1470_v56, %v1469_v37  ;;  %v2666_v10 = vld [vmem:[#allocation2 + $0xc9] sm:$0xff]  ;;  %v1428_v56 = vld [vmem:[#allocation2 + $0x18] sm:$0xff] }
 0x133   : > { %4274 = vmatmul.mubr.f32.gmra.mrb[2].mxu1 %v6268_v57  ;;  %v1473_v57 = vld [vmem:[#allocation4 + $0x1e0] sm:$0xff] }
 0x134   : > { %4618 = vmatmul.mubr.f32.gmra.mrb[18].mxu0 %v6206_v9  ;;  %4276 = vmatprep.mubr.f32.mxu1 %v6270_v6  ;;  %v1471_v9 = vld [vmem:[#allocation4 + $0x1d0] sm:$0xff] }
 0x135   : > { %4620 = vmatprep.mubr.f32.mxu0 %v6209_v62  ;;  %4901 = vmatpush3.bf16.msra.mxu1 %v4898_v18  ;;  %v1472_v62 = vld [vmem:[#allocation4 + $0x1d8] sm:$0xff]  ;;  %v1475_v6 = vld [vmem:[#allocation4 + $0x1f0] sm:$0xff] }
 0x136   : > { %4903 = vmatprep.subr.bf16.mxu1 %v4902_v46  ;;  %v6876_v18 = vld [vmem:[#allocation36_spill] sm:$0xff] }
 0x137   : > { %4277 = vmatmul.mubr.f32.gmra.mrb[4].mxu1 %v6278_v39  ;;  %v6867_v39 = vmax.f32 %v6281_v11, 0.0  ;;  %v2995_v11 = vld [vmem:[#allocation4 + $0x418] sm:$0xff] }
 0x138   : > { %4621 = vmatmul.mubr.f32.gmra.mrb[20].mxu0 %v6211_v4  ;;  %4279 = vmatprep.mubr.f32.mxu1 %v6287_v49  ;;  %v4914_v4 = vpack.c.bf16 %v1472_v62, %v1471_v9  ;;  %v6870_v49 = vmax.f32 %v6323_v8, 0.0  ;;  %v2656_v8 = vld [vmem:[#allocation2 + $0x51] sm:$0xff]  ;;  %v6536_v9 = vld [vmem:[#allocation2 + $0x121] sm:$0xff] }
 0x139   : > { %4623 = vmatprep.mubr.f32.mxu0 %v6233_v51  ;;  %4905 = vmatpush3.bf16.msra.mxu1 %v4902_v46  ;;  %v1474_v51 = vld [vmem:[#allocation4 + $0x1e8] sm:$0xff]  ;;  %v3006_v46 = vld [vmem:[#allocation4 + $0x470] sm:$0xff] }
 0x13a   : > { %4907 = vmatprep.subr.bf16.mxu1 %v4906_v36  ;;  %v5082_v37 = vpack.c.bf16 %v3007_v43, %v3006_v46  ;;  %v6877_v62 = vld [vmem:[#allocation24_spill] sm:$0xff]  ;;  %v2969_v46 = vld [vmem:[#allocation2 + $0xaa] sm:$0xff]  ;;  %v1455_v43 = vld [vmem:[#allocation2 + $0x158] sm:$0xff] }
 0x13b   : > { %4280 = vmatmul.mubr.f32.gmra.mrb[6].mxu1 %v6293_v40  ;;  %v6871_v40 = vld [vmem:[#allocation31_spill] sm:$0xff] }
 0x13c   : > { %4624 = vmatmul.mubr.f32.gmra.mrb[22].mxu0 %v6235_v15  ;;  %4282 = vmatprep.mubr.f32.mxu1 %v6299_v58  ;;  %v4918_v15 = vpack.c.bf16 %v1474_v51, %v1473_v57  ;;  %v2655_v58 = vld [vmem:[#allocation2 + $0x49] sm:$0xff]  ;;  %v6546_v51 = vld [vmem:[#allocation2 + $0x139] sm:$0xff] }
 0x13d   : > { %4626 = vmatprep.mubr.f32.mxu0 %v6238_v42  ;;  %4909 = vmatpush3.bf16.msra.mxu1 %v4906_v36  ;;  %v1476_v42 = vld [vmem:[#allocation4 + $0x1f8] sm:$0xff]  ;;  %v6514_v36 = vld [vmem:[#allocation2 + $0xd9] sm:$0xff] }
 0x13e   : > { %4911 = vmatprep.subr.bf16.mxu1 %v4910_v25  ;;  %v6543_v57 = vld [vmem:[#allocation2 + $0x129] sm:$0xff] }
 0x13f   : > { %4283 = vmatmul.mubr.f32.gmra.mrb[8].mxu1 %v6303_v52 }
 0x140   : > { %4627 = vmatmul.mubr.f32.gmra.mrb[24].mxu0 %v6240_v38  ;;  %4285 = vmatprep.mubr.f32.mxu1 %v6305_v22  ;;  %v4922_v38 = vpack.c.bf16 %v1476_v42, %v1475_v6  ;;  %v6868_v22 = vmax.f32 %v6284_v28, 0.0  ;;  %v2654_v28 = vld [vmem:[#allocation2 + $0x39] sm:$0xff]  ;;  %v6880_v6 = vld [vmem:[#allocation38_spill] sm:$0xff]  ;;  %v6552_v42 = vld [vmem:[#allocation2 + $0x141] sm:$0xff] }
 0x141   : > { %4629 = vmatprep.mubr.f32.mxu0 %v6257_v30  ;;  %4913 = vmatpush3.bf16.msra.mxu1 %v4910_v25  ;;  %v6869_v30 = vmax.f32 %v6317_v12, 0.0  ;;  %v2996_v12 = vld [vmem:[#allocation4 + $0x420] sm:$0xff] }
 0x142   : > { %4915 = vmatprep.subr.bf16.mxu1 %v4914_v4  ;;  %v6521_v25 = vld [vmem:[#allocation2 + $0xf1] sm:$0xff] }
 0x143   : > { %4286 = vmatmul.mubr.f32.gmra.mrb[10].mxu1 %v6309_v3  ;;  %v6872_v3 = vld [vmem:[#allocation23_spill] sm:$0xff] }
 0x144   : > { %4630 = vmatmul.mubr.f32.gmra.mrb[26].mxu0 %v6259_v60  ;;  %4288 = vmatprep.mubr.f32.mxu1 %v6311_v44  ;;  %v2653_v60 = vld [vmem:[#allocation2 + $0x31] sm:$0xff]  ;;  %v2994_v44 = vld [vmem:[#allocation4 + $0x410] sm:$0xff] }
 0x145   : > { %4632 = vmatprep.mubr.f32.mxu0 %v6867_v39  ;;  %4917 = vmatpush3.bf16.msra.mxu1 %v4914_v4  ;;  %v5058_v52 = vpack.c.bf16 %v2995_v11, %v2994_v44  ;;  %v6878_v4 = vld [vmem:[#allocation37_spill] sm:$0xff]  ;;  %v1436_v39 = vld [vmem:[#allocation2 + $0x78] sm:$0xff]  ;;  %v1438_v44 = vld [vmem:[#allocation2 + $0x90] sm:$0xff] }
 0x146   : > { %4919 = vmatprep.subr.bf16.mxu1 %v4918_v15  ;;  %v6563_v11 = vld [vmem:[#allocation2 + $0x169] sm:$0xff] }
 0x147   : > { %4289 = vmatmul.mubr.f32.gmra.mrb[12].mxu1 %v6320_v20  ;;  %v2997_v20 = vld [vmem:[#allocation4 + $0x428] sm:$0xff] }
 0x148   : > { %4633 = vmatmul.mubr.f32.gmra.mrb[28].mxu0 %v6868_v22  ;;  %4291 = vmatprep.mubr.f32.mxu1 %v6325_v45  ;;  %v2657_v45 = vld [vmem:[#allocation2 + $0x61] sm:$0xff]  ;;  %v6881_v22 = vld [vmem:[#allocation26_spill] sm:$0xff] }
 0x149   : > { %4635 = vmatprep.mubr.f32.mxu0 %v6869_v30  ;;  %4921 = vmatpush3.bf16.msra.mxu1 %v4918_v15  ;;  %v6879_v15 = vld [vmem:[#allocation25_spill] sm:$0xff]  ;;  %v1437_v30 = vld [vmem:[#allocation2 + $0x80] sm:$0xff] }
 0x14a   : > { %4923 = vmatprep.subr.bf16.mxu1 %v4922_v38 }
 0x14b   : > { %4292 = vmatmul.mubr.f32.gmra.mrb[14].mxu1 %v6333_v33  ;;  %v5062_v33 = vpack.c.bf16 %v2997_v20, %v2996_v12  ;;  %v1441_v12 = vld [vmem:[#allocation2 + $0xb0] sm:$0xff] }
 0x14c   : > { %4636 = vmatmul.mubr.f32.gmra.mrb[30].mxu0 %v6870_v49  ;;  %4294 = vmatprep.mubr.f32.mxu1 %v6871_v40  ;;  %v6882_v49 = vld [vmem:[#allocation27_spill] sm:$0xff]  ;;  %v6574_v20 = vld [vmem:[#allocation2 + $0x189] sm:$0xff] }
 0x14d   : > { %4670 = vmatprep.mubr.f32.mxu0 %v2653_v60  ;;  %4925 = vmatpush3.bf16.msra.mxu1 %v4922_v38  ;;  %v6555_v38 = vld [vmem:[#allocation2 + $0x151] sm:$0xff]  ;;  %v6560_v60 = vld [vmem:[#allocation2 + $0x159] sm:$0xff] }
 0x14e   : > { %5086 = vmatprep.subr.bf16.mxu1 %v6872_v3  ;;  %v1439_v40 = vld [vmem:[#allocation2 + $0x98] sm:$0xff] }
 0x14f   : > { %4295 = vmatmul.mubr.f32.gmra.mrb[16].mxu1 %v6343_v5  ;;  %v2658_v5 = vld [vmem:[#allocation2 + $0x69] sm:$0xff] }
 0x150   : > { %4671 = vmatmul.mubr.f32.vlgmr.msra.gmra.mrb[0].mxu0 %v2654_v28  ;;  %4297 = vmatprep.mubr.f32.mxu1 %v6345_v55  ;;  %v5066_v55 = vpack.c.bf16 %v2999_v7, %v2998_v63  ;;  %v1440_v28 = vld [vmem:[#allocation2 + $0xa8] sm:$0xff] }
 0x151   : > { %5057 = vmatpush3.bf16.msra.mxu0 %v6459_v1  ;;  %4673 = vmatprep.mubr.f32.mxu0 %v2655_v58  ;;  %v2663_v1 = vld [vmem:[#allocation2 + $0xa9] sm:$0xff]  ;;  %v6569_v58 = vld [vmem:[#allocation2 + $0x181] sm:$0xff] }
 0x152   : > { %5059 = vmatprep.subr.bf16.mxu0 %v5058_v52  ;;  %v1443_v63 = vld [vmem:[#allocation2 + $0xc8] sm:$0xff] }
 0x153   : > { %4298 = vmatmul.mubr.f32.gmra.mrb[18].mxu1 %v6354_v2  ;;  %v2660_v2 = vld [vmem:[#allocation2 + $0x81] sm:$0xff] }
 0x154   : > { %4674 = vmatmul.mubr.f32.gmra.mrb[2].mxu0 %v2656_v8  ;;  %4300 = vmatprep.mubr.f32.mxu1 %v6873_v47  ;;  %v1442_v8 = vld [vmem:[#allocation2 + $0xc0] sm:$0xff]  ;;  %v1444_v47 = vld [vmem:[#allocation2 + $0xd8] sm:$0xff] }
 0x155   : > { %4676 = vmatprep.mubr.f32.mxu0 %v2657_v45  ;;  %5061 = vmatpush3.bf16.msra.mxu0 %v5058_v52  ;;  %v6883_v52 = vld [vmem:[#allocation28_spill] sm:$0xff] }
 0x156   : > { %5063 = vmatprep.subr.bf16.mxu0 %v5062_v33  ;;  %v2683_v45 = vld [vmem:[#allocation2 + $0x199] sm:$0xff]  ;;  %v2684_v7 = vld [vmem:[#allocation2 + $0x1a1] sm:$0xff] }
 0x157   : > { %4301 = vmatmul.mubr.f32.gmra.mrb[20].mxu1 %v6366_v27  ;;  %v2662_v27 = vld [vmem:[#allocation2 + $0x99] sm:$0xff] }
 0x158   : > { %4677 = vmatmul.mubr.f32.gmra.mrb[4].mxu0 %v2658_v5  ;;  %4303 = vmatprep.mubr.f32.mxu1 %v6368_v14  ;;  %v6875_v14 = vld [vmem:[#allocation35_spill] sm:$0xff] }
 0x159   : > { %4679 = vmatprep.mubr.f32.mxu0 %v2659_v26  ;;  %5065 = vmatpush3.bf16.msra.mxu0 %v5062_v33  ;;  %v6885_v33 = vld [vmem:[#allocation29_spill] sm:$0xff]  ;;  %v2959_v5 = vld [vmem:[#allocation2 + $0x32] sm:$0xff] }
 0x15a   : > { %5067 = vmatprep.subr.bf16.mxu0 %v5066_v55  ;;  %v6886_v26 = vld [vmem:[#allocation30_spill] sm:$0xff] }
 0x15b   : > { %4304 = vmatmul.mubr.f32.gmra.mrb[22].mxu1 %v6376_v53  ;;  %v2664_v53 = vld [vmem:[#allocation2 + $0xb1] sm:$0xff] }
 0x15c   : > { %4680 = vmatmul.mubr.f32.gmra.mrb[6].mxu0 %v2660_v2  ;;  %4306 = vmatprep.mubr.f32.mxu1 %v6874_v54  ;;  %v2961_v2 = vld [vmem:[#allocation2 + $0x4a] sm:$0xff] }
 0x15d   : > { %4682 = vmatprep.mubr.f32.mxu0 %v2661_v23  ;;  %5069 = vmatpush3.bf16.msra.mxu0 %v5066_v55  ;;  %v1445_v55 = vld [vmem:[#allocation2 + $0xe0] sm:$0xff]  ;;  %v1447_v23 = vld [vmem:[#allocation2 + $0xf8] sm:$0xff]  ;;  %v1449_v54 = vld [vmem:[#allocation2 + $0x110] sm:$0xff] }
 0x15e   : > { %5071 = vmatprep.subr.bf16.mxu0 %v5070_v24 }
 0x15f   : > { %4307 = vmatmul.mubr.f32.gmra.mrb[24].mxu1 %v6875_v14  ;;  %v1451_v14 = vld [vmem:[#allocation2 + $0x128] sm:$0xff] }
 0x160   : > { %4683 = vmatmul.mubr.f32.gmra.mrb[8].mxu0 %v2662_v27  ;;  %4309 = vmatprep.mubr.f32.mxu1 %v6876_v18  ;;  %v2964_v27 = vld [vmem:[#allocation2 + $0x6a] sm:$0xff]  ;;  %v2967_v18 = vld [vmem:[#allocation2 + $0x92] sm:$0xff] }
 0x161   : > { %4685 = vmatprep.mubr.f32.mxu0 %v2663_v1  ;;  %5073 = vmatpush3.bf16.msra.mxu0 %v5070_v24  ;;  %v2962_v24 = vld [vmem:[#allocation2 + $0x52] sm:$0xff]  ;;  %v1450_v1 = vld [vmem:[#allocation2 + $0x120] sm:$0xff] }
 0x162   : > { %5075 = vmatprep.subr.bf16.mxu0 %v5074_v13 }
 0x163   : > { %4310 = vmatmul.mubr.f32.gmra.mrb[26].mxu1 %v6396_v31  ;;  %v6519_v31 = vld [vmem:[#allocation2 + $0xe1] sm:$0xff] }
 0x164   : > { %4686 = vmatmul.mubr.f32.gmra.mrb[10].mxu0 %v2664_v53  ;;  %4312 = vmatprep.mubr.f32.mxu1 %v6398_v48  ;;  %v1429_v48 = vld [vmem:[#allocation2 + $0x20] sm:$0xff] }
 0x165   : > { %4688 = vmatprep.mubr.f32.mxu0 %v2665_v29  ;;  %5077 = vmatpush3.bf16.msra.mxu0 %v5074_v13  ;;  %v2965_v13 = vld [vmem:[#allocation2 + $0x7a] sm:$0xff] }
 0x166   : > { %5079 = vmatprep.subr.bf16.mxu0 %v5078_v35  ;;  %v1453_v53 = vld [vmem:[#allocation2 + $0x140] sm:$0xff] }
 0x167   : > { %4313 = vmatmul.mubr.f32.gmra.mrb[28].mxu1 %v6406_v32  ;;  %v6526_v32 = vld [vmem:[#allocation2 + $0xf9] sm:$0xff] }
 0x168   : > { %4689 = vmatmul.mubr.f32.gmra.mrb[12].mxu0 %v2666_v10  ;;  %4315 = vmatprep.mubr.f32.mxu1 %v6408_v16  ;;  %v6528_v16 = vld [vmem:[#allocation2 + $0x109] sm:$0xff]  ;;  %v2968_v29 = vld [vmem:[#allocation2 + $0x9a] sm:$0xff]  ;;  %v2970_v10 = vld [vmem:[#allocation2 + $0xb2] sm:$0xff] }
 0x169   : > { %4691 = vmatprep.mubr.f32.mxu0 %v6514_v36  ;;  %5081 = vmatpush3.bf16.msra.mxu0 %v5078_v35  ;;  %v1454_v35 = vld [vmem:[#allocation2 + $0x150] sm:$0xff] }
 0x16a   : > { %5083 = vmatprep.subr.bf16.mxu0 %v5082_v37 }
 0x16b   : > { %4316 = vmatmul.mubr.f32.gmra.mrb[30].mxu1 %v6415_v21  ;;  %v6534_v21 = vld [vmem:[#allocation2 + $0x111] sm:$0xff] }
 0x16c   : > { %4692 = vmatmul.mubr.f32.gmra.mrb[14].mxu0 %v6519_v31  ;;  %4350 = vmatprep.mubr.f32.mxu1 %v1428_v56  ;;  %v2971_v56 = vld [vmem:[#allocation2 + $0xc2] sm:$0xff] }
 0x16d   : > { %4694 = vmatprep.mubr.f32.mxu0 %v6521_v25  ;;  %5085 = vmatpush3.bf16.msra.mxu0 %v5082_v37  ;;  %v1456_v37 = vld [vmem:[#allocation2 + $0x168] sm:$0xff] }
 0x16f   : > { %4351 = vmatmul.mubr.f32.vlgmr.msra.gmra.mrb[0].mxu1 %v1429_v48  ;;  %v1457_v48 = vld [vmem:[#allocation2 + $0x170] sm:$0xff] }
 0x170   : > { %4695 = vmatmul.mubr.f32.gmra.mrb[16].mxu0 %v6526_v32  ;;  %5094 = vmatpush3.bf16.msra.mxu1 %v6872_v3  ;;  %v6884_v3 = vld [vmem:[#allocation32_spill] sm:$0xff] }
 0x171   : > { %4353 = vmatprep.mubr.f32.mxu1 %v6420_v17  ;;  %4697 = vmatprep.mubr.f32.mxu0 %v6528_v16  ;;  %v1434_v17 = vld [vmem:[#allocation2 + $0x60] sm:$0xff] }
 0x172   : > { %5087 = vmatprep.subr.bf16.mxu1 %v6877_v62 }
 0x173   : > { %4354 = vmatmul.mubr.f32.gmra.mrb[2].mxu1 %v6427_v61  ;;  %v1435_v61 = vld [vmem:[#allocation2 + $0x68] sm:$0xff] }
 0x174   : > { %4698 = vmatmul.mubr.f32.gmra.mrb[18].mxu0 %v6534_v21  ;;  %4356 = vmatprep.mubr.f32.mxu1 %v6878_v4  ;;  %v2973_v4 = vld [vmem:[#allocation2 + $0xda] sm:$0xff] }
 0x175   : > { %4700 = vmatprep.mubr.f32.mxu0 %v6536_v9  ;;  %5095 = vmatpush3.bf16.msra.mxu1 %v6877_v62  ;;  %v2972_v62 = vld [vmem:[#allocation2 + $0xca] sm:$0xff] }
 0x176   : > { %5088 = vmatprep.subr.bf16.mxu1 %v6879_v15 }
 0x177   : > { %4357 = vmatmul.mubr.f32.gmra.mrb[4].mxu1 %v6880_v6  ;;  %v2975_v6 = vld [vmem:[#allocation2 + $0xf2] sm:$0xff] }
 0x178   : > { %4701 = vmatmul.mubr.f32.gmra.mrb[20].mxu0 %v6543_v57  ;;  %4359 = vmatprep.mubr.f32.mxu1 %v1434_v17  ;;  %v5468_v17 = vld [vmem:[#allocation2 + $0x180] sm:$0xff] }
 0x179   : > { %4703 = vmatprep.mubr.f32.mxu0 %v6546_v51  ;;  %5096 = vmatpush3.bf16.msra.mxu1 %v6879_v15  ;;  %v2974_v15 = vld [vmem:[#allocation2 + $0xe2] sm:$0xff] }
 0x17a   : > { %5089 = vmatprep.subr.bf16.mxu1 %v6881_v22 }
 0x17b   : > { %4360 = vmatmul.mubr.f32.gmra.mrb[6].mxu1 %v1435_v61  ;;  %v5469_v61 = vld [vmem:[#allocation2 + $0x188] sm:$0xff] }
 0x17c   : > { %4704 = vmatmul.mubr.f32.gmra.mrb[22].mxu0 %v6552_v42  ;;  %4362 = vmatprep.mubr.f32.mxu1 %v1436_v39  ;;  %v2976_v39 = vld [vmem:[#allocation2 + $0xfa] sm:$0xff] }
 0x17d   : > { %4706 = vmatprep.mubr.f32.mxu0 %v6555_v38  ;;  %5097 = vmatpush3.bf16.msra.mxu1 %v6881_v22  ;;  %v2977_v22 = vld [vmem:[#allocation2 + $0x10a] sm:$0xff] }
 0x17e   : > { %5090 = vmatprep.subr.bf16.mxu1 %v6882_v49 }
 0x17f   : > { %4363 = vmatmul.mubr.f32.gmra.mrb[8].mxu1 %v1437_v30  ;;  %v2978_v30 = vld [vmem:[#allocation2 + $0x112] sm:$0xff] }
 0x180   : > { %4707 = vmatmul.mubr.f32.gmra.mrb[24].mxu0 %v6560_v60  ;;  %4365 = vmatprep.mubr.f32.mxu1 %v1438_v44  ;;  %v2979_v44 = vld [vmem:[#allocation2 + $0x122] sm:$0xff] }
 0x181   : > { %4709 = vmatprep.mubr.f32.mxu0 %v6563_v11  ;;  %5098 = vmatpush3.bf16.msra.mxu1 %v6882_v49  ;;  %v2980_v49 = vld [vmem:[#allocation2 + $0x12a] sm:$0xff] }
 0x182   : > { %5091 = vmatprep.subr.bf16.mxu1 %v6883_v52 }
 0x183   : > { %4366 = vmatmul.mubr.f32.gmra.mrb[10].mxu1 %v1439_v40  ;;  %v2981_v40 = vld [vmem:[#allocation2 + $0x13a] sm:$0xff] }
 0x184   : > { %4710 = vmatmul.mubr.f32.gmra.mrb[26].mxu0 %v6884_v3  ;;  %4368 = vmatprep.mubr.f32.mxu1 %v1440_v28 }
 0x185   : > { %4712 = vmatprep.mubr.f32.mxu0 %v6569_v58  ;;  %5099 = vmatpush3.bf16.msra.mxu1 %v6883_v52 }
 0x186   : > { %5092 = vmatprep.subr.bf16.mxu1 %v6885_v33 }
 0x187   : > { %4369 = vmatmul.mubr.f32.gmra.mrb[12].mxu1 %v1441_v12 }
 0x188   : > { %4713 = vmatmul.mubr.f32.gmra.mrb[28].mxu0 %v6574_v20  ;;  %4371 = vmatprep.mubr.f32.mxu1 %v1442_v8 }
 0x189   : > { %4715 = vmatprep.mubr.f32.mxu0 %v2683_v45  ;;  %5100 = vmatpush3.bf16.msra.mxu1 %v6885_v33 }
 0x18a   : > { %5093 = vmatprep.subr.bf16.mxu1 %v6886_v26 }
 0x18b   : > { %4372 = vmatmul.mubr.f32.gmra.mrb[14].mxu1 %v1443_v63 }
 0x18c   : > { %4716 = vmatmul.mubr.f32.gmra.mrb[30].mxu0 %v2684_v7  ;;  %4374 = vmatprep.mubr.f32.mxu1 %v1444_v47 }
 0x18d   : > { %4750 = vmatprep.mubr.f32.mxu0 %v2959_v5  ;;  %5101 = vmatpush3.bf16.msra.mxu1 %v6886_v26 }
 0x18f   : > { %4375 = vmatmul.mubr.f32.gmra.mrb[16].mxu1 %v1445_v55 }
 0x190   : > { %4751 = vmatmul.mubr.f32.vlgmr.msra.gmra.mrb[0].mxu0 %v2960_v34  ;;  %4377 = vmatprep.mubr.f32.mxu1 %v1446_v50 }
 0x191   : > { %4753 = vmatprep.mubr.f32.mxu0 %v2961_v2 }
 0x193   : > { %4378 = vmatmul.mubr.f32.gmra.mrb[18].mxu1 %v1447_v23 }
 0x194   : > { %4754 = vmatmul.mubr.f32.gmra.mrb[2].mxu0 %v2962_v24  ;;  %4380 = vmatprep.mubr.f32.mxu1 %v1448_v0 }
 0x195   : > { %4756 = vmatprep.mubr.f32.mxu0 %v2963_v41 }
 0x197   : > { %4381 = vmatmul.mubr.f32.gmra.mrb[20].mxu1 %v1449_v54 }
 0x198   : > { %4757 = vmatmul.mubr.f32.gmra.mrb[4].mxu0 %v2964_v27  ;;  %4383 = vmatprep.mubr.f32.mxu1 %v1450_v1 }
 0x199   : > { %4759 = vmatprep.mubr.f32.mxu0 %v2965_v13 }
 0x19b   : > { %4384 = vmatmul.mubr.f32.gmra.mrb[22].mxu1 %v1451_v14 }
 0x19c   : > { %4760 = vmatmul.mubr.f32.gmra.mrb[6].mxu0 %v2966_v59  ;;  %4386 = vmatprep.mubr.f32.mxu1 %v1452_v19 }
 0x19d   : > { %4762 = vmatprep.mubr.f32.mxu0 %v2967_v18 }
 0x19f   : > { %4387 = vmatmul.mubr.f32.gmra.mrb[24].mxu1 %v1453_v53 }
 0x1a0   : > { %4763 = vmatmul.mubr.f32.gmra.mrb[8].mxu0 %v2968_v29  ;;  %4389 = vmatprep.mubr.f32.mxu1 %v1454_v35 }
 0x1a1   : > { %4765 = vmatprep.mubr.f32.mxu0 %v2969_v46 }
 0x1a3   : > { %4390 = vmatmul.mubr.f32.gmra.mrb[26].mxu1 %v1455_v43 }
 0x1a4   : > { %4766 = vmatmul.mubr.f32.gmra.mrb[10].mxu0 %v2970_v10  ;;  %4392 = vmatprep.mubr.f32.mxu1 %v1456_v37 }
 0x1a5   : > { %4768 = vmatprep.mubr.f32.mxu0 %v2971_v56 }
 0x1a7   : > { %4393 = vmatmul.mubr.f32.gmra.mrb[28].mxu1 %v1457_v48 }
 0x1a8   : > { %4769 = vmatmul.mubr.f32.gmra.mrb[12].mxu0 %v2972_v62  ;;  %4395 = vmatprep.mubr.f32.mxu1 %v5468_v17 }
 0x1a9   : > { %4771 = vmatprep.mubr.f32.mxu0 %v2973_v4 }
 0x1ab   : > { %4396 = vmatmul.mubr.f32.gmra.mrb[30].mxu1 %v5469_v61 }
 0x1ac   : > { %4772 = vmatmul.mubr.f32.gmra.mrb[14].mxu0 %v2974_v15  ;;  %4454 = vmatprep.mubr.f32.mxu1 %v6514_v36  ;;  %v2982_v36 = vld [vmem:[#allocation2 + $0x142] sm:$0xff] }
 0x1ad   : > { %4774 = vmatprep.mubr.f32.mxu0 %v2975_v6 }
 0x1af   : > { %4455 = vmatmul.mubr.f32.vlgmr.msra.gmra.mrb[16].mxu1 %v6519_v31  ;;  %v2983_v31 = vld [vmem:[#allocation2 + $0x152] sm:$0xff] }
 0x1b0   : > { %4775 = vmatmul.mubr.f32.gmra.mrb[16].mxu0 %v2976_v39  ;;  %4457 = vmatprep.mubr.f32.mxu1 %v6521_v25  ;;  %v2984_v25 = vld [vmem:[#allocation2 + $0x15a] sm:$0xff] }
 0x1b1   : > { %4777 = vmatprep.mubr.f32.mxu0 %v2977_v22 }
 0x1b3   : > { %4458 = vmatmul.mubr.f32.gmra.mrb[18].mxu1 %v6526_v32  ;;  %v2985_v32 = vld [vmem:[#allocation2 + $0x16a] sm:$0xff] }
 0x1b4   : > { %4778 = vmatmul.mubr.f32.gmra.mrb[18].mxu0 %v2978_v30  ;;  %4460 = vmatprep.mubr.f32.mxu1 %v6528_v16  ;;  %v2986_v16 = vld [vmem:[#allocation2 + $0x172] sm:$0xff] }
 0x1b5   : > { %4780 = vmatprep.mubr.f32.mxu0 %v2979_v44 }
 0x1b7   : > { %4461 = vmatmul.mubr.f32.gmra.mrb[20].mxu1 %v6534_v21  ;;  %v2987_v21 = vld [vmem:[#allocation2 + $0x182] sm:$0xff] }
 0x1b8   : > { %4781 = vmatmul.mubr.f32.gmra.mrb[20].mxu0 %v2980_v49  ;;  %4463 = vmatprep.mubr.f32.mxu1 %v6536_v9  ;;  %v1763_v9 = vld [vmem:[#allocation2 + $0x171] sm:$0xff] }
 0x1b9   : > { %4783 = vmatprep.mubr.f32.mxu0 %v2981_v40 }
 0x1bb   : > { %4464 = vmatmul.mubr.f32.gmra.mrb[22].mxu1 %v6543_v57  ;;  %v2988_v57 = vld [vmem:[#allocation2 + $0x18a] sm:$0xff] }
 0x1bc   : > { %4784 = vmatmul.mubr.f32.gmra.mrb[22].mxu0 %v2982_v36  ;;  %4466 = vmatprep.mubr.f32.mxu1 %v6546_v51  ;;  %v2989_v51 = vld [vmem:[#allocation2 + $0x19a] sm:$0xff] }
 0x1bd   : > { %4786 = vmatprep.mubr.f32.mxu0 %v2983_v31 }
 0x1bf   : > { %4467 = vmatmul.mubr.f32.gmra.mrb[24].mxu1 %v6552_v42  ;;  %v2990_v42 = vld [vmem:[#allocation2 + $0x1a2] sm:$0xff] }
 0x1c0   : > { %4787 = vmatmul.mubr.f32.gmra.mrb[24].mxu0 %v2984_v25  ;;  %4469 = vmatprep.mubr.f32.mxu1 %v6555_v38  ;;  %v5736_v38 = vmov 0.0  }
 0x1c1   : > { %4789 = vmatprep.mubr.f32.mxu0 %v2985_v32  ;;  %3407 = vst [vmem:[%s5946_s8] sm:$0x1] %v5736_v38  ;;  %3408 = vst [vmem:[%s5949_s30] sm:$0x1] %v5736_v38 }
 0x1c3   : > { %4470 = vmatmul.mubr.f32.gmra.mrb[26].mxu1 %v6560_v60 }
 0x1c4   : > { %4790 = vmatmul.mubr.f32.gmra.mrb[26].mxu0 %v2986_v16  ;;  %4472 = vmatprep.mubr.f32.mxu1 %v6563_v11 }
 0x1c5   : > { %4792 = vmatprep.mubr.f32.mxu0 %v2987_v21 }
 0x1c7   : > { %4473 = vmatmul.mubr.f32.gmra.mrb[28].mxu1 %v1763_v9 }
 0x1c8   : > { %4793 = vmatmul.mubr.f32.gmra.mrb[28].mxu0 %v2988_v57  ;;  %4475 = vmatprep.mubr.f32.mxu1 %v6569_v58 }
 0x1c9   : > { %4795 = vmatprep.mubr.f32.mxu0 %v2989_v51 }
 0x1cb   : > { %4476 = vmatmul.mubr.f32.gmra.mrb[30].mxu1 %v6574_v20 }
 0x1cc   : > { %4796 = vmatmul.mubr.f32.gmra.mrb[30].mxu0 %v2990_v42 }
 0x242   : > { %v4352_v60 = vpop.f32.mrb[0].mxu1 }
 0x243   : > { %v1543_v28 = vpop.f32.mrb[1].mxu1 }
 0x246   : > { %v4355_v52 = vpop.f32.mrb[2].mxu1 }
 0x247   : > { %v1553_v11 = vpop.f32.mrb[3].mxu1 }
 0x24a   : > { %v4358_v3 = vpop.f32.mrb[4].mxu1 }
 0x24b   : > { %v1563_v12 = vpop.f32.mrb[5].mxu1 }
 0x24e   : > { %v4361_v8 = vpop.f32.mrb[6].mxu1 }
 0x24f   : > { %v1573_v45 = vpop.f32.mrb[7].mxu1 }
 0x252   : > { %v4364_v33 = vpop.f32.mrb[8].mxu1 }
 0x253   : > { %v1583_v58 = vpop.f32.mrb[9].mxu1 }
 0x256   : > { %v4367_v63 = vpop.f32.mrb[10].mxu1 }
 0x257   : > { %v6599_v7 = vpop.f32.mrb[11].mxu1 }
 0x25a   : > { %v6601_v20 = vpop.f32.mrb[12].mxu1 }
 0x25b   : > { %v6603_v47 = vpop.f32.mrb[13].mxu1 }
 0x25e   : > { %v6605_v5 = vpop.f32.mrb[14].mxu1 }
 0x25f   : > { %v6607_v26 = vpop.f32.mrb[15].mxu1 }
 0x263   : > { %v4752_v55 = vpop.f32.mrb[0].mxu0 }
 0x264   : > { %v5102_v34 = vadd.f32 %v4752_v55, %v4352_v60  ;;  %v3074_v50 = vpop.f32.mrb[1].mxu0 }
 0x265   : > { %v5103_v2 = vadd.f32 %v3074_v50, %v1543_v28 }
 0x266   : > { %3266 = vst [vmem:[%s5943_s14 + $0x8] sm:$0xff] %v5102_v34  ;;  %v3335_v23 = vmul.f32 %v5102_v34, %v5102_v34 }
 0x267   : > { %3265 = vst [vmem:[%s5943_s14] sm:$0xff] %v5103_v2  ;;  %v3297_v24 = vadd.f32 %v5103_v2, %v5102_v34  ;;  %v3334_v0 = vmul.f32 %v5103_v2, %v5103_v2  ;;  %v4755_v41 = vpop.f32.mrb[2].mxu0 }
 0x268   : > { %v5104_v54 = vadd.f32 %v4755_v41, %v4355_v52  ;;  %v3084_v27 = vpop.f32.mrb[3].mxu0 }
 0x269   : > { %v3366_v1 = vadd.f32 %v3335_v23, %v3334_v0  ;;  %v5105_v13 = vadd.f32 %v3084_v27, %v1553_v11 }
 0x26a   : > { %3268 = vst [vmem:[%s5943_s14 + $0x18] sm:$0xff] %v5104_v54  ;;  %v3337_v29 = vmul.f32 %v5104_v54, %v5104_v54 }
 0x26b   : > { %3267 = vst [vmem:[%s5943_s14 + $0x10] sm:$0xff] %v5105_v13  ;;  %v3298_v14 = vadd.f32 %v5105_v13, %v3297_v24  ;;  %v3336_v59 = vmul.f32 %v5105_v13, %v5105_v13  ;;  %v4758_v19 = vpop.f32.mrb[4].mxu0 }
 0x26c   : > { %v5106_v18 = vadd.f32 %v4758_v19, %v4358_v3  ;;  %v3094_v53 = vpop.f32.mrb[5].mxu0 }
 0x26d   : > { %v3367_v35 = vadd.f32 %v3366_v1, %v3336_v59  ;;  %v5107_v46 = vadd.f32 %v3094_v53, %v1563_v12  ;;  %v3299_v43 = vadd.f32 %v5104_v54, %v3298_v14 }
 0x26e   : > { %3270 = vst [vmem:[%s5943_s14 + $0x28] sm:$0xff] %v5106_v18  ;;  %v3339_v17 = vmul.f32 %v5106_v18, %v5106_v18 }
 0x26f   : > { %3269 = vst [vmem:[%s5943_s14 + $0x20] sm:$0xff] %v5107_v46  ;;  %v3300_v10 = vadd.f32 %v5107_v46, %v3299_v43  ;;  %v3338_v37 = vmul.f32 %v5107_v46, %v5107_v46  ;;  %v3368_v56 = vadd.f32 %v3367_v35, %v3337_v29  ;;  %v4761_v48 = vpop.f32.mrb[6].mxu0 }
 0x270   : > { %v5108_v62 = vadd.f32 %v4761_v48, %v4361_v8  ;;  %v3104_v4 = vpop.f32.mrb[7].mxu0 }
 0x271   : > { %v3369_v15 = vadd.f32 %v3368_v56, %v3338_v37  ;;  %v5109_v6 = vadd.f32 %v3104_v4, %v1573_v45  ;;  %v3301_v61 = vadd.f32 %v5106_v18, %v3300_v10 }
 0x272   : > { %3272 = vst [vmem:[%s5943_s14 + $0x38] sm:$0xff] %v5108_v62  ;;  %v3341_v36 = vmul.f32 %v5108_v62, %v5108_v62 }
 0x273   : > { %3271 = vst [vmem:[%s5943_s14 + $0x30] sm:$0xff] %v5109_v6  ;;  %v3302_v39 = vadd.f32 %v5109_v6, %v3301_v61  ;;  %v3340_v22 = vmul.f32 %v5109_v6, %v5109_v6  ;;  %v3370_v30 = vadd.f32 %v3369_v15, %v3339_v17  ;;  %v4764_v44 = vpop.f32.mrb[8].mxu0 }
 0x274   : > { %v5110_v49 = vadd.f32 %v4764_v44, %v4364_v33  ;;  %v3114_v40 = vpop.f32.mrb[9].mxu0 }
 0x275   : > { %v3371_v31 = vadd.f32 %v3370_v30, %v3340_v22  ;;  %v5111_v25 = vadd.f32 %v3114_v40, %v1583_v58  ;;  %v3303_v32 = vadd.f32 %v5108_v62, %v3302_v39 }
 0x276   : > { %3274 = vst [vmem:[%s5943_s14 + $0x48] sm:$0xff] %v5110_v49  ;;  %v3343_v38 = vmul.f32 %v5110_v49, %v5110_v49 }
 0x277   : > { %3273 = vst [vmem:[%s5943_s14 + $0x40] sm:$0xff] %v5111_v25  ;;  %v3304_v16 = vadd.f32 %v5111_v25, %v3303_v32  ;;  %v3342_v21 = vmul.f32 %v5111_v25, %v5111_v25  ;;  %v3372_v9 = vadd.f32 %v3371_v31, %v3341_v36  ;;  %v4767_v57 = vpop.f32.mrb[10].mxu0 }
 0x278   : > { %v5112_v51 = vadd.f32 %v4767_v57, %v4367_v63  ;;  %v3124_v42 = vpop.f32.mrb[11].mxu0 }
 0x279   : > { %v3373_v60 = vadd.f32 %v3372_v9, %v3342_v21  ;;  %v5113_v28 = vadd.f32 %v3124_v42, %v6599_v7  ;;  %v3305_v52 = vadd.f32 %v5110_v49, %v3304_v16 }
 0x27a   : > { %3276 = vst [vmem:[%s5943_s14 + $0x58] sm:$0xff] %v5112_v51  ;;  %v3345_v58 = vmul.f32 %v5112_v51, %v5112_v51 }
 0x27b   : > { %3275 = vst [vmem:[%s5943_s14 + $0x50] sm:$0xff] %v5113_v28  ;;  %v3306_v11 = vadd.f32 %v5113_v28, %v3305_v52  ;;  %v3344_v3 = vmul.f32 %v5113_v28, %v5113_v28  ;;  %v3374_v12 = vadd.f32 %v3373_v60, %v3343_v38  ;;  %v4770_v8 = vpop.f32.mrb[12].mxu0 }
 0x27c   : > { %v5114_v45 = vadd.f32 %v4770_v8, %v6601_v20  ;;  %v3134_v33 = vpop.f32.mrb[13].mxu0 }
 0x27d   : > { %v3375_v63 = vadd.f32 %v3374_v12, %v3344_v3  ;;  %v5115_v55 = vadd.f32 %v3134_v33, %v6603_v47  ;;  %v3307_v34 = vadd.f32 %v5112_v51, %v3306_v11 }
 0x27e   : > { %3278 = vst [vmem:[%s5943_s14 + $0x68] sm:$0xff] %v5114_v45  ;;  %v3347_v41 = vmul.f32 %v5114_v45, %v5114_v45 }
 0x27f   : > { %3277 = vst [vmem:[%s5943_s14 + $0x60] sm:$0xff] %v5115_v55  ;;  %v3308_v7 = vadd.f32 %v5115_v55, %v3307_v34  ;;  %v3346_v50 = vmul.f32 %v5115_v55, %v5115_v55  ;;  %v3376_v2 = vadd.f32 %v3375_v63, %v3345_v58  ;;  %v4773_v23 = vpop.f32.mrb[14].mxu0 }
 0x280   : > { %v5116_v24 = vadd.f32 %v4773_v23, %v6605_v5  ;;  %v3144_v0 = vpop.f32.mrb[15].mxu0 }
 0x281   : > { %v3377_v54 = vadd.f32 %v3376_v2, %v3346_v50  ;;  %v5117_v20 = vadd.f32 %v3144_v0, %v6607_v26  ;;  %v3309_v27 = vadd.f32 %v5114_v45, %v3308_v7 }
 0x282   : > { %3280 = vst [vmem:[%s5943_s14 + $0x78] sm:$0xff] %v5116_v24  ;;  %v4456_v47 = vpop.f32.mrb[16].mxu1  ;;  %v3349_v29 = vmul.f32 %v5116_v24, %v5116_v24 }
 0x283   : > { %3279 = vst [vmem:[%s5943_s14 + $0x70] sm:$0xff] %v5117_v20  ;;  %v3310_v1 = vadd.f32 %v5117_v20, %v3309_v27  ;;  %v3348_v13 = vmul.f32 %v5117_v20, %v5117_v20  ;;  %v3378_v14 = vadd.f32 %v3377_v54, %v3347_v41  ;;  %v4776_v59 = vpop.f32.mrb[16].mxu0  ;;  %v1929_v19 = vpop.f32.mrb[17].mxu1 }
 0x284   : > { %v5118_v18 = vadd.f32 %v4776_v59, %v4456_v47  ;;  %v3154_v53 = vpop.f32.mrb[17].mxu0 }
 0x285   : > { %v3379_v5 = vadd.f32 %v3378_v14, %v3348_v13  ;;  %v5119_v35 = vadd.f32 %v3154_v53, %v1929_v19  ;;  %v3311_v46 = vadd.f32 %v5116_v24, %v3310_v1 }
 0x286   : > { %3282 = vst [vmem:[%s5943_s14 + $0x88] sm:$0xff] %v5118_v18  ;;  %v4459_v26 = vpop.f32.mrb[18].mxu1  ;;  %v3351_v17 = vmul.f32 %v5118_v18, %v5118_v18 }
 0x287   : > { %3281 = vst [vmem:[%s5943_s14 + $0x80] sm:$0xff] %v5119_v35  ;;  %v3312_v43 = vadd.f32 %v5119_v35, %v3311_v46  ;;  %v3350_v10 = vmul.f32 %v5119_v35, %v5119_v35  ;;  %v3380_v37 = vadd.f32 %v3379_v5, %v3349_v29  ;;  %v4779_v56 = vpop.f32.mrb[18].mxu0  ;;  %v1939_v48 = vpop.f32.mrb[19].mxu1 }
 0x288   : > { %v5120_v62 = vadd.f32 %v4779_v56, %v4459_v26  ;;  %v3164_v4 = vpop.f32.mrb[19].mxu0 }
 0x289   : > { %v3381_v15 = vadd.f32 %v3380_v37, %v3350_v10  ;;  %v5121_v6 = vadd.f32 %v3164_v4, %v1939_v48  ;;  %v3313_v61 = vadd.f32 %v5118_v18, %v3312_v43 }
 0x28a   : > { %3284 = vst [vmem:[%s5943_s14 + $0x98] sm:$0xff] %v5120_v62  ;;  %v4462_v39 = vpop.f32.mrb[20].mxu1  ;;  %v3353_v25 = vmul.f32 %v5120_v62, %v5120_v62 }
 0x28b   : > { %3283 = vst [vmem:[%s5943_s14 + $0x90] sm:$0xff] %v5121_v6  ;;  %v3314_v22 = vadd.f32 %v5121_v6, %v3313_v61  ;;  %v3352_v30 = vmul.f32 %v5121_v6, %v5121_v6  ;;  %v3382_v44 = vadd.f32 %v3381_v15, %v3351_v17  ;;  %v4782_v49 = vpop.f32.mrb[20].mxu0  ;;  %v1949_v40 = vpop.f32.mrb[21].mxu1 }
 0x28c   : > { %v5122_v36 = vadd.f32 %v4782_v49, %v4462_v39  ;;  %v3174_v31 = vpop.f32.mrb[21].mxu0 }
 0x28d   : > { %v3383_v32 = vadd.f32 %v3382_v44, %v3352_v30  ;;  %v5123_v16 = vadd.f32 %v3174_v31, %v1949_v40  ;;  %v3315_v21 = vadd.f32 %v5120_v62, %v3314_v22 }
 0x28e   : > { %3286 = vst [vmem:[%s5943_s14 + $0xa8] sm:$0xff] %v5122_v36  ;;  %v4465_v9 = vpop.f32.mrb[22].mxu1  ;;  %v3355_v11 = vmul.f32 %v5122_v36, %v5122_v36 }
 0x28f   : > { %3285 = vst [vmem:[%s5943_s14 + $0xa0] sm:$0xff] %v5123_v16  ;;  %v3316_v57 = vadd.f32 %v5123_v16, %v3315_v21  ;;  %v3354_v51 = vmul.f32 %v5123_v16, %v5123_v16  ;;  %v3384_v42 = vadd.f32 %v3383_v32, %v3353_v25  ;;  %v4785_v38 = vpop.f32.mrb[22].mxu0  ;;  %v1959_v60 = vpop.f32.mrb[23].mxu1 }
 0x290   : > { %v5124_v28 = vadd.f32 %v4785_v38, %v4465_v9  ;;  %v3184_v52 = vpop.f32.mrb[23].mxu0 }
 0x291   : > { %v3385_v3 = vadd.f32 %v3384_v42, %v3354_v51  ;;  %v5125_v12 = vadd.f32 %v3184_v52, %v1959_v60  ;;  %v3317_v8 = vadd.f32 %v5122_v36, %v3316_v57 }
 0x292   : > { %3288 = vst [vmem:[%s5943_s14 + $0xb8] sm:$0xff] %v5124_v28  ;;  %v4468_v45 = vpop.f32.mrb[24].mxu1  ;;  %v3357_v2 = vmul.f32 %v5124_v28, %v5124_v28 }
 0x293   : > { %3287 = vst [vmem:[%s5943_s14 + $0xb0] sm:$0xff] %v5125_v12  ;;  %v3318_v33 = vadd.f32 %v5125_v12, %v3317_v8  ;;  %v3356_v58 = vmul.f32 %v5125_v12, %v5125_v12  ;;  %v3386_v63 = vadd.f32 %v3385_v3, %v3355_v11  ;;  %v4788_v55 = vpop.f32.mrb[24].mxu0  ;;  %v1969_v34 = vpop.f32.mrb[25].mxu1 }
 0x294   : > { %v5126_v7 = vadd.f32 %v4788_v55, %v4468_v45  ;;  %v3194_v50 = vpop.f32.mrb[25].mxu0 }
 0x295   : > { %v3387_v23 = vadd.f32 %v3386_v63, %v3356_v58  ;;  %v5127_v24 = vadd.f32 %v3194_v50, %v1969_v34  ;;  %v3319_v0 = vadd.f32 %v5124_v28, %v3318_v33 }
 0x296   : > { %3290 = vst [vmem:[%s5943_s14 + $0xc8] sm:$0xff] %v5126_v7  ;;  %v4471_v41 = vpop.f32.mrb[26].mxu1  ;;  %v3359_v59 = vmul.f32 %v5126_v7, %v5126_v7 }
 0x297   : > { %3289 = vst [vmem:[%s5943_s14 + $0xc0] sm:$0xff] %v5127_v24  ;;  %v3320_v54 = vadd.f32 %v5127_v24, %v3319_v0  ;;  %v3358_v20 = vmul.f32 %v5127_v24, %v5127_v24  ;;  %v3388_v27 = vadd.f32 %v3387_v23, %v3357_v2  ;;  %v4791_v47 = vpop.f32.mrb[26].mxu0  ;;  %v1979_v1 = vpop.f32.mrb[27].mxu1 }
 0x298   : > { %v5128_v13 = vadd.f32 %v4791_v47, %v4471_v41  ;;  %v3204_v14 = vpop.f32.mrb[27].mxu0 }
 0x299   : > { %v3389_v19 = vadd.f32 %v3388_v27, %v3358_v20  ;;  %v5129_v18 = vadd.f32 %v3204_v14, %v1979_v1  ;;  %v3321_v53 = vadd.f32 %v5126_v7, %v3320_v54 }
 0x29a   : > { %3292 = vst [vmem:[%s5943_s14 + $0xd8] sm:$0xff] %v5128_v13  ;;  %v4474_v29 = vpop.f32.mrb[28].mxu1  ;;  %v3361_v56 = vmul.f32 %v5128_v13, %v5128_v13 }
 0x29b   : > { %3291 = vst [vmem:[%s5943_s14 + $0xd0] sm:$0xff] %v5129_v18  ;;  %v3322_v5 = vadd.f32 %v5129_v18, %v3321_v53  ;;  %v3360_v35 = vmul.f32 %v5129_v18, %v5129_v18  ;;  %v3390_v46 = vadd.f32 %v3389_v19, %v3359_v59  ;;  %v4794_v26 = vpop.f32.mrb[28].mxu0  ;;  %v1989_v43 = vpop.f32.mrb[29].mxu1 }
 0x29c   : > { %v5130_v10 = vadd.f32 %v4794_v26, %v4474_v29  ;;  %v3214_v37 = vpop.f32.mrb[29].mxu0 }
 0x29d   : > { %v3391_v48 = vadd.f32 %v3390_v46, %v3360_v35  ;;  %v5131_v62 = vadd.f32 %v3214_v37, %v1989_v43  ;;  %v3323_v4 = vadd.f32 %v5128_v13, %v3322_v5 }
 0x29e   : > { %3294 = vst [vmem:[%s5943_s14 + $0xe8] sm:$0xff] %v5130_v10  ;;  %v4477_v17 = vpop.f32.mrb[30].mxu1  ;;  %v3363_v49 = vmul.f32 %v5130_v10, %v5130_v10 }
 0x29f   : > { %3293 = vst [vmem:[%s5943_s14 + $0xe0] sm:$0xff] %v5131_v62  ;;  %v3324_v15 = vadd.f32 %v5131_v62, %v3323_v4  ;;  %v3362_v6 = vmul.f32 %v5131_v62, %v5131_v62  ;;  %v3392_v61 = vadd.f32 %v3391_v48, %v3361_v56  ;;  %v4797_v39 = vpop.f32.mrb[30].mxu0  ;;  %v1999_v22 = vpop.f32.mrb[31].mxu1 }
 0x2a0   : > { %v5132_v30 = vadd.f32 %v4797_v39, %v4477_v17  ;;  %v3224_v44 = vpop.f32.mrb[31].mxu0 }
 0x2a1   : > { %v3393_v40 = vadd.f32 %v3392_v61, %v3362_v6  ;;  %v5133_v36 = vadd.f32 %v3224_v44, %v1999_v22  ;;  %v3325_v31 = vadd.f32 %v5130_v10, %v3324_v15 }
 0x2a2   : > { %3296 = vst [vmem:[%s5943_s14 + $0xf8] sm:$0xff] %v5132_v30 }
 0x2a3   : > { %3295 = vst [vmem:[%s5943_s14 + $0xf0] sm:$0xff] %v5133_v36  ;;  %v3326_v25 = vadd.f32 %v5133_v36, %v3325_v31  ;;  %v3364_v32 = vmul.f32 %v5133_v36, %v5133_v36  ;;  %v3394_v16 = vadd.f32 %v3393_v40, %v3363_v49 }
 0x2a4   : > { %5591 = shalt.err (!%p5588_p6)
}
 0x2a5   : > { %s5592_s2 = scalar_lea.hbm %s6649_s15, 4096  ;;  %s5596_s14 = scalar_lea.hbm %s6775_s4, 8192 }
 0x2a6   : > { %p5593_p7 = scmp.ne.s32.totalorder %s6649_s15, %s5592_s2  ;;  %p5597_p0 = scmp.lt.u32.totalorder %s6649_s15, %s6775_s4 }
 0x2a7   : > { %p5598_p2 = scmp.lt.u32.totalorder %s5596_s14, %s5592_s2  ;;  %p5600_p8 = scmp.lt.u32.totalorder %s5592_s2, %s6649_s15 }
 0x2a8   : > { %p5594_p9 = pnand %p5593_p7, %p6887_p4 }
 0x2a9   : > { %p5599_p1 = por %p5598_p2, %p5597_p0 }
 0x2aa   : > { %p5595_p12 = pneg %p5594_p9 }
 0x2ab   : > { %p5601_p13 = por %p5600_p8, %p5599_p1 }
 0x2ad   : > { %p5602_p10 = pnand %p5601_p13, %p5595_p12 }
 0x2af   : > { %5605 = shalt.err (!%p5602_p10)
}
 0x2b0   : > { %s5738_s12 = smov 128   ;;  %s5739_s18 = smov 8   ;;  %v3365_v21 = vmul.f32 %v5132_v30, %v5132_v30  ;;  %v3327_v9 = vadd.f32 %v5132_v30, %v3326_v25  ;;  %v3395_v57 = vadd.f32 %v3394_v16, %v3364_v32  ;;  %v3409_v45 = vld [vmem:[%s5946_s8] sm:$0x1] }
 0x2b1   : > { %5370 = dma.vmem_to_hbm [thread:$0]  (%p6887_p4), %s6651_s20, 4096, %s6649_s15, %s3416_s17, %s5738_s12, %s5738_s12, %s5739_s18  }
 0x2b2   : > { %v3328_v51 = vrot.slane %v3327_v9, 4  ;;  %v3396_v42 = vadd.f32 %v3395_v57, %v3365_v21  ;;  %s3420_s25 = sand.u32 1, %s5808_s27   ;;  %s3639_s20 = sshll.u32 %s5718_s24, 4  ;;  %v3412_v63 = vld [vmem:[%s5949_s30] sm:$0x1] }
 0x2b3   : > { %s3456_s15 = sshll.u32 %s5946_s8, 4  ;;  %s3469_s17 = sshll.u32 %s5949_s30, 4  ;;  %s6690_s15 = int_to_ptr.vmem [resolvable:$true] %s3456_s15  ;;  %s6698_s17 = int_to_ptr.vmem [resolvable:$true] %s3469_s17 }
 0x2b4   : > { %v3329_v38 = vadd.f32 %v3328_v51, %v3327_v9  ;;  %v3397_v60 = vrot.slane %v3396_v42, 4  ;;  %s6688_s28 = scalar_lea.hbm %s6776_s5, %s3639_s20  ;;  %s6696_s2 = scalar_lea.hbm %s6777_s6, %s3639_s20 }
 0x2b5   : > { %s6700_s29 = scalar_lea.sflag [#allocation12], %s3420_s25  ;;  %s5606_s10 = scalar_lea.vmem %s6690_s15, 16 }
 0x2b6   : > { %v3330_v28 = vrot.slane %v3329_v38, 2  ;;  %v3398_v52 = vadd.f32 %v3397_v60, %v3396_v42  ;;  %p5607_p11 = scmp.ne.s32.totalorder %s6690_s15, %s5606_s10  ;;  %s5740_s14 = smov [#allocation11]  }
 0x2b7   : > { %s5610_s11 = sshll.u32 %s5740_s14, 4  ;;  %s5611_s11 = int_to_ptr.vmem [resolvable:$false] %s5610_s11 }
 0x2b8   : > { %v3331_v11 = vadd.f32 %v3330_v28, %v3329_v38  ;;  %v3399_v3 = vrot.slane %v3398_v52, 2  ;;  %p5608_p3 = pnand %p5607_p11, %p6887_p4  ;;  %s5612_s19 = scalar_lea.vmem %s5611_s11, 32 }
 0x2b9   : > { %p5613_p6 = scmp.lt.s32.totalorder %s6690_s15, %s5611_s11  ;;  %p5614_p7 = scmp.lt.s32.totalorder %s5612_s19, %s5606_s10 }
 0x2ba   : > { %v3332_v12 = vrot.slane %v3331_v11, 1  ;;  %v3400_v8 = vadd.f32 %v3399_v3, %v3398_v52  ;;  %p5609_p5 = pneg %p5608_p3 }
 0x2bb   : > { %p5615_p9 = por %p5614_p7, %p5613_p6 }
 0x2bc   : > { %v3401_v33 = vrot.slane %v3400_v8, 1  ;;  %v3333_v58 = vadd.f32 %v3332_v12, %v3331_v11 }
 0x2bd   : > { %p5616_p12 = pnand %p5615_p9, %p5609_p5 }
 0x2be   : > { %v3402_v55 = vadd.f32 %v3401_v33, %v3400_v8  ;;  %v3410_v34 = vadd.f32 %v3409_v45, %v3333_v58 }
 0x2c0   : > { %3411 = vst [vmem:[%s5946_s8] sm:$0x1] %v3410_v34  ;;  %v3413_v7 = vadd.f32 %v3412_v63, %v3402_v55 }
 0x2c1   : > { %5619 = shalt.err (!%p5616_p12)
}
 0x2c2   : > { %s5620_s8 = scalar_lea.hbm %s6688_s28, 16  ;;  %s5624_s25 = scalar_lea.hbm %s6776_s5, 32 }
 0x2c3   : > { %p5621_p0 = scmp.ne.s32.totalorder %s6688_s28, %s5620_s8  ;;  %p5625_p8 = scmp.lt.u32.totalorder %s6688_s28, %s6776_s5 }
 0x2c4   : > { %p5626_p13 = scmp.lt.u32.totalorder %s5624_s25, %s5620_s8  ;;  %p5628_p11 = scmp.lt.u32.totalorder %s5620_s8, %s6688_s28 }
 0x2c5   : > { %p5622_p2 = pnand %p5621_p0, %p6887_p4 }
 0x2c6   : > { %p5627_p10 = por %p5626_p13, %p5625_p8 }
 0x2c7   : > { %p5623_p1 = pneg %p5622_p2 }
 0x2c8   : > { %p5629_p3 = por %p5628_p11, %p5627_p10 }
 0x2ca   : > { %p5630_p5 = pnand %p5629_p3, %p5623_p1 }
 0x2cc   : > { %5633 = shalt.err (!%p5630_p5)
}
 0x2cd   : > { %5371 = dma.vmem_to_hbm [thread:$0]  (%p6887_p4), %s6690_s15, 16, %s6688_s28, %s6700_s29   ;;  %3414 = vst [vmem:[%s5949_s30] sm:$0x1] %v3413_v7 }
 0x2ce   : > { %s5634_s16 = scalar_lea.vmem %s6698_s17, 16  ;;  %s5741_s24 = smov [#allocation13]  }
 0x2cf   : > { %p5635_p6 = scmp.ne.s32.totalorder %s6698_s17, %s5634_s16  ;;  %s5638_s27 = sshll.u32 %s5741_s24, 4  ;;  %s5639_s27 = int_to_ptr.vmem [resolvable:$false] %s5638_s27 }
 0x2d0   : > { %s5640_s10 = scalar_lea.vmem %s5639_s27, 32  ;;  %p5641_p12 = scmp.lt.s32.totalorder %s6698_s17, %s5639_s27 }
 0x2d1   : > { %p5636_p7 = pnand %p5635_p6, %p6887_p4  ;;  %p5642_p0 = scmp.lt.s32.totalorder %s5640_s10, %s5634_s16 }
 0x2d3   : > { %p5637_p9 = pneg %p5636_p7  ;;  %p5643_p2 = por %p5642_p0, %p5641_p12 }
 0x2d5   : > { %p5644_p1 = pnand %p5643_p2, %p5637_p9 }
 0x2d7   : > { %5647 = shalt.err (!%p5644_p1)
}
 0x2d8   : > { %s5648_s30 = scalar_lea.hbm %s6696_s2, 16  ;;  %s5652_s14 = scalar_lea.hbm %s6777_s6, 32 }
 0x2d9   : > { %p5649_p8 = scmp.ne.s32.totalorder %s6696_s2, %s5648_s30  ;;  %p5653_p11 = scmp.lt.u32.totalorder %s6696_s2, %s6777_s6 }
 0x2da   : > { %p5654_p3 = scmp.lt.u32.totalorder %s5652_s14, %s5648_s30  ;;  %p5656_p6 = scmp.lt.u32.totalorder %s5648_s30, %s6696_s2 }
 0x2db   : > { %p5650_p13 = pnand %p5649_p8, %p6887_p4 }
 0x2dc   : > { %p5655_p5 = por %p5654_p3, %p5653_p11 }
 0x2dd   : > { %p5651_p10 = pneg %p5650_p13 }
 0x2de   : > { %p5657_p7 = por %p5656_p6, %p5655_p5 }
 0x2e0   : > { %p5658_p9 = pnand %p5657_p7, %p5651_p10 }
 0x2e2   : > { %5661 = shalt.err (!%p5658_p9)
}
 0x2e3   : > { %5372 = dma.vmem_to_hbm [thread:$0]  (%p6887_p4), %s6698_s17, 16, %s6696_s2, %s6700_s29  }
 0x2e4 PF: > { %p5402_p12 = scmp.ge.s32.totalorder %s5726_s26, 2  ;;  %s3481_s8 = sand.u32 1, %s5706_s21  }
 0x2e5   : > { %p6888_p0 = scmp.ne.s32.totalorder %s6828_s9, 0  ;;  %s3482_s12 = scalar_lea.sflag [#allocation6], %s3481_s8 }
 0x2e7   : > { %p5387_p2 = pnand %p5402_p12, %p6888_p0 }
 0x2e9   : > { %5697 = dma.done.wait (!%p5387_p2), %s3482_s12, 4096  }
 0x2ea   : > { %5699 = vsyncadd (!%p5387_p2), %s3482_s12, 4294963200  ;;  %s6889_s18 = sadd.s32 4294967294, %s5726_s26  }
 0x2eb   : > { %s3490_s25 = sand.u32 1, %s6889_s18  }
 0x2ec   : > { %s3491_s20 = scalar_lea.sflag [#allocation12], %s3490_s25 }
 0x2ed   : > { %5701 = dma.done.wait (!%p5387_p2), %s3491_s20, 32  }
 0x2ee   : > { %5703 = vsyncadd (!%p5387_p2), %s3491_s20, 4294967264  ;;  %s25_s26 = sadd.s32 1, %s5726_s26   ;;  %s6890_s7 = sld [smem:[#allocation22_spill]] }
 0x2ef   : > { %p22_p4 = scmp.ge.s32.totalorder %s25_s26, 4   ;;  %s6891_s24 = sld [smem:[#allocation20_spill]] }
 0x2f0   : > { %s6892_s25 = sld [smem:[#allocation21_spill]]  ;;  %s6893_s21 = smov %s5710_s22 }
 0x2f1   : > { %s6894_s22 = smov %s5714_s23  ;;  %24 = sbr.rel (!%p22_p4) target bundleno = 10 (0xa), region = 124 }
 0x2f4   : > { %s6895_s23 = smov %s6890_s7 }
 0x2f8   :  { %3503 = vsyncpa [#allocation5], 1 }
 0x2f9   :  { %3505 = vsyncpa [#allocation5 + $0x1], 1 }
 0x2fa   :  { %3506 = vsyncpa [#allocation8], 1 }
 0x2fb   :  { %3507 = vsyncpa [#allocation6], 1 }
 0x2fc   :  { %3509 = vsyncpa [#allocation6 + $0x1], 1 }
 0x2fd   :  { %3510 = vsyncpa [#allocation12], 1 }
 0x2fe   :  { %3512 = vsyncpa [#allocation12 + $0x1], 1 }
 0x2ff   :  { %3513 = vsyncmov [#allocation3] }
 0x302   :  { %s3514_s9 = vpop.sfrf %3513 }
 0x303   :  { %p3643_p1 = scmp.ne.s32.totalorder %s3514_s9, 0 }
 0x305   :  { %3518 = shalt.err (%p3643_p1)  }

</bundles_post_ra>
